<compile_context>
chip_gen: v7x
topology: tpu7x:2x2x1
jax: 0.10.0
libtpu: 0.0.40
codegen_flags: <defaults>
</compile_context>

<pallas_src>
import jax
import jax.numpy as jnp
from jax.experimental import pallas as pl
from jax.experimental.pallas import tpu as pltpu

K = 3            # TNet k
N_POINTS = 128   # points per cloud (small test size; kernel handles larger N)
BN_EPS = 1e-5
OUT_PAD = 128    # lane-dense padded output width (k*k = 9 -> 128)
COMPUTE_DTYPE = jnp.bfloat16  # MXU input dtype; accumulation stays f32


# -----------------------------------------------------------------------------
# Kernel
# -----------------------------------------------------------------------------
def _tnet_kernel(x_ref,
                 w1_ref, b1_ref, w2_ref, b2_ref, w3_ref, b3_ref,
                 w4_ref, b4_ref, w5_ref, b5_ref, w6_ref, b6_ref,
                 o_ref, gmax_ref):
    t = pl.program_id(1)                       # N-tile index (inner, "arbitrary")
    tb, nt, k = x_ref.shape

    # Reset the per-batch-block running max at the first N-tile.  Post-ReLU
    # activations are >= 0, so zeros are a valid identity for the max.
    @pl.when(t == 0)
    def _():
        gmax_ref[...] = jnp.zeros_like(gmax_ref)

    def mm_bias_relu(h, w_ref, b_ref):
        # bf16 MXU matmul, f32 accumulation, f32 bias + ReLU epilogue,
        # bf16 result (halves the live activation footprint; the next matmul
        # casts to bf16 anyway).
        o = jnp.dot(h, w_ref[...], preferred_element_type=jnp.float32)
        return jnp.maximum(o + b_ref[...], 0.0).astype(COMPUTE_DTYPE)

    # conv1/conv2/conv3 (1x1 conv == matmul) on the point-major slab.
    x = x_ref[...].reshape(tb * nt, k)               # bf16 already (host cast)
    h = mm_bias_relu(x, w1_ref, b1_ref)              # (M, 64)
    h = mm_bias_relu(h, w2_ref, b2_ref)              # (M, 128)
    h = mm_bias_relu(h, w3_ref, b3_ref)              # (M, 1024) bf16

    # torch.max(x, 2): fold this N-tile's per-cloud max into the accumulator.
    tile_max = jnp.max(h.reshape(tb, nt, h.shape[-1]), axis=1)   # (TB, 1024)
    gmax_ref[...] = jnp.maximum(gmax_ref[...], tile_max.astype(jnp.float32))

    # FC stage + store only once all N-tiles of this batch block are folded.
    @pl.when(t == pl.num_programs(1) - 1)
    def _():
        g = gmax_ref[...].astype(COMPUTE_DTYPE)      # (TB, 1024)
        f = mm_bias_relu(g, w4_ref, b4_ref)          # (TB, 512)
        f = mm_bias_relu(f, w5_ref, b5_ref)          # (TB, 256)
        out = jnp.dot(f, w6_ref[...], preferred_element_type=jnp.float32)
        # b6 already holds fc3.bias + flattened identity, zero-padded to OUT_PAD.
        o_ref[...] = out + b6_ref[...]               # (TB, OUT_PAD)


# -----------------------------------------------------------------------------
# Wrapper
# -----------------------------------------------------------------------------
def _round_up(x, m):
    return (x + m - 1) // m * m


def _pick_n_tile(n, max_tile):
    """Largest multiple-of-8 divisor of n that is <= max_tile (else full n)."""
    if n <= max_tile:
        return n
    start = max_tile - (max_tile % 8)
    for cand in range(start, 7, -8):
        if n % cand == 0:
            return cand
    return n   # no clean divisor; fall back to a single full-N tile


def tnet_forward(x_ncw, kernel_params, *, tb=128, n_tile=32,
                 vmem_limit_bytes=48 * 1024 * 1024):
    """x_ncw: (B, k, N) float32 -> (B, k, k) transform matrices."""
    B, k, N = x_ncw.shape

    # Point-major bf16 layout; clamp tb to the (16-rounded) batch so small
    # batches don't compute padded garbage rows; pad batch to a multiple of tb.
    tb = min(tb, _round_up(B, 16))
    assert tb % 16 == 0, "tb must be a multiple of 16 (bf16 sublane packing)"
    x = jnp.transpose(x_ncw, (0, 2, 1)).astype(COMPUTE_DTYPE)   # (B, N, k)
    num_blocks = pl.cdiv(B, tb)
    b_pad = num_blocks * tb
    if b_pad != B:
        x = jnp.pad(x, ((0, b_pad - B), (0, 0), (0, 0)))

    nt = _pick_n_tile(N, n_tile)
    num_n_tiles = N // nt

    def const_spec(shape):
        nd = len(shape)
        return pl.BlockSpec(shape, lambda g, t, _nd=nd: (0,) * _nd)

    out = pl.pallas_call(
        _tnet_kernel,
        out_shape=jax.ShapeDtypeStruct((b_pad, OUT_PAD), jnp.float32),
        grid_spec=pltpu.PrefetchScalarGridSpec(
            num_scalar_prefetch=0,
            grid=(num_blocks, num_n_tiles),
            in_specs=[pl.BlockSpec((tb, nt, k), lambda g, t: (g, t, 0))]
                     + [const_spec(p.shape) for p in kernel_params],
            out_specs=pl.BlockSpec((tb, OUT_PAD), lambda g, t: (g, 0)),
            scratch_shapes=[pltpu.VMEM((tb, 1024), jnp.float32)],
        ),
        compiler_params=pltpu.CompilerParams(
            # On v7x, pltpu.CORE_PARALLEL on the batch axis would shard the
            # grid across the 2 TensorCores (needs num_blocks >= 2).
            dimension_semantics=("parallel", "arbitrary"),
            vmem_limit_bytes=vmem_limit_bytes),
    )(x, *kernel_params)

    return out[:B, :k * k].reshape(B, k, k)


# -----------------------------------------------------------------------------
# Parameters: PyTorch-layout raw params, host-side BN folding.
# -----------------------------------------------------------------------------
def init_raw_params(key, k=K):
    """Deterministic synthetic parameters in PyTorch layouts (eval-mode BN)."""
    keys = iter(jax.random.split(key, 64))

    def rnd(shape, scale=0.1):
        return scale * jax.random.normal(next(keys), shape, dtype=jnp.float32)

    def bn(c):
        return dict(
            gamma=1.0 + rnd((c,), 0.05),
            beta=rnd((c,), 0.05),
            mean=rnd((c,), 0.05),
            var=1.0 + 0.1 * jax.random.uniform(next(keys), (c,),
                                               dtype=jnp.float32))

    p = {
        "conv1_w": rnd((64, k, 1)),     "conv1_b": rnd((64,)),   "bn1": bn(64),
        "conv2_w": rnd((128, 64, 1)),   "conv2_b": rnd((128,)),  "bn2": bn(128),
        "conv3_w": rnd((1024, 128, 1)), "conv3_b": rnd((1024,)), "bn3": bn(1024),
        "fc1_w":   rnd((512, 1024)),    "fc1_b":   rnd((512,)),  "bn4": bn(512),
        "fc2_w":   rnd((256, 512)),     "fc2_b":   rnd((256,)),  "bn5": bn(256),
        # PyTorch TNet __init__: fc3.weight = 0, fc3.bias = eye(k).view(-1)
        "fc3_w":   jnp.zeros((k * k, 256), jnp.float32),
        "fc3_b":   jnp.eye(k, dtype=jnp.float32).reshape(-1),
    }
    return p


def fold_params(p, k=K):
    """Fold eval-mode BN into weights/biases; cast weights to bf16; pad fc3."""
    def fold(w_oi, b_o, bn):   # w_oi: (Cout, Cin) torch layout
        scale = bn["gamma"] / jnp.sqrt(bn["var"] + BN_EPS)
        w = (w_oi.T * scale[None, :]).astype(COMPUTE_DTYPE)       # (Cin, Cout)
        b = ((b_o - bn["mean"]) * scale + bn["beta"])[None, :]    # (1, Cout)
        return w, b.astype(jnp.float32)

    w1, b1 = fold(p["conv1_w"][:, :, 0], p["conv1_b"], p["bn1"])
    w2, b2 = fold(p["conv2_w"][:, :, 0], p["conv2_b"], p["bn2"])
    w3, b3 = fold(p["conv3_w"][:, :, 0], p["conv3_b"], p["bn3"])
    w4, b4 = fold(p["fc1_w"], p["fc1_b"], p["bn4"])
    w5, b5 = fold(p["fc2_w"], p["fc2_b"], p["bn5"])

    # fc3 (no BN): pad output columns 9 -> OUT_PAD for lane-dense stores and
    # pre-add the identity that the PyTorch forward() adds (bias + eye).
    w6 = jnp.zeros((256, OUT_PAD), jnp.float32)
    w6 = w6.at[:, :k * k].set(p["fc3_w"].T)
    b6 = jnp.zeros((1, OUT_PAD), jnp.float32)
    b6 = b6.at[0, :k * k].set(p["fc3_b"]
                              + jnp.eye(k, dtype=jnp.float32).reshape(-1))

    return (w1, b1, w2, b2, w3, b3, w4, b4, w5, b5,
            w6.astype(COMPUTE_DTYPE), b6)


# -----------------------------------------------------------------------------
# Pure-JAX f32 reference (PyTorch math, eval-mode BN) for correctness check.
# -----------------------------------------------------------------------------
def tnet_reference(x_ncw, p, k=K):
    def bn_apply(h, bn):
        scale = bn["gamma"] / jnp.sqrt(bn["var"] + BN_EPS)
        return (h - bn["mean"]) * scale + bn["beta"]

    x = jnp.transpose(x_ncw, (0, 2, 1))                            # (B, N, k)
    h = jax.nn.relu(bn_apply(x @ p["conv1_w"][:, :, 0].T + p["conv1_b"], p["bn1"]))
    h = jax.nn.relu(bn_apply(h @ p["conv2_w"][:, :, 0].T + p["conv2_b"], p["bn2"]))
    h = jax.nn.relu(bn_apply(h @ p["conv3_w"][:, :, 0].T + p["conv3_b"], p["bn3"]))
    g = jnp.max(h, axis=1)                                         # (B, 1024)
    f = jax.nn.relu(bn_apply(g @ p["fc1_w"].T + p["fc1_b"], p["bn4"]))
    f = jax.nn.relu(bn_apply(f @ p["fc2_w"].T + p["fc2_b"], p["bn5"]))
    o = f @ p["fc3_w"].T + p["fc3_b"] + jnp.eye(k, dtype=jnp.float32).reshape(-1)
    return o.reshape(-1, k, k)


if __name__ == "__main__":
    key = jax.random.PRNGKey(0)
    pkey, xkey, wkey, bkey = jax.random.split(key, 4)
    raw = init_raw_params(pkey)

    # The canonical PyTorch init (fc3.weight=0, fc3.bias=eye) makes the output
    # exactly 2*I regardless of the earlier layers, which would not exercise
    # the kernel.  Perturb fc3 slightly so the numeric check covers the whole
    # pipeline; the forward math (fc3(x) + identity) is unchanged.
    raw["fc3_w"] = 0.1 * jax.random.normal(wkey, raw["fc3_w"].shape,
                                           dtype=jnp.float32)
    raw["fc3_b"] = raw["fc3_b"] + 0.05 * jax.random.normal(
        bkey, raw["fc3_b"].shape, dtype=jnp.float32)

    kernel_params = fold_params(raw)

    B = 2
    x = jax.random.normal(xkey, (B, K, N_POINTS), dtype=jnp.float32)  # NCW

    # n_tile=32 with N=128 -> 4 N-tiles: exercises the running-max accumulator
    # and the pl.when-gated FC/store epilogue.
    out = jax.block_until_ready(tnet_forward(x, kernel_params, n_tile=32))
    ref = tnet_reference(x, raw)

    assert out.shape == (B, K, K), out.shape
    # bf16 matmuls / activations with f32 accumulation vs. pure-f32 reference.
    assert jnp.allclose(out, ref, atol=5e-2, rtol=5e-2), (out, ref)

    print("KERNEL_OK")
</pallas_src>

<mosaic_0001>
module attributes {stable_mosaic.version = 11 : i64} {
  func.func @_tnet_kernel(%arg0: i32, %arg1: i32, %arg2: memref<16x32x3xbf16, #tpu.memory_space<vmem>>, %arg3: memref<3x64xbf16, #tpu.memory_space<vmem>>, %arg4: memref<1x64xf32, #tpu.memory_space<vmem>>, %arg5: memref<64x128xbf16, #tpu.memory_space<vmem>>, %arg6: memref<1x128xf32, #tpu.memory_space<vmem>>, %arg7: memref<128x1024xbf16, #tpu.memory_space<vmem>>, %arg8: memref<1x1024xf32, #tpu.memory_space<vmem>>, %arg9: memref<1024x512xbf16, #tpu.memory_space<vmem>>, %arg10: memref<1x512xf32, #tpu.memory_space<vmem>>, %arg11: memref<512x256xbf16, #tpu.memory_space<vmem>>, %arg12: memref<1x256xf32, #tpu.memory_space<vmem>>, %arg13: memref<256x128xbf16, #tpu.memory_space<vmem>>, %arg14: memref<1x128xf32, #tpu.memory_space<vmem>>, %arg15: memref<16x128xf32, #tpu.memory_space<vmem>>, %arg16: memref<16x1024xf32, #tpu.memory_space<vmem>>) attributes {dimension_semantics = [#tpu.dimension_semantics<parallel>, #tpu.dimension_semantics<arbitrary>], iteration_bounds = array<i64: 1, 4>, scalar_prefetch = 0 : i64, scratch_operands = 1 : i64, tpu.core_type = #tpu.core_type<tc>, window_params = [{transform_indices = @transform_0, window_bounds = array<i64: 16, 32, 3>}, {pipeline_mode = #tpu.pipeline_mode<synchronous>, transform_indices = @transform_1, window_bounds = array<i64: 3, 64>}, {pipeline_mode = #tpu.pipeline_mode<synchronous>, transform_indices = @transform_2, window_bounds = array<i64: 1, 64>}, {pipeline_mode = #tpu.pipeline_mode<synchronous>, transform_indices = @transform_3, window_bounds = array<i64: 64, 128>}, {pipeline_mode = #tpu.pipeline_mode<synchronous>, transform_indices = @transform_4, window_bounds = array<i64: 1, 128>}, {pipeline_mode = #tpu.pipeline_mode<synchronous>, transform_indices = @transform_5, window_bounds = array<i64: 128, 1024>}, {pipeline_mode = #tpu.pipeline_mode<synchronous>, transform_indices = @transform_6, window_bounds = array<i64: 1, 1024>}, {pipeline_mode = #tpu.pipeline_mode<synchronous>, transform_indices = @transform_7, window_bounds = array<i64: 1024, 512>}, {pipeline_mode = #tpu.pipeline_mode<synchronous>, transform_indices = @transform_8, window_bounds = array<i64: 1, 512>}, {pipeline_mode = #tpu.pipeline_mode<synchronous>, transform_indices = @transform_9, window_bounds = array<i64: 512, 256>}, {pipeline_mode = #tpu.pipeline_mode<synchronous>, transform_indices = @transform_10, window_bounds = array<i64: 1, 256>}, {pipeline_mode = #tpu.pipeline_mode<synchronous>, transform_indices = @transform_11, window_bounds = array<i64: 256, 128>}, {pipeline_mode = #tpu.pipeline_mode<synchronous>, transform_indices = @transform_12, window_bounds = array<i64: 1, 128>}, {transform_indices = @transform_13, window_bounds = array<i64: 16, 128>}]} {
    %c0_i32 = arith.constant 0 : i32
    %0 = arith.cmpi eq, %arg1, %c0_i32 : i32
    %1 = arith.extui %0 : i1 to i32
    %c0_i32_0 = arith.constant 0 : i32
    %2 = arith.cmpi ne, %1, %c0_i32_0 : i32
    scf.if %2 {
      %cst_26 = arith.constant 0.000000e+00 : f32
      %38 = vector.broadcast %cst_26 : f32 to vector<16x1024xf32>
      %c0_27 = arith.constant 0 : index
      %c0_28 = arith.constant 0 : index
      %39 = vector.load %arg16[%c0_27, %c0_28] : memref<16x1024xf32, #tpu.memory_space<vmem>>, vector<16x1024xf32>
      tpu.vector_store %arg16[%c0_27, %c0_28], %38 {strides = array<i32>} : memref<16x1024xf32, #tpu.memory_space<vmem>>, vector<16x1024xf32>,
    } else {
    }
    %c0 = arith.constant 0 : index
    %c0_1 = arith.constant 0 : index
    %c0_2 = arith.constant 0 : index
    %3 = vector.load %arg2[%c0, %c0_1, %c0_2] : memref<16x32x3xbf16, #tpu.memory_space<vmem>>, vector<16x32x3xbf16>
    %4 = vector.shape_cast %3 : vector<16x32x3xbf16> to vector<512x3xbf16>
    %c0_3 = arith.constant 0 : index
    %c0_4 = arith.constant 0 : index
    %5 = vector.load %arg3[%c0_3, %c0_4] : memref<3x64xbf16, #tpu.memory_space<vmem>>, vector<3x64xbf16>
    %cst = arith.constant dense<0.000000e+00> : vector<512x64xf32>
    %6 = tpu.matmul %4, %5, %cst {dimension_numbers = #tpu.dot_dimension_numbers<[1], [0], [0], [1], [0, 0, 1, 1], [], []>} : vector<512x3xbf16>, vector<3x64xbf16>, vector<512x64xf32> -> vector<512x64xf32>
    %c0_5 = arith.constant 0 : index
    %c0_6 = arith.constant 0 : index
    %7 = vector.load %arg4[%c0_5, %c0_6] : memref<1x64xf32, #tpu.memory_space<vmem>>, vector<1x64xf32>
    %8 = vector.broadcast %7 : vector<1x64xf32> to vector<512x64xf32>
    %9 = arith.addf %6, %8 : vector<512x64xf32>
    %cst_7 = arith.constant 0.000000e+00 : f32
    %10 = vector.broadcast %cst_7 : f32 to vector<512x64xf32>
    %11 = arith.maximumf %9, %10 : vector<512x64xf32>
    %12 = arith.truncf %11 : vector<512x64xf32> to vector<512x64xbf16>
    %c0_8 = arith.constant 0 : index
    %c0_9 = arith.constant 0 : index
    %13 = vector.load %arg5[%c0_8, %c0_9] : memref<64x128xbf16, #tpu.memory_space<vmem>>, vector<64x128xbf16>
    %cst_10 = arith.constant dense<0.000000e+00> : vector<512x128xf32>
    %14 = tpu.matmul %12, %13, %cst_10 {dimension_numbers = #tpu.dot_dimension_numbers<[1], [0], [0], [1], [0, 0, 1, 1], [], []>} : vector<512x64xbf16>, vector<64x128xbf16>, vector<512x128xf32> -> vector<512x128xf32>
    %c0_11 = arith.constant 0 : index
    %c0_12 = arith.constant 0 : index
    %15 = vector.load %arg6[%c0_11, %c0_12] : memref<1x128xf32, #tpu.memory_space<vmem>>, vector<1x128xf32>
    %16 = vector.broadcast %15 : vector<1x128xf32> to vector<512x128xf32>
    %17 = arith.addf %14, %16 : vector<512x128xf32>
    %cst_13 = arith.constant 0.000000e+00 : f32
    %18 = vector.broadcast %cst_13 : f32 to vector<512x128xf32>
    %19 = arith.maximumf %17, %18 : vector<512x128xf32>
    %20 = arith.truncf %19 : vector<512x128xf32> to vector<512x128xbf16>
    %c0_14 = arith.constant 0 : index
    %c0_15 = arith.constant 0 : index
    %21 = vector.load %arg7[%c0_14, %c0_15] : memref<128x1024xbf16, #tpu.memory_space<vmem>>, vector<128x1024xbf16>
    %cst_16 = arith.constant dense<0.000000e+00> : vector<512x1024xf32>
    %22 = tpu.matmul %20, %21, %cst_16 {dimension_numbers = #tpu.dot_dimension_numbers<[1], [0], [0], [1], [0, 0, 1, 1], [], []>} : vector<512x128xbf16>, vector<128x1024xbf16>, vector<512x1024xf32> -> vector<512x1024xf32>
    %c0_17 = arith.constant 0 : index
    %c0_18 = arith.constant 0 : index
    %23 = vector.load %arg8[%c0_17, %c0_18] : memref<1x1024xf32, #tpu.memory_space<vmem>>, vector<1x1024xf32>
    %24 = vector.broadcast %23 : vector<1x1024xf32> to vector<512x1024xf32>
    %25 = arith.addf %22, %24 : vector<512x1024xf32>
    %cst_19 = arith.constant 0.000000e+00 : f32
    %26 = vector.broadcast %cst_19 : f32 to vector<512x1024xf32>
    %27 = arith.maximumf %25, %26 : vector<512x1024xf32>
    %28 = arith.truncf %27 : vector<512x1024xf32> to vector<512x1024xbf16>
    %29 = vector.shape_cast %28 : vector<512x1024xbf16> to vector<16x32x1024xbf16>
    %cst_20 = arith.constant dense<0xFF80> : vector<16x1024xbf16>
    %30 = vector.multi_reduction <maximumf>, %29, %cst_20 [1] : vector<16x32x1024xbf16> to vector<16x1024xbf16>
    %c0_21 = arith.constant 0 : index
    %c0_22 = arith.constant 0 : index
    %31 = vector.load %arg16[%c0_21, %c0_22] : memref<16x1024xf32, #tpu.memory_space<vmem>>, vector<16x1024xf32>
    %32 = arith.extf %30 : vector<16x1024xbf16> to vector<16x1024xf32>
    %33 = arith.maximumf %31, %32 : vector<16x1024xf32>
    %c0_23 = arith.constant 0 : index
    %c0_24 = arith.constant 0 : index
    %34 = vector.load %arg16[%c0_23, %c0_24] : memref<16x1024xf32, #tpu.memory_space<vmem>>, vector<16x1024xf32>
    tpu.vector_store %arg16[%c0_23, %c0_24], %33 {strides = array<i32>} : memref<16x1024xf32, #tpu.memory_space<vmem>>, vector<16x1024xf32>,
    %c3_i32 = arith.constant 3 : i32
    %35 = arith.cmpi eq, %arg1, %c3_i32 : i32
    %36 = arith.extui %35 : i1 to i32
    %c0_i32_25 = arith.constant 0 : i32
    %37 = arith.cmpi ne, %36, %c0_i32_25 : i32
    scf.if %37 {
      %c0_26 = arith.constant 0 : index
      %c0_27 = arith.constant 0 : index
      %38 = vector.load %arg16[%c0_26, %c0_27] : memref<16x1024xf32, #tpu.memory_space<vmem>>, vector<16x1024xf32>
      %39 = arith.truncf %38 : vector<16x1024xf32> to vector<16x1024xbf16>
      %c0_28 = arith.constant 0 : index
      %c0_29 = arith.constant 0 : index
      %40 = vector.load %arg9[%c0_28, %c0_29] : memref<1024x512xbf16, #tpu.memory_space<vmem>>, vector<1024x512xbf16>
      %cst_30 = arith.constant dense<0.000000e+00> : vector<16x512xf32>
      %41 = tpu.matmul %39, %40, %cst_30 {dimension_numbers = #tpu.dot_dimension_numbers<[1], [0], [0], [1], [0, 0, 1, 1], [], []>} : vector<16x1024xbf16>, vector<1024x512xbf16>, vector<16x512xf32> -> vector<16x512xf32>
      %c0_31 = arith.constant 0 : index
      %c0_32 = arith.constant 0 : index
      %42 = vector.load %arg10[%c0_31, %c0_32] : memref<1x512xf32, #tpu.memory_space<vmem>>, vector<1x512xf32>
      %43 = vector.broadcast %42 : vector<1x512xf32> to vector<16x512xf32>
      %44 = arith.addf %41, %43 : vector<16x512xf32>
      %cst_33 = arith.constant 0.000000e+00 : f32
      %45 = vector.broadcast %cst_33 : f32 to vector<16x512xf32>
      %46 = arith.maximumf %44, %45 : vector<16x512xf32>
      %47 = arith.truncf %46 : vector<16x512xf32> to vector<16x512xbf16>
      %c0_34 = arith.constant 0 : index
      %c0_35 = arith.constant 0 : index
      %48 = vector.load %arg11[%c0_34, %c0_35] : memref<512x256xbf16, #tpu.memory_space<vmem>>, vector<512x256xbf16>
      %cst_36 = arith.constant dense<0.000000e+00> : vector<16x256xf32>
      %49 = tpu.matmul %47, %48, %cst_36 {dimension_numbers = #tpu.dot_dimension_numbers<[1], [0], [0], [1], [0, 0, 1, 1], [], []>} : vector<16x512xbf16>, vector<512x256xbf16>, vector<16x256xf32> -> vector<16x256xf32>
      %c0_37 = arith.constant 0 : index
      %c0_38 = arith.constant 0 : index
      %50 = vector.load %arg12[%c0_37, %c0_38] : memref<1x256xf32, #tpu.memory_space<vmem>>, vector<1x256xf32>
      %51 = vector.broadcast %50 : vector<1x256xf32> to vector<16x256xf32>
      %52 = arith.addf %49, %51 : vector<16x256xf32>
      %cst_39 = arith.constant 0.000000e+00 : f32
      %53 = vector.broadcast %cst_39 : f32 to vector<16x256xf32>
      %54 = arith.maximumf %52, %53 : vector<16x256xf32>
      %55 = arith.truncf %54 : vector<16x256xf32> to vector<16x256xbf16>
      %c0_40 = arith.constant 0 : index
      %c0_41 = arith.constant 0 : index
      %56 = vector.load %arg13[%c0_40, %c0_41] : memref<256x128xbf16, #tpu.memory_space<vmem>>, vector<256x128xbf16>
      %cst_42 = arith.constant dense<0.000000e+00> : vector<16x128xf32>
      %57 = tpu.matmul %55, %56, %cst_42 {dimension_numbers = #tpu.dot_dimension_numbers<[1], [0], [0], [1], [0, 0, 1, 1], [], []>} : vector<16x256xbf16>, vector<256x128xbf16>, vector<16x128xf32> -> vector<16x128xf32>
      %c0_43 = arith.constant 0 : index
      %c0_44 = arith.constant 0 : index
      %58 = vector.load %arg14[%c0_43, %c0_44] : memref<1x128xf32, #tpu.memory_space<vmem>>, vector<1x128xf32>
      %59 = vector.broadcast %58 : vector<1x128xf32> to vector<16x128xf32>
      %60 = arith.addf %57, %59 : vector<16x128xf32>
      %c0_45 = arith.constant 0 : index
      %c0_46 = arith.constant 0 : index
      %61 = vector.load %arg15[%c0_45, %c0_46] : memref<16x128xf32, #tpu.memory_space<vmem>>, vector<16x128xf32>
      tpu.vector_store %arg15[%c0_45, %c0_46], %60 {strides = array<i32>} : memref<16x128xf32, #tpu.memory_space<vmem>>, vector<16x128xf32>,
    } else {
    }
    return
  }
  func.func @transform_0(%arg0: i32, %arg1: i32) -> (i32, i32, i32) {
    %c0_i32 = arith.constant 0 : i32
    %c0_i32_0 = arith.constant 0 : i32
    return %arg0, %arg1, %c0_i32 : i32, i32, i32
  }
  func.func @transform_1(%arg0: i32, %arg1: i32) -> (i32, i32) {
    %c0_i32 = arith.constant 0 : i32
    %c0_i32_0 = arith.constant 0 : i32
    %c0_i32_1 = arith.constant 0 : i32
    return %c0_i32, %c0_i32_0 : i32, i32
  }
  func.func @transform_2(%arg0: i32, %arg1: i32) -> (i32, i32) {
    %c0_i32 = arith.constant 0 : i32
    %c0_i32_0 = arith.constant 0 : i32
    %c0_i32_1 = arith.constant 0 : i32
    return %c0_i32, %c0_i32_0 : i32, i32
  }
  func.func @transform_3(%arg0: i32, %arg1: i32) -> (i32, i32) {
    %c0_i32 = arith.constant 0 : i32
    %c0_i32_0 = arith.constant 0 : i32
    %c0_i32_1 = arith.constant 0 : i32
    return %c0_i32, %c0_i32_0 : i32, i32
  }
  func.func @transform_4(%arg0: i32, %arg1: i32) -> (i32, i32) {
    %c0_i32 = arith.constant 0 : i32
    %c0_i32_0 = arith.constant 0 : i32
    %c0_i32_1 = arith.constant 0 : i32
    return %c0_i32, %c0_i32_0 : i32, i32
  }
  func.func @transform_5(%arg0: i32, %arg1: i32) -> (i32, i32) {
    %c0_i32 = arith.constant 0 : i32
    %c0_i32_0 = arith.constant 0 : i32
    %c0_i32_1 = arith.constant 0 : i32
    return %c0_i32, %c0_i32_0 : i32, i32
  }
  func.func @transform_6(%arg0: i32, %arg1: i32) -> (i32, i32) {
    %c0_i32 = arith.constant 0 : i32
    %c0_i32_0 = arith.constant 0 : i32
    %c0_i32_1 = arith.constant 0 : i32
    return %c0_i32, %c0_i32_0 : i32, i32
  }
  func.func @transform_7(%arg0: i32, %arg1: i32) -> (i32, i32) {
    %c0_i32 = arith.constant 0 : i32
    %c0_i32_0 = arith.constant 0 : i32
    %c0_i32_1 = arith.constant 0 : i32
    return %c0_i32, %c0_i32_0 : i32, i32
  }
  func.func @transform_8(%arg0: i32, %arg1: i32) -> (i32, i32) {
    %c0_i32 = arith.constant 0 : i32
    %c0_i32_0 = arith.constant 0 : i32
    %c0_i32_1 = arith.constant 0 : i32
    return %c0_i32, %c0_i32_0 : i32, i32
  }
  func.func @transform_9(%arg0: i32, %arg1: i32) -> (i32, i32) {
    %c0_i32 = arith.constant 0 : i32
    %c0_i32_0 = arith.constant 0 : i32
    %c0_i32_1 = arith.constant 0 : i32
    return %c0_i32, %c0_i32_0 : i32, i32
  }
  func.func @transform_10(%arg0: i32, %arg1: i32) -> (i32, i32) {
    %c0_i32 = arith.constant 0 : i32
    %c0_i32_0 = arith.constant 0 : i32
    %c0_i32_1 = arith.constant 0 : i32
    return %c0_i32, %c0_i32_0 : i32, i32
  }
  func.func @transform_11(%arg0: i32, %arg1: i32) -> (i32, i32) {
    %c0_i32 = arith.constant 0 : i32
    %c0_i32_0 = arith.constant 0 : i32
    %c0_i32_1 = arith.constant 0 : i32
    return %c0_i32, %c0_i32_0 : i32, i32
  }
  func.func @transform_12(%arg0: i32, %arg1: i32) -> (i32, i32) {
    %c0_i32 = arith.constant 0 : i32
    %c0_i32_0 = arith.constant 0 : i32
    %c0_i32_1 = arith.constant 0 : i32
    return %c0_i32, %c0_i32_0 : i32, i32
  }
  func.func @transform_13(%arg0: i32, %arg1: i32) -> (i32, i32) {
    %c0_i32 = arith.constant 0 : i32
    %c0_i32_0 = arith.constant 0 : i32
    return %arg0, %c0_i32 : i32, i32
  }
}

</mosaic_0001>

<bundles_post_ra>
// kernel: tpu_custom_call.1
= control target key start
LH: loop header
LB: loop body
LE: loop exit
PB: predicated region body
PF: predicated region fallthrough
CT: control target
= control target key end

     0   :  { %s14806_s0 = inlined_call_operand.vmem [shape: bf16[16,128,3], index: 0, kind: input, shape index: {}]   ;;  %s14807_s1 = inlined_call_operand.vmem [shape: bf16[3,64], index: 1, kind: input, shape index: {}]   ;;  %s14808_s2 = inlined_call_operand.hbm [shape: f32[1,64], index: 2, kind: input, shape index: {}]   ;;  %s14809_s3 = inlined_call_operand.vmem [shape: bf16[64,128], index: 3, kind: input, shape index: {}]   ;;  %s14810_s4 = inlined_call_operand.hbm [shape: f32[1,128], index: 4, kind: input, shape index: {}]   ;;  %s14811_s5 = inlined_call_operand.vmem [shape: bf16[128,1024], index: 5, kind: input, shape index: {}]   ;;  %s14812_s6 = inlined_call_operand.vmem [shape: f32[1,1024], index: 6, kind: input, shape index: {}]   ;;  %s14813_s7 = inlined_call_operand.hbm [shape: bf16[1024,512], index: 7, kind: input, shape index: {}]   ;;  %s14814_s8 = inlined_call_operand.vmem [shape: f32[1,512], index: 8, kind: input, shape index: {}]   ;;  %s14815_s9 = inlined_call_operand.vmem [shape: bf16[512,256], index: 9, kind: input, shape index: {}]   ;;  %s14816_s10 = inlined_call_operand.vmem [shape: f32[1,256], index: 10, kind: input, shape index: {}]   ;;  %s14817_s11 = inlined_call_operand.hbm [shape: bf16[256,128], index: 11, kind: input, shape index: {}]   ;;  %s14818_s12 = inlined_call_operand.vmem [shape: f32[1,128], index: 12, kind: input, shape index: {}]   ;;  %s14819_s13 = inlined_call_operand.hbm [shape: f32[16,128], index: 13, kind: output, shape index: {}]  }
   0x1   :  { %14880 = sst [smem:[#allocation93_spill]] %s14808_s2 }
   0x2   :  { %14881 = sst [smem:[#allocation94_spill]] %s14810_s4 }
   0x3   :  { %14882 = sst [smem:[#allocation95_spill]] %s14814_s8 }
   0x4   :  { %14883 = sst [smem:[#allocation96_spill]] %s14815_s9 }
   0x5   :  { %14884 = sst [smem:[#allocation97_spill]] %s14816_s10 }
   0x6   :  { %14885 = sst [smem:[#allocation98_spill]] %s14818_s12 }
   0x7   :  { %14886 = sst [smem:[#allocation99_spill]] %s14819_s13 }
   0x8   :  { %18 = vsyncpa [#allocation5], 0 }
   0x9   :  { %19 = vsyncpa [#allocation8], 0 }
   0xa   :  { %20 = vsyncpa [#allocation11], 0 }
   0xb   :  { %21 = vsyncpa [#allocation6], 0  ;;  %s10940_s25 = smov 0   ;;  %s10942_s26 = smov 0  }
   0xc   :  { %s10944_s27 = smov 0   ;;  %s10946_s28 = smov 0  }
   0xd   :  { %s10948_s29 = smov 0  }
   0xe LB: > { %s14820_s30 = sadd.s32 4294967295, %s10854_s29   ;;  %s36_s14 = sadd.s32 1, %s10850_s28  ;;  %s10854_s29 = sphi %s10948_s29, %s27_s29   ;;  %s10850_s28 = sphi %s10946_s28, %s15503_s28   ;;  %s10846_s27 = sphi %s10944_s27, %s15502_s27   ;;  %s10842_s26 = sphi %s10942_s26, %s15501_s26   ;;  %s10838_s25 = sphi %s10940_s25, %s15500_s25  }
   0xf   : > { %p37_p0 = scmp.ge.s32.totalorder %s36_s14, 4  ;;  %s48_s15 = sadd.s32 1, %s10842_s26 }
  0x10   : > { %p55_p1 = scmp.ne.s32.totalorder %s10842_s26, %s10838_s25  ;;  %p56_p2 = scmp.eq.s32.totalorder %s10854_s29, 0 }
  0x11   : > { %s15505_s14 = smov (%p37_p0, %s36_s14), 0  ;;  %p9238_p4 = scmp.ge.s32.totalorder %s10854_s29, 1 }
  0x12   : > { %14887 = sst [smem:[#allocation17_spill]] %s15505_s14  ;;  %p10973_p3 = por %p56_p2, %p55_p1 }
  0x13   : > { %s44_s17 = ssub.s32 %s10850_s28, %s15505_s14  ;;  %p350_p5 = scmp.lt.s32.totalorder %s10854_s29, 5 }
  0x14   : > { %s14888_s16 = scalar_select %p10973_p3, 1, 0 }
  0x15   : > { %p46_p6 = scmp.eq.s32.totalorder %s44_s17, 0  ;;  %p10981_p7 = pnand %p9238_p4, %p350_p5 }
  0x16   : > { %p10987_p8 = scmp.eq.s32.totalorder %s14820_s30, 0  ;;  %s10856_s21 = smov [#allocation7]  }
  0x17   : > { %s14889_s18 = scalar_select %p10981_p7, 1, 0 }
  0x18   : > { %s14890_s19 = scalar_select %p10987_p8, 1, 0 }
  0x19   : > { %s10992_s20 = scalar_select %p46_p6, %s10842_s26, %s48_s15  }
  0x1a   : > { %p10052_p9 = pneg %p10981_p7  ;;  %s380_s22 = sshll.u32 %s10856_s21, 4  ;;  %s381_s22 = int_to_ptr.vmem [resolvable:$true] %s380_s22 }
  0x1b   : > { %14891 = sst [smem:[#allocation18_spill]] %s10992_s20  ;;  %s10857_s24 = smov [#allocation4]  }
  0x1c   : > { %p10998_p10 = pnand %p10987_p8, %p10052_p9  ;;  %s366_s17 = sshll.u32 %s10857_s24, 4  ;;  %s367_s17 = int_to_ptr.vmem [resolvable:$true] %s366_s17 }
  0x1d   : > { %s14893_s4 = sld [smem:[#allocation94_spill]] }
  0x1e   : > { %p11010_p12 = pneg %p10998_p10 }
  0x23   : > { %s10662_s13 = scalar_lea.hbm %s14893_s4, 16 }
  0x24   : > { %p10663_p11 = scmp.ne.s32.totalorder %s14893_s4, %s10662_s13  ;;  %p10669_p1 = scmp.lt.u32.totalorder %s10662_s13, %s14893_s4 }
  0x26   : > { %p10665_p13 = pnand %p11010_p12, %p10663_p11 }
  0x28   : > { %p10666_p0 = pneg %p10665_p13 }
  0x2a   : > { %p10671_p2 = pnand %p10669_p1, %p10666_p0 }
  0x2c   : > { %10674 = shalt.err (!%p10671_p2)
}
  0x2d   : > { %s10675_s30 = scalar_lea.vmem %s381_s22, 16  ;;  %s10682_s12 = scalar_lea.vmem %s381_s22, 32 }
  0x2e   : > { %p10676_p4 = scmp.ne.s32.totalorder %s381_s22, %s10675_s30  ;;  %p10683_p9 = scmp.lt.s32.totalorder %s381_s22, %s381_s22 }
  0x2f   : > { %p10684_p8 = scmp.lt.s32.totalorder %s10682_s12, %s10675_s30 }
  0x30   : > { %p10678_p5 = pnand %p10676_p4, %p11010_p12 }
  0x31   : > { %p10685_p7 = por %p10684_p8, %p10683_p9 }
  0x32   : > { %p10679_p6 = pneg %p10678_p5 }
  0x34   : > { %p10686_p3 = pnand %p10685_p7, %p10679_p6 }
  0x36   : > { %10689 = shalt.err (!%p10686_p3)
}
  0x37   : > { %10058 = dma.hbm_to_vmem [thread:$0]  (!%p10998_p10), %s14893_s4, 16, %s381_s22, [#allocation8]  }
  0x38   : > { %s14895_s2 = sld [smem:[#allocation93_spill]] }
  0x3e   : > { %s10690_s20 = scalar_lea.hbm %s14895_s2, 16 }
  0x3f   : > { %p10691_p11 = scmp.ne.s32.totalorder %s14895_s2, %s10690_s20  ;;  %p10697_p3 = scmp.lt.u32.totalorder %s10690_s20, %s14895_s2 }
  0x41   : > { %p10693_p8 = pnand %p10691_p11, %p11010_p12 }
  0x43   : > { %p10694_p7 = pneg %p10693_p8 }
  0x45   : > { %p10699_p13 = pnand %p10697_p3, %p10694_p7 }
  0x47   : > { %10702 = shalt.err (!%p10699_p13)
}
  0x48   : > { %s10703_s14 = scalar_lea.vmem %s367_s17, 16  ;;  %s10710_s22 = scalar_lea.vmem %s367_s17, 32 }
  0x49   : > { %p10704_p0 = scmp.ne.s32.totalorder %s367_s17, %s10703_s14  ;;  %p10711_p4 = scmp.lt.s32.totalorder %s367_s17, %s367_s17 }
  0x4a   : > { %p10712_p5 = scmp.lt.s32.totalorder %s10710_s22, %s10703_s14 }
  0x4b   : > { %p10706_p1 = pnand %p10704_p0, %p11010_p12 }
  0x4c   : > { %p10713_p6 = por %p10712_p5, %p10711_p4 }
  0x4d   : > { %p10707_p2 = pneg %p10706_p1 }
  0x4f   : > { %p10714_p9 = pnand %p10713_p6, %p10707_p2 }
  0x51   : > { %10717 = shalt.err (!%p10714_p9)
}
  0x52   : > { %10055 = dma.hbm_to_vmem [thread:$0]  (!%p10998_p10), %s14895_s2, 16, %s367_s17, [#allocation5]  }
  0x53   : > { %s10858_s10 = smov [#allocation9]   ;;  %s10718_s30 = scalar_lea.hbm %s14813_s7, 32768 }
  0x54   : > { %s396_s13 = sshll.u32 %s10858_s10, 4  ;;  %p10719_p11 = scmp.ne.s32.totalorder %s14813_s7, %s10718_s30  ;;  %s397_s13 = int_to_ptr.vmem [resolvable:$true] %s396_s13 }
  0x55   : > { %p10725_p3 = scmp.lt.u32.totalorder %s10718_s30, %s14813_s7 }
  0x56   : > { %p10721_p8 = pnand %p10719_p11, %p11010_p12 }
  0x58   : > { %p10722_p7 = pneg %p10721_p8 }
  0x5a   : > { %p10727_p13 = pnand %p10725_p3, %p10722_p7 }
  0x5c   : > { %10730 = shalt.err (!%p10727_p13)
}
  0x5d   : > { %s10731_s17 = scalar_lea.vmem %s397_s13, 32768  ;;  %p10739_p4 = scmp.lt.s32.totalorder %s397_s13, %s397_s13 }
  0x5e   : > { %p10732_p0 = scmp.ne.s32.totalorder %s397_s13, %s10731_s17  ;;  %p10740_p5 = scmp.lt.s32.totalorder %s10731_s17, %s10731_s17 }
  0x60   : > { %p10734_p1 = pnand %p10732_p0, %p11010_p12  ;;  %p10741_p6 = por %p10740_p5, %p10739_p4 }
  0x62   : > { %p10735_p2 = pneg %p10734_p1 }
  0x64   : > { %p10742_p9 = pnand %p10741_p6, %p10735_p2 }
  0x66   : > { %10745 = shalt.err (!%p10742_p9)
}
  0x67   : > { %s10859_s4 = smov 256   ;;  %s10860_s8 = smov 16  }
  0x68   : > { %10061 = dma.hbm_to_vmem [thread:$0]  (!%p10998_p10), %s14813_s7, 32768, %s397_s13, [#allocation8], %s10859_s4, %s10859_s4, %s10860_s8  }
  0x69   : > { %s10861_s20 = smov [#allocation10]   ;;  %s10746_s14 = scalar_lea.hbm %s14817_s11, 2048 }
  0x6a   : > { %s418_s15 = sshll.u32 %s10861_s20, 4  ;;  %p10747_p11 = scmp.ne.s32.totalorder %s14817_s11, %s10746_s14  ;;  %s419_s15 = int_to_ptr.vmem [resolvable:$true] %s418_s15 }
  0x6b   : > { %p10753_p3 = scmp.lt.u32.totalorder %s10746_s14, %s14817_s11 }
  0x6c   : > { %p10749_p8 = pnand %p10747_p11, %p11010_p12 }
  0x6e   : > { %p10750_p7 = pneg %p10749_p8 }
  0x70   : > { %p10755_p13 = pnand %p10753_p3, %p10750_p7 }
  0x72   : > { %10758 = shalt.err (!%p10755_p13)
}
  0x73   : > { %s10759_s13 = scalar_lea.vmem %s419_s15, 2048  ;;  %p10767_p4 = scmp.lt.s32.totalorder %s419_s15, %s419_s15 }
  0x74   : > { %p10760_p0 = scmp.ne.s32.totalorder %s419_s15, %s10759_s13  ;;  %p10768_p5 = scmp.lt.s32.totalorder %s10759_s13, %s10759_s13 }
  0x76   : > { %p10762_p1 = pnand %p10760_p0, %p11010_p12  ;;  %p10769_p6 = por %p10768_p5, %p10767_p4 }
  0x78   : > { %p10763_p2 = pneg %p10762_p1 }
  0x7a   : > { %p10770_p9 = pnand %p10769_p6, %p10763_p2 }
  0x7c   : > { %10773 = shalt.err (!%p10770_p9)
}
  0x7d   : > { %s10862_s4 = smov 64   ;;  %s10863_s8 = smov 4  }
  0x7e   : > { %10064 = dma.hbm_to_vmem [thread:$0]  (!%p10998_p10), %s14817_s11, 2048, %s419_s15, [#allocation11], %s10862_s4, %s10862_s4, %s10863_s8  }
  0x7f   : > { %p9243_p11 = scmp.ge.s32.totalorder %s10854_s29, 4 }
  0x80   : > { %p14896_p8 = scmp.ne.s32.totalorder (!%p9243_p11), %s14888_s16, 0 }
  0x81   : > { %431 = sbr.rel (%p9243_p11) target bundleno = 156 (0x9c), region = 64 }
  0x88   : > { %434 = sbr.rel (!%p14896_p8) target bundleno = 156 (0x9c), region = 68  ;;  %s436_s9 = sand.u32 (%p14896_p8), 1, %s10842_s26  }
  0x89   : > { %s9762_s21 = sshll.u32 (%p14896_p8), %s10850_s28, 4  ;;  %s9244_s10 = sshll.u32 (%p14896_p8), %s436_s9, 8 }
  0x8a   : > { %s11088_s12 = scalar_lea.vmem (%p14896_p8), %s14806_s0, %s9762_s21  ;;  %s11093_s16 = scalar_lea.vmem (%p14896_p8), [#allocation3], %s9244_s10 }
  0x8b   : > { %v460_v0 = vld [vmem:[%s11088_s12] sm:$0xff] (%p14896_p8)   ;;  %v464_v1 = vld [vmem:[%s11088_s12 + $0x8] sm:$0xff] (%p14896_p8)  }
  0x8c   : > { %v468_v2 = vld [vmem:[%s11088_s12 + $0x40] sm:$0xff] (%p14896_p8)   ;;  %461 = vst [vmem:[%s11093_s16] sm:$0xff] (%p14896_p8), %v460_v0   ;;  %465 = vst [vmem:[%s11093_s16 + $0x8] sm:$0xff] (%p14896_p8), %v464_v1   ;;  %v472_v3 = vld [vmem:[%s11088_s12 + $0x48] sm:$0xff] (%p14896_p8)  }
  0x8d   : > { %469 = vst [vmem:[%s11093_s16 + $0x10] sm:$0xff] (%p14896_p8), %v468_v2   ;;  %v476_v4 = vld [vmem:[%s11088_s12 + $0x80] sm:$0xff] (%p14896_p8)   ;;  %v480_v5 = vld [vmem:[%s11088_s12 + $0x88] sm:$0xff] (%p14896_p8)   ;;  %473 = vst [vmem:[%s11093_s16 + $0x18] sm:$0xff] (%p14896_p8), %v472_v3  }
  0x8e   : > { %477 = vst [vmem:[%s11093_s16 + $0x20] sm:$0xff] (%p14896_p8), %v476_v4   ;;  %481 = vst [vmem:[%s11093_s16 + $0x28] sm:$0xff] (%p14896_p8), %v480_v5   ;;  %v484_v6 = vld [vmem:[%s11088_s12 + $0xc0] sm:$0xff] (%p14896_p8)   ;;  %v488_v7 = vld [vmem:[%s11088_s12 + $0xc8] sm:$0xff] (%p14896_p8)  }
  0x8f   : > { %v492_v8 = vld [vmem:[%s11088_s12 + $0x100] sm:$0xff]   ;;  %485 = vst [vmem:[%s11093_s16 + $0x30] sm:$0xff] %v484_v6   ;;  %489 = vst [vmem:[%s11093_s16 + $0x38] sm:$0xff] %v488_v7   ;;  %v496_v9 = vld [vmem:[%s11088_s12 + $0x108] sm:$0xff]  }
  0x90   : > { %493 = vst [vmem:[%s11093_s16 + $0x40] sm:$0xff] %v492_v8   ;;  %v500_v10 = vld [vmem:[%s11088_s12 + $0x140] sm:$0xff]   ;;  %v504_v11 = vld [vmem:[%s11088_s12 + $0x148] sm:$0xff]   ;;  %497 = vst [vmem:[%s11093_s16 + $0x48] sm:$0xff] %v496_v9  }
  0x91   : > { %501 = vst [vmem:[%s11093_s16 + $0x50] sm:$0xff] %v500_v10   ;;  %505 = vst [vmem:[%s11093_s16 + $0x58] sm:$0xff] %v504_v11   ;;  %v508_v12 = vld [vmem:[%s11088_s12 + $0x180] sm:$0xff]   ;;  %v512_v13 = vld [vmem:[%s11088_s12 + $0x188] sm:$0xff]  }
  0x92   : > { %v516_v14 = vld [vmem:[%s11088_s12 + $0x1c0] sm:$0xff]   ;;  %509 = vst [vmem:[%s11093_s16 + $0x60] sm:$0xff] %v508_v12   ;;  %513 = vst [vmem:[%s11093_s16 + $0x68] sm:$0xff] %v512_v13   ;;  %v520_v15 = vld [vmem:[%s11088_s12 + $0x1c8] sm:$0xff]  }
  0x93   : > { %517 = vst [vmem:[%s11093_s16 + $0x70] sm:$0xff] %v516_v14   ;;  %v524_v16 = vld [vmem:[%s11088_s12 + $0x200] sm:$0xff]   ;;  %v528_v17 = vld [vmem:[%s11088_s12 + $0x208] sm:$0xff]   ;;  %521 = vst [vmem:[%s11093_s16 + $0x78] sm:$0xff] %v520_v15  }
  0x94   : > { %525 = vst [vmem:[%s11093_s16 + $0x80] sm:$0xff] %v524_v16   ;;  %529 = vst [vmem:[%s11093_s16 + $0x88] sm:$0xff] %v528_v17   ;;  %v532_v18 = vld [vmem:[%s11088_s12 + $0x240] sm:$0xff]   ;;  %v536_v19 = vld [vmem:[%s11088_s12 + $0x248] sm:$0xff]  }
  0x95   : > { %v540_v20 = vld [vmem:[%s11088_s12 + $0x280] sm:$0xff]   ;;  %533 = vst [vmem:[%s11093_s16 + $0x90] sm:$0xff] %v532_v18   ;;  %537 = vst [vmem:[%s11093_s16 + $0x98] sm:$0xff] %v536_v19   ;;  %v544_v21 = vld [vmem:[%s11088_s12 + $0x288] sm:$0xff]  }
  0x96   : > { %541 = vst [vmem:[%s11093_s16 + $0xa0] sm:$0xff] %v540_v20   ;;  %v548_v22 = vld [vmem:[%s11088_s12 + $0x2c0] sm:$0xff]   ;;  %v552_v23 = vld [vmem:[%s11088_s12 + $0x2c8] sm:$0xff]   ;;  %545 = vst [vmem:[%s11093_s16 + $0xa8] sm:$0xff] %v544_v21  }
  0x97   : > { %549 = vst [vmem:[%s11093_s16 + $0xb0] sm:$0xff] %v548_v22   ;;  %553 = vst [vmem:[%s11093_s16 + $0xb8] sm:$0xff] %v552_v23   ;;  %v556_v24 = vld [vmem:[%s11088_s12 + $0x300] sm:$0xff]   ;;  %v560_v25 = vld [vmem:[%s11088_s12 + $0x308] sm:$0xff]  }
  0x98   : > { %v564_v26 = vld [vmem:[%s11088_s12 + $0x340] sm:$0xff]   ;;  %557 = vst [vmem:[%s11093_s16 + $0xc0] sm:$0xff] %v556_v24   ;;  %561 = vst [vmem:[%s11093_s16 + $0xc8] sm:$0xff] %v560_v25   ;;  %v568_v27 = vld [vmem:[%s11088_s12 + $0x348] sm:$0xff]  }
  0x99   : > { %565 = vst [vmem:[%s11093_s16 + $0xd0] sm:$0xff] %v564_v26   ;;  %v572_v28 = vld [vmem:[%s11088_s12 + $0x380] sm:$0xff]   ;;  %v576_v29 = vld [vmem:[%s11088_s12 + $0x388] sm:$0xff]   ;;  %569 = vst [vmem:[%s11093_s16 + $0xd8] sm:$0xff] %v568_v27  }
  0x9a   : > { %573 = vst [vmem:[%s11093_s16 + $0xe0] sm:$0xff] %v572_v28   ;;  %577 = vst [vmem:[%s11093_s16 + $0xe8] sm:$0xff] %v576_v29   ;;  %v580_v30 = vld [vmem:[%s11088_s12 + $0x3c0] sm:$0xff]   ;;  %v584_v31 = vld [vmem:[%s11088_s12 + $0x3c8] sm:$0xff]  }
  0x9b   : > { %581 = vst [vmem:[%s11093_s16 + $0xf0] sm:$0xff] %v580_v30   ;;  %585 = vst [vmem:[%s11093_s16 + $0xf8] sm:$0xff] %v584_v31  }
  0x9c PF: > { %p14897_p10 = scmp.ne.s32.totalorder %s14889_s18, 0 }
  0x9e   : > { %741 = sbr.rel (%p14897_p10) target bundleno = 2618 (0xa3a), region = 109 }
  0xa5   : > { %s744_s23 = sand.u32 1, %s10838_s25   ;;  %p14898_p12 = scmp.ne.s32.totalorder %s14890_s19, 0 }
  0xa6   : > { %s9248_s15 = sshll.u32 %s744_s23, 8 }
  0xa7   : > { %s11159_s14 = scalar_lea.vmem [#allocation3], %s9248_s15 }
  0xa8   : > { %10821 = dma.done.wait (%p14898_p12), [#allocation5], 16  }
  0xa9   : > { %10823 = vsyncadd (%p14898_p12), [#allocation5], 4294967280 }
  0xaa   : > { %10825 = dma.done.wait (%p14898_p12), [#allocation8], 32784  }
  0xab   : > { %10827 = vsyncadd (%p14898_p12), [#allocation8], 4294934512 }
  0xac   : > { %10829 = dma.done.wait (%p14898_p12), [#allocation11], 2048  }
  0xad   : > { %10831 = vsyncadd (%p14898_p12), [#allocation11], 4294965248  ;;  %p9253_p7 = scmp.ne.s32.totalorder %s10846_s27, 0 }
  0xae   : > { %v10864_v32 = vmov (!%p9253_p7), 0.0  }
  0xaf   : > { %805 = sbr.rel (%p9253_p7) target bundleno = 183 (0xb7), region = 133  ;;  %806 = vst [vmem:[#allocation2] sm:$0xff] (!%p9253_p7), %v10864_v32  ;;  %807 = vst [vmem:[#allocation2 + $0x8] sm:$0xff] (!%p9253_p7), %v10864_v32 }
  0xb0   : > { %808 = vst [vmem:[#allocation2 + $0x10] sm:$0xff] (!%p9253_p7), %v10864_v32  ;;  %809 = vst [vmem:[#allocation2 + $0x18] sm:$0xff] (!%p9253_p7), %v10864_v32 }
  0xb1   : > { %810 = vst [vmem:[#allocation2 + $0x20] sm:$0xff] (!%p9253_p7), %v10864_v32  ;;  %811 = vst [vmem:[#allocation2 + $0x28] sm:$0xff] (!%p9253_p7), %v10864_v32 }
  0xb2   : > { %812 = vst [vmem:[#allocation2 + $0x30] sm:$0xff] (!%p9253_p7), %v10864_v32  ;;  %813 = vst [vmem:[#allocation2 + $0x38] sm:$0xff] (!%p9253_p7), %v10864_v32 }
  0xb3   : > { %814 = vst [vmem:[#allocation2 + $0x40] sm:$0xff] (!%p9253_p7), %v10864_v32  ;;  %815 = vst [vmem:[#allocation2 + $0x48] sm:$0xff] (!%p9253_p7), %v10864_v32 }
  0xb4   : > { %816 = vst [vmem:[#allocation2 + $0x50] sm:$0xff] (!%p9253_p7), %v10864_v32  ;;  %817 = vst [vmem:[#allocation2 + $0x58] sm:$0xff] (!%p9253_p7), %v10864_v32 }
  0xb5   : > { %818 = vst [vmem:[#allocation2 + $0x60] sm:$0xff] (!%p9253_p7), %v10864_v32  ;;  %819 = vst [vmem:[#allocation2 + $0x68] sm:$0xff] (!%p9253_p7), %v10864_v32 }
  0xb6   : > { %820 = vst [vmem:[#allocation2 + $0x70] sm:$0xff] %v10864_v32  ;;  %821 = vst [vmem:[#allocation2 + $0x78] sm:$0xff] %v10864_v32 }
  0xb7 PF: > { %v886_v33 = vld [vmem:[%s14807_s1] sm:$0x3]  ;;  %vm1151_vm0 = vcmask 1040384   ;;  %vm1152_vm1 = vcmask 1041408   ;;  %v10865_v35 = vmov 65535   ;;  %vm1054_vm2 = vcmask 23552  }
  0xb8   : > { %v10129_v34 = vld [vmem:[%s11159_s14] sm:$0xff]   ;;  %v1153_v36 = vsel %vm1151_vm0, 4294967295, %v10865_v35  ;;  %v10130_v39 = vld [vmem:[%s11159_s14 + $0x8] sm:$0xff]   ;;  %v10131_v40 = vld [vmem:[%s11159_s14 + $0x10] sm:$0xff]   ;;  %vm1582_vm3 = vcmask 523264   ;;  %vm6350_vm4 = vcmask 1041409  }
  0xb9   : > { %v1154_v37 = vsel %vm1152_vm1, %v1153_v36, 0  ;;  %9856 = vmatprep.mubr.msk.bf16.mxu0 %vm1054_vm2, %v10129_v34  ;;  %v10132_v41 = vld [vmem:[%s11159_s14 + $0x18] sm:$0xff]   ;;  %v10133_v42 = vld [vmem:[%s11159_s14 + $0x20] sm:$0xff]   ;;  %v10134_v43 = vld [vmem:[%s11159_s14 + $0x28] sm:$0xff]   ;;  %vm6352_vm5 = vcmask 1042434   ;;  %vm6354_vm6 = vcmask 1043459  }
  0xba   : > { %v1156_v38 = vand.u32 %v1154_v37, %v886_v33  ;;  %v10135_v44 = vld [vmem:[%s11159_s14 + $0x30] sm:$0xff]   ;;  %v10136_v45 = vld [vmem:[%s11159_s14 + $0x38] sm:$0xff]   ;;  %v10137_v46 = vld [vmem:[%s11159_s14 + $0x40] sm:$0xff]   ;;  %vm6356_vm7 = vcmask 1044484   ;;  %vm6358_vm8 = vcmask 1045509   ;;  %vm6360_vm9 = vcmask 1046534  }
  0xbb   : > { %v10161_v47 = vld [vmem:[%s14809_s3] sm:$0xff]   ;;  %v10162_v48 = vld [vmem:[%s14809_s3 + $0x8] sm:$0xff]   ;;  %v10139_v50 = vld [vmem:[%s11159_s14 + $0x50] sm:$0xff]   ;;  %vm6362_vm10 = vcmask 1047559   ;;  %p9420_p3 = scmp.ne.s32.totalorder %s10846_s27, 3 }
  0xbc   : > { %9854 = vmatprep.subr.bf16.mxu0 %v1156_v38  ;;  %9920 = vmatprep.subr.bf16.mxu1 %v10161_v47  ;;  %v10138_v49 = vld [vmem:[%s11159_s14 + $0x48] sm:$0xff]   ;;  %v10140_v51 = vld [vmem:[%s11159_s14 + $0x58] sm:$0xff]   ;;  %v10141_v52 = vld [vmem:[%s11159_s14 + $0x60] sm:$0xff]   ;;  %s15486_s22 = sld [smem:[#allocation96_spill]] (!%p9420_p3)  ;;  %s15487_s9 = sld [smem:[#allocation95_spill]] (!%p9420_p3) }
  0xbd   : > { %9855 = vmatpush3.bf16.msra.mxu0 %v1156_v38  ;;  %9921 = vmatpush3.bf16.msra.mxu1 %v10161_v47  ;;  %v10142_v53 = vld [vmem:[%s11159_s14 + $0x68] sm:$0xff]   ;;  %v10143_v54 = vld [vmem:[%s11159_s14 + $0x70] sm:$0xff]   ;;  %v10144_v55 = vld [vmem:[%s11159_s14 + $0x78] sm:$0xff]   ;;  %s15493_s12 = sld [smem:[#allocation97_spill]] (!%p9420_p3)  ;;  %s15494_s15 = sld [smem:[#allocation98_spill]] (!%p9420_p3) }
  0xbe   : > { %9922 = vmatprep.subr.bf16.mxu1 %v10162_v48  ;;  %v10145_v56 = vld [vmem:[%s11159_s14 + $0x80] sm:$0xff]   ;;  %v10146_v57 = vld [vmem:[%s11159_s14 + $0x88] sm:$0xff]   ;;  %v10147_v58 = vld [vmem:[%s11159_s14 + $0x90] sm:$0xff]  }
  0xbf   : > { %v10148_v59 = vld [vmem:[%s11159_s14 + $0x98] sm:$0xff]   ;;  %v10149_v60 = vld [vmem:[%s11159_s14 + $0xa0] sm:$0xff]   ;;  %v10150_v61 = vld [vmem:[%s11159_s14 + $0xa8] sm:$0xff]  }
  0xc0   : > { %9857 = vmatmul.mubr.msk.bf16.vlgmr.msra.gmra.mrb[0].mxu0 %vm1054_vm2, %v10130_v39  ;;  %v10151_v62 = vld [vmem:[%s11159_s14 + $0xb0] sm:$0xff]   ;;  %v10152_v63 = vld [vmem:[%s11159_s14 + $0xb8] sm:$0xff]   ;;  %v10153_v1 = vld [vmem:[%s11159_s14 + $0xc0] sm:$0xff]  }
  0xc1   : > { %9860 = vmatprep.mubr.msk.bf16.mxu0 %vm1054_vm2, %v10131_v40  ;;  %9923 = vmatpush3.bf16.msra.mxu1 %v10162_v48  ;;  %v10163_v0 = vld [vmem:[%s14809_s3 + $0x10] sm:$0xff]   ;;  %v10164_v2 = vld [vmem:[%s14809_s3 + $0x18] sm:$0xff]   ;;  %v10154_v3 = vld [vmem:[%s11159_s14 + $0xc8] sm:$0xff]  }
  0xc2   : > { %9924 = vmatprep.subr.bf16.mxu1 %v10163_v0  ;;  %v10155_v4 = vld [vmem:[%s11159_s14 + $0xd0] sm:$0xff]   ;;  %v10156_v5 = vld [vmem:[%s11159_s14 + $0xd8] sm:$0xff]   ;;  %v10157_v6 = vld [vmem:[%s11159_s14 + $0xe0] sm:$0xff]  }
  0xc3   : > { %v10158_v7 = vld [vmem:[%s11159_s14 + $0xe8] sm:$0xff]   ;;  %v10159_v8 = vld [vmem:[%s11159_s14 + $0xf0] sm:$0xff]   ;;  %v10160_v9 = vld [vmem:[%s11159_s14 + $0xf8] sm:$0xff]  }
  0xc4   : > { %v2064_v10 = vld [vmem:[%s14811_s5] sm:$0xff]  ;;  %v11262_v12 = vld [vmem:[%s14811_s5 + $0x8] sm:$0xff] }
  0xc5   : > { %9925 = vmatpush3.bf16.msra.mxu1 %v10163_v0  ;;  %v2068_v11 = vld [vmem:[%s14811_s5 + $0x20] sm:$0xff]  ;;  %v11267_v15 = vld [vmem:[%s14811_s5 + $0x28] sm:$0xff] }
  0xc6   : > { %9926 = vmatprep.subr.bf16.mxu1 %v10164_v2  ;;  %v9356_v13 = vcombine.low %v2064_v10, %v2068_v11  ;;  %v9357_v14 = vcombine.high %v2064_v10, %v2068_v11  ;;  %v9358_v16 = vcombine.low %v11262_v12, %v11267_v15  ;;  %v9359_v17 = vcombine.high %v11262_v12, %v11267_v15  ;;  %v2072_v18 = vld [vmem:[%s14811_s5 + $0x40] sm:$0xff] }
  0xc7   : > { %v2076_v19 = vld [vmem:[%s14811_s5 + $0x60] sm:$0xff] }
  0xc8   : > { %9861 = vmatmul.mubr.msk.bf16.gmra.mrb[4].mxu0 %vm1054_vm2, %v10132_v41  ;;  %2490 = vmatprep.subr.bf16.mxu0 %v9357_v14  ;;  %v9364_v20 = vcombine.low %v2072_v18, %v2076_v19  ;;  %v9365_v21 = vcombine.high %v2072_v18, %v2076_v19  ;;  %v2080_v22 = vld [vmem:[%s14811_s5 + $0x80] sm:$0xff]  ;;  %v2089_v19 = vld [vmem:[%s14811_s5 + $0xc8] sm:$0xff] }
  0xc9   : > { %9864 = vmatprep.mubr.msk.bf16.mxu0 %vm1054_vm2, %v10133_v42  ;;  %9927 = vmatpush3.bf16.msra.mxu1 %v10164_v2  ;;  %v2084_v23 = vld [vmem:[%s14811_s5 + $0xa0] sm:$0xff] }
  0xca   : > { %2843 = vmatprep.subr.bf16.mxu1 %v9359_v17  ;;  %2491 = vmatpush1.bf16.msra.mxu0 %v9356_v13  ;;  %v9372_v24 = vcombine.low %v2080_v22, %v2084_v23  ;;  %v9373_v25 = vcombine.high %v2080_v22, %v2084_v23  ;;  %v2088_v26 = vld [vmem:[%s14811_s5 + $0xc0] sm:$0xff] }
  0xcb   : > { %2492 = vmatprep.subr.bf16.mxu0 %v9365_v21  ;;  %v2092_v27 = vld [vmem:[%s14811_s5 + $0xe0] sm:$0xff] }
  0xcc   : > { %v9380_v28 = vcombine.low %v2088_v26, %v2092_v27  ;;  %v9381_v29 = vcombine.high %v2088_v26, %v2092_v27  ;;  %v2096_v30 = vld [vmem:[%s14811_s5 + $0x100] sm:$0xff]  ;;  %v2097_v27 = vld [vmem:[%s14811_s5 + $0x108] sm:$0xff] }
  0xcd   : > { %v2100_v31 = vld [vmem:[%s14811_s5 + $0x120] sm:$0xff] }
  0xce   : > { %2493 = vmatpush1.bf16.msra.mxu0 %v9364_v20  ;;  %v9388_v32 = vcombine.low %v2096_v30, %v2100_v31  ;;  %v9389_v33 = vcombine.high %v2096_v30, %v2100_v31  ;;  %v2104_v34 = vld [vmem:[%s14811_s5 + $0x140] sm:$0xff]  ;;  %v2093_v20 = vld [vmem:[%s14811_s5 + $0xe8] sm:$0xff] }
  0xcf   : > { %2494 = vmatprep.subr.bf16.mxu0 %v9373_v25  ;;  %v2108_v35 = vld [vmem:[%s14811_s5 + $0x160] sm:$0xff] }
  0xd0   : > { %9865 = vmatmul.mubr.msk.bf16.gmra.mrb[8].mxu0 %vm1054_vm2, %v10134_v43  ;;  %v9396_v36 = vcombine.low %v2104_v34, %v2108_v35  ;;  %v9397_v37 = vcombine.high %v2104_v34, %v2108_v35  ;;  %v2112_v38 = vld [vmem:[%s14811_s5 + $0x180] sm:$0xff]  ;;  %v9382_v34 = vcombine.low %v2089_v19, %v2093_v20 }
  0xd1   : > { %9868 = vmatprep.mubr.msk.bf16.mxu0 %vm1054_vm2, %v10135_v44  ;;  %v2116_v39 = vld [vmem:[%s14811_s5 + $0x1a0] sm:$0xff] }
  0xd2   : > { %2495 = vmatpush1.bf16.msra.mxu0 %v9372_v24  ;;  %v9404_v40 = vcombine.low %v2112_v38, %v2116_v39  ;;  %v9405_v41 = vcombine.high %v2112_v38, %v2116_v39  ;;  %v11309_v42 = vld [vmem:[#allocation4] ss:$0 sm:$0xff]  ;;  %v2105_v38 = vld [vmem:[%s14811_s5 + $0x148] sm:$0xff] }
  0xd3   : > { %2496 = vmatprep.subr.bf16.mxu0 %v9381_v29  ;;  %v2120_v44 = vld [vmem:[%s14811_s5 + $0x1c0] sm:$0xff]  ;;  %v2109_v39 = vld [vmem:[%s14811_s5 + $0x168] sm:$0xff] }
  0xd6   : > { %2497 = vmatpush1.bf16.msra.mxu0 %v9380_v28  ;;  %v2101_v28 = vld [vmem:[%s14811_s5 + $0x128] sm:$0xff] }
  0xd7   : > { %2498 = vmatprep.subr.bf16.mxu0 %v9389_v33 }
  0xd8   : > { %9869 = vmatmul.mubr.msk.bf16.gmra.mrb[12].mxu0 %vm1054_vm2, %v10136_v45  ;;  %v2124_v45 = vld [vmem:[%s14811_s5 + $0x1e0] sm:$0xff] }
  0xd9   : > { %9872 = vmatprep.mubr.msk.bf16.mxu0 %vm1054_vm2, %v10137_v46  ;;  %v9412_v48 = vcombine.low %v2120_v44, %v2124_v45 }
  0xda   : > { %2499 = vmatpush1.bf16.msra.mxu0 %v9388_v32 }
  0xdb   : > { %2500 = vmatprep.subr.bf16.mxu0 %v9397_v37 }
  0xde   : > { %2501 = vmatpush1.bf16.msra.mxu0 %v9396_v36  ;;  %v9391_v36 = vcombine.high %v2097_v27, %v2101_v28 }
  0xdf   : > { %2502 = vmatprep.subr.bf16.mxu0 %v9405_v41 }
  0xe0   : > { %9873 = vmatmul.mubr.msk.bf16.gmra.mrb[16].mxu0 %vm1054_vm2, %v10138_v49  ;;  %v9413_v49 = vcombine.high %v2120_v44, %v2124_v45  ;;  %v9390_v44 = vcombine.low %v2097_v27, %v2101_v28 }
  0xe1   : > { %9876 = vmatprep.mubr.msk.bf16.mxu0 %vm1054_vm2, %v10139_v50 }
  0xe2   : > { %2503 = vmatpush1.bf16.msra.mxu0 %v9404_v40 }
  0xe3   : > { %2504 = vmatprep.subr.bf16.mxu0 %v9413_v49 }
  0xe6   : > { %2505 = vmatpush1.bf16.msra.mxu0 %v9412_v48 }
  0xe8   : > { %9877 = vmatmul.mubr.msk.bf16.gmra.mrb[20].mxu0 %vm1054_vm2, %v10140_v51 }
  0xe9   : > { %9880 = vmatprep.mubr.msk.bf16.mxu0 %vm1054_vm2, %v10141_v52 }
  0xf0   : > { %9881 = vmatmul.mubr.msk.bf16.gmra.mrb[24].mxu0 %vm1054_vm2, %v10142_v53 }
  0xf1   : > { %9884 = vmatprep.mubr.msk.bf16.mxu0 %vm1054_vm2, %v10143_v54 }
  0xf8   : > { %9885 = vmatmul.mubr.msk.bf16.gmra.mrb[28].mxu0 %vm1054_vm2, %v10144_v55 }
  0xf9   : > { %9888 = vmatprep.mubr.msk.bf16.mxu0 %vm1054_vm2, %v10145_v56 }
 0x100   : > { %9889 = vmatmul.mubr.msk.bf16.gmra.mrb[32].mxu0 %vm1054_vm2, %v10146_v57 }
 0x101   : > { %9892 = vmatprep.mubr.msk.bf16.mxu0 %vm1054_vm2, %v10147_v58 }
 0x108   : > { %9893 = vmatmul.mubr.msk.bf16.gmra.mrb[36].mxu0 %vm1054_vm2, %v10148_v59  ;;  %v2073_v59 = vld [vmem:[%s14811_s5 + $0x48] sm:$0xff] }
 0x109   : > { %9896 = vmatprep.mubr.msk.bf16.mxu0 %vm1054_vm2, %v10149_v60  ;;  %v2077_v60 = vld [vmem:[%s14811_s5 + $0x68] sm:$0xff] }
 0x10a   : > { %v9367_v2 = vcombine.high %v2073_v59, %v2077_v60  ;;  %v9366_v13 = vcombine.low %v2073_v59, %v2077_v60 }
 0x110   : > { %9897 = vmatmul.mubr.msk.bf16.gmra.mrb[40].mxu0 %vm1054_vm2, %v10150_v61 }
 0x111   : > { %9900 = vmatprep.mubr.msk.bf16.mxu0 %vm1054_vm2, %v10151_v62 }
 0x118   : > { %9901 = vmatmul.mubr.msk.bf16.gmra.mrb[44].mxu0 %vm1054_vm2, %v10152_v63 }
 0x119   : > { %9904 = vmatprep.mubr.msk.bf16.mxu0 %vm1054_vm2, %v10153_v1 }
 0x120   : > { %9905 = vmatmul.mubr.msk.bf16.gmra.mrb[48].mxu0 %vm1054_vm2, %v10154_v3 }
 0x121   : > { %9908 = vmatprep.mubr.msk.bf16.mxu0 %vm1054_vm2, %v10155_v4 }
 0x128   : > { %9909 = vmatmul.mubr.msk.bf16.gmra.mrb[52].mxu0 %vm1054_vm2, %v10156_v5  ;;  %v2081_v5 = vld [vmem:[%s14811_s5 + $0x88] sm:$0xff] }
 0x129   : > { %9912 = vmatprep.mubr.msk.bf16.mxu0 %vm1054_vm2, %v10157_v6  ;;  %v2085_v6 = vld [vmem:[%s14811_s5 + $0xa8] sm:$0xff] }
 0x12a   : > { %v9375_v17 = vcombine.high %v2081_v5, %v2085_v6  ;;  %v9374_v24 = vcombine.low %v2081_v5, %v2085_v6 }
 0x130   : > { %9913 = vmatmul.mubr.msk.bf16.gmra.mrb[56].mxu0 %vm1054_vm2, %v10158_v7 }
 0x131   : > { %9916 = vmatprep.mubr.msk.bf16.mxu0 %vm1054_vm2, %v10159_v8 }
 0x138   : > { %9917 = vmatmul.mubr.msk.bf16.gmra.mrb[60].mxu0 %vm1054_vm2, %v10160_v9 }
 0x193   : > { %v9858_v43 = vpop.f32.mrb[0].mxu0 }
 0x194   : > { %v1201_v46 = vadd.f32 %v9858_v43, %v11309_v42  ;;  %v1192_v47 = vpop.f32.mrb[1].mxu0 }
 0x195   : > { %v1193_v50 = vadd.f32 %v11309_v42, %v1192_v47  ;;  %v9859_v51 = vpop.f32.mrb[2].mxu0  ;;  %v9399_v47 = vcombine.high %v2105_v38, %v2109_v39 }
 0x196   : > { %v1204_v52 = vadd.f32 %v9859_v51, %v11309_v42  ;;  %v1195_v53 = vpop.f32.mrb[3].mxu0  ;;  %v1449_v55 = vmax.f32 %v1201_v46, 0.0  ;;  %v2117_v51 = vld [vmem:[%s14811_s5 + $0x1a8] sm:$0xff] }
 0x197   : > { %v1196_v54 = vadd.f32 %v11309_v42, %v1195_v53  ;;  %v1447_v57 = vmax.f32 %v1193_v50, 0.0  ;;  %v2113_v50 = vld [vmem:[%s14811_s5 + $0x188] sm:$0xff] }
 0x198   : > { %v1450_v56 = vmax.f32 %v1204_v52, 0.0  ;;  %v9407_v59 = vcombine.high %v2113_v50, %v2117_v51 }
 0x199   : > { %v1448_v58 = vmax.f32 %v1196_v54, 0.0 }
 0x19a   : > { %v1512_v61 = vpack.c.bf16 %v1450_v56, %v1449_v55 }
 0x19b   : > { %v9862_v62 = vpop.f32.mrb[4].mxu0  ;;  %v1511_v63 = vpack.c.bf16 %v1448_v58, %v1447_v57  ;;  %v9398_v57 = vcombine.low %v2105_v38, %v2109_v39 }
 0x19c   : > { %v1217_v0 = vadd.f32 %v9862_v62, %v11309_v42  ;;  %v1208_v1 = vpop.f32.mrb[5].mxu0  ;;  %v2125_v62 = vld [vmem:[%s14811_s5 + $0x1e8] sm:$0xff] }
 0x19d   : > { %v1209_v3 = vadd.f32 %v11309_v42, %v1208_v1  ;;  %9928 = vmatprep.mubr.msk.bf16.mxu1 %vm1582_vm3, %v1511_v63  ;;  %v9863_v4 = vpop.f32.mrb[6].mxu0 }
 0x19e   : > { %v1453_v7 = vmax.f32 %v1217_v0, 0.0  ;;  %v1220_v8 = vadd.f32 %v9863_v4, %v11309_v42  ;;  %9929 = vmatmul.mubr.msk.bf16.vlgmr.msra.gmra.mrb[0].mxu1 %vm1582_vm3, %v1512_v61  ;;  %v1211_v9 = vpop.f32.mrb[7].mxu0  ;;  %v2121_v61 = vld [vmem:[%s14811_s5 + $0x1c8] sm:$0xff] }
 0x19f   : > { %v1451_v10 = vmax.f32 %v1209_v3, 0.0  ;;  %v1212_v11 = vadd.f32 %v11309_v42, %v1211_v9  ;;  %2844 = vmatpush1.bf16.msra.mxu1 %v9358_v16  ;;  %v9383_v16 = vcombine.high %v2089_v19, %v2093_v20  ;;  %v9415_v5 = vcombine.high %v2121_v61, %v2125_v62 }
 0x1a0   : > { %v1454_v14 = vmax.f32 %v1220_v8, 0.0  ;;  %2845 = vmatprep.subr.bf16.mxu1 %v9367_v2  ;;  %v9406_v2 = vcombine.low %v2113_v50, %v2117_v51 }
 0x1a1   : > { %v1452_v18 = vmax.f32 %v1212_v11, 0.0 }
 0x1a2   : > { %v1514_v21 = vpack.c.bf16 %v1454_v14, %v1453_v7  ;;  %v9414_v14 = vcombine.low %v2121_v61, %v2125_v62 }
 0x1a3   : > { %v1513_v22 = vpack.c.bf16 %v1452_v18, %v1451_v10  ;;  %v9866_v23 = vpop.f32.mrb[8].mxu0  ;;  %2846 = vmatpush1.bf16.msra.mxu1 %v9366_v13 }
 0x1a4   : > { %v1233_v12 = vadd.f32 %v9866_v23, %v11309_v42  ;;  %v1224_v15 = vpop.f32.mrb[9].mxu0  ;;  %2847 = vmatprep.subr.bf16.mxu1 %v9375_v17 }
 0x1a5   : > { %9932 = vmatprep.mubr.msk.bf16.mxu1 %vm1582_vm3, %v1513_v22  ;;  %v1225_v25 = vadd.f32 %v11309_v42, %v1224_v15  ;;  %v9867_v26 = vpop.f32.mrb[10].mxu0 }
 0x1a6   : > { %9933 = vmatmul.mubr.msk.bf16.gmra.mrb[4].mxu1 %vm1582_vm3, %v1514_v21  ;;  %v1457_v29 = vmax.f32 %v1233_v12, 0.0  ;;  %v1236_v30 = vadd.f32 %v9867_v26, %v11309_v42  ;;  %v1227_v31 = vpop.f32.mrb[11].mxu0 }
 0x1a7   : > { %v1455_v32 = vmax.f32 %v1225_v25, 0.0  ;;  %v1228_v33 = vadd.f32 %v11309_v42, %v1227_v31  ;;  %2848 = vmatpush1.bf16.msra.mxu1 %v9374_v24 }
 0x1a8   : > { %v1458_v35 = vmax.f32 %v1236_v30, 0.0  ;;  %2849 = vmatprep.subr.bf16.mxu1 %v9383_v16 }
 0x1a9   : > { %v1456_v37 = vmax.f32 %v1228_v33, 0.0 }
 0x1aa   : > { %v1516_v40 = vpack.c.bf16 %v1458_v35, %v1457_v29 }
 0x1ab   : > { %v1515_v41 = vpack.c.bf16 %v1456_v37, %v1455_v32  ;;  %v9870_v43 = vpop.f32.mrb[12].mxu0  ;;  %2850 = vmatpush1.bf16.msra.mxu1 %v9382_v34 }
 0x1ac   : > { %v1249_v45 = vadd.f32 %v9870_v43, %v11309_v42  ;;  %v1240_v46 = vpop.f32.mrb[13].mxu0  ;;  %2851 = vmatprep.subr.bf16.mxu1 %v9391_v36 }
 0x1ad   : > { %9936 = vmatprep.mubr.msk.bf16.mxu1 %vm1582_vm3, %v1515_v41  ;;  %v1241_v48 = vadd.f32 %v11309_v42, %v1240_v46  ;;  %v9871_v49 = vpop.f32.mrb[14].mxu0 }
 0x1ae   : > { %9937 = vmatmul.mubr.msk.bf16.gmra.mrb[8].mxu1 %vm1582_vm3, %v1516_v40  ;;  %v1461_v52 = vmax.f32 %v1249_v45, 0.0  ;;  %v1252_v53 = vadd.f32 %v9871_v49, %v11309_v42  ;;  %v1243_v54 = vpop.f32.mrb[15].mxu0 }
 0x1af   : > { %v1459_v55 = vmax.f32 %v1241_v48, 0.0  ;;  %v1244_v56 = vadd.f32 %v11309_v42, %v1243_v54  ;;  %2852 = vmatpush1.bf16.msra.mxu1 %v9390_v44 }
 0x1b0   : > { %v1462_v58 = vmax.f32 %v1252_v53, 0.0  ;;  %2853 = vmatprep.subr.bf16.mxu1 %v9399_v47 }
 0x1b1   : > { %v1460_v60 = vmax.f32 %v1244_v56, 0.0 }
 0x1b2   : > { %v1518_v63 = vpack.c.bf16 %v1462_v58, %v1461_v52 }
 0x1b3   : > { %v1517_v0 = vpack.c.bf16 %v1460_v60, %v1459_v55  ;;  %v9874_v1 = vpop.f32.mrb[16].mxu0  ;;  %2854 = vmatpush1.bf16.msra.mxu1 %v9398_v57 }
 0x1b4   : > { %v1265_v3 = vadd.f32 %v9874_v1, %v11309_v42  ;;  %v1256_v4 = vpop.f32.mrb[17].mxu0  ;;  %2855 = vmatprep.subr.bf16.mxu1 %v9407_v59 }
 0x1b5   : > { %9940 = vmatprep.mubr.msk.bf16.mxu1 %vm1582_vm3, %v1517_v0  ;;  %v1257_v6 = vadd.f32 %v11309_v42, %v1256_v4  ;;  %v9875_v7 = vpop.f32.mrb[18].mxu0 }
 0x1b6   : > { %9941 = vmatmul.mubr.msk.bf16.gmra.mrb[12].mxu1 %vm1582_vm3, %v1518_v63  ;;  %v1465_v8 = vmax.f32 %v1265_v3, 0.0  ;;  %v1268_v9 = vadd.f32 %v9875_v7, %v11309_v42  ;;  %v1259_v10 = vpop.f32.mrb[19].mxu0 }
 0x1b7   : > { %v1463_v11 = vmax.f32 %v1257_v6, 0.0  ;;  %v1260_v13 = vadd.f32 %v11309_v42, %v1259_v10  ;;  %2856 = vmatpush1.bf16.msra.mxu1 %v9406_v2 }
 0x1b8   : > { %v1466_v17 = vmax.f32 %v1268_v9, 0.0  ;;  %2857 = vmatprep.subr.bf16.mxu1 %v9415_v5 }
 0x1b9   : > { %v1464_v18 = vmax.f32 %v1260_v13, 0.0 }
 0x1ba   : > { %v1520_v19 = vpack.c.bf16 %v1466_v17, %v1465_v8 }
 0x1bb   : > { %v1519_v20 = vpack.c.bf16 %v1464_v18, %v1463_v11  ;;  %v9878_v21 = vpop.f32.mrb[20].mxu0  ;;  %2858 = vmatpush1.bf16.msra.mxu1 %v9414_v14 }
 0x1bc   : > { %v1281_v22 = vadd.f32 %v9878_v21, %v11309_v42  ;;  %v1272_v23 = vpop.f32.mrb[21].mxu0 }
 0x1bd   : > { %9944 = vmatprep.mubr.msk.bf16.mxu1 %vm1582_vm3, %v1519_v20  ;;  %v1273_v24 = vadd.f32 %v11309_v42, %v1272_v23  ;;  %v9879_v12 = vpop.f32.mrb[22].mxu0 }
 0x1be   : > { %9945 = vmatmul.mubr.msk.bf16.gmra.mrb[16].mxu1 %vm1582_vm3, %v1520_v19  ;;  %v1469_v15 = vmax.f32 %v1281_v22, 0.0  ;;  %v1284_v16 = vadd.f32 %v9879_v12, %v11309_v42  ;;  %v1275_v25 = vpop.f32.mrb[23].mxu0 }
 0x1bf   : > { %v1467_v26 = vmax.f32 %v1273_v24, 0.0  ;;  %v1276_v27 = vadd.f32 %v11309_v42, %v1275_v25 }
 0x1c0   : > { %v1470_v28 = vmax.f32 %v1284_v16, 0.0 }
 0x1c1   : > { %v1468_v29 = vmax.f32 %v1276_v27, 0.0 }
 0x1c2   : > { %v1522_v30 = vpack.c.bf16 %v1470_v28, %v1469_v15 }
 0x1c3   : > { %v1521_v31 = vpack.c.bf16 %v1468_v29, %v1467_v26  ;;  %v9882_v32 = vpop.f32.mrb[24].mxu0 }
 0x1c4   : > { %v1297_v33 = vadd.f32 %v9882_v32, %v11309_v42  ;;  %v1288_v34 = vpop.f32.mrb[25].mxu0 }
 0x1c5   : > { %9948 = vmatprep.mubr.msk.bf16.mxu1 %vm1582_vm3, %v1521_v31  ;;  %v1289_v35 = vadd.f32 %v11309_v42, %v1288_v34  ;;  %v9883_v36 = vpop.f32.mrb[26].mxu0 }
 0x1c6   : > { %9949 = vmatmul.mubr.msk.bf16.gmra.mrb[20].mxu1 %vm1582_vm3, %v1522_v30  ;;  %v1473_v37 = vmax.f32 %v1297_v33, 0.0  ;;  %v1300_v38 = vadd.f32 %v9883_v36, %v11309_v42  ;;  %v1291_v39 = vpop.f32.mrb[27].mxu0 }
 0x1c7   : > { %v1471_v40 = vmax.f32 %v1289_v35, 0.0  ;;  %v1292_v41 = vadd.f32 %v11309_v42, %v1291_v39 }
 0x1c8   : > { %v1474_v43 = vmax.f32 %v1300_v38, 0.0 }
 0x1c9   : > { %v1472_v44 = vmax.f32 %v1292_v41, 0.0 }
 0x1ca   : > { %v1524_v45 = vpack.c.bf16 %v1474_v43, %v1473_v37 }
 0x1cb   : > { %v1523_v46 = vpack.c.bf16 %v1472_v44, %v1471_v40  ;;  %v9886_v47 = vpop.f32.mrb[28].mxu0 }
 0x1cc   : > { %v1313_v48 = vadd.f32 %v9886_v47, %v11309_v42  ;;  %v1304_v49 = vpop.f32.mrb[29].mxu0 }
 0x1cd   : > { %9952 = vmatprep.mubr.msk.bf16.mxu1 %vm1582_vm3, %v1523_v46  ;;  %v1305_v50 = vadd.f32 %v11309_v42, %v1304_v49  ;;  %v9887_v51 = vpop.f32.mrb[30].mxu0 }
 0x1ce   : > { %9953 = vmatmul.mubr.msk.bf16.gmra.mrb[24].mxu1 %vm1582_vm3, %v1524_v45  ;;  %v1477_v52 = vmax.f32 %v1313_v48, 0.0  ;;  %v1316_v53 = vadd.f32 %v9887_v51, %v11309_v42  ;;  %v1307_v54 = vpop.f32.mrb[31].mxu0 }
 0x1cf   : > { %v1475_v55 = vmax.f32 %v1305_v50, 0.0  ;;  %v1308_v56 = vadd.f32 %v11309_v42, %v1307_v54 }
 0x1d0   : > { %v1478_v57 = vmax.f32 %v1316_v53, 0.0 }
 0x1d1   : > { %v1476_v58 = vmax.f32 %v1308_v56, 0.0 }
 0x1d2   : > { %v1526_v59 = vpack.c.bf16 %v1478_v57, %v1477_v52 }
 0x1d3   : > { %v1525_v60 = vpack.c.bf16 %v1476_v58, %v1475_v55  ;;  %v9890_v61 = vpop.f32.mrb[32].mxu0 }
 0x1d4   : > { %v1329_v62 = vadd.f32 %v9890_v61, %v11309_v42  ;;  %v1320_v63 = vpop.f32.mrb[33].mxu0 }
 0x1d5   : > { %9956 = vmatprep.mubr.msk.bf16.mxu1 %vm1582_vm3, %v1525_v60  ;;  %v1321_v0 = vadd.f32 %v11309_v42, %v1320_v63  ;;  %v9891_v1 = vpop.f32.mrb[34].mxu0 }
 0x1d6   : > { %9957 = vmatmul.mubr.msk.bf16.gmra.mrb[28].mxu1 %vm1582_vm3, %v1526_v59  ;;  %v1481_v2 = vmax.f32 %v1329_v62, 0.0  ;;  %v1332_v3 = vadd.f32 %v9891_v1, %v11309_v42  ;;  %v1323_v4 = vpop.f32.mrb[35].mxu0 }
 0x1d7   : > { %v1479_v5 = vmax.f32 %v1321_v0, 0.0  ;;  %v1324_v6 = vadd.f32 %v11309_v42, %v1323_v4 }
 0x1d8   : > { %v1482_v7 = vmax.f32 %v1332_v3, 0.0  ;;  %v14836_v3 = vmov 0  }
 0x1d9   : > { %v1480_v8 = vmax.f32 %v1324_v6, 0.0  ;;  %2522 = vmatprep.mubr.bf16.mxu0 %v14836_v3 }
 0x1da   : > { %v1528_v9 = vpack.c.bf16 %v1482_v7, %v1481_v2 }
 0x1db   : > { %v1527_v10 = vpack.c.bf16 %v1480_v8, %v1479_v5  ;;  %v9894_v11 = vpop.f32.mrb[36].mxu0  ;;  %v11443_v8 = vld [vmem:[%s14811_s5 + $0x10] sm:$0xff] }
 0x1dc   : > { %v1345_v13 = vadd.f32 %v9894_v11, %v11309_v42  ;;  %v1336_v14 = vpop.f32.mrb[37].mxu0 }
 0x1dd   : > { %9960 = vmatprep.mubr.msk.bf16.mxu1 %vm1582_vm3, %v1527_v10  ;;  %v1337_v17 = vadd.f32 %v11309_v42, %v1336_v14  ;;  %v9895_v18 = vpop.f32.mrb[38].mxu0  ;;  %v11453_v10 = vld [vmem:[%s14811_s5 + $0x18] sm:$0xff] }
 0x1de   : > { %9961 = vmatmul.mubr.msk.bf16.gmra.mrb[32].mxu1 %vm1582_vm3, %v1528_v9  ;;  %v1485_v19 = vmax.f32 %v1345_v13, 0.0  ;;  %v1348_v20 = vadd.f32 %v9895_v18, %v11309_v42  ;;  %v1339_v21 = vpop.f32.mrb[39].mxu0  ;;  %v11448_v9 = vld [vmem:[%s14811_s5 + $0x30] sm:$0xff]  ;;  %v11464_v18 = vld [vmem:[%s14811_s5 + $0x38] sm:$0xff] }
 0x1df   : > { %v1483_v22 = vmax.f32 %v1337_v17, 0.0  ;;  %v1340_v23 = vadd.f32 %v11309_v42, %v1339_v21  ;;  %v9360_v14 = vcombine.low %v11443_v8, %v11448_v9  ;;  %v9361_v17 = vcombine.high %v11443_v8, %v11448_v9  ;;  %v2090_v9 = vld [vmem:[%s14811_s5 + $0xd0] sm:$0xff] }
 0x1e0   : > { %v1486_v24 = vmax.f32 %v1348_v20, 0.0 }
 0x1e1   : > { %v1484_v12 = vmax.f32 %v1340_v23, 0.0  ;;  %v9363_v23 = vcombine.high %v11453_v10, %v11464_v18  ;;  %3196 = vmatprep.subr.bf16.mxu0 %v9361_v17 }
 0x1e2   : > { %v1530_v15 = vpack.c.bf16 %v1486_v24, %v1485_v19 }
 0x1e3   : > { %v1529_v16 = vpack.c.bf16 %v1484_v12, %v1483_v22  ;;  %v9898_v25 = vpop.f32.mrb[40].mxu0  ;;  %v9362_v22 = vcombine.low %v11453_v10, %v11464_v18  ;;  %3549 = vmatprep.subr.bf16.mxu1 %v9363_v23  ;;  %v2091_v18 = vld [vmem:[%s14811_s5 + $0xd8] sm:$0xff] }
 0x1e4   : > { %v1361_v26 = vadd.f32 %v9898_v25, %v11309_v42  ;;  %v1352_v27 = vpop.f32.mrb[41].mxu0 }
 0x1e5   : > { %9964 = vmatprep.mubr.msk.bf16.mxu1 %vm1582_vm3, %v1529_v16  ;;  %v1353_v28 = vadd.f32 %v11309_v42, %v1352_v27  ;;  %v9899_v29 = vpop.f32.mrb[42].mxu0 }
 0x1e6   : > { %9965 = vmatmul.mubr.msk.bf16.gmra.mrb[36].mxu1 %vm1582_vm3, %v1530_v15  ;;  %v1489_v30 = vmax.f32 %v1361_v26, 0.0  ;;  %v1364_v31 = vadd.f32 %v9899_v29, %v11309_v42  ;;  %v1355_v32 = vpop.f32.mrb[43].mxu0 }
 0x1e7   : > { %v1487_v33 = vmax.f32 %v1353_v28, 0.0  ;;  %v1356_v34 = vadd.f32 %v11309_v42, %v1355_v32 }
 0x1e8   : > { %v1490_v35 = vmax.f32 %v1364_v31, 0.0 }
 0x1e9   : > { %v1488_v36 = vmax.f32 %v1356_v34, 0.0 }
 0x1ea   : > { %v1532_v37 = vpack.c.bf16 %v1490_v35, %v1489_v30 }
 0x1eb   : > { %v1531_v38 = vpack.c.bf16 %v1488_v36, %v1487_v33  ;;  %v9902_v39 = vpop.f32.mrb[44].mxu0 }
 0x1ec   : > { %v1377_v40 = vadd.f32 %v9902_v39, %v11309_v42  ;;  %v1368_v41 = vpop.f32.mrb[45].mxu0 }
 0x1ed   : > { %9968 = vmatprep.mubr.msk.bf16.mxu1 %vm1582_vm3, %v1531_v38  ;;  %v1369_v43 = vadd.f32 %v11309_v42, %v1368_v41  ;;  %v9903_v44 = vpop.f32.mrb[46].mxu0 }
 0x1ee   : > { %9969 = vmatmul.mubr.msk.bf16.gmra.mrb[40].mxu1 %vm1582_vm3, %v1532_v37  ;;  %v1493_v45 = vmax.f32 %v1377_v40, 0.0  ;;  %v1380_v46 = vadd.f32 %v9903_v44, %v11309_v42  ;;  %v1371_v47 = vpop.f32.mrb[47].mxu0 }
 0x1ef   : > { %v1491_v48 = vmax.f32 %v1369_v43, 0.0  ;;  %v1372_v49 = vadd.f32 %v11309_v42, %v1371_v47 }
 0x1f0   : > { %v1494_v50 = vmax.f32 %v1380_v46, 0.0 }
 0x1f1   : > { %v1492_v51 = vmax.f32 %v1372_v49, 0.0 }
 0x1f2   : > { %v1534_v52 = vpack.c.bf16 %v1494_v50, %v1493_v45 }
 0x1f3   : > { %v1533_v53 = vpack.c.bf16 %v1492_v51, %v1491_v48  ;;  %v9906_v54 = vpop.f32.mrb[48].mxu0 }
 0x1f4   : > { %v1393_v55 = vadd.f32 %v9906_v54, %v11309_v42  ;;  %v1384_v56 = vpop.f32.mrb[49].mxu0 }
 0x1f5   : > { %9972 = vmatprep.mubr.msk.bf16.mxu1 %vm1582_vm3, %v1533_v53  ;;  %v1385_v57 = vadd.f32 %v11309_v42, %v1384_v56  ;;  %v9907_v58 = vpop.f32.mrb[50].mxu0  ;;  %v11488_v56 = vld [vmem:[#allocation7] ss:$0 sm:$0xff] }
 0x1f6   : > { %9973 = vmatmul.mubr.msk.bf16.gmra.mrb[44].mxu1 %vm1582_vm3, %v1534_v52  ;;  %v1497_v59 = vmax.f32 %v1393_v55, 0.0  ;;  %v1396_v60 = vadd.f32 %v9907_v58, %v11309_v42  ;;  %v1387_v61 = vpop.f32.mrb[51].mxu0 }
 0x1f7   : > { %v1495_v62 = vmax.f32 %v1385_v57, 0.0  ;;  %v1388_v63 = vadd.f32 %v11309_v42, %v1387_v61 }
 0x1f8   : > { %v1498_v0 = vmax.f32 %v1396_v60, 0.0 }
 0x1f9   : > { %v1496_v1 = vmax.f32 %v1388_v63, 0.0 }
 0x1fa   : > { %v1536_v2 = vpack.c.bf16 %v1498_v0, %v1497_v59 }
 0x1fb   : > { %v1535_v4 = vpack.c.bf16 %v1496_v1, %v1495_v62  ;;  %v9910_v5 = vpop.f32.mrb[52].mxu0 }
 0x1fc   : > { %v1409_v6 = vadd.f32 %v9910_v5, %v11309_v42  ;;  %v1400_v7 = vpop.f32.mrb[53].mxu0 }
 0x1fd   : > { %v1401_v11 = vadd.f32 %v11309_v42, %v1400_v7  ;;  %v9911_v13 = vpop.f32.mrb[54].mxu0  ;;  %9976 = vmatprep.mubr.msk.bf16.mxu1 %vm1582_vm3, %v1535_v4  ;;  %v2075_v7 = vld [vmem:[%s14811_s5 + $0x58] sm:$0xff] }
 0x1fe   : > { %v1501_v19 = vmax.f32 %v1409_v6, 0.0  ;;  %v1412_v20 = vadd.f32 %v9911_v13, %v11309_v42  ;;  %v1403_v21 = vpop.f32.mrb[55].mxu0  ;;  %9977 = vmatmul.mubr.msk.bf16.gmra.mrb[48].mxu1 %vm1582_vm3, %v1536_v2  ;;  %v2074_v2 = vld [vmem:[%s14811_s5 + $0x50] sm:$0xff] }
 0x1ff   : > { %v1499_v24 = vmax.f32 %v1401_v11, 0.0  ;;  %v1404_v12 = vadd.f32 %v11309_v42, %v1403_v21  ;;  %v2078_v6 = vld [vmem:[%s14811_s5 + $0x70] sm:$0xff]  ;;  %v2079_v11 = vld [vmem:[%s14811_s5 + $0x78] sm:$0xff] }
 0x200   : > { %v1502_v15 = vmax.f32 %v1412_v20, 0.0  ;;  %v2082_v20 = vld [vmem:[%s14811_s5 + $0x90] sm:$0xff] }
 0x201   : > { %v1500_v16 = vmax.f32 %v1404_v12, 0.0  ;;  %v9371_v12 = vcombine.high %v2075_v7, %v2079_v11 }
 0x202   : > { %v1538_v25 = vpack.c.bf16 %v1502_v15, %v1501_v19  ;;  %v2086_v15 = vld [vmem:[%s14811_s5 + $0xb0] sm:$0xff] }
 0x203   : > { %v1537_v26 = vpack.c.bf16 %v1500_v16, %v1499_v24  ;;  %v9914_v27 = vpop.f32.mrb[56].mxu0  ;;  %v9369_v24 = vcombine.high %v2074_v2, %v2078_v6  ;;  %v2083_v16 = vld [vmem:[%s14811_s5 + $0x98] sm:$0xff] }
 0x204   : > { %v1425_v28 = vadd.f32 %v9914_v27, %v11309_v42  ;;  %v1416_v29 = vpop.f32.mrb[57].mxu0 }
 0x205   : > { %v1417_v30 = vadd.f32 %v11309_v42, %v1416_v29  ;;  %v9915_v31 = vpop.f32.mrb[58].mxu0  ;;  %9980 = vmatprep.mubr.msk.bf16.mxu1 %vm1582_vm3, %v1537_v26 }
 0x206   : > { %v1505_v32 = vmax.f32 %v1425_v28, 0.0  ;;  %v1428_v33 = vadd.f32 %v9915_v31, %v11309_v42  ;;  %v1419_v34 = vpop.f32.mrb[59].mxu0  ;;  %9981 = vmatmul.mubr.msk.bf16.gmra.mrb[52].mxu1 %vm1582_vm3, %v1538_v25  ;;  %v2087_v25 = vld [vmem:[%s14811_s5 + $0xb8] sm:$0xff]  ;;  %v9368_v31 = vcombine.low %v2074_v2, %v2078_v6 }
 0x207   : > { %v1503_v35 = vmax.f32 %v1417_v30, 0.0  ;;  %v1420_v36 = vadd.f32 %v11309_v42, %v1419_v34 }
 0x208   : > { %v1506_v37 = vmax.f32 %v1428_v33, 0.0 }
 0x209   : > { %v1504_v38 = vmax.f32 %v1420_v36, 0.0  ;;  %v9379_v36 = vcombine.high %v2083_v16, %v2087_v25 }
 0x20a   : > { %v1540_v39 = vpack.c.bf16 %v1506_v37, %v1505_v32  ;;  %v9370_v32 = vcombine.low %v2075_v7, %v2079_v11 }
 0x20b   : > { %v1539_v40 = vpack.c.bf16 %v1504_v38, %v1503_v35  ;;  %v9918_v41 = vpop.f32.mrb[60].mxu0  ;;  %v9377_v35 = vcombine.high %v2082_v20, %v2086_v15 }
 0x20c   : > { %v1441_v43 = vadd.f32 %v9918_v41, %v11309_v42  ;;  %v1432_v44 = vpop.f32.mrb[61].mxu0  ;;  %v9378_v41 = vcombine.low %v2083_v16, %v2087_v25 }
 0x20d   : > { %v1433_v45 = vadd.f32 %v11309_v42, %v1432_v44  ;;  %v9919_v46 = vpop.f32.mrb[62].mxu0  ;;  %9984 = vmatprep.mubr.msk.bf16.mxu1 %vm1582_vm3, %v1539_v40  ;;  %v9376_v40 = vcombine.low %v2082_v20, %v2086_v15 }
 0x20e   : > { %v1509_v47 = vmax.f32 %v1441_v43, 0.0  ;;  %v1444_v48 = vadd.f32 %v9919_v46, %v11309_v42  ;;  %v1435_v49 = vpop.f32.mrb[63].mxu0  ;;  %9985 = vmatmul.mubr.msk.bf16.gmra.mrb[56].mxu1 %vm1582_vm3, %v1540_v39 }
 0x20f   : > { %v1507_v50 = vmax.f32 %v1433_v45, 0.0  ;;  %v1436_v51 = vadd.f32 %v11309_v42, %v1435_v49 }
 0x210   : > { %v1510_v52 = vmax.f32 %v1444_v48, 0.0 }
 0x211   : > { %v1508_v53 = vmax.f32 %v1436_v51, 0.0  ;;  %v2099_v51 = vld [vmem:[%s14811_s5 + $0x118] sm:$0xff] }
 0x212   : > { %v1542_v54 = vpack.c.bf16 %v1510_v52, %v1509_v47  ;;  %v2098_v47 = vld [vmem:[%s14811_s5 + $0x110] sm:$0xff]  ;;  %v2103_v52 = vld [vmem:[%s14811_s5 + $0x138] sm:$0xff] }
 0x213   : > { %v1541_v55 = vpack.c.bf16 %v1508_v53, %v1507_v50  ;;  %v2102_v50 = vld [vmem:[%s14811_s5 + $0x130] sm:$0xff] }
 0x215   : > { %9988 = vmatprep.mubr.msk.bf16.mxu1 %vm1582_vm3, %v1541_v55 }
 0x216   : > { %9989 = vmatmul.mubr.msk.bf16.gmra.mrb[60].mxu1 %vm1582_vm3, %v1542_v54 }
 0x217   : > { %2875 = vmatprep.mubr.bf16.mxu1 %v14836_v3 }
 0x271   : > { %v9930_v57 = vpop.f32.mrb[0].mxu1 }
 0x272   : > { %v1722_v58 = vadd.f32 %v9930_v57, %v11488_v56  ;;  %v1713_v59 = vpop.f32.mrb[1].mxu1 }
 0x273   : > { %v1714_v60 = vadd.f32 %v11488_v56, %v1713_v59  ;;  %v9931_v61 = vpop.f32.mrb[2].mxu1 }
 0x274   : > { %v1725_v42 = vadd.f32 %v9931_v61, %v11488_v56  ;;  %v1716_v62 = vpop.f32.mrb[3].mxu1  ;;  %v1970_v0 = vmax.f32 %v1722_v58, 0.0 }
 0x275   : > { %v1717_v63 = vadd.f32 %v11488_v56, %v1716_v62  ;;  %v1968_v4 = vmax.f32 %v1714_v60, 0.0  ;;  %v9395_v62 = vcombine.high %v2099_v51, %v2103_v52 }
 0x276   : > { %v1971_v1 = vmax.f32 %v1725_v42, 0.0  ;;  %v9393_v42 = vcombine.high %v2098_v47, %v2102_v50 }
 0x277   : > { %v1969_v5 = vmax.f32 %v1717_v63, 0.0 }
 0x278   : > { %v11506_v13 = vpack.c.bf16 %v1971_v1, %v1970_v0 }
 0x279   : > { %v11508_v17 = vpack.c.bf16 %v1969_v5, %v1968_v4  ;;  %v9934_v19 = vpop.f32.mrb[4].mxu1  ;;  %v9392_v4 = vcombine.low %v2098_v47, %v2102_v50  ;;  %v9394_v5 = vcombine.low %v2099_v51, %v2103_v52 }
 0x27a   : > { %v1738_v21 = vadd.f32 %v9934_v19, %v11488_v56  ;;  %v1729_v23 = vpop.f32.mrb[5].mxu1 }
 0x27b   : > { %v1730_v26 = vadd.f32 %v11488_v56, %v1729_v23  ;;  %2523 = vmatmul.mubr.bf16.vlgmr.msra.gmra.mrb[64].mxu0 %v11508_v17  ;;  %2876 = vmatmul.mubr.bf16.vlgmr.msra.gmra.mrb[64].mxu1 %v11508_v17  ;;  %v9935_v27 = vpop.f32.mrb[6].mxu1 }
 0x27c   : > { %v1974_v28 = vmax.f32 %v1738_v21, 0.0  ;;  %3197 = vmatpush1.bf16.msra.mxu0 %v9360_v14  ;;  %3550 = vmatpush1.bf16.msra.mxu1 %v9362_v22  ;;  %v1741_v29 = vadd.f32 %v9935_v27, %v11488_v56  ;;  %v1732_v30 = vpop.f32.mrb[7].mxu1  ;;  %v2094_v14 = vld [vmem:[%s14811_s5 + $0xf0] sm:$0xff]  ;;  %v2095_v22 = vld [vmem:[%s14811_s5 + $0xf8] sm:$0xff] }
 0x27d   : > { %v1972_v33 = vmax.f32 %v1730_v26, 0.0  ;;  %v1733_v34 = vadd.f32 %v11488_v56, %v1732_v30  ;;  %2532 = vmatprep.mubr.bf16.mxu0 %v14836_v3  ;;  %2885 = vmatprep.mubr.bf16.mxu1 %v14836_v3  ;;  %v9385_v45 = vcombine.high %v2090_v9, %v2094_v14  ;;  %v9387_v46 = vcombine.high %v2091_v18, %v2095_v22 }
 0x27e   : > { %v1975_v8 = vmax.f32 %v1741_v29, 0.0  ;;  %3198 = vmatprep.subr.bf16.mxu0 %v9369_v24  ;;  %3551 = vmatprep.subr.bf16.mxu1 %v9371_v12  ;;  %v9384_v59 = vcombine.low %v2090_v9, %v2094_v14  ;;  %v9386_v60 = vcombine.low %v2091_v18, %v2095_v22  ;;  %v2111_v22 = vld [vmem:[%s14811_s5 + $0x178] sm:$0xff] }
 0x27f   : > { %v1973_v10 = vmax.f32 %v1733_v34, 0.0 }
 0x280   : > { %v11548_v37 = vpack.c.bf16 %v1975_v8, %v1974_v28  ;;  %3199 = vmatpush1.bf16.msra.mxu0 %v9368_v31  ;;  %3552 = vmatpush1.bf16.msra.mxu1 %v9370_v32  ;;  %v2107_v8 = vld [vmem:[%s14811_s5 + $0x158] sm:$0xff] }
 0x281   : > { %v11550_v38 = vpack.c.bf16 %v1973_v10, %v1972_v33  ;;  %v9938_v39 = vpop.f32.mrb[8].mxu1  ;;  %3200 = vmatprep.subr.bf16.mxu0 %v9377_v35  ;;  %3553 = vmatprep.subr.bf16.mxu1 %v9379_v36  ;;  %v2106_v35 = vld [vmem:[%s14811_s5 + $0x150] sm:$0xff] }
 0x282   : > { %v1754_v43 = vadd.f32 %v9938_v39, %v11488_v56  ;;  %v1745_v44 = vpop.f32.mrb[9].mxu1  ;;  %v2110_v36 = vld [vmem:[%s14811_s5 + $0x170] sm:$0xff] }
 0x283   : > { %2533 = vmatmul.mubr.bf16.gmra.mrb[68].mxu0 %v11506_v13  ;;  %2886 = vmatmul.mubr.bf16.gmra.mrb[68].mxu1 %v11506_v13  ;;  %v1746_v48 = vadd.f32 %v11488_v56, %v1745_v44  ;;  %v9939_v49 = vpop.f32.mrb[10].mxu1  ;;  %v9400_v14 = vcombine.low %v2106_v35, %v2110_v36  ;;  %v9401_v18 = vcombine.high %v2106_v35, %v2110_v36 }
 0x284   : > { %v1978_v53 = vmax.f32 %v1754_v43, 0.0  ;;  %2542 = vmatprep.mubr.bf16.mxu0 %v14836_v3  ;;  %2895 = vmatprep.mubr.bf16.mxu1 %v14836_v3  ;;  %v1757_v54 = vadd.f32 %v9939_v49, %v11488_v56  ;;  %v1748_v55 = vpop.f32.mrb[11].mxu1 }
 0x285   : > { %v1976_v57 = vmax.f32 %v1746_v48, 0.0  ;;  %v1749_v58 = vadd.f32 %v11488_v56, %v1748_v55  ;;  %3201 = vmatpush1.bf16.msra.mxu0 %v9376_v40  ;;  %3554 = vmatpush1.bf16.msra.mxu1 %v9378_v41  ;;  %v9402_v40 = vcombine.low %v2107_v8, %v2111_v22  ;;  %v9403_v41 = vcombine.high %v2107_v8, %v2111_v22 }
 0x286   : > { %v1979_v61 = vmax.f32 %v1757_v54, 0.0  ;;  %3202 = vmatprep.subr.bf16.mxu0 %v9385_v45  ;;  %3555 = vmatprep.subr.bf16.mxu1 %v9387_v46 }
 0x287   : > { %v1977_v63 = vmax.f32 %v1749_v58, 0.0 }
 0x288   : > { %v11572_v0 = vpack.c.bf16 %v1979_v61, %v1978_v53 }
 0x289   : > { %v11574_v1 = vpack.c.bf16 %v1977_v63, %v1976_v57  ;;  %v9942_v2 = vpop.f32.mrb[12].mxu1  ;;  %3203 = vmatpush1.bf16.msra.mxu0 %v9384_v59  ;;  %3556 = vmatpush1.bf16.msra.mxu1 %v9386_v60 }
 0x28a   : > { %v1770_v6 = vadd.f32 %v9942_v2, %v11488_v56  ;;  %v1761_v7 = vpop.f32.mrb[13].mxu1  ;;  %3204 = vmatprep.subr.bf16.mxu0 %v9393_v42  ;;  %3557 = vmatprep.subr.bf16.mxu1 %v9395_v62 }
 0x28b   : > { %2543 = vmatmul.mubr.bf16.gmra.mrb[72].mxu0 %v11550_v38  ;;  %2896 = vmatmul.mubr.bf16.gmra.mrb[72].mxu1 %v11550_v38  ;;  %v1762_v11 = vadd.f32 %v11488_v56, %v1761_v7  ;;  %v9943_v19 = vpop.f32.mrb[14].mxu1 }
 0x28c   : > { %2552 = vmatprep.mubr.bf16.mxu0 %v14836_v3  ;;  %2905 = vmatprep.mubr.bf16.mxu1 %v14836_v3  ;;  %v1982_v20 = vmax.f32 %v1770_v6, 0.0  ;;  %v1773_v21 = vadd.f32 %v9943_v19, %v11488_v56  ;;  %v1764_v23 = vpop.f32.mrb[15].mxu1 }
 0x28d   : > { %v1980_v24 = vmax.f32 %v1762_v11, 0.0  ;;  %v1765_v12 = vadd.f32 %v11488_v56, %v1764_v23  ;;  %3205 = vmatpush1.bf16.msra.mxu0 %v9392_v4  ;;  %3558 = vmatpush1.bf16.msra.mxu1 %v9394_v5 }
 0x28e   : > { %v1983_v15 = vmax.f32 %v1773_v21, 0.0  ;;  %3206 = vmatprep.subr.bf16.mxu0 %v9401_v18  ;;  %3559 = vmatprep.subr.bf16.mxu1 %v9403_v41  ;;  %v2114_v41 = vld [vmem:[%s14811_s5 + $0x190] sm:$0xff] }
 0x28f   : > { %v1981_v16 = vmax.f32 %v1765_v12, 0.0 }
 0x290   : > { %v11584_v25 = vpack.c.bf16 %v1983_v15, %v1982_v20 }
 0x291   : > { %v11586_v26 = vpack.c.bf16 %v1981_v16, %v1980_v24  ;;  %v9946_v27 = vpop.f32.mrb[16].mxu1  ;;  %3207 = vmatpush1.bf16.msra.mxu0 %v9400_v14  ;;  %3560 = vmatpush1.bf16.msra.mxu1 %v9402_v40 }
 0x292   : > { %v1786_v28 = vadd.f32 %v9946_v27, %v11488_v56  ;;  %v1777_v29 = vpop.f32.mrb[17].mxu1 }
 0x293   : > { %2553 = vmatmul.mubr.bf16.gmra.mrb[76].mxu0 %v11548_v37  ;;  %2906 = vmatmul.mubr.bf16.gmra.mrb[76].mxu1 %v11548_v37  ;;  %v1778_v30 = vadd.f32 %v11488_v56, %v1777_v29  ;;  %v9947_v31 = vpop.f32.mrb[18].mxu1 }
 0x294   : > { %2562 = vmatprep.mubr.bf16.mxu0 %v14836_v3  ;;  %2915 = vmatprep.mubr.bf16.mxu1 %v14836_v3  ;;  %v1986_v32 = vmax.f32 %v1786_v28, 0.0  ;;  %v1789_v33 = vadd.f32 %v9947_v31, %v11488_v56  ;;  %v1780_v34 = vpop.f32.mrb[19].mxu1 }
 0x295   : > { %v1984_v9 = vmax.f32 %v1778_v30, 0.0  ;;  %v1781_v10 = vadd.f32 %v11488_v56, %v1780_v34 }
 0x296   : > { %v1987_v39 = vmax.f32 %v1789_v33, 0.0 }
 0x297   : > { %v1985_v43 = vmax.f32 %v1781_v10, 0.0 }
 0x298   : > { %v11608_v44 = vpack.c.bf16 %v1987_v39, %v1986_v32 }
 0x299   : > { %v11610_v45 = vpack.c.bf16 %v1985_v43, %v1984_v9  ;;  %v9950_v46 = vpop.f32.mrb[20].mxu1  ;;  %v2118_v43 = vld [vmem:[%s14811_s5 + $0x1b0] sm:$0xff] }
 0x29a   : > { %v1802_v47 = vadd.f32 %v9950_v46, %v11488_v56  ;;  %v1793_v48 = vpop.f32.mrb[21].mxu1  ;;  %v2115_v46 = vld [vmem:[%s14811_s5 + $0x198] sm:$0xff] }
 0x29b   : > { %2563 = vmatmul.mubr.bf16.gmra.mrb[80].mxu0 %v11574_v1  ;;  %2916 = vmatmul.mubr.bf16.gmra.mrb[80].mxu1 %v11574_v1  ;;  %v1794_v49 = vadd.f32 %v11488_v56, %v1793_v48  ;;  %v9951_v50 = vpop.f32.mrb[22].mxu1 }
 0x29c   : > { %2572 = vmatprep.mubr.bf16.mxu0 %v14836_v3  ;;  %2925 = vmatprep.mubr.bf16.mxu1 %v14836_v3  ;;  %v1990_v51 = vmax.f32 %v1802_v47, 0.0  ;;  %v1805_v52 = vadd.f32 %v9951_v50, %v11488_v56  ;;  %v1796_v53 = vpop.f32.mrb[23].mxu1  ;;  %v9409_v50 = vcombine.high %v2114_v41, %v2118_v43 }
 0x29d   : > { %v1988_v54 = vmax.f32 %v1794_v49, 0.0  ;;  %v1797_v55 = vadd.f32 %v11488_v56, %v1796_v53  ;;  %v9408_v49 = vcombine.low %v2114_v41, %v2118_v43 }
 0x29e   : > { %v1991_v57 = vmax.f32 %v1805_v52, 0.0  ;;  %3208 = vmatprep.subr.bf16.mxu0 %v9409_v50 }
 0x29f   : > { %v1989_v58 = vmax.f32 %v1797_v55, 0.0  ;;  %3209 = vmatpush1.bf16.msra.mxu0 %v9408_v49 }
 0x2a0   : > { %v11620_v59 = vpack.c.bf16 %v1991_v57, %v1990_v51  ;;  %v2119_v51 = vld [vmem:[%s14811_s5 + $0x1b8] sm:$0xff] }
 0x2a1   : > { %v11622_v60 = vpack.c.bf16 %v1989_v58, %v1988_v54  ;;  %v9954_v61 = vpop.f32.mrb[24].mxu1  ;;  %v9410_v53 = vcombine.low %v2115_v46, %v2119_v51  ;;  %v9411_v54 = vcombine.high %v2115_v46, %v2119_v51 }
 0x2a2   : > { %14899 = vst [vmem:[#allocation19_spill] sm:$0xff] %v11620_v59  ;;  %v1818_v42 = vadd.f32 %v9954_v61, %v11488_v56  ;;  %v1809_v62 = vpop.f32.mrb[25].mxu1 }
 0x2a3   : > { %2573 = vmatmul.mubr.bf16.gmra.mrb[84].mxu0 %v11572_v0  ;;  %2926 = vmatmul.mubr.bf16.gmra.mrb[84].mxu1 %v11572_v0  ;;  %v1810_v63 = vadd.f32 %v11488_v56, %v1809_v62  ;;  %v9955_v2 = vpop.f32.mrb[26].mxu1 }
 0x2a4   : > { %2582 = vmatprep.mubr.bf16.mxu0 %v14836_v3  ;;  %2935 = vmatprep.mubr.bf16.mxu1 %v14836_v3  ;;  %v1994_v4 = vmax.f32 %v1818_v42, 0.0  ;;  %v1821_v5 = vadd.f32 %v9955_v2, %v11488_v56  ;;  %v1812_v6 = vpop.f32.mrb[27].mxu1 }
 0x2a5   : > { %v1992_v7 = vmax.f32 %v1810_v63, 0.0  ;;  %v1813_v11 = vadd.f32 %v11488_v56, %v1812_v6  ;;  %3561 = vmatprep.subr.bf16.mxu1 %v9411_v54 }
 0x2a6   : > { %v1995_v19 = vmax.f32 %v1821_v5, 0.0  ;;  %3562 = vmatpush1.bf16.msra.mxu1 %v9410_v53 }
 0x2a7   : > { %v1993_v20 = vmax.f32 %v1813_v11, 0.0 }
 0x2a8   : > { %v11632_v21 = vpack.c.bf16 %v1995_v19, %v1994_v4 }
 0x2a9   : > { %v11634_v23 = vpack.c.bf16 %v1993_v20, %v1992_v7  ;;  %v9958_v24 = vpop.f32.mrb[28].mxu1 }
 0x2aa   : > { %14900 = vst [vmem:[#allocation20_spill] sm:$0xff] %v11632_v21  ;;  %v1834_v12 = vadd.f32 %v9958_v24, %v11488_v56  ;;  %v1825_v15 = vpop.f32.mrb[29].mxu1 }
 0x2ab   : > { %14901 = vst [vmem:[#allocation21_spill] sm:$0xff] %v11634_v23  ;;  %2583 = vmatmul.mubr.bf16.gmra.mrb[88].mxu0 %v11586_v26  ;;  %2936 = vmatmul.mubr.bf16.gmra.mrb[88].mxu1 %v11586_v26  ;;  %v1826_v16 = vadd.f32 %v11488_v56, %v1825_v15  ;;  %v9959_v27 = vpop.f32.mrb[30].mxu1 }
 0x2ac   : > { %2592 = vmatprep.mubr.bf16.mxu0 %v14836_v3  ;;  %2945 = vmatprep.mubr.bf16.mxu1 %v14836_v3  ;;  %v1998_v28 = vmax.f32 %v1834_v12, 0.0  ;;  %v1837_v29 = vadd.f32 %v9959_v27, %v11488_v56  ;;  %v1828_v30 = vpop.f32.mrb[31].mxu1 }
 0x2ad   : > { %v1996_v31 = vmax.f32 %v1826_v16, 0.0  ;;  %v1829_v32 = vadd.f32 %v11488_v56, %v1828_v30 }
 0x2ae   : > { %v1999_v33 = vmax.f32 %v1837_v29, 0.0 }
 0x2af   : > { %v1997_v34 = vmax.f32 %v1829_v32, 0.0 }
 0x2b0   : > { %v11644_v35 = vpack.c.bf16 %v1999_v33, %v1998_v28 }
 0x2b1   : > { %v11646_v36 = vpack.c.bf16 %v1997_v34, %v1996_v31  ;;  %v9962_v8 = vpop.f32.mrb[32].mxu1 }
 0x2b2   : > { %14902 = vst [vmem:[#allocation22_spill] sm:$0xff] %v11644_v35  ;;  %v1850_v9 = vadd.f32 %v9962_v8, %v11488_v56  ;;  %v1841_v10 = vpop.f32.mrb[33].mxu1 }
 0x2b3   : > { %14903 = vst [vmem:[#allocation23_spill] sm:$0xff] %v11646_v36  ;;  %2593 = vmatmul.mubr.bf16.gmra.mrb[92].mxu0 %v11584_v25  ;;  %2946 = vmatmul.mubr.bf16.gmra.mrb[92].mxu1 %v11584_v25  ;;  %v1842_v14 = vadd.f32 %v11488_v56, %v1841_v10  ;;  %v9963_v18 = vpop.f32.mrb[34].mxu1 }
 0x2b4   : > { %2602 = vmatprep.mubr.bf16.mxu0 %v14836_v3  ;;  %2955 = vmatprep.mubr.bf16.mxu1 %v14836_v3  ;;  %v2002_v22 = vmax.f32 %v1850_v9, 0.0  ;;  %v1853_v39 = vadd.f32 %v9963_v18, %v11488_v56  ;;  %v1844_v40 = vpop.f32.mrb[35].mxu1 }
 0x2b5   : > { %v2000_v47 = vmax.f32 %v1842_v14, 0.0  ;;  %v1845_v48 = vadd.f32 %v11488_v56, %v1844_v40 }
 0x2b6   : > { %v2003_v52 = vmax.f32 %v1853_v39, 0.0 }
 0x2b7   : > { %v2001_v55 = vmax.f32 %v1845_v48, 0.0 }
 0x2b8   : > { %v11668_v57 = vpack.c.bf16 %v2003_v52, %v2002_v22 }
 0x2b9   : > { %v11670_v58 = vpack.c.bf16 %v2001_v55, %v2000_v47  ;;  %v9966_v61 = vpop.f32.mrb[36].mxu1 }
 0x2ba   : > { %14904 = vst [vmem:[#allocation24_spill] sm:$0xff] %v11668_v57  ;;  %v1866_v42 = vadd.f32 %v9966_v61, %v11488_v56  ;;  %v1857_v62 = vpop.f32.mrb[37].mxu1 }
 0x2bb   : > { %14905 = vst [vmem:[#allocation25_spill] sm:$0xff] %v11670_v58  ;;  %2603 = vmatmul.mubr.bf16.gmra.mrb[96].mxu0 %v11610_v45  ;;  %2956 = vmatmul.mubr.bf16.gmra.mrb[96].mxu1 %v11610_v45  ;;  %v1858_v63 = vadd.f32 %v11488_v56, %v1857_v62  ;;  %v9967_v2 = vpop.f32.mrb[38].mxu1 }
 0x2bc   : > { %2612 = vmatprep.mubr.bf16.mxu0 %v14836_v3  ;;  %2965 = vmatprep.mubr.bf16.mxu1 %v14836_v3  ;;  %v2006_v4 = vmax.f32 %v1866_v42, 0.0  ;;  %v1869_v5 = vadd.f32 %v9967_v2, %v11488_v56  ;;  %v1860_v6 = vpop.f32.mrb[39].mxu1 }
 0x2bd   : > { %v2004_v7 = vmax.f32 %v1858_v63, 0.0  ;;  %v1861_v11 = vadd.f32 %v11488_v56, %v1860_v6 }
 0x2be   : > { %v2007_v19 = vmax.f32 %v1869_v5, 0.0 }
 0x2bf   : > { %v2005_v20 = vmax.f32 %v1861_v11, 0.0 }
 0x2c0   : > { %v11680_v24 = vpack.c.bf16 %v2007_v19, %v2006_v4 }
 0x2c1   : > { %v11682_v12 = vpack.c.bf16 %v2005_v20, %v2004_v7  ;;  %v9970_v15 = vpop.f32.mrb[40].mxu1 }
 0x2c2   : > { %14906 = vst [vmem:[#allocation26_spill] sm:$0xff] %v11680_v24  ;;  %v1882_v16 = vadd.f32 %v9970_v15, %v11488_v56  ;;  %v1873_v27 = vpop.f32.mrb[41].mxu1 }
 0x2c3   : > { %14907 = vst [vmem:[#allocation27_spill] sm:$0xff] %v11682_v12  ;;  %2613 = vmatmul.mubr.bf16.gmra.mrb[100].mxu0 %v11608_v44  ;;  %2966 = vmatmul.mubr.bf16.gmra.mrb[100].mxu1 %v11608_v44  ;;  %v1874_v28 = vadd.f32 %v11488_v56, %v1873_v27  ;;  %v9971_v29 = vpop.f32.mrb[42].mxu1 }
 0x2c4   : > { %2622 = vmatprep.mubr.bf16.mxu0 %v14836_v3  ;;  %2975 = vmatprep.mubr.bf16.mxu1 %v14836_v3  ;;  %v2010_v30 = vmax.f32 %v1882_v16, 0.0  ;;  %v1885_v31 = vadd.f32 %v9971_v29, %v11488_v56  ;;  %v1876_v32 = vpop.f32.mrb[43].mxu1 }
 0x2c5   : > { %v2008_v33 = vmax.f32 %v1874_v28, 0.0  ;;  %v1877_v34 = vadd.f32 %v11488_v56, %v1876_v32 }
 0x2c6   : > { %v2011_v8 = vmax.f32 %v1885_v31, 0.0 }
 0x2c7   : > { %v2009_v9 = vmax.f32 %v1877_v34, 0.0 }
 0x2c8   : > { %v11692_v10 = vpack.c.bf16 %v2011_v8, %v2010_v30 }
 0x2c9   : > { %v11694_v14 = vpack.c.bf16 %v2009_v9, %v2008_v33  ;;  %v9974_v18 = vpop.f32.mrb[44].mxu1 }
 0x2ca   : > { %14908 = vst [vmem:[#allocation28_spill] sm:$0xff] %v11692_v10  ;;  %v1898_v22 = vadd.f32 %v9974_v18, %v11488_v56  ;;  %v1889_v39 = vpop.f32.mrb[45].mxu1 }
 0x2cb   : > { %14909 = vst [vmem:[#allocation29_spill] sm:$0xff] %v11694_v14  ;;  %2623 = vmatmul.mubr.bf16.gmra.mrb[104].mxu0 %v11622_v60  ;;  %2976 = vmatmul.mubr.bf16.gmra.mrb[104].mxu1 %v11622_v60  ;;  %v1890_v40 = vadd.f32 %v11488_v56, %v1889_v39  ;;  %v9975_v41 = vpop.f32.mrb[46].mxu1 }
 0x2cc   : > { %2632 = vmatprep.mubr.bf16.mxu0 %v14836_v3  ;;  %2985 = vmatprep.mubr.bf16.mxu1 %v14836_v3  ;;  %v2014_v43 = vmax.f32 %v1898_v22, 0.0  ;;  %v1901_v46 = vadd.f32 %v9975_v41, %v11488_v56  ;;  %v1892_v47 = vpop.f32.mrb[47].mxu1 }
 0x2cd   : > { %v2012_v48 = vmax.f32 %v1890_v40, 0.0  ;;  %v1893_v49 = vadd.f32 %v11488_v56, %v1892_v47 }
 0x2ce   : > { %v2015_v50 = vmax.f32 %v1901_v46, 0.0 }
 0x2cf   : > { %v2013_v51 = vmax.f32 %v1893_v49, 0.0 }
 0x2d0   : > { %v11704_v52 = vpack.c.bf16 %v2015_v50, %v2014_v43 }
 0x2d1   : > { %v11706_v53 = vpack.c.bf16 %v2013_v51, %v2012_v48  ;;  %v9978_v54 = vpop.f32.mrb[48].mxu1 }
 0x2d2   : > { %14910 = vst [vmem:[#allocation30_spill] sm:$0xff] %v11704_v52  ;;  %v1914_v55 = vadd.f32 %v9978_v54, %v11488_v56  ;;  %v1905_v61 = vpop.f32.mrb[49].mxu1 }
 0x2d3   : > { %14911 = vst [vmem:[#allocation31_spill] sm:$0xff] %v11706_v53  ;;  %2633 = vmatmul.mubr.bf16.gmra.mrb[108].mxu0 %v11620_v59  ;;  %2986 = vmatmul.mubr.bf16.gmra.mrb[108].mxu1 %v11620_v59  ;;  %v1906_v42 = vadd.f32 %v11488_v56, %v1905_v61  ;;  %v9979_v62 = vpop.f32.mrb[50].mxu1 }
 0x2d4   : > { %2642 = vmatprep.mubr.bf16.mxu0 %v14836_v3  ;;  %2995 = vmatprep.mubr.bf16.mxu1 %v14836_v3  ;;  %v2018_v63 = vmax.f32 %v1914_v55, 0.0  ;;  %v1917_v2 = vadd.f32 %v9979_v62, %v11488_v56  ;;  %v1908_v4 = vpop.f32.mrb[51].mxu1 }
 0x2d5   : > { %v2016_v5 = vmax.f32 %v1906_v42, 0.0  ;;  %v1909_v6 = vadd.f32 %v11488_v56, %v1908_v4 }
 0x2d6   : > { %v2019_v7 = vmax.f32 %v1917_v2, 0.0 }
 0x2d7   : > { %v2017_v11 = vmax.f32 %v1909_v6, 0.0 }
 0x2d8   : > { %v11716_v19 = vpack.c.bf16 %v2019_v7, %v2018_v63 }
 0x2d9   : > { %v11718_v20 = vpack.c.bf16 %v2017_v11, %v2016_v5  ;;  %v9982_v15 = vpop.f32.mrb[52].mxu1 }
 0x2da   : > { %14912 = vst [vmem:[#allocation32_spill] sm:$0xff] %v11716_v19  ;;  %v1930_v16 = vadd.f32 %v9982_v15, %v11488_v56  ;;  %v1921_v27 = vpop.f32.mrb[53].mxu1 }
 0x2db   : > { %14913 = vst [vmem:[#allocation33_spill] sm:$0xff] %v11718_v20  ;;  %2643 = vmatmul.mubr.bf16.gmra.mrb[112].mxu0 %v11634_v23  ;;  %2996 = vmatmul.mubr.bf16.gmra.mrb[112].mxu1 %v11634_v23  ;;  %v1922_v28 = vadd.f32 %v11488_v56, %v1921_v27  ;;  %v9983_v29 = vpop.f32.mrb[54].mxu1 }
 0x2dc   : > { %2652 = vmatprep.mubr.bf16.mxu0 %v14836_v3  ;;  %3005 = vmatprep.mubr.bf16.mxu1 %v14836_v3  ;;  %v2022_v30 = vmax.f32 %v1930_v16, 0.0  ;;  %v1933_v31 = vadd.f32 %v9983_v29, %v11488_v56  ;;  %v1924_v32 = vpop.f32.mrb[55].mxu1 }
 0x2dd   : > { %v2020_v33 = vmax.f32 %v1922_v28, 0.0  ;;  %v1925_v34 = vadd.f32 %v11488_v56, %v1924_v32  ;;  %v2123_v32 = vld [vmem:[%s14811_s5 + $0x1d8] sm:$0xff] }
 0x2de   : > { %v2023_v8 = vmax.f32 %v1933_v31, 0.0  ;;  %v2122_v31 = vld [vmem:[%s14811_s5 + $0x1d0] sm:$0xff] }
 0x2df   : > { %v2021_v9 = vmax.f32 %v1925_v34, 0.0 }
 0x2e0   : > { %v11728_v18 = vpack.c.bf16 %v2023_v8, %v2022_v30  ;;  %v2127_v8 = vld [vmem:[%s14811_s5 + $0x1f8] sm:$0xff] }
 0x2e1   : > { %v11730_v22 = vpack.c.bf16 %v2021_v9, %v2020_v33  ;;  %v9986_v39 = vpop.f32.mrb[56].mxu1  ;;  %v9418_v9 = vcombine.low %v2123_v32, %v2127_v8 }
 0x2e2   : > { %14914 = vst [vmem:[#allocation34_spill] sm:$0xff] %v11728_v18  ;;  %v1946_v40 = vadd.f32 %v9986_v39, %v11488_v56  ;;  %v1937_v41 = vpop.f32.mrb[57].mxu1  ;;  %v9419_v39 = vcombine.high %v2123_v32, %v2127_v8 }
 0x2e3   : > { %14915 = vst [vmem:[#allocation35_spill] sm:$0xff] %v11730_v22  ;;  %2653 = vmatmul.mubr.bf16.gmra.mrb[116].mxu0 %v11632_v21  ;;  %3006 = vmatmul.mubr.bf16.gmra.mrb[116].mxu1 %v11632_v21  ;;  %v1938_v43 = vadd.f32 %v11488_v56, %v1937_v41  ;;  %v9987_v46 = vpop.f32.mrb[58].mxu1 }
 0x2e4   : > { %2662 = vmatprep.mubr.bf16.mxu0 %v14836_v3  ;;  %3015 = vmatprep.mubr.bf16.mxu1 %v14836_v3  ;;  %v2026_v47 = vmax.f32 %v1946_v40, 0.0  ;;  %v1949_v48 = vadd.f32 %v9987_v46, %v11488_v56  ;;  %v1940_v49 = vpop.f32.mrb[59].mxu1  ;;  %v2130_v40 = vlaneseq }
 0x2e5   : > { %v2024_v50 = vmax.f32 %v1938_v43, 0.0  ;;  %v1941_v51 = vadd.f32 %v11488_v56, %v1940_v49  ;;  %3563 = vmatprep.subr.bf16.mxu1 %v9419_v39 }
 0x2e6   : > { %v2027_v54 = vmax.f32 %v1949_v48, 0.0  ;;  %3564 = vmatpush1.bf16.msra.mxu1 %v9418_v9  ;;  %v11810_v41 = vshrl.u32 %v2130_v40, 7 }
 0x2e7   : > { %v2025_v55 = vmax.f32 %v1941_v51, 0.0 }
 0x2e8   : > { %v11740_v61 = vpack.c.bf16 %v2027_v54, %v2026_v47  ;;  %14920 = vst [vmem:[#allocation40_spill] sm:$0xff] %v11810_v41  ;;  %v11815_v43 = vsub.s32 0, %v11810_v41  ;;  %v14828_v46 = vsub.s32 2, %v11810_v41  ;;  %v2128_v47 = vld [vmem:[%s14812_s6] sm:$0xff]  ;;  %v11822_v48 = vsub.s32 1, %v11810_v41 }
 0x2e9   : > { %v11742_v42 = vpack.c.bf16 %v2025_v55, %v2024_v50  ;;  %v9990_v62 = vpop.f32.mrb[60].mxu1  ;;  %v14827_v49 = vsub.s32 3, %v11810_v41 }
 0x2ea   : > { %14916 = vst [vmem:[#allocation36_spill] sm:$0xff] %v11740_v61  ;;  %v1962_v63 = vadd.f32 %v9990_v62, %v11488_v56  ;;  %v1953_v2 = vpop.f32.mrb[61].mxu1  ;;  %14921 = vst [vmem:[#allocation41_spill] sm:$0xff] %v11815_v43  ;;  %v11828_v50 = vrot.slane %v2128_v47, %v11815_v43  ;;  %v11832_v51 = vrot.slane %v2128_v47, %v14828_v46 }
 0x2eb   : > { %14917 = vst [vmem:[#allocation37_spill] sm:$0xff] %v11742_v42  ;;  %2663 = vmatmul.mubr.bf16.gmra.mrb[120].mxu0 %v11646_v36  ;;  %3016 = vmatmul.mubr.bf16.gmra.mrb[120].mxu1 %v11646_v36  ;;  %v1954_v4 = vadd.f32 %v11488_v56, %v1953_v2  ;;  %v9991_v5 = vpop.f32.mrb[62].mxu1  ;;  %14922 = vst [vmem:[#allocation42_spill] sm:$0xff] %v11822_v48  ;;  %v11835_v54 = vrot.slane %v2128_v47, %v11822_v48 }
 0x2ec   : > { %2672 = vmatprep.mubr.bf16.mxu0 %v14836_v3  ;;  %3025 = vmatprep.mubr.bf16.mxu1 %v14836_v3  ;;  %v2030_v6 = vmax.f32 %v1962_v63, 0.0  ;;  %v1965_v7 = vadd.f32 %v9991_v5, %v11488_v56  ;;  %v1956_v11 = vpop.f32.mrb[63].mxu1  ;;  %v11839_v55 = vrot.slane %v2128_v47, %v14827_v49 }
 0x2ed   : > { %v2028_v15 = vmax.f32 %v1954_v4, 0.0  ;;  %v1957_v16 = vadd.f32 %v11488_v56, %v1956_v11  ;;  %v2126_v56 = vld [vmem:[%s14811_s5 + $0x1f0] sm:$0xff] }
 0x2ee   : > { %v2031_v27 = vmax.f32 %v1965_v7, 0.0  ;;  %v9416_v33 = vcombine.low %v2122_v31, %v2126_v56  ;;  %v9417_v34 = vcombine.high %v2122_v31, %v2126_v56 }
 0x2ef   : > { %v2029_v28 = vmax.f32 %v1957_v16, 0.0 }
 0x2f0   : > { %v11752_v29 = vpack.c.bf16 %v2031_v27, %v2030_v6  ;;  %3210 = vmatprep.subr.bf16.mxu0 %v9417_v34 }
 0x2f1   : > { %v11754_v30 = vpack.c.bf16 %v2029_v28, %v2028_v15  ;;  %3211 = vmatpush1.bf16.msra.mxu0 %v9416_v33 }
 0x2f2   : > { %14918 = vst [vmem:[#allocation38_spill] sm:$0xff] %v11752_v29 }
 0x2f3   : > { %14919 = vst [vmem:[#allocation39_spill] sm:$0xff] %v11754_v30  ;;  %2673 = vmatmul.mubr.bf16.gmra.mrb[124].mxu0 %v11644_v35  ;;  %3026 = vmatmul.mubr.bf16.gmra.mrb[124].mxu1 %v11644_v35 }
 0x2f4   : > { %2682 = vmatprep.mubr.bf16.mxu0 %v14836_v3  ;;  %3035 = vmatprep.mubr.bf16.mxu1 %v14836_v3 }
 0x2fb   : > { %2683 = vmatmul.mubr.bf16.gmra.mrb[128].mxu0 %v11670_v58  ;;  %3036 = vmatmul.mubr.bf16.gmra.mrb[128].mxu1 %v11670_v58 }
 0x2fc   : > { %2692 = vmatprep.mubr.bf16.mxu0 %v14836_v3  ;;  %3045 = vmatprep.mubr.bf16.mxu1 %v14836_v3 }
 0x303   : > { %2693 = vmatmul.mubr.bf16.gmra.mrb[132].mxu0 %v11668_v57  ;;  %3046 = vmatmul.mubr.bf16.gmra.mrb[132].mxu1 %v11668_v57 }
 0x304   : > { %2702 = vmatprep.mubr.bf16.mxu0 %v14836_v3  ;;  %3055 = vmatprep.mubr.bf16.mxu1 %v14836_v3 }
 0x30b   : > { %2703 = vmatmul.mubr.bf16.gmra.mrb[136].mxu0 %v11682_v12  ;;  %3056 = vmatmul.mubr.bf16.gmra.mrb[136].mxu1 %v11682_v12 }
 0x30c   : > { %2712 = vmatprep.mubr.bf16.mxu0 %v14836_v3  ;;  %3065 = vmatprep.mubr.bf16.mxu1 %v14836_v3 }
 0x313   : > { %2713 = vmatmul.mubr.bf16.gmra.mrb[140].mxu0 %v11680_v24  ;;  %3066 = vmatmul.mubr.bf16.gmra.mrb[140].mxu1 %v11680_v24 }
 0x314   : > { %2722 = vmatprep.mubr.bf16.mxu0 %v14836_v3  ;;  %3075 = vmatprep.mubr.bf16.mxu1 %v14836_v3 }
 0x31b   : > { %2723 = vmatmul.mubr.bf16.gmra.mrb[144].mxu0 %v11694_v14  ;;  %3076 = vmatmul.mubr.bf16.gmra.mrb[144].mxu1 %v11694_v14 }
 0x31c   : > { %2732 = vmatprep.mubr.bf16.mxu0 %v14836_v3  ;;  %3085 = vmatprep.mubr.bf16.mxu1 %v14836_v3 }
 0x323   : > { %2733 = vmatmul.mubr.bf16.gmra.mrb[148].mxu0 %v11692_v10  ;;  %3086 = vmatmul.mubr.bf16.gmra.mrb[148].mxu1 %v11692_v10 }
 0x324   : > { %2742 = vmatprep.mubr.bf16.mxu0 %v14836_v3  ;;  %3095 = vmatprep.mubr.bf16.mxu1 %v14836_v3 }
 0x32b   : > { %2743 = vmatmul.mubr.bf16.gmra.mrb[152].mxu0 %v11706_v53  ;;  %3096 = vmatmul.mubr.bf16.gmra.mrb[152].mxu1 %v11706_v53 }
 0x32c   : > { %2752 = vmatprep.mubr.bf16.mxu0 %v14836_v3  ;;  %3105 = vmatprep.mubr.bf16.mxu1 %v14836_v3 }
 0x333   : > { %2753 = vmatmul.mubr.bf16.gmra.mrb[156].mxu0 %v11704_v52  ;;  %3106 = vmatmul.mubr.bf16.gmra.mrb[156].mxu1 %v11704_v52 }
 0x334   : > { %2762 = vmatprep.mubr.bf16.mxu0 %v14836_v3  ;;  %3115 = vmatprep.mubr.bf16.mxu1 %v14836_v3 }
 0x33b   : > { %2763 = vmatmul.mubr.bf16.gmra.mrb[160].mxu0 %v11718_v20  ;;  %3116 = vmatmul.mubr.bf16.gmra.mrb[160].mxu1 %v11718_v20 }
 0x33c   : > { %2772 = vmatprep.mubr.bf16.mxu0 %v14836_v3  ;;  %3125 = vmatprep.mubr.bf16.mxu1 %v14836_v3 }
 0x343   : > { %2773 = vmatmul.mubr.bf16.gmra.mrb[164].mxu0 %v11716_v19  ;;  %3126 = vmatmul.mubr.bf16.gmra.mrb[164].mxu1 %v11716_v19 }
 0x344   : > { %2782 = vmatprep.mubr.bf16.mxu0 %v14836_v3  ;;  %3135 = vmatprep.mubr.bf16.mxu1 %v14836_v3 }
 0x34b   : > { %2783 = vmatmul.mubr.bf16.gmra.mrb[168].mxu0 %v11730_v22  ;;  %3136 = vmatmul.mubr.bf16.gmra.mrb[168].mxu1 %v11730_v22 }
 0x34c   : > { %2792 = vmatprep.mubr.bf16.mxu0 %v14836_v3  ;;  %3145 = vmatprep.mubr.bf16.mxu1 %v14836_v3 }
 0x34e   : > { %v2524_v62 = vpop.f32.mrb[64].mxu0  ;;  %v2877_v63 = vpop.f32.mrb[64].mxu1 }
 0x34f   : > { %v2525_v2 = vadd.f32 %v2524_v62, %v11828_v50  ;;  %v2878_v4 = vadd.f32 %v2877_v63, %v11832_v51  ;;  %v2526_v5 = vpop.f32.mrb[65].mxu0  ;;  %v2879_v6 = vpop.f32.mrb[65].mxu1 }
 0x350   : > { %v2527_v7 = vadd.f32 %v2526_v5, %v11835_v54  ;;  %v2880_v11 = vadd.f32 %v2879_v6, %v11839_v55  ;;  %v2528_v15 = vpop.f32.mrb[66].mxu0  ;;  %v2881_v16 = vpop.f32.mrb[66].mxu1 }
 0x351   : > { %v2529_v27 = vadd.f32 %v2528_v15, %v11828_v50  ;;  %v2882_v28 = vadd.f32 %v2881_v16, %v11832_v51  ;;  %v2530_v31 = vpop.f32.mrb[67].mxu0  ;;  %v2883_v56 = vpop.f32.mrb[67].mxu1  ;;  %v3902_v34 = vmax.f32 %v2525_v2, 0.0  ;;  %v3904_v8 = vmax.f32 %v2878_v4, 0.0 }
 0x352   : > { %v2531_v32 = vadd.f32 %v2530_v31, %v11835_v54  ;;  %v2884_v33 = vadd.f32 %v2883_v56, %v11839_v55  ;;  %v3903_v40 = vmax.f32 %v2527_v7, 0.0  ;;  %v3905_v47 = vmax.f32 %v2880_v11, 0.0 }
 0x353   : > { %v3910_v9 = vmax.f32 %v2529_v27, 0.0  ;;  %v3912_v39 = vmax.f32 %v2882_v28, 0.0  ;;  %2793 = vmatmul.mubr.bf16.gmra.mrb[172].mxu0 %v11728_v18  ;;  %3146 = vmatmul.mubr.bf16.gmra.mrb[172].mxu1 %v11728_v18 }
 0x354   : > { %v3911_v62 = vmax.f32 %v2531_v32, 0.0  ;;  %v3913_v63 = vmax.f32 %v2884_v33, 0.0  ;;  %2802 = vmatprep.mubr.bf16.mxu0 %v14836_v3  ;;  %3155 = vmatprep.mubr.bf16.mxu1 %v14836_v3 }
 0x355   : > { %v4414_v5 = vpack.c.bf16 %v3910_v9, %v3902_v34  ;;  %v4416_v6 = vpack.c.bf16 %v3912_v39, %v3904_v8 }
 0x356   : > { %v4415_v15 = vpack.c.bf16 %v3911_v62, %v3903_v40  ;;  %v4417_v16 = vpack.c.bf16 %v3913_v63, %v3905_v47  ;;  %v2534_v2 = vpop.f32.mrb[68].mxu0  ;;  %v2887_v4 = vpop.f32.mrb[68].mxu1 }
 0x357   : > { %v2535_v27 = vadd.f32 %v2534_v2, %v11828_v50  ;;  %v2888_v28 = vadd.f32 %v2887_v4, %v11832_v51  ;;  %v2536_v31 = vpop.f32.mrb[69].mxu0  ;;  %v2889_v56 = vpop.f32.mrb[69].mxu1 }
 0x358   : > { %v2537_v7 = vadd.f32 %v2536_v31, %v11835_v54  ;;  %v2890_v11 = vadd.f32 %v2889_v56, %v11839_v55  ;;  %v2538_v32 = vpop.f32.mrb[70].mxu0  ;;  %v2891_v33 = vpop.f32.mrb[70].mxu1 }
 0x359   : > { %v2539_v49 = vadd.f32 %v2538_v32, %v11828_v50  ;;  %v2892_v34 = vadd.f32 %v2891_v33, %v11832_v51  ;;  %v2540_v8 = vpop.f32.mrb[71].mxu0  ;;  %v2893_v9 = vpop.f32.mrb[71].mxu1  ;;  %v3918_v47 = vmax.f32 %v2535_v27, 0.0  ;;  %v3920_v62 = vmax.f32 %v2888_v28, 0.0 }
 0x35a   : > { %v2541_v39 = vadd.f32 %v2540_v8, %v11835_v54  ;;  %v2894_v40 = vadd.f32 %v2893_v9, %v11839_v55  ;;  %v3919_v4 = vmax.f32 %v2537_v7, 0.0  ;;  %v3921_v31 = vmax.f32 %v2890_v11, 0.0 }
 0x35b   : > { %v3926_v63 = vmax.f32 %v2539_v49, 0.0  ;;  %v3928_v2 = vmax.f32 %v2892_v34, 0.0  ;;  %2803 = vmatmul.mubr.bf16.gmra.mrb[176].mxu0 %v11742_v42  ;;  %3156 = vmatmul.mubr.bf16.gmra.mrb[176].mxu1 %v11742_v42 }
 0x35c   : > { %v3927_v56 = vmax.f32 %v2541_v39, 0.0  ;;  %v3929_v32 = vmax.f32 %v2894_v40, 0.0  ;;  %2812 = vmatprep.mubr.bf16.mxu0 %v14836_v3  ;;  %3165 = vmatprep.mubr.bf16.mxu1 %v14836_v3 }
 0x35d   : > { %v4422_v33 = vpack.c.bf16 %v3926_v63, %v3918_v47  ;;  %v4424_v8 = vpack.c.bf16 %v3928_v2, %v3920_v62 }
 0x35e   : > { %v4423_v46 = vpack.c.bf16 %v3927_v56, %v3919_v4  ;;  %v4425_v9 = vpack.c.bf16 %v3929_v32, %v3921_v31  ;;  %v2544_v27 = vpop.f32.mrb[72].mxu0  ;;  %v2897_v28 = vpop.f32.mrb[72].mxu1 }
 0x35f   : > { %v4670_v49 = vmax.bf16 %v4422_v33, %v4414_v5  ;;  %v4692_v34 = vmax.bf16 %v4424_v8, %v4416_v6  ;;  %v2545_v48 = vadd.f32 %v2544_v27, %v11828_v50  ;;  %v2898_v43 = vadd.f32 %v2897_v28, %v11832_v51  ;;  %v2546_v7 = vpop.f32.mrb[73].mxu0  ;;  %v2899_v11 = vpop.f32.mrb[73].mxu1 }
 0x360   : > { %v4681_v39 = vmax.bf16 %v4423_v46, %v4415_v15  ;;  %v4703_v40 = vmax.bf16 %v4425_v9, %v4417_v16  ;;  %v2547_v41 = vadd.f32 %v2546_v7, %v11835_v54  ;;  %v2900_v3 = vadd.f32 %v2899_v11, %v11839_v55  ;;  %v2548_v47 = vpop.f32.mrb[74].mxu0  ;;  %v2901_v62 = vpop.f32.mrb[74].mxu1 }
 0x361   : > { %v4671_v63 = vunpack.i.l.bf16 %v4670_v49  ;;  %v4672_v2 = vunpack.i.h.bf16 %v4670_v49  ;;  %v4693_v4 = vunpack.i.l.bf16 %v4692_v34  ;;  %v4694_v31 = vunpack.i.h.bf16 %v4692_v34  ;;  %v2550_v5 = vpop.f32.mrb[75].mxu0  ;;  %v2903_v6 = vpop.f32.mrb[75].mxu1 }
 0x362   : > { %v4682_v56 = vunpack.i.l.bf16 %v4681_v39  ;;  %v4683_v32 = vunpack.i.h.bf16 %v4681_v39  ;;  %v4704_v33 = vunpack.i.l.bf16 %v4703_v40  ;;  %v4705_v8 = vunpack.i.h.bf16 %v4703_v40 }
 0x363   : > { %v4673_v27 = vmax.f32 %v4671_v63, %v4672_v2  ;;  %v4695_v28 = vmax.f32 %v4693_v4, %v4694_v31  ;;  %v3934_v46 = vmax.f32 %v2545_v48, 0.0  ;;  %v3936_v15 = vmax.f32 %v2898_v43, 0.0  ;;  %2813 = vmatmul.mubr.bf16.gmra.mrb[180].mxu0 %v11740_v61  ;;  %3166 = vmatmul.mubr.bf16.gmra.mrb[180].mxu1 %v11740_v61 }
 0x364   : > { %v4684_v16 = vmax.f32 %v4682_v56, %v4683_v32  ;;  %v4706_v9 = vmax.f32 %v4704_v33, %v4705_v8  ;;  %v3935_v7 = vmax.f32 %v2547_v41, 0.0  ;;  %v3937_v49 = vmax.f32 %v2900_v3, 0.0 }
 0x365   : > { %v14923_v11 = vmov 0   ;;  %v4674_v34 = vrot.slane %v4673_v27, 4  ;;  %v4696_v39 = vrot.slane %v4695_v28, 4  ;;  %v2549_v40 = vadd.f32 %v2548_v47, %v11828_v50 }
 0x366   : > { %2822 = vmatprep.mubr.bf16.mxu0 %v14923_v11  ;;  %3175 = vmatprep.mubr.bf16.mxu1 %v14923_v11  ;;  %v2902_v63 = vadd.f32 %v2901_v62, %v11832_v51  ;;  %v4685_v48 = vrot.slane %v4684_v16, 4  ;;  %v4707_v43 = vrot.slane %v4706_v9, 4  ;;  %v2551_v2 = vadd.f32 %v2550_v5, %v11835_v54  ;;  %v2554_v31 = vpop.f32.mrb[76].mxu0  ;;  %v2907_v56 = vpop.f32.mrb[76].mxu1 }
 0x367   : > { %v2904_v4 = vadd.f32 %v2903_v6, %v11839_v55  ;;  %v4675_v41 = vmax.f32 %v4673_v27, %v4674_v34  ;;  %v4697_v3 = vmax.f32 %v4695_v28, %v4696_v39  ;;  %v3942_v32 = vmax.f32 %v2549_v40, 0.0  ;;  %v2556_v8 = vpop.f32.mrb[77].mxu0  ;;  %v2909_v61 = vpop.f32.mrb[77].mxu1 }
 0x368   : > { %v3944_v33 = vmax.f32 %v2902_v63, 0.0  ;;  %v4686_v42 = vmax.f32 %v4684_v16, %v4685_v48  ;;  %v4708_v18 = vmax.f32 %v4706_v9, %v4707_v43  ;;  %v3943_v22 = vmax.f32 %v2551_v2, 0.0  ;;  %v2558_v19 = vpop.f32.mrb[78].mxu0  ;;  %v2911_v62 = vpop.f32.mrb[78].mxu1 }
 0x369   : > { %v3945_v47 = vmax.f32 %v2904_v4, 0.0  ;;  %v4676_v20 = vrot.slane %v4675_v41, 2  ;;  %v4698_v52 = vrot.slane %v4697_v3, 2  ;;  %v11879_v53 = vpack.c.bf16 %v3942_v32, %v3934_v46  ;;  %v2560_v6 = vpop.f32.mrb[79].mxu0  ;;  %v2913_v10 = vpop.f32.mrb[79].mxu1 }
 0x36a   : > { %v11881_v5 = vpack.c.bf16 %v3944_v33, %v3936_v15  ;;  %v4687_v27 = vrot.slane %v4686_v42, 2  ;;  %v4709_v28 = vrot.slane %v4708_v18, 2  ;;  %v4431_v34 = vpack.c.bf16 %v3943_v22, %v3935_v7 }
 0x36b   : > { %v4433_v39 = vpack.c.bf16 %v3945_v47, %v3937_v49  ;;  %v4677_v40 = vmax.f32 %v4675_v41, %v4676_v20  ;;  %v4699_v63 = vmax.f32 %v4697_v3, %v4698_v52  ;;  %v2555_v16 = vadd.f32 %v2554_v31, %v11828_v50  ;;  %2823 = vmatmul.mubr.bf16.gmra.mrb[184].mxu0 %v11754_v30 }
 0x36c   : > { %v2908_v9 = vadd.f32 %v2907_v56, %v11832_v51  ;;  %v4688_v48 = vmax.f32 %v4686_v42, %v4687_v27  ;;  %v4710_v43 = vmax.f32 %v4708_v18, %v4709_v28  ;;  %v2557_v46 = vadd.f32 %v2556_v8, %v11835_v54  ;;  %3176 = vmatmul.mubr.bf16.gmra.mrb[184].mxu1 %v11754_v30 }
 0x36d   : > { %v2910_v15 = vadd.f32 %v2909_v61, %v11839_v55  ;;  %v4678_v2 = vrot.slane %v4677_v40, 1  ;;  %v4700_v4 = vrot.slane %v4699_v63, 1  ;;  %v3950_v22 = vmax.f32 %v2555_v16, 0.0  ;;  %2832 = vmatprep.mubr.bf16.mxu0 %v14923_v11  ;;  %3185 = vmatprep.mubr.bf16.mxu1 %v14923_v11 }
 0x36e   : > { %v3952_v7 = vmax.f32 %v2908_v9, 0.0  ;;  %v4689_v52 = vrot.slane %v4688_v48, 1  ;;  %v4711_v20 = vrot.slane %v4710_v43, 1  ;;  %v3951_v49 = vmax.f32 %v2557_v46, 0.0  ;;  %v2564_v42 = vpop.f32.mrb[80].mxu0  ;;  %v2917_v18 = vpop.f32.mrb[80].mxu1 }
 0x36f   : > { %v3953_v31 = vmax.f32 %v2910_v15, 0.0  ;;  %v4679_v56 = vmax.f32 %v4677_v40, %v4678_v2  ;;  %v4701_v41 = vmax.f32 %v4699_v63, %v4700_v4  ;;  %v2559_v61 = vadd.f32 %v2558_v19, %v11828_v50  ;;  %v2566_v32 = vpop.f32.mrb[81].mxu0  ;;  %v2919_v33 = vpop.f32.mrb[81].mxu1 }
 0x370   : > { %v2912_v3 = vadd.f32 %v2911_v62, %v11832_v51  ;;  %v4690_v8 = vmax.f32 %v4688_v48, %v4689_v52  ;;  %v4712_v47 = vmax.f32 %v4710_v43, %v4711_v20  ;;  %v2561_v27 = vadd.f32 %v2560_v6, %v11835_v54  ;;  %v2568_v16 = vpop.f32.mrb[82].mxu0  ;;  %v2921_v9 = vpop.f32.mrb[82].mxu1 }
 0x371   : > { %v2914_v28 = vadd.f32 %v2913_v10, %v11839_v55  ;;  %v4680_v46 = vpack.i.bf16 %v4679_v56, %v4679_v56  ;;  %v4702_v15 = vpack.i.bf16 %v4701_v41, %v4701_v41  ;;  %v3958_v30 = vmax.f32 %v2559_v61, 0.0  ;;  %v2570_v40 = vpop.f32.mrb[83].mxu0  ;;  %v2923_v63 = vpop.f32.mrb[83].mxu1 }
 0x372   : > { %v3960_v14 = vmax.f32 %v2912_v3, 0.0  ;;  %v4691_v2 = vpack.i.bf16 %v4690_v8, %v4690_v8  ;;  %v4713_v19 = vpack.i.bf16 %v4712_v47, %v4712_v47  ;;  %v3959_v4 = vmax.f32 %v2561_v27, 0.0 }
 0x373   : > { %v3961_v62 = vmax.f32 %v2914_v28, 0.0  ;;  %v11895_v24 = vunpack.c.l.bf16 %v4680_v46  ;;  %v11897_v48 = vunpack.c.l.bf16 %v4702_v15  ;;  %v4438_v43 = vpack.c.bf16 %v3958_v30, %v3950_v22  ;;  %2833 = vmatmul.mubr.bf16.gmra.mrb[188].mxu0 %v11752_v29 }
 0x374   : > { %v4440_v6 = vpack.c.bf16 %v3960_v14, %v3952_v7  ;;  %v11900_v10 = vunpack.c.l.bf16 %v4691_v2  ;;  %v11902_v52 = vunpack.c.l.bf16 %v4713_v19  ;;  %v4439_v20 = vpack.c.bf16 %v3959_v4, %v3951_v49  ;;  %3186 = vmatmul.mubr.bf16.gmra.mrb[188].mxu1 %v11752_v29  ;;  %3228 = vmatprep.mubr.bf16.mxu0 %v14923_v11 }
 0x375   : > { %v4441_v56 = vpack.c.bf16 %v3961_v62, %v3953_v31  ;;  %v4758_v41 = vmax.bf16 %v4438_v43, %v11879_v53  ;;  %v2565_v3 = vadd.f32 %v2564_v42, %v11828_v50  ;;  %v2918_v14 = vadd.f32 %v2917_v18, %v11832_v51  ;;  %3581 = vmatprep.mubr.bf16.mxu1 %v14923_v11 }
 0x376   : > { %v4780_v61 = vmax.bf16 %v4440_v6, %v11881_v5  ;;  %v4769_v30 = vmax.bf16 %v4439_v20, %v4431_v34  ;;  %v2567_v7 = vadd.f32 %v2566_v32, %v11835_v54  ;;  %v2920_v49 = vadd.f32 %v2919_v33, %v11839_v55  ;;  %v2574_v31 = vpop.f32.mrb[84].mxu0  ;;  %v2927_v8 = vpop.f32.mrb[84].mxu1 }
 0x377   : > { %v4791_v22 = vmax.bf16 %v4441_v56, %v4433_v39  ;;  %v4759_v47 = vunpack.i.l.bf16 %v4758_v41  ;;  %v4760_v27 = vunpack.i.h.bf16 %v4758_v41  ;;  %v2576_v46 = vpop.f32.mrb[85].mxu0  ;;  %v2929_v5 = vpop.f32.mrb[85].mxu1  ;;  %v3966_v4 = vmax.f32 %v2565_v3, 0.0 }
 0x378   : > { %v4781_v28 = vunpack.i.l.bf16 %v4780_v61  ;;  %v4782_v53 = vunpack.i.h.bf16 %v4780_v61  ;;  %v4770_v15 = vunpack.i.l.bf16 %v4769_v30  ;;  %v4771_v42 = vunpack.i.h.bf16 %v4769_v30  ;;  %v11913_v19 = vpop.f32.mrb[86].mxu0  ;;  %v11915_v34 = vpop.f32.mrb[86].mxu1 }
 0x379   : > { %v4792_v2 = vunpack.i.l.bf16 %v4791_v22  ;;  %v4793_v18 = vunpack.i.h.bf16 %v4791_v22  ;;  %v4761_v39 = vmax.f32 %v4759_v47, %v4760_v27  ;;  %v3968_v33 = vmax.f32 %v2918_v14, 0.0  ;;  %v11917_v62 = vpop.f32.mrb[87].mxu0  ;;  %v11919_v43 = vpop.f32.mrb[87].mxu1 }
 0x37a   : > { %v4783_v32 = vmax.f32 %v4781_v28, %v4782_v53  ;;  %v4772_v6 = vmax.f32 %v4770_v15, %v4771_v42  ;;  %v3967_v56 = vmax.f32 %v2567_v7, 0.0  ;;  %v3969_v41 = vmax.f32 %v2920_v49, 0.0 }
 0x37b   : > { %v4794_v20 = vmax.f32 %v4792_v2, %v4793_v18  ;;  %v4762_v61 = vrot.slane %v4761_v39, 4  ;;  %v2569_v22 = vadd.f32 %v2568_v16, %v11828_v50  ;;  %v2922_v29 = vadd.f32 %v2921_v9, %v11832_v51  ;;  %3229 = vmatmul.mubr.bf16.vlgmr.msra.gmra.mrb[192].mxu0 %v11508_v17 }
 0x37c   : > { %v4784_v30 = vrot.slane %v4783_v32, 4  ;;  %v4773_v47 = vrot.slane %v4772_v6, 4  ;;  %v2571_v3 = vadd.f32 %v2570_v40, %v11835_v54  ;;  %v2924_v14 = vadd.f32 %v2923_v63, %v11839_v55  ;;  %3582 = vmatmul.mubr.bf16.vlgmr.msra.gmra.mrb[192].mxu1 %v11508_v17  ;;  %3238 = vmatprep.mubr.bf16.mxu0 %v14923_v11 }
 0x37d   : > { %v4795_v27 = vrot.slane %v4794_v20, 4  ;;  %v4763_v7 = vmax.f32 %v4761_v39, %v4762_v61  ;;  %v3974_v28 = vmax.f32 %v2569_v22, 0.0  ;;  %v3976_v53 = vmax.f32 %v2922_v29, 0.0  ;;  %3591 = vmatprep.mubr.bf16.mxu1 %v14923_v11 }
 0x37e   : > { %v4785_v49 = vmax.f32 %v4783_v32, %v4784_v30  ;;  %v4774_v16 = vmax.f32 %v4772_v6, %v4773_v47  ;;  %v3975_v15 = vmax.f32 %v2571_v3, 0.0  ;;  %v3977_v42 = vmax.f32 %v2924_v14, 0.0  ;;  %v11929_v2 = vpop.f32.mrb[88].mxu0  ;;  %v11931_v18 = vpop.f32.mrb[88].mxu1 }
 0x37f   : > { %v4796_v9 = vmax.f32 %v4794_v20, %v4795_v27  ;;  %v4764_v40 = vrot.slane %v4763_v7, 2  ;;  %v11933_v12 = vpack.c.bf16 %v3974_v28, %v3966_v4  ;;  %v11935_v17 = vpack.c.bf16 %v3976_v53, %v3968_v33  ;;  %v11937_v39 = vpop.f32.mrb[89].mxu0  ;;  %v11939_v32 = vpop.f32.mrb[89].mxu1 }
 0x380   : > { %v4786_v63 = vrot.slane %v4785_v49, 2  ;;  %v4775_v29 = vrot.slane %v4774_v16, 2  ;;  %v11941_v20 = vpack.c.bf16 %v3975_v15, %v3967_v56  ;;  %v11943_v61 = vpack.c.bf16 %v3977_v42, %v3969_v41  ;;  %v11945_v30 = vpop.f32.mrb[90].mxu0  ;;  %v11947_v22 = vpop.f32.mrb[90].mxu1 }
 0x381   : > { %v4797_v6 = vrot.slane %v4796_v9, 2  ;;  %v4765_v47 = vmax.f32 %v4763_v7, %v4764_v40  ;;  %v2575_v33 = vadd.f32 %v2574_v31, %v11828_v50  ;;  %v2928_v27 = vadd.f32 %v2927_v8, %v11832_v51  ;;  %v11951_v3 = vpop.f32.mrb[91].mxu0  ;;  %v11953_v14 = vpop.f32.mrb[91].mxu1 }
 0x382   : > { %v4787_v4 = vmax.f32 %v4785_v49, %v4786_v63  ;;  %v4776_v28 = vmax.f32 %v4774_v16, %v4775_v29  ;;  %v2577_v56 = vadd.f32 %v2576_v46, %v11835_v54  ;;  %v2930_v41 = vadd.f32 %v2929_v5, %v11839_v55 }
 0x383   : > { %v4798_v53 = vmax.f32 %v4796_v9, %v4797_v6  ;;  %v4766_v15 = vrot.slane %v4765_v47, 1  ;;  %v3982_v57 = vmax.f32 %v2575_v33, 0.0  ;;  %v3984_v58 = vmax.f32 %v2928_v27, 0.0  ;;  %3239 = vmatmul.mubr.bf16.gmra.mrb[196].mxu0 %v11506_v13 }
 0x384   : > { %v4788_v42 = vrot.slane %v4787_v4, 1  ;;  %v4777_v7 = vrot.slane %v4776_v28, 1  ;;  %v3983_v49 = vmax.f32 %v2577_v56, 0.0  ;;  %v3985_v8 = vmax.f32 %v2930_v41, 0.0  ;;  %3592 = vmatmul.mubr.bf16.gmra.mrb[196].mxu1 %v11506_v13  ;;  %3248 = vmatprep.mubr.bf16.mxu0 %v14923_v11 }
 0x385   : > { %v4799_v31 = vrot.slane %v4798_v53, 1  ;;  %v4767_v16 = vmax.f32 %v4765_v47, %v4766_v15  ;;  %v2579_v46 = vadd.f32 %v11913_v19, %v11828_v50  ;;  %v2932_v5 = vadd.f32 %v11915_v34, %v11832_v51  ;;  %3601 = vmatprep.mubr.bf16.mxu1 %v14923_v11 }
 0x386   : > { %v4789_v9 = vmax.f32 %v4787_v4, %v4788_v42  ;;  %v4778_v40 = vmax.f32 %v4776_v28, %v4777_v7  ;;  %v2581_v29 = vadd.f32 %v11917_v62, %v11835_v54  ;;  %v2934_v13 = vadd.f32 %v11919_v43, %v11839_v55  ;;  %v11969_v6 = vpop.f32.mrb[92].mxu0  ;;  %v11971_v47 = vpop.f32.mrb[92].mxu1 }
 0x387   : > { %v4800_v63 = vmax.f32 %v4798_v53, %v4799_v31  ;;  %v4768_v4 = vpack.i.bf16 %v4767_v16, %v4767_v16  ;;  %v3990_v19 = vmax.f32 %v2579_v46, 0.0  ;;  %v3992_v27 = vmax.f32 %v2932_v5, 0.0  ;;  %v11973_v56 = vpop.f32.mrb[93].mxu0  ;;  %v11975_v34 = vpop.f32.mrb[93].mxu1 }
 0x388   : > { %v4790_v33 = vpack.i.bf16 %v4789_v9, %v4789_v9  ;;  %v4779_v28 = vpack.i.bf16 %v4778_v40, %v4778_v40  ;;  %v3991_v41 = vmax.f32 %v2581_v29, 0.0  ;;  %v3993_v15 = vmax.f32 %v2934_v13, 0.0  ;;  %v11977_v62 = vpop.f32.mrb[94].mxu0  ;;  %v11979_v42 = vpop.f32.mrb[94].mxu1 }
 0x389   : > { %v4801_v53 = vpack.i.bf16 %v4800_v63, %v4800_v63  ;;  %v6102_v43 = vunpack.c.l.bf16 %v4768_v4  ;;  %v4454_v31 = vpack.c.bf16 %v3990_v19, %v3982_v57  ;;  %v4456_v35 = vpack.c.bf16 %v3992_v27, %v3984_v58  ;;  %v11981_v16 = vpop.f32.mrb[95].mxu0  ;;  %v11983_v9 = vpop.f32.mrb[95].mxu1 }
 0x38a   : > { %v6104_v7 = vunpack.c.l.bf16 %v4790_v33  ;;  %v6103_v46 = vunpack.c.l.bf16 %v4779_v28  ;;  %v4455_v36 = vpack.c.bf16 %v3991_v41, %v3983_v49  ;;  %v4457_v21 = vpack.c.bf16 %v3993_v15, %v3985_v8 }
 0x38b   : > { %v6105_v5 = vunpack.c.l.bf16 %v4801_v53  ;;  %v11987_v40 = vsel %vm6350_vm4, %v6102_v43, %v11895_v24  ;;  %v4846_v29 = vmax.bf16 %v4454_v31, %v11933_v12  ;;  %v4868_v57 = vmax.bf16 %v4456_v35, %v11935_v17  ;;  %3249 = vmatmul.mubr.bf16.gmra.mrb[200].mxu0 %v11550_v38 }
 0x38c   : > { %v11991_v63 = vsel %vm6350_vm4, %v6104_v7, %v11897_v48  ;;  %v11998_v58 = vsel %vm6350_vm4, %v6103_v46, %v11900_v10  ;;  %v4857_v24 = vmax.bf16 %v4455_v36, %v11941_v20  ;;  %v4879_v8 = vmax.bf16 %v4457_v21, %v11943_v61  ;;  %3602 = vmatmul.mubr.bf16.gmra.mrb[200].mxu1 %v11550_v38 }
 0x38d   : > { %v12002_v49 = vsel %vm6350_vm4, %v6105_v5, %v11902_v52  ;;  %v4847_v48 = vunpack.i.l.bf16 %v4846_v29  ;;  %v4848_v12 = vunpack.i.h.bf16 %v4846_v29  ;;  %v4869_v13 = vunpack.i.l.bf16 %v4868_v57  ;;  %3258 = vmatprep.mubr.bf16.mxu0 %v14923_v11  ;;  %3611 = vmatprep.mubr.bf16.mxu1 %v14923_v11 }
 0x38e   : > { %v4870_v35 = vunpack.i.h.bf16 %v4868_v57  ;;  %v4858_v10 = vunpack.i.l.bf16 %v4857_v24  ;;  %v4859_v17 = vunpack.i.h.bf16 %v4857_v24  ;;  %v4880_v4 = vunpack.i.l.bf16 %v4879_v8  ;;  %v12009_v52 = vpop.f32.mrb[96].mxu0  ;;  %v12011_v19 = vpop.f32.mrb[96].mxu1 }
 0x38f   : > { %v4881_v33 = vunpack.i.h.bf16 %v4879_v8  ;;  %v4849_v36 = vmax.f32 %v4847_v48, %v4848_v12  ;;  %v2585_v38 = vadd.f32 %v11929_v2, %v11828_v50  ;;  %v2938_v20 = vadd.f32 %v11931_v18, %v11832_v51  ;;  %v12017_v61 = vpop.f32.mrb[97].mxu0  ;;  %v12019_v27 = vpop.f32.mrb[97].mxu1 }
 0x390   : > { %v4871_v21 = vmax.f32 %v4869_v13, %v4870_v35  ;;  %v4860_v28 = vmax.f32 %v4858_v10, %v4859_v17  ;;  %v2587_v41 = vadd.f32 %v11937_v39, %v11835_v54  ;;  %v2940_v15 = vadd.f32 %v11939_v32, %v11839_v55  ;;  %v12025_v43 = vpop.f32.mrb[98].mxu0  ;;  %v12027_v7 = vpop.f32.mrb[98].mxu1 }
 0x391   : > { %v4882_v53 = vmax.f32 %v4880_v4, %v4881_v33  ;;  %v4850_v2 = vrot.slane %v4849_v36, 4  ;;  %v3998_v46 = vmax.f32 %v2585_v38, 0.0  ;;  %v4000_v18 = vmax.f32 %v2938_v20, 0.0  ;;  %v12029_v5 = vpop.f32.mrb[99].mxu0  ;;  %v12031_v29 = vpop.f32.mrb[99].mxu1 }
 0x392   : > { %v4872_v31 = vrot.slane %v4871_v21, 4  ;;  %v4861_v57 = vrot.slane %v4860_v28, 4  ;;  %v3999_v8 = vmax.f32 %v2587_v41, 0.0  ;;  %v4001_v48 = vmax.f32 %v2940_v15, 0.0 }
 0x393   : > { %v4883_v24 = vrot.slane %v4882_v53, 4  ;;  %v4851_v39 = vmax.f32 %v4849_v36, %v4850_v2  ;;  %v2589_v32 = vadd.f32 %v11945_v30, %v11828_v50  ;;  %v2942_v13 = vadd.f32 %v11947_v22, %v11832_v51  ;;  %3259 = vmatmul.mubr.bf16.gmra.mrb[204].mxu0 %v11548_v37 }
 0x394   : > { %v4873_v12 = vmax.f32 %v4871_v21, %v4872_v31  ;;  %v4862_v35 = vmax.f32 %v4860_v28, %v4861_v57  ;;  %v2591_v17 = vadd.f32 %v11951_v3, %v11835_v54  ;;  %v2944_v4 = vadd.f32 %v11953_v14, %v11839_v55  ;;  %3612 = vmatmul.mubr.bf16.gmra.mrb[204].mxu1 %v11548_v37 }
 0x395   : > { %v4884_v10 = vmax.f32 %v4882_v53, %v4883_v24  ;;  %v4852_v33 = vrot.slane %v4851_v39, 2  ;;  %v4006_v21 = vmax.f32 %v2589_v32, 0.0  ;;  %v4008_v38 = vmax.f32 %v2942_v13, 0.0  ;;  %3268 = vmatprep.mubr.bf16.mxu0 %v14923_v11  ;;  %3621 = vmatprep.mubr.bf16.mxu1 %v14923_v11 }
 0x396   : > { %v4874_v36 = vrot.slane %v4873_v12, 2  ;;  %v4863_v30 = vrot.slane %v4862_v35, 2  ;;  %v4007_v20 = vmax.f32 %v2591_v17, 0.0  ;;  %v4009_v28 = vmax.f32 %v2944_v4, 0.0  ;;  %v12045_v53 = vpop.f32.mrb[100].mxu0  ;;  %v12047_v3 = vpop.f32.mrb[100].mxu1 }
 0x397   : > { %v4885_v22 = vrot.slane %v4884_v10, 2  ;;  %v4853_v14 = vmax.f32 %v4851_v39, %v4852_v33  ;;  %v12049_v37 = vpack.c.bf16 %v4006_v21, %v3998_v46  ;;  %v12051_v15 = vpack.c.bf16 %v4008_v38, %v4000_v18  ;;  %v12053_v2 = vpop.f32.mrb[101].mxu0  ;;  %v12055_v31 = vpop.f32.mrb[101].mxu1 }
 0x398   : > { %v4875_v41 = vmax.f32 %v4873_v12, %v4874_v36  ;;  %v4864_v57 = vmax.f32 %v4862_v35, %v4863_v30  ;;  %v12057_v32 = vpack.c.bf16 %v4007_v20, %v3999_v8  ;;  %v12059_v13 = vpack.c.bf16 %v4009_v28, %v4001_v48  ;;  %v12061_v17 = vpop.f32.mrb[102].mxu0  ;;  %v12063_v4 = vpop.f32.mrb[102].mxu1 }
 0x399   : > { %v4886_v24 = vmax.f32 %v4884_v10, %v4885_v22  ;;  %v4854_v39 = vrot.slane %v4853_v14, 1  ;;  %v2595_v46 = vadd.f32 %v11969_v6, %v11828_v50  ;;  %v2948_v18 = vadd.f32 %v11971_v47, %v11832_v51  ;;  %v12069_v33 = vpop.f32.mrb[103].mxu0  ;;  %v12071_v35 = vpop.f32.mrb[103].mxu1 }
 0x39a   : > { %v4876_v12 = vrot.slane %v4875_v41, 1  ;;  %v4865_v8 = vrot.slane %v4864_v57, 1  ;;  %v2597_v48 = vadd.f32 %v11973_v56, %v11835_v54  ;;  %v2950_v36 = vadd.f32 %v11975_v34, %v11839_v55 }
 0x39b   : > { %v4887_v10 = vrot.slane %v4886_v24, 1  ;;  %v4855_v21 = vmax.f32 %v4853_v14, %v4854_v39  ;;  %v4014_v30 = vmax.f32 %v2595_v46, 0.0  ;;  %v4016_v22 = vmax.f32 %v2948_v18, 0.0  ;;  %3269 = vmatmul.mubr.bf16.gmra.mrb[208].mxu0 %v11574_v1 }
 0x39c   : > { %v4877_v38 = vmax.f32 %v4875_v41, %v4876_v12  ;;  %v4866_v6 = vmax.f32 %v4864_v57, %v4865_v8  ;;  %v4015_v20 = vmax.f32 %v2597_v48, 0.0  ;;  %v4017_v28 = vmax.f32 %v2950_v36, 0.0  ;;  %3622 = vmatmul.mubr.bf16.gmra.mrb[208].mxu1 %v11574_v1  ;;  %3278 = vmatprep.mubr.bf16.mxu0 %v14923_v11 }
 0x39d   : > { %v4888_v47 = vmax.f32 %v4886_v24, %v4887_v10  ;;  %v4856_v23 = vpack.i.bf16 %v4855_v21, %v4855_v21  ;;  %v2599_v56 = vadd.f32 %v11977_v62, %v11828_v50  ;;  %v2952_v34 = vadd.f32 %v11979_v42, %v11832_v51  ;;  %3631 = vmatprep.mubr.bf16.mxu1 %v14923_v11 }
 0x39e   : > { %v4878_v59 = vpack.i.bf16 %v4877_v38, %v4877_v38  ;;  %v4867_v14 = vpack.i.bf16 %v4866_v6, %v4866_v6  ;;  %v2601_v57 = vadd.f32 %v11981_v16, %v11835_v54  ;;  %v2954_v1 = vadd.f32 %v11983_v9, %v11839_v55  ;;  %v12089_v24 = vpop.f32.mrb[104].mxu0  ;;  %v12091_v39 = vpop.f32.mrb[104].mxu1 }
 0x39f   : > { %v4889_v41 = vpack.i.bf16 %v4888_v47, %v4888_v47  ;;  %v6110_v12 = vunpack.c.l.bf16 %v4856_v23  ;;  %v4022_v62 = vmax.f32 %v2599_v56, 0.0  ;;  %v4024_v18 = vmax.f32 %v2952_v34, 0.0  ;;  %v12093_v8 = vpop.f32.mrb[105].mxu0  ;;  %v12095_v42 = vpop.f32.mrb[105].mxu1 }
 0x3a0   : > { %v6112_v46 = vunpack.c.l.bf16 %v4878_v59  ;;  %v6111_v10 = vunpack.c.l.bf16 %v4867_v14  ;;  %v4023_v36 = vmax.f32 %v2601_v57, 0.0  ;;  %v4025_v21 = vmax.f32 %v2954_v1, 0.0  ;;  %v12097_v16 = vpop.f32.mrb[106].mxu0  ;;  %v12099_v38 = vpop.f32.mrb[106].mxu1 }
 0x3a1   : > { %v6113_v48 = vunpack.c.l.bf16 %v4889_v41  ;;  %v12103_v9 = vsel %vm6352_vm5, %v6110_v12, %v11987_v40  ;;  %v4470_v23 = vpack.c.bf16 %v4022_v62, %v4014_v30  ;;  %v4472_v6 = vpack.c.bf16 %v4024_v18, %v4016_v22  ;;  %v12109_v47 = vpop.f32.mrb[107].mxu0  ;;  %v12111_v56 = vpop.f32.mrb[107].mxu1 }
 0x3a2   : > { %v12107_v59 = vsel %vm6352_vm5, %v6112_v46, %v11991_v63  ;;  %v12115_v34 = vsel %vm6352_vm5, %v6111_v10, %v11998_v58  ;;  %v4471_v40 = vpack.c.bf16 %v4023_v36, %v4015_v20  ;;  %v4473_v41 = vpack.c.bf16 %v4025_v21, %v4017_v28 }
 0x3a3   : > { %v12119_v14 = vsel %vm6352_vm5, %v6113_v48, %v12002_v49  ;;  %v4934_v57 = vmax.bf16 %v4470_v23, %v12049_v37  ;;  %v4956_v63 = vmax.bf16 %v4472_v6, %v12051_v15  ;;  %v2605_v30 = vadd.f32 %v12009_v52, %v11828_v50  ;;  %3279 = vmatmul.mubr.bf16.gmra.mrb[212].mxu0 %v11572_v0 }
 0x3a4   : > { %v2958_v22 = vadd.f32 %v12011_v19, %v11832_v51  ;;  %v4945_v58 = vmax.bf16 %v4471_v40, %v12057_v32  ;;  %v4967_v1 = vmax.bf16 %v4473_v41, %v12059_v13  ;;  %v2607_v49 = vadd.f32 %v12017_v61, %v11835_v54  ;;  %3632 = vmatmul.mubr.bf16.gmra.mrb[212].mxu1 %v11572_v0 }
 0x3a5   : > { %v2960_v37 = vadd.f32 %v12019_v27, %v11839_v55  ;;  %v4935_v15 = vunpack.i.l.bf16 %v4934_v57  ;;  %v4936_v20 = vunpack.i.h.bf16 %v4934_v57  ;;  %v4957_v52 = vunpack.i.l.bf16 %v4956_v63  ;;  %3288 = vmatprep.mubr.bf16.mxu0 %v14923_v11  ;;  %3641 = vmatprep.mubr.bf16.mxu1 %v14923_v11 }
 0x3a6   : > { %v4958_v28 = vunpack.i.h.bf16 %v4956_v63  ;;  %v4946_v19 = vunpack.i.l.bf16 %v4945_v58  ;;  %v4947_v32 = vunpack.i.h.bf16 %v4945_v58  ;;  %v4968_v12 = vunpack.i.l.bf16 %v4967_v1  ;;  %v12137_v46 = vpop.f32.mrb[108].mxu0  ;;  %v12139_v61 = vpop.f32.mrb[108].mxu1 }
 0x3a7   : > { %v4969_v13 = vunpack.i.h.bf16 %v4967_v1  ;;  %v4937_v62 = vmax.f32 %v4935_v15, %v4936_v20  ;;  %v4030_v18 = vmax.f32 %v2605_v30, 0.0  ;;  %v4032_v0 = vmax.f32 %v2958_v22, 0.0  ;;  %v12141_v10 = vpop.f32.mrb[109].mxu0  ;;  %v12143_v48 = vpop.f32.mrb[109].mxu1 }
 0x3a8   : > { %v4959_v27 = vmax.f32 %v4957_v52, %v4958_v28  ;;  %v4948_v36 = vmax.f32 %v4946_v19, %v4947_v32  ;;  %v4031_v23 = vmax.f32 %v2607_v49, 0.0  ;;  %v4033_v6 = vmax.f32 %v2960_v37, 0.0  ;;  %v12145_v40 = vpop.f32.mrb[110].mxu0  ;;  %v12147_v41 = vpop.f32.mrb[110].mxu1 }
 0x3a9   : > { %v4970_v21 = vmax.f32 %v4968_v12, %v4969_v13  ;;  %14924 = vst [vmem:[#allocation43_spill] sm:$0xff] %v12147_v41  ;;  %v4938_v57 = vrot.slane %v4937_v62, 4  ;;  %v2609_v58 = vadd.f32 %v12025_v43, %v11828_v50  ;;  %v2962_v30 = vadd.f32 %v12027_v7, %v11832_v51  ;;  %v12153_v22 = vpop.f32.mrb[111].mxu0  ;;  %v12155_v1 = vpop.f32.mrb[111].mxu1 }
 0x3aa   : > { %v4960_v63 = vrot.slane %v4959_v27, 4  ;;  %14925 = vst [vmem:[#allocation44_spill] sm:$0xff] %v12153_v22  ;;  %14926 = vst [vmem:[#allocation45_spill] sm:$0xff] %v12155_v1  ;;  %v4949_v15 = vrot.slane %v4948_v36, 4  ;;  %v2611_v49 = vadd.f32 %v12029_v5, %v11835_v54  ;;  %v2964_v37 = vadd.f32 %v12031_v29, %v11839_v55 }
 0x3ab   : > { %v4971_v20 = vrot.slane %v4970_v21, 4  ;;  %v4939_v52 = vmax.f32 %v4937_v62, %v4938_v57  ;;  %v4038_v19 = vmax.f32 %v2609_v58, 0.0  ;;  %v4040_v32 = vmax.f32 %v2962_v30, 0.0  ;;  %3289 = vmatmul.mubr.bf16.gmra.mrb[216].mxu0 %v11586_v26 }
 0x3ac   : > { %v4961_v28 = vmax.f32 %v4959_v27, %v4960_v63  ;;  %v4950_v43 = vmax.f32 %v4948_v36, %v4949_v15  ;;  %v4039_v12 = vmax.f32 %v2611_v49, 0.0  ;;  %v4041_v13 = vmax.f32 %v2964_v37, 0.0  ;;  %3642 = vmatmul.mubr.bf16.gmra.mrb[216].mxu1 %v11586_v26  ;;  %3298 = vmatprep.mubr.bf16.mxu0 %v14923_v11 }
 0x3ad   : > { %v4972_v7 = vmax.f32 %v4970_v21, %v4971_v20  ;;  %v4940_v1 = vrot.slane %v4939_v52, 2  ;;  %v12164_v5 = vpack.c.bf16 %v4038_v19, %v4030_v18  ;;  %v12166_v41 = vpack.c.bf16 %v4040_v32, %v4032_v0  ;;  %3651 = vmatprep.mubr.bf16.mxu1 %v14923_v11 }
 0x3ae   : > { %v4962_v22 = vrot.slane %v4961_v28, 2  ;;  %v4951_v29 = vrot.slane %v4950_v43, 2  ;;  %v12169_v27 = vpack.c.bf16 %v4039_v12, %v4031_v23  ;;  %v12171_v36 = vpack.c.bf16 %v4041_v13, %v4033_v6  ;;  %v12173_v21 = vpop.f32.mrb[112].mxu0  ;;  %v12175_v26 = vpop.f32.mrb[112].mxu1 }
 0x3af   : > { %v4973_v62 = vrot.slane %v4972_v7, 2  ;;  %v4941_v57 = vmax.f32 %v4939_v52, %v4940_v1  ;;  %v2615_v18 = vadd.f32 %v12045_v53, %v11828_v50  ;;  %v2968_v0 = vadd.f32 %v12047_v3, %v11832_v51  ;;  %v12181_v58 = vpop.f32.mrb[113].mxu0  ;;  %v12183_v30 = vpop.f32.mrb[113].mxu1 }
 0x3b0   : > { %v4963_v63 = vmax.f32 %v4961_v28, %v4962_v22  ;;  %v4952_v23 = vmax.f32 %v4950_v43, %v4951_v29  ;;  %v2617_v6 = vadd.f32 %v12053_v2, %v11835_v54  ;;  %v2970_v20 = vadd.f32 %v12055_v31, %v11839_v55  ;;  %v12189_v1 = vpop.f32.mrb[114].mxu0  ;;  %v12191_v22 = vpop.f32.mrb[114].mxu1 }
 0x3b1   : > { %v4974_v15 = vmax.f32 %v4972_v7, %v4973_v62  ;;  %v4942_v53 = vrot.slane %v4941_v57, 1  ;;  %v4046_v37 = vmax.f32 %v2615_v18, 0.0  ;;  %v4048_v3 = vmax.f32 %v2968_v0, 0.0  ;;  %v12193_v52 = vpop.f32.mrb[115].mxu0  ;;  %v12195_v28 = vpop.f32.mrb[115].mxu1 }
 0x3b2   : > { %v4964_v49 = vrot.slane %v4963_v63, 1  ;;  %14927 = vst [vmem:[#allocation46_spill] sm:$0xff] %v12195_v28  ;;  %v4953_v19 = vrot.slane %v4952_v23, 1  ;;  %v4047_v43 = vmax.f32 %v2617_v6, 0.0  ;;  %v4049_v7 = vmax.f32 %v2970_v20, 0.0 }
 0x3b3   : > { %v4975_v32 = vrot.slane %v4974_v15, 1  ;;  %v4943_v2 = vmax.f32 %v4941_v57, %v4942_v53  ;;  %v2619_v31 = vadd.f32 %v12061_v17, %v11828_v50  ;;  %v2972_v13 = vadd.f32 %v12063_v4, %v11832_v51  ;;  %3299 = vmatmul.mubr.bf16.gmra.mrb[220].mxu0 %v11584_v25 }
 0x3b4   : > { %v4965_v12 = vmax.f32 %v4963_v63, %v4964_v49  ;;  %v4954_v29 = vmax.f32 %v4952_v23, %v4953_v19  ;;  %v2621_v18 = vadd.f32 %v12069_v33, %v11835_v54  ;;  %v2974_v0 = vadd.f32 %v12071_v35, %v11839_v55  ;;  %3652 = vmatmul.mubr.bf16.gmra.mrb[220].mxu1 %v11584_v25 }
 0x3b5   : > { %v4976_v62 = vmax.f32 %v4974_v15, %v4975_v32  ;;  %v4944_v57 = vpack.i.bf16 %v4943_v2, %v4943_v2  ;;  %v4054_v6 = vmax.f32 %v2619_v31, 0.0  ;;  %v4056_v20 = vmax.f32 %v2972_v13, 0.0  ;;  %3308 = vmatprep.mubr.bf16.mxu0 %v14923_v11  ;;  %3661 = vmatprep.mubr.bf16.mxu1 %v14923_v11 }
 0x3b6   : > { %v4966_v63 = vpack.i.bf16 %v4965_v12, %v4965_v12  ;;  %v4955_v17 = vpack.i.bf16 %v4954_v29, %v4954_v29  ;;  %v4055_v23 = vmax.f32 %v2621_v18, 0.0  ;;  %v4057_v15 = vmax.f32 %v2974_v0, 0.0  ;;  %v12209_v53 = vpop.f32.mrb[116].mxu0  ;;  %v12211_v33 = vpop.f32.mrb[116].mxu1 }
 0x3b7   : > { %v4977_v4 = vpack.i.bf16 %v4976_v62, %v4976_v62  ;;  %v6118_v49 = vunpack.c.l.bf16 %v4944_v57  ;;  %v4486_v19 = vpack.c.bf16 %v4054_v6, %v4046_v37  ;;  %v4488_v25 = vpack.c.bf16 %v4056_v20, %v4048_v3  ;;  %v12213_v32 = vpop.f32.mrb[117].mxu0  ;;  %v12215_v2 = vpop.f32.mrb[117].mxu1 }
 0x3b8   : > { %v6120_v35 = vunpack.c.l.bf16 %v4966_v63  ;;  %v6119_v12 = vunpack.c.l.bf16 %v4955_v17  ;;  %v4487_v13 = vpack.c.bf16 %v4055_v23, %v4047_v43  ;;  %v4489_v28 = vpack.c.bf16 %v4057_v15, %v4049_v7  ;;  %v12217_v29 = vpop.f32.mrb[118].mxu0  ;;  %v12219_v62 = vpop.f32.mrb[118].mxu1 }
 0x3b9   : > { %v6121_v31 = vunpack.c.l.bf16 %v4977_v4  ;;  %v12223_v18 = vsel %vm6354_vm6, %v6118_v49, %v12103_v9  ;;  %v5022_v3 = vmax.bf16 %v4486_v19, %v12164_v5  ;;  %v5044_v0 = vmax.bf16 %v4488_v25, %v12166_v41  ;;  %v12231_v57 = vpop.f32.mrb[119].mxu0  ;;  %v12233_v43 = vpop.f32.mrb[119].mxu1 }
 0x3ba   : > { %v12227_v37 = vsel %vm6354_vm6, %v6120_v35, %v12107_v59  ;;  %v12237_v7 = vsel %vm6354_vm6, %v6119_v12, %v12115_v34  ;;  %v5033_v63 = vmax.bf16 %v4487_v13, %v12169_v27  ;;  %v5055_v59 = vmax.bf16 %v4489_v28, %v12171_v36 }
 0x3bb   : > { %v12241_v9 = vsel %vm6354_vm6, %v6121_v31, %v12119_v14  ;;  %v5023_v6 = vunpack.i.l.bf16 %v5022_v3  ;;  %v5024_v5 = vunpack.i.h.bf16 %v5022_v3  ;;  %v5045_v20 = vunpack.i.l.bf16 %v5044_v0  ;;  %3309 = vmatmul.mubr.bf16.gmra.mrb[224].mxu0 %v11610_v45 }
 0x3bc   : > { %v5046_v41 = vunpack.i.h.bf16 %v5044_v0  ;;  %v5034_v17 = vunpack.i.l.bf16 %v5033_v63  ;;  %v5035_v4 = vunpack.i.h.bf16 %v5033_v63  ;;  %v5056_v23 = vunpack.i.l.bf16 %v5055_v59  ;;  %3662 = vmatmul.mubr.bf16.gmra.mrb[224].mxu1 %v11610_v45  ;;  %3318 = vmatprep.mubr.bf16.mxu0 %v14923_v11 }
 0x3bd   : > { %v5057_v15 = vunpack.i.h.bf16 %v5055_v59  ;;  %v5025_v34 = vmax.f32 %v5023_v6, %v5024_v5  ;;  %v2625_v27 = vadd.f32 %v12089_v24, %v11828_v50  ;;  %v2978_v36 = vadd.f32 %v12091_v39, %v11832_v51  ;;  %3671 = vmatprep.mubr.bf16.mxu1 %v14923_v11 }
 0x3be   : > { %v5047_v14 = vmax.f32 %v5045_v20, %v5046_v41  ;;  %v5036_v28 = vmax.f32 %v5034_v17, %v5035_v4  ;;  %v2627_v35 = vadd.f32 %v12093_v8, %v11835_v54  ;;  %v2980_v45 = vadd.f32 %v12095_v42, %v11839_v55  ;;  %v12257_v19 = vpop.f32.mrb[120].mxu0  ;;  %v12259_v25 = vpop.f32.mrb[120].mxu1 }
 0x3bf   : > { %v5058_v49 = vmax.f32 %v5056_v23, %v5057_v15  ;;  %v5026_v12 = vrot.slane %v5025_v34, 4  ;;  %v4062_v24 = vmax.f32 %v2625_v27, 0.0  ;;  %v4064_v13 = vmax.f32 %v2978_v36, 0.0  ;;  %v12261_v3 = vpop.f32.mrb[121].mxu0  ;;  %v12263_v39 = vpop.f32.mrb[121].mxu1 }
 0x3c0   : > { %v5048_v31 = vrot.slane %v5047_v14, 4  ;;  %v5037_v0 = vrot.slane %v5036_v28, 4  ;;  %v4063_v59 = vmax.f32 %v2627_v35, 0.0  ;;  %v4065_v6 = vmax.f32 %v2980_v45, 0.0  ;;  %v12265_v8 = vpop.f32.mrb[122].mxu0  ;;  %v12267_v5 = vpop.f32.mrb[122].mxu1 }
 0x3c1   : > { %v5059_v63 = vrot.slane %v5058_v49, 4  ;;  %v5027_v42 = vmax.f32 %v5025_v34, %v5026_v12  ;;  %v2629_v41 = vadd.f32 %v12097_v16, %v11828_v50  ;;  %v2982_v17 = vadd.f32 %v12099_v38, %v11832_v51  ;;  %v12273_v4 = vpop.f32.mrb[123].mxu0  ;;  %v12275_v23 = vpop.f32.mrb[123].mxu1 }
 0x3c2   : > { %v5049_v20 = vmax.f32 %v5047_v14, %v5048_v31  ;;  %14928 = vst [vmem:[#allocation47_spill] sm:$0xff] %v12273_v4  ;;  %14929 = vst [vmem:[#allocation48_spill] sm:$0xff] %v12275_v23  ;;  %v5038_v15 = vmax.f32 %v5036_v28, %v5037_v0  ;;  %v2631_v36 = vadd.f32 %v12109_v47, %v11835_v54 }
 0x3c3   : > { %v5060_v27 = vmax.f32 %v5058_v49, %v5059_v63  ;;  %v2984_v35 = vadd.f32 %v12111_v56, %v11839_v55  ;;  %v5028_v34 = vrot.slane %v5027_v42, 2  ;;  %v4070_v45 = vmax.f32 %v2629_v41, 0.0  ;;  %3319 = vmatmul.mubr.bf16.gmra.mrb[228].mxu0 %v11608_v44 }
 0x3c4   : > { %v5050_v14 = vrot.slane %v5049_v20, 2  ;;  %v4072_v12 = vmax.f32 %v2982_v17, 0.0  ;;  %v5039_v16 = vrot.slane %v5038_v15, 2  ;;  %v4071_v31 = vmax.f32 %v2631_v36, 0.0  ;;  %3672 = vmatmul.mubr.bf16.gmra.mrb[228].mxu1 %v11608_v44  ;;  %3328 = vmatprep.mubr.bf16.mxu0 %v14923_v11 }
 0x3c5   : > { %v5061_v38 = vrot.slane %v5060_v27, 2  ;;  %v4073_v4 = vmax.f32 %v2984_v35, 0.0  ;;  %v5029_v28 = vmax.f32 %v5027_v42, %v5028_v34  ;;  %v12284_v47 = vpack.c.bf16 %v4070_v45, %v4062_v24  ;;  %3681 = vmatprep.mubr.bf16.mxu1 %v14923_v11 }
 0x3c6   : > { %v5051_v49 = vmax.f32 %v5049_v20, %v5050_v14  ;;  %v12286_v0 = vpack.c.bf16 %v4072_v12, %v4064_v13  ;;  %v5040_v56 = vmax.f32 %v5038_v15, %v5039_v16  ;;  %v12289_v41 = vpack.c.bf16 %v4071_v31, %v4063_v59  ;;  %v12293_v36 = vpop.f32.mrb[124].mxu0  ;;  %v12295_v35 = vpop.f32.mrb[124].mxu1 }
 0x3c7   : > { %v5062_v63 = vmax.f32 %v5060_v27, %v5061_v38  ;;  %v12291_v17 = vpack.c.bf16 %v4073_v4, %v4065_v6  ;;  %14930 = vst [vmem:[#allocation49_spill] sm:$0xff] %v12295_v35  ;;  %v5030_v44 = vrot.slane %v5029_v28, 1  ;;  %v2635_v24 = vadd.f32 %v12137_v46, %v11828_v50  ;;  %v12301_v42 = vpop.f32.mrb[125].mxu0  ;;  %v12303_v20 = vpop.f32.mrb[125].mxu1 }
 0x3c8   : > { %v5052_v23 = vrot.slane %v5051_v49, 1  ;;  %v2988_v13 = vadd.f32 %v12139_v61, %v11832_v51  ;;  %14931 = vst [vmem:[#allocation50_spill] sm:$0xff] %v12301_v42  ;;  %14932 = vst [vmem:[#allocation51_spill] sm:$0xff] %v12303_v20  ;;  %v5041_v59 = vrot.slane %v5040_v56, 1  ;;  %v2637_v6 = vadd.f32 %v12141_v10, %v11835_v54  ;;  %v12309_v27 = vpop.f32.mrb[126].mxu0  ;;  %v12311_v34 = vpop.f32.mrb[126].mxu1 }
 0x3c9   : > { %v5063_v15 = vrot.slane %v5062_v63, 1  ;;  %v2990_v4 = vadd.f32 %v12143_v48, %v11839_v55  ;;  %v5031_v46 = vmax.f32 %v5029_v28, %v5030_v44  ;;  %v4078_v61 = vmax.f32 %v2635_v24, 0.0  ;;  %v12313_v45 = vpop.f32.mrb[127].mxu0  ;;  %v12315_v12 = vpop.f32.mrb[127].mxu1  ;;  %v14935_v24 = vld [vmem:[#allocation44_spill] sm:$0xff] }
 0x3ca   : > { %v5053_v14 = vmax.f32 %v5051_v49, %v5052_v23  ;;  %14933 = vst [vmem:[#allocation52_spill] sm:$0xff] %v12315_v12  ;;  %v5042_v16 = vmax.f32 %v5040_v56, %v5041_v59  ;;  %v4080_v31 = vmax.f32 %v2988_v13, 0.0  ;;  %v4079_v20 = vmax.f32 %v2637_v6, 0.0  ;;  %v14934_v23 = vld [vmem:[#allocation43_spill] sm:$0xff]  ;;  %v14936_v59 = vld [vmem:[#allocation45_spill] sm:$0xff] }
 0x3cb   : > { %v5064_v38 = vmax.f32 %v5062_v63, %v5063_v15  ;;  %v5032_v10 = vpack.i.bf16 %v5031_v46, %v5031_v46  ;;  %v4081_v35 = vmax.f32 %v2990_v4, 0.0  ;;  %v2639_v48 = vadd.f32 %v12145_v40, %v11828_v50  ;;  %3329 = vmatmul.mubr.bf16.gmra.mrb[232].mxu0 %v11622_v60 }
 0x3cc   : > { %v5054_v42 = vpack.i.bf16 %v5053_v14, %v5053_v14  ;;  %v5043_v28 = vpack.i.bf16 %v5042_v16, %v5042_v16  ;;  %v2992_v49 = vadd.f32 %v14934_v23, %v11832_v51  ;;  %v2641_v12 = vadd.f32 %v14935_v24, %v11835_v54  ;;  %3682 = vmatmul.mubr.bf16.gmra.mrb[232].mxu1 %v11622_v60 }
 0x3cd   : > { %v5065_v44 = vpack.i.bf16 %v5064_v38, %v5064_v38  ;;  %v6126_v56 = vunpack.c.l.bf16 %v5032_v10  ;;  %v4086_v13 = vmax.f32 %v2639_v48, 0.0  ;;  %v2994_v15 = vadd.f32 %v14936_v59, %v11839_v55  ;;  %3338 = vmatprep.mubr.bf16.mxu0 %v14923_v11  ;;  %3691 = vmatprep.mubr.bf16.mxu1 %v14923_v11 }
 0x3ce   : > { %v6128_v63 = vunpack.c.l.bf16 %v5054_v42  ;;  %v6127_v40 = vunpack.c.l.bf16 %v5043_v28  ;;  %v4088_v4 = vmax.f32 %v2992_v49, 0.0  ;;  %v4087_v46 = vmax.f32 %v2641_v12, 0.0  ;;  %v12329_v14 = vpop.f32.mrb[128].mxu0  ;;  %v12331_v16 = vpop.f32.mrb[128].mxu1 }
 0x3cf   : > { %v6129_v6 = vunpack.c.l.bf16 %v5065_v44  ;;  %v12335_v60 = vsel %vm6356_vm7, %v6126_v56, %v12223_v18  ;;  %v4502_v38 = vpack.c.bf16 %v4086_v13, %v4078_v61  ;;  %v4089_v10 = vmax.f32 %v2994_v15, 0.0  ;;  %v12341_v48 = vpop.f32.mrb[129].mxu0  ;;  %v12343_v28 = vpop.f32.mrb[129].mxu1 }
 0x3d0   : > { %v12339_v42 = vsel %vm6356_vm7, %v6128_v63, %v12227_v37  ;;  %v12347_v12 = vsel %vm6356_vm7, %v6127_v40, %v12237_v7  ;;  %v4504_v18 = vpack.c.bf16 %v4088_v4, %v4080_v31  ;;  %v4503_v23 = vpack.c.bf16 %v4087_v46, %v4079_v20  ;;  %v12353_v49 = vpop.f32.mrb[130].mxu0  ;;  %v12355_v37 = vpop.f32.mrb[130].mxu1 }
 0x3d1   : > { %v12351_v44 = vsel %vm6356_vm7, %v6129_v6, %v12241_v9  ;;  %v5110_v61 = vmax.bf16 %v4502_v38, %v12284_v47  ;;  %v4505_v24 = vpack.c.bf16 %v4089_v10, %v4081_v35  ;;  %v2645_v56 = vadd.f32 %v12173_v21, %v11828_v50  ;;  %v12362_v63 = vpop.f32.mrb[131].mxu0  ;;  %v12364_v13 = vpop.f32.mrb[131].mxu1 }
 0x3d2   : > { %v2998_v7 = vadd.f32 %v12175_v26, %v11832_v51  ;;  %14937 = vst [vmem:[#allocation43_spill] sm:$0xff] %v12362_v63  ;;  %14938 = vst [vmem:[#allocation44_spill] sm:$0xff] %v12364_v13  ;;  %v5132_v9 = vmax.bf16 %v4504_v18, %v12286_v0  ;;  %v5121_v20 = vmax.bf16 %v4503_v23, %v12289_v41  ;;  %v14939_v26 = vld [vmem:[#allocation19_spill] sm:$0xff] }
 0x3d3   : > { %v2647_v31 = vadd.f32 %v12181_v58, %v11835_v54  ;;  %v3000_v47 = vadd.f32 %v12183_v30, %v11839_v55  ;;  %v5111_v35 = vunpack.i.l.bf16 %v5110_v61  ;;  %v5112_v59 = vunpack.i.h.bf16 %v5110_v61  ;;  %3339 = vmatmul.mubr.bf16.gmra.mrb[236].mxu0 %v14939_v26 }
 0x3d4   : > { %v5143_v21 = vmax.bf16 %v4505_v24, %v12291_v17  ;;  %v4094_v15 = vmax.f32 %v2645_v56, 0.0  ;;  %v5133_v40 = vunpack.i.l.bf16 %v5132_v9  ;;  %v5134_v6 = vunpack.i.h.bf16 %v5132_v9  ;;  %3692 = vmatmul.mubr.bf16.gmra.mrb[236].mxu1 %v14939_v26  ;;  %3348 = vmatprep.mubr.bf16.mxu0 %v14923_v11 }
 0x3d5   : > { %v5122_v4 = vunpack.i.l.bf16 %v5121_v20  ;;  %v5123_v46 = vunpack.i.h.bf16 %v5121_v20  ;;  %v5113_v0 = vmax.f32 %v5111_v35, %v5112_v59  ;;  %v4096_v38 = vmax.f32 %v2998_v7, 0.0  ;;  %3701 = vmatprep.mubr.bf16.mxu1 %v14923_v11 }
 0x3d6   : > { %v5144_v58 = vunpack.i.l.bf16 %v5143_v21  ;;  %v5145_v41 = vunpack.i.h.bf16 %v5143_v21  ;;  %v5135_v30 = vmax.f32 %v5133_v40, %v5134_v6  ;;  %v4095_v17 = vmax.f32 %v2647_v31, 0.0  ;;  %v12377_v23 = vpop.f32.mrb[132].mxu0  ;;  %v12379_v61 = vpop.f32.mrb[132].mxu1 }
 0x3d7   : > { %v5124_v10 = vmax.f32 %v5122_v4, %v5123_v46  ;;  %v4097_v18 = vmax.f32 %v3000_v47, 0.0  ;;  %14940 = vst [vmem:[#allocation45_spill] sm:$0xff] %v12377_v23  ;;  %14941 = vst [vmem:[#allocation19_spill] sm:$0xff] %v12379_v61  ;;  %v5114_v24 = vrot.slane %v5113_v0, 4  ;;  %v2649_v9 = vadd.f32 %v12189_v1, %v11828_v50  ;;  %v12385_v35 = vpop.f32.mrb[133].mxu0  ;;  %v12387_v7 = vpop.f32.mrb[133].mxu1 }
 0x3d8   : > { %v5146_v56 = vmax.f32 %v5144_v58, %v5145_v41  ;;  %v3002_v20 = vadd.f32 %v12191_v22, %v11832_v51  ;;  %14942 = vst [vmem:[#allocation53_spill] sm:$0xff] %v12385_v35  ;;  %14943 = vst [vmem:[#allocation54_spill] sm:$0xff] %v12387_v7  ;;  %v5136_v59 = vrot.slane %v5135_v30, 4  ;;  %v2651_v31 = vadd.f32 %v12193_v52, %v11835_v54  ;;  %v14944_v47 = vld [vmem:[#allocation46_spill] sm:$0xff]  ;;  %v12393_v40 = vpop.f32.mrb[134].mxu0  ;;  %v12395_v6 = vpop.f32.mrb[134].mxu1 }
 0x3d9   : > { %v5125_v21 = vrot.slane %v5124_v10, 4  ;;  %v3004_v26 = vadd.f32 %v14944_v47, %v11839_v55  ;;  %14945 = vst [vmem:[#allocation46_spill] sm:$0xff] %v12393_v40  ;;  %v5115_v1 = vmax.f32 %v5113_v0, %v5114_v24  ;;  %v4102_v46 = vmax.f32 %v2649_v9, 0.0  ;;  %v12397_v58 = vpop.f32.mrb[135].mxu0  ;;  %v12399_v41 = vpop.f32.mrb[135].mxu1  ;;  %v14946_v40 = vld [vmem:[#allocation21_spill] sm:$0xff] }
 0x3da   : > { %v5147_v4 = vrot.slane %v5146_v56, 4  ;;  %v4104_v22 = vmax.f32 %v3002_v20, 0.0  ;;  %v5137_v7 = vmax.f32 %v5135_v30, %v5136_v59  ;;  %v4103_v61 = vmax.f32 %v2651_v31, 0.0 }
 0x3db   : > { %v5126_v35 = vmax.f32 %v5124_v10, %v5125_v21  ;;  %v4105_v23 = vmax.f32 %v3004_v26, 0.0  ;;  %v5116_v52 = vrot.slane %v5115_v1, 2  ;;  %v12401_v63 = vpack.c.bf16 %v4102_v46, %v4094_v15  ;;  %3349 = vmatmul.mubr.bf16.gmra.mrb[240].mxu0 %v14946_v40 }
 0x3dc   : > { %v5148_v13 = vmax.f32 %v5146_v56, %v5147_v4  ;;  %v12403_v47 = vpack.c.bf16 %v4104_v22, %v4096_v38  ;;  %v5138_v0 = vrot.slane %v5137_v7, 2  ;;  %v12406_v9 = vpack.c.bf16 %v4103_v61, %v4095_v17  ;;  %3702 = vmatmul.mubr.bf16.gmra.mrb[240].mxu1 %v14946_v40  ;;  %3358 = vmatprep.mubr.bf16.mxu0 %v14923_v11 }
 0x3dd   : > { %v5127_v24 = vrot.slane %v5126_v35, 2  ;;  %v12408_v20 = vpack.c.bf16 %v4105_v23, %v4097_v18  ;;  %v5117_v30 = vmax.f32 %v5115_v1, %v5116_v52  ;;  %v2655_v15 = vadd.f32 %v12209_v53, %v11828_v50  ;;  %3711 = vmatprep.mubr.bf16.mxu1 %v14923_v11 }
 0x3de   : > { %v5149_v10 = vrot.slane %v5148_v13, 2  ;;  %v3008_v38 = vadd.f32 %v12211_v33, %v11832_v51  ;;  %v5139_v56 = vmax.f32 %v5137_v7, %v5138_v0  ;;  %v2657_v17 = vadd.f32 %v12213_v32, %v11835_v54  ;;  %v12421_v23 = vpop.f32.mrb[136].mxu0  ;;  %v12423_v61 = vpop.f32.mrb[136].mxu1 }
 0x3df   : > { %v5128_v59 = vmax.f32 %v5126_v35, %v5127_v24  ;;  %v3010_v18 = vadd.f32 %v12215_v2, %v11839_v55  ;;  %v5118_v21 = vrot.slane %v5117_v30, 1  ;;  %v4110_v31 = vmax.f32 %v2655_v15, 0.0  ;;  %v12425_v26 = vpop.f32.mrb[137].mxu0  ;;  %v12427_v33 = vpop.f32.mrb[137].mxu1 }
 0x3e0   : > { %v5150_v53 = vmax.f32 %v5148_v13, %v5149_v10  ;;  %v5140_v7 = vrot.slane %v5139_v56, 1  ;;  %v4112_v40 = vmax.f32 %v3008_v38, 0.0  ;;  %v4111_v1 = vmax.f32 %v2657_v17, 0.0  ;;  %v12429_v32 = vpop.f32.mrb[138].mxu0  ;;  %v12431_v4 = vpop.f32.mrb[138].mxu1 }
 0x3e1   : > { %v5129_v35 = vrot.slane %v5128_v59, 1  ;;  %14947 = vst [vmem:[#allocation21_spill] sm:$0xff] %v12429_v32  ;;  %14948 = vst [vmem:[#allocation55_spill] sm:$0xff] %v12431_v4  ;;  %v5119_v2 = vmax.f32 %v5117_v30, %v5118_v21  ;;  %v4113_v22 = vmax.f32 %v3010_v18, 0.0  ;;  %v2659_v52 = vadd.f32 %v12217_v29, %v11828_v50  ;;  %v12435_v13 = vpop.f32.mrb[139].mxu0  ;;  %v12437_v0 = vpop.f32.mrb[139].mxu1 }
 0x3e2   : > { %v5151_v46 = vrot.slane %v5150_v53, 1  ;;  %14949 = vst [vmem:[#allocation56_spill] sm:$0xff] %v12435_v13  ;;  %14950 = vst [vmem:[#allocation57_spill] sm:$0xff] %v12437_v0  ;;  %v5141_v24 = vmax.f32 %v5139_v56, %v5140_v7  ;;  %v3012_v15 = vadd.f32 %v12219_v62, %v11832_v51  ;;  %v2661_v38 = vadd.f32 %v12231_v57, %v11835_v54  ;;  %v14951_v21 = vld [vmem:[#allocation20_spill] sm:$0xff] }
 0x3e3   : > { %v5130_v10 = vmax.f32 %v5128_v59, %v5129_v35  ;;  %v5120_v17 = vpack.i.bf16 %v5119_v2, %v5119_v2  ;;  %v4118_v30 = vmax.f32 %v2659_v52, 0.0  ;;  %v3014_v18 = vadd.f32 %v12233_v43, %v11839_v55  ;;  %3359 = vmatmul.mubr.bf16.gmra.mrb[244].mxu0 %v14951_v21 }
 0x3e4   : > { %v5152_v4 = vmax.f32 %v5150_v53, %v5151_v46  ;;  %v5142_v29 = vpack.i.bf16 %v5141_v24, %v5141_v24  ;;  %v4120_v32 = vmax.f32 %v3012_v15, 0.0  ;;  %v4119_v0 = vmax.f32 %v2661_v38, 0.0  ;;  %3712 = vmatmul.mubr.bf16.gmra.mrb[244].mxu1 %v14951_v21  ;;  %3368 = vmatprep.mubr.bf16.mxu0 %v14923_v11 }
 0x3e5   : > { %v5131_v13 = vpack.i.bf16 %v5130_v10, %v5130_v10  ;;  %v6134_v62 = vunpack.c.l.bf16 %v5120_v17  ;;  %v4518_v59 = vpack.c.bf16 %v4118_v30, %v4110_v31  ;;  %v4121_v57 = vmax.f32 %v3014_v18, 0.0  ;;  %3721 = vmatprep.mubr.bf16.mxu1 %v14923_v11 }
 0x3e6   : > { %v5153_v56 = vpack.i.bf16 %v5152_v4, %v5152_v4  ;;  %v6136_v53 = vunpack.c.l.bf16 %v5142_v29  ;;  %v4520_v35 = vpack.c.bf16 %v4120_v32, %v4112_v40  ;;  %v4519_v43 = vpack.c.bf16 %v4119_v0, %v4111_v1  ;;  %v12449_v2 = vpop.f32.mrb[140].mxu0  ;;  %v12451_v46 = vpop.f32.mrb[140].mxu1 }
 0x3e7   : > { %v6135_v7 = vunpack.c.l.bf16 %v5131_v13  ;;  %v12455_v52 = vsel %vm6358_vm8, %v6134_v62, %v12335_v60  ;;  %v5198_v10 = vmax.bf16 %v4518_v59, %v12401_v63  ;;  %v4521_v4 = vpack.c.bf16 %v4121_v57, %v4113_v22  ;;  %v12458_v31 = vpop.f32.mrb[141].mxu0  ;;  %v12460_v15 = vpop.f32.mrb[141].mxu1 }
 0x3e8   : > { %v6137_v24 = vunpack.c.l.bf16 %v5153_v56  ;;  %v12464_v40 = vsel %vm6358_vm8, %v6136_v53, %v12339_v42  ;;  %v5220_v32 = vmax.bf16 %v4520_v35, %v12403_v47  ;;  %v5209_v60 = vmax.bf16 %v4519_v43, %v12406_v9  ;;  %v12472_v13 = vpop.f32.mrb[142].mxu0  ;;  %v12474_v63 = vpop.f32.mrb[142].mxu1 }
 0x3e9   : > { %v12468_v1 = vsel %vm6358_vm8, %v6135_v7, %v12347_v12  ;;  %v5199_v0 = vunpack.i.l.bf16 %v5198_v10  ;;  %v5200_v38 = vunpack.i.h.bf16 %v5198_v10  ;;  %v5231_v42 = vmax.bf16 %v4521_v4, %v12408_v20  ;;  %v12481_v17 = vpop.f32.mrb[143].mxu0  ;;  %v12483_v12 = vpop.f32.mrb[143].mxu1 }
 0x3ea   : > { %v12478_v22 = vsel %vm6358_vm8, %v6137_v24, %v12351_v44  ;;  %v5221_v30 = vunpack.i.l.bf16 %v5220_v32  ;;  %v5222_v47 = vunpack.i.h.bf16 %v5220_v32  ;;  %v5210_v18 = vunpack.i.l.bf16 %v5209_v60  ;;  %v14952_v44 = vld [vmem:[#allocation23_spill] sm:$0xff] }
 0x3eb   : > { %v5211_v9 = vunpack.i.h.bf16 %v5209_v60  ;;  %v5201_v21 = vmax.f32 %v5199_v0, %v5200_v38  ;;  %v5232_v29 = vunpack.i.l.bf16 %v5231_v42  ;;  %v5233_v62 = vunpack.i.h.bf16 %v5231_v42  ;;  %3369 = vmatmul.mubr.bf16.gmra.mrb[248].mxu0 %v14952_v44 }
 0x3ec   : > { %v2665_v56 = vadd.f32 %v12257_v19, %v11828_v50  ;;  %v5223_v59 = vmax.f32 %v5221_v30, %v5222_v47  ;;  %v3018_v20 = vadd.f32 %v12259_v25, %v11832_v51  ;;  %v2667_v53 = vadd.f32 %v12261_v3, %v11835_v54  ;;  %3722 = vmatmul.mubr.bf16.gmra.mrb[248].mxu1 %v14952_v44 }
 0x3ed   : > { %v5212_v57 = vmax.f32 %v5210_v18, %v5211_v9  ;;  %v5202_v7 = vrot.slane %v5201_v21, 4  ;;  %v5234_v35 = vmax.f32 %v5232_v29, %v5233_v62  ;;  %v3020_v24 = vadd.f32 %v12263_v39, %v11839_v55  ;;  %3378 = vmatprep.mubr.bf16.mxu0 %v14923_v11  ;;  %3731 = vmatprep.mubr.bf16.mxu1 %v14923_v11  ;;  %v14956_v29 = vld [vmem:[#allocation47_spill] sm:$0xff] }
 0x3ee   : > { %v4126_v43 = vmax.f32 %v2665_v56, 0.0  ;;  %v5224_v19 = vrot.slane %v5223_v59, 4  ;;  %v4128_v4 = vmax.f32 %v3018_v20, 0.0  ;;  %v4127_v32 = vmax.f32 %v2667_v53, 0.0  ;;  %v12497_v25 = vpop.f32.mrb[144].mxu0  ;;  %v12499_v60 = vpop.f32.mrb[144].mxu1 }
 0x3ef   : > { %v5213_v10 = vrot.slane %v5212_v57, 4  ;;  %14953 = vst [vmem:[#allocation20_spill] sm:$0xff] %v12499_v60  ;;  %v5203_v3 = vmax.f32 %v5201_v21, %v5202_v7  ;;  %v5235_v0 = vrot.slane %v5234_v35, 4  ;;  %v4129_v38 = vmax.f32 %v3020_v24, 0.0  ;;  %v12503_v30 = vpop.f32.mrb[145].mxu0  ;;  %v12505_v39 = vpop.f32.mrb[145].mxu1 }
 0x3f0   : > { %v2669_v42 = vadd.f32 %v12265_v8, %v11828_v50  ;;  %14954 = vst [vmem:[#allocation23_spill] sm:$0xff] %v12503_v30  ;;  %14955 = vst [vmem:[#allocation58_spill] sm:$0xff] %v12505_v39  ;;  %v5225_v47 = vmax.f32 %v5223_v59, %v5224_v19  ;;  %v3022_v9 = vadd.f32 %v12267_v5, %v11832_v51  ;;  %v12511_v56 = vpop.f32.mrb[146].mxu0  ;;  %v12513_v21 = vpop.f32.mrb[146].mxu1  ;;  %v14959_v8 = vld [vmem:[#allocation48_spill] sm:$0xff] }
 0x3f1   : > { %v5214_v18 = vmax.f32 %v5212_v57, %v5213_v10  ;;  %v2671_v62 = vadd.f32 %v14956_v29, %v11835_v54  ;;  %14957 = vst [vmem:[#allocation47_spill] sm:$0xff] %v12511_v56  ;;  %14958 = vst [vmem:[#allocation59_spill] sm:$0xff] %v12513_v21  ;;  %v5204_v44 = vrot.slane %v5203_v3, 2  ;;  %v5236_v20 = vmax.f32 %v5234_v35, %v5235_v0  ;;  %v12517_v24 = vpop.f32.mrb[147].mxu0  ;;  %v12519_v59 = vpop.f32.mrb[147].mxu1  ;;  %v14962_v21 = vld [vmem:[#allocation22_spill] sm:$0xff] }
 0x3f2   : > { %v4134_v53 = vmax.f32 %v2669_v42, 0.0  ;;  %v3024_v7 = vadd.f32 %v14959_v8, %v11839_v55  ;;  %14960 = vst [vmem:[#allocation48_spill] sm:$0xff] %v12517_v24  ;;  %14961 = vst [vmem:[#allocation60_spill] sm:$0xff] %v12519_v59  ;;  %v5226_v57 = vrot.slane %v5225_v47, 2  ;;  %v4136_v5 = vmax.f32 %v3022_v9, 0.0 }
 0x3f3   : > { %v5215_v19 = vrot.slane %v5214_v18, 2  ;;  %v4135_v10 = vmax.f32 %v2671_v62, 0.0  ;;  %v5205_v39 = vmax.f32 %v5203_v3, %v5204_v44  ;;  %v5237_v29 = vrot.slane %v5236_v20, 2  ;;  %3379 = vmatmul.mubr.bf16.gmra.mrb[252].mxu0 %v14962_v21 }
 0x3f4   : > { %v12521_v30 = vpack.c.bf16 %v4134_v53, %v4126_v43  ;;  %v4137_v56 = vmax.f32 %v3024_v7, 0.0  ;;  %v5227_v35 = vmax.f32 %v5225_v47, %v5226_v57  ;;  %v12524_v42 = vpack.c.bf16 %v4136_v5, %v4128_v4  ;;  %3732 = vmatmul.mubr.bf16.gmra.mrb[252].mxu1 %v14962_v21  ;;  %3388 = vmatprep.mubr.bf16.mxu0 %v14923_v11  ;;  %v14963_v4 = vld [vmem:[#allocation49_spill] sm:$0xff] }
 0x3f5   : > { %v5216_v0 = vmax.f32 %v5214_v18, %v5215_v19  ;;  %v12526_v8 = vpack.c.bf16 %v4135_v10, %v4127_v32  ;;  %v5206_v59 = vrot.slane %v5205_v39, 1  ;;  %v5238_v24 = vmax.f32 %v5236_v20, %v5237_v29  ;;  %3741 = vmatprep.mubr.bf16.mxu1 %v14923_v11  ;;  %v14964_v32 = vld [vmem:[#allocation50_spill] sm:$0xff] }
 0x3f6   : > { %v12529_v60 = vpack.c.bf16 %v4137_v56, %v4129_v38  ;;  %v2675_v3 = vadd.f32 %v12293_v36, %v11828_v50  ;;  %v5228_v43 = vrot.slane %v5227_v35, 1  ;;  %v3028_v18 = vadd.f32 %v14963_v4, %v11832_v51  ;;  %v12539_v62 = vpop.f32.mrb[148].mxu0  ;;  %v12541_v21 = vpop.f32.mrb[148].mxu1  ;;  %v14966_v36 = vld [vmem:[#allocation51_spill] sm:$0xff] }
 0x3f7   : > { %v5217_v47 = vrot.slane %v5216_v0, 1  ;;  %v2677_v9 = vadd.f32 %v14964_v32, %v11835_v54  ;;  %14965 = vst [vmem:[#allocation22_spill] sm:$0xff] %v12541_v21  ;;  %v5207_v38 = vmax.f32 %v5205_v39, %v5206_v59  ;;  %v5239_v56 = vrot.slane %v5238_v24, 1  ;;  %v12545_v20 = vpop.f32.mrb[149].mxu0  ;;  %v12547_v53 = vpop.f32.mrb[149].mxu1 }
 0x3f8   : > { %v3030_v44 = vadd.f32 %v14966_v36, %v11839_v55  ;;  %14967 = vst [vmem:[#allocation49_spill] sm:$0xff] %v12545_v20  ;;  %14968 = vst [vmem:[#allocation50_spill] sm:$0xff] %v12547_v53  ;;  %v5229_v7 = vmax.f32 %v5227_v35, %v5228_v43  ;;  %v4142_v19 = vmax.f32 %v2675_v3, 0.0  ;;  %v4144_v5 = vmax.f32 %v3028_v18, 0.0  ;;  %v12549_v10 = vpop.f32.mrb[150].mxu0  ;;  %v12551_v29 = vpop.f32.mrb[150].mxu1 }
 0x3f9   : > { %v5218_v57 = vmax.f32 %v5216_v0, %v5217_v47  ;;  %v5208_v4 = vpack.i.bf16 %v5207_v38, %v5207_v38  ;;  %v5240_v32 = vmax.f32 %v5238_v24, %v5239_v56  ;;  %v4143_v39 = vmax.f32 %v2677_v9, 0.0  ;;  %v12555_v21 = vpop.f32.mrb[151].mxu0  ;;  %v12557_v36 = vpop.f32.mrb[151].mxu1  ;;  %v14970_v18 = vld [vmem:[#allocation25_spill] sm:$0xff]  ;;  %v14971_v56 = vld [vmem:[#allocation52_spill] sm:$0xff] }
 0x3fa   : > { %v2679_v59 = vadd.f32 %v12309_v27, %v11828_v50  ;;  %14969 = vst [vmem:[#allocation51_spill] sm:$0xff] %v12557_v36  ;;  %v5230_v20 = vpack.i.bf16 %v5229_v7, %v5229_v7  ;;  %v4145_v35 = vmax.f32 %v3030_v44, 0.0  ;;  %v3032_v0 = vadd.f32 %v12311_v34, %v11832_v51 }
 0x3fb   : > { %v5219_v53 = vpack.i.bf16 %v5218_v57, %v5218_v57  ;;  %v6142_v3 = vunpack.c.l.bf16 %v5208_v4  ;;  %v5241_v43 = vpack.i.bf16 %v5240_v32, %v5240_v32  ;;  %v2681_v24 = vadd.f32 %v12313_v45, %v11835_v54  ;;  %3389 = vmatmul.mubr.bf16.gmra.mrb[0].mxu0 %v14970_v18 }
 0x3fc   : > { %v4150_v47 = vmax.f32 %v2679_v59, 0.0  ;;  %v6144_v9 = vunpack.c.l.bf16 %v5230_v20  ;;  %v4152_v38 = vmax.f32 %v3032_v0, 0.0  ;;  %v3034_v36 = vadd.f32 %v14971_v56, %v11839_v55  ;;  %3742 = vmatmul.mubr.bf16.gmra.mrb[0].mxu1 %v14970_v18  ;;  %3398 = vmatprep.mubr.bf16.mxu0 %v14923_v11 }
 0x3fd   : > { %v6143_v27 = vunpack.c.l.bf16 %v5219_v53  ;;  %v12570_v34 = vsel %vm6360_vm9, %v6142_v3, %v12455_v52  ;;  %v6145_v44 = vunpack.c.l.bf16 %v5241_v43  ;;  %v4151_v57 = vmax.f32 %v2681_v24, 0.0  ;;  %3751 = vmatprep.mubr.bf16.mxu1 %v14923_v11 }
 0x3fe   : > { %v4534_v7 = vpack.c.bf16 %v4150_v47, %v4142_v19  ;;  %v12575_v45 = vsel %vm6360_vm9, %v6144_v9, %v12464_v40  ;;  %v4536_v53 = vpack.c.bf16 %v4152_v38, %v4144_v5  ;;  %v4153_v4 = vmax.f32 %v3034_v36, 0.0  ;;  %v12581_v32 = vpop.f32.mrb[152].mxu0  ;;  %v12583_v59 = vpop.f32.mrb[152].mxu1 }
 0x3ff   : > { %v12579_v20 = vsel %vm6360_vm9, %v6143_v27, %v12468_v1  ;;  %v12587_v52 = vsel %vm6360_vm9, %v6145_v44, %v12478_v22  ;;  %v4535_v0 = vpack.c.bf16 %v4151_v57, %v4143_v39  ;;  %v2685_v40 = vadd.f32 %v12329_v14, %v11828_v50  ;;  %v12592_v3 = vpop.f32.mrb[153].mxu0  ;;  %v12594_v1 = vpop.f32.mrb[153].mxu1  ;;  %v14976_v57 = vld [vmem:[#allocation24_spill] sm:$0xff] }
 0x400   : > { %v5286_v19 = vmax.bf16 %v4534_v7, %v12521_v30  ;;  %v5308_v5 = vmax.bf16 %v4536_v53, %v12524_v42  ;;  %v4537_v36 = vpack.c.bf16 %v4153_v4, %v4145_v35  ;;  %v3038_v43 = vadd.f32 %v12331_v16, %v11832_v51  ;;  %v12601_v47 = vpop.f32.mrb[154].mxu0  ;;  %v12603_v30 = vpop.f32.mrb[154].mxu1 }
 0x401   : > { %v2687_v22 = vadd.f32 %v12341_v48, %v11835_v54  ;;  %14972 = vst [vmem:[#allocation25_spill] sm:$0xff] %v12601_v47  ;;  %14973 = vst [vmem:[#allocation52_spill] sm:$0xff] %v12603_v30  ;;  %v5297_v14 = vmax.bf16 %v4535_v0, %v12526_v8  ;;  %v4158_v18 = vmax.f32 %v2685_v40, 0.0  ;;  %v12606_v9 = vpop.f32.mrb[155].mxu0  ;;  %v12608_v27 = vpop.f32.mrb[155].mxu1  ;;  %v3040_v8 = vadd.f32 %v12343_v28, %v11839_v55 }
 0x402   : > { %v5287_v39 = vunpack.i.l.bf16 %v5286_v19  ;;  %v5288_v24 = vunpack.i.h.bf16 %v5286_v19  ;;  %14974 = vst [vmem:[#allocation61_spill] sm:$0xff] %v12606_v9  ;;  %14975 = vst [vmem:[#allocation62_spill] sm:$0xff] %v12608_v27  ;;  %v5309_v42 = vunpack.i.l.bf16 %v5308_v5  ;;  %v5310_v35 = vunpack.i.h.bf16 %v5308_v5  ;;  %v6078_v9 = vld [vmem:[#allocation2] sm:$0xff] }
 0x403   : > { %v5319_v16 = vmax.bf16 %v4537_v36, %v12529_v60  ;;  %v4160_v38 = vmax.f32 %v3038_v43, 0.0  ;;  %v5298_v48 = vunpack.i.l.bf16 %v5297_v14  ;;  %v5299_v44 = vunpack.i.h.bf16 %v5297_v14  ;;  %3399 = vmatmul.mubr.bf16.gmra.mrb[4].mxu0 %v14976_v57 }
 0x404   : > { %v5289_v56 = vmax.f32 %v5287_v39, %v5288_v24  ;;  %v4159_v7 = vmax.f32 %v2687_v22, 0.0  ;;  %v5311_v53 = vmax.f32 %v5309_v42, %v5310_v35  ;;  %3752 = vmatmul.mubr.bf16.gmra.mrb[4].mxu1 %v14976_v57  ;;  %3408 = vmatprep.mubr.bf16.mxu0 %v14923_v11  ;;  %v2689_v60 = vadd.f32 %v12353_v49, %v11828_v50  ;;  %v14977_v39 = vld [vmem:[#allocation43_spill] sm:$0xff] }
 0x405   : > { %v5320_v4 = vunpack.i.l.bf16 %v5319_v16  ;;  %v5321_v19 = vunpack.i.h.bf16 %v5319_v16  ;;  %v5300_v40 = vmax.f32 %v5298_v48, %v5299_v44  ;;  %v3042_v5 = vadd.f32 %v12355_v37, %v11832_v51  ;;  %3761 = vmatprep.mubr.bf16.mxu1 %v14923_v11 }
 0x406   : > { %v5290_v0 = vrot.slane %v5289_v56, 4  ;;  %v5312_v36 = vrot.slane %v5311_v53, 4  ;;  %v4161_v22 = vmax.f32 %v3040_v8, 0.0  ;;  %v2691_v28 = vadd.f32 %v14977_v39, %v11835_v54  ;;  %v12623_v24 = vpop.f32.mrb[156].mxu0  ;;  %v12625_v14 = vpop.f32.mrb[156].mxu1 }
 0x407   : > { %v5322_v43 = vmax.f32 %v5320_v4, %v5321_v19  ;;  %14978 = vst [vmem:[#allocation24_spill] sm:$0xff] %v12623_v24  ;;  %14979 = vst [vmem:[#allocation43_spill] sm:$0xff] %v12625_v14  ;;  %v5301_v35 = vrot.slane %v5300_v40, 4  ;;  %v4166_v16 = vmax.f32 %v2689_v60, 0.0  ;;  %v4168_v48 = vmax.f32 %v3042_v5, 0.0  ;;  %v12627_v49 = vpop.f32.mrb[157].mxu0 }
 0x408   : > { %v5291_v42 = vmax.f32 %v5289_v56, %v5290_v0  ;;  %14980 = vst [vmem:[#allocation63_spill] sm:$0xff] %v12627_v49  ;;  %v12629_v44 = vpop.f32.mrb[157].mxu1  ;;  %v5313_v37 = vmax.f32 %v5311_v53, %v5312_v36  ;;  %v4167_v27 = vmax.f32 %v2691_v28, 0.0  ;;  %v14982_v4 = vld [vmem:[#allocation44_spill] sm:$0xff]  ;;  %v12633_v8 = vpop.f32.mrb[158].mxu0 }
 0x409   : > { %14981 = vst [vmem:[#allocation64_spill] sm:$0xff] %v12629_v44  ;;  %v5323_v57 = vrot.slane %v5322_v43, 4  ;;  %v3044_v19 = vadd.f32 %v14982_v4, %v11839_v55  ;;  %14983 = vst [vmem:[#allocation44_spill] sm:$0xff] %v12633_v8  ;;  %v12635_v39 = vpop.f32.mrb[158].mxu1  ;;  %v5302_v14 = vmax.f32 %v5300_v40, %v5301_v35  ;;  %v12637_v56 = vpack.c.bf16 %v4166_v16, %v4158_v18  ;;  %v12641_v60 = vpop.f32.mrb[159].mxu0  ;;  %v14988_v18 = vld [vmem:[#allocation19_spill] sm:$0xff] }
 0x40a   : > { %14984 = vst [vmem:[#allocation65_spill] sm:$0xff] %v12635_v39  ;;  %v5292_v24 = vrot.slane %v5291_v42, 2  ;;  %v12639_v0 = vpack.c.bf16 %v4168_v48, %v4160_v38  ;;  %14985 = vst [vmem:[#allocation66_spill] sm:$0xff] %v12641_v60  ;;  %v12643_v5 = vpop.f32.mrb[159].mxu1  ;;  %v5314_v53 = vrot.slane %v5313_v37, 2  ;;  %v12645_v28 = vpack.c.bf16 %v4167_v27, %v4159_v7  ;;  %v14987_v39 = vld [vmem:[#allocation45_spill] sm:$0xff] }
 0x40b   : > { %14986 = vst [vmem:[#allocation67_spill] sm:$0xff] %v12643_v5  ;;  %v5324_v36 = vmax.f32 %v5322_v43, %v5323_v57  ;;  %v4169_v4 = vmax.f32 %v3044_v19, 0.0  ;;  %v5303_v8 = vrot.slane %v5302_v14, 2  ;;  %v2695_v49 = vadd.f32 %v14987_v39, %v11828_v50  ;;  %v14989_v38 = vld [vmem:[#allocation27_spill] sm:$0xff]  ;;  %v14990_v5 = vld [vmem:[#allocation53_spill] sm:$0xff] }
 0x40c   : > { %v5293_v44 = vmax.f32 %v5291_v42, %v5292_v24  ;;  %v3048_v40 = vadd.f32 %v14988_v18, %v11832_v51  ;;  %3409 = vmatmul.mubr.bf16.gmra.mrb[8].mxu0 %v14989_v38  ;;  %v5315_v35 = vmax.f32 %v5313_v37, %v5314_v53  ;;  %v2697_v43 = vadd.f32 %v14990_v5, %v11835_v54  ;;  %v14991_v37 = vld [vmem:[#allocation54_spill] sm:$0xff] }
 0x40d   : > { %v5325_v16 = vrot.slane %v5324_v36, 2  ;;  %v12652_v48 = vpack.c.bf16 %v4169_v4, %v4161_v22  ;;  %3762 = vmatmul.mubr.bf16.gmra.mrb[8].mxu1 %v14989_v38  ;;  %3418 = vmatprep.mubr.bf16.mxu0 %v14923_v11  ;;  %v5304_v7 = vmax.f32 %v5302_v14, %v5303_v8  ;;  %v4174_v24 = vmax.f32 %v2695_v49, 0.0  ;;  %v14994_v38 = vld [vmem:[#allocation46_spill] sm:$0xff] }
 0x40e   : > { %v5294_v27 = vrot.slane %v5293_v44, 1  ;;  %v4176_v42 = vmax.f32 %v3048_v40, 0.0  ;;  %3771 = vmatprep.mubr.bf16.mxu1 %v14923_v11  ;;  %v5316_v57 = vrot.slane %v5315_v35, 1  ;;  %v4175_v39 = vmax.f32 %v2697_v43, 0.0  ;;  %v12663_v53 = vpop.f32.mrb[160].mxu0  ;;  %v12665_v5 = vpop.f32.mrb[160].mxu1 }
 0x40f   : > { %v5326_v19 = vmax.f32 %v5324_v36, %v5325_v16  ;;  %v12661_v22 = vadd.f32 %v14991_v37, %v11839_v55  ;;  %14992 = vst [vmem:[#allocation45_spill] sm:$0xff] %v12663_v53  ;;  %14993 = vst [vmem:[#allocation19_spill] sm:$0xff] %v12665_v5  ;;  %v5305_v18 = vrot.slane %v5304_v7, 1  ;;  %v2699_v14 = vadd.f32 %v14994_v38, %v11828_v50  ;;  %v12671_v8 = vpop.f32.mrb[161].mxu0  ;;  %v12673_v36 = vpop.f32.mrb[161].mxu1 }
 0x410   : > { %v5295_v4 = vmax.f32 %v5293_v44, %v5294_v27  ;;  %v3052_v49 = vadd.f32 %v12395_v6, %v11832_v51  ;;  %14995 = vst [vmem:[#allocation27_spill] sm:$0xff] %v12671_v8  ;;  %14996 = vst [vmem:[#allocation53_spill] sm:$0xff] %v12673_v36  ;;  %v5317_v40 = vmax.f32 %v5315_v35, %v5316_v57  ;;  %v12678_v5 = vpop.f32.mrb[162].mxu0  ;;  %v12680_v44 = vpop.f32.mrb[162].mxu1 }
 0x411   : > { %v5327_v16 = vrot.slane %v5326_v19, 1  ;;  %v4177_v43 = vmax.f32 %v12661_v22, 0.0  ;;  %v2701_v37 = vadd.f32 %v12397_v58, %v11835_v54  ;;  %14997 = vst [vmem:[#allocation54_spill] sm:$0xff] %v12678_v5  ;;  %14998 = vst [vmem:[#allocation46_spill] sm:$0xff] %v12680_v44  ;;  %v5306_v38 = vmax.f32 %v5304_v7, %v5305_v18  ;;  %v12682_v6 = vpop.f32.mrb[163].mxu0  ;;  %v12684_v8 = vpop.f32.mrb[163].mxu1 }
 0x412   : > { %v5296_v27 = vpack.i.bf16 %v5295_v4, %v5295_v4  ;;  %v4182_v53 = vmax.f32 %v2699_v14, 0.0  ;;  %v4184_v60 = vmax.f32 %v3052_v49, 0.0  ;;  %v5318_v36 = vpack.i.bf16 %v5317_v40, %v5317_v40  ;;  %v14999_v44 = vld [vmem:[#allocation26_spill] sm:$0xff] }
 0x413   : > { %v5328_v35 = vmax.f32 %v5326_v19, %v5327_v16  ;;  %v4183_v57 = vmax.f32 %v2701_v37, 0.0  ;;  %v3054_v22 = vadd.f32 %v12399_v41, %v11839_v55  ;;  %v5307_v30 = vpack.i.bf16 %v5306_v38, %v5306_v38  ;;  %v6080_v7 = vld [vmem:[#allocation2 + $0x10] sm:$0xff]  ;;  %v6079_v41 = vld [vmem:[#allocation2 + $0x8] sm:$0xff] }
 0x414   : > { %v6150_v58 = vunpack.c.l.bf16 %v5296_v27  ;;  %v4550_v5 = vpack.c.bf16 %v4182_v53, %v4174_v24  ;;  %v4552_v47 = vpack.c.bf16 %v4184_v60, %v4176_v42  ;;  %3419 = vmatmul.mubr.bf16.gmra.mrb[12].mxu0 %v14999_v44  ;;  %v6152_v4 = vunpack.c.l.bf16 %v5318_v36 }
 0x415   : > { %v5329_v18 = vpack.i.bf16 %v5328_v35, %v5328_v35  ;;  %v4551_v14 = vpack.c.bf16 %v4183_v57, %v4175_v39  ;;  %v4185_v49 = vmax.f32 %v3054_v22, 0.0  ;;  %3772 = vmatmul.mubr.bf16.gmra.mrb[12].mxu1 %v14999_v44  ;;  %3428 = vmatprep.mubr.bf16.mxu0 %v14923_v11  ;;  %v6151_v40 = vunpack.c.l.bf16 %v5307_v30  ;;  %v6081_v39 = vld [vmem:[#allocation2 + $0x18] sm:$0xff] }
 0x416   : > { %v6363_v19 = vsel %vm6362_vm10, %v6150_v58, %v12570_v34  ;;  %v5374_v16 = vmax.bf16 %v4550_v5, %v12637_v56  ;;  %v5396_v60 = vmax.bf16 %v4552_v47, %v12639_v0  ;;  %3781 = vmatprep.mubr.bf16.mxu1 %v14923_v11  ;;  %v6377_v42 = vsel %vm6362_vm10, %v6152_v4, %v12575_v45  ;;  %v12699_v37 = vpop.f32.mrb[164].mxu0  ;;  %v12701_v44 = vpop.f32.mrb[164].mxu1 }
 0x417   : > { %v6485_v24 = vmax.f32 %v6078_v9, %v6363_v19  ;;  %v6153_v53 = vunpack.c.l.bf16 %v5329_v18  ;;  %v5385_v36 = vmax.bf16 %v4551_v14, %v12645_v28  ;;  %v6487_v34 = vmax.f32 %v6080_v7, %v6377_v42  ;;  %v12705_v0 = vpop.f32.mrb[165].mxu0  ;;  %v12707_v9 = vpop.f32.mrb[165].mxu1 }
 0x418   : > { %v6370_v30 = vsel %vm6362_vm10, %v6151_v40, %v12579_v20  ;;  %v5375_v56 = vunpack.i.l.bf16 %v5374_v16  ;;  %v5376_v47 = vunpack.i.h.bf16 %v5374_v16  ;;  %v5397_v28 = vunpack.i.l.bf16 %v5396_v60  ;;  %v12711_v38 = vpop.f32.mrb[166].mxu0  ;;  %v12713_v35 = vpop.f32.mrb[166].mxu1 }
 0x419   : > { %6501 = vst [vmem:[#allocation2] sm:$0xff] %v6485_v24  ;;  %v6486_v45 = vmax.f32 %v6079_v41, %v6370_v30  ;;  %v6384_v5 = vsel %vm6362_vm10, %v6153_v53, %v12587_v52  ;;  %v5398_v27 = vunpack.i.h.bf16 %v5396_v60  ;;  %6503 = vst [vmem:[#allocation2 + $0x10] sm:$0xff] %v6487_v34  ;;  %v5386_v22 = vunpack.i.l.bf16 %v5385_v36  ;;  %v12715_v7 = vpop.f32.mrb[167].mxu0  ;;  %v12717_v4 = vpop.f32.mrb[167].mxu1  ;;  %v15000_v24 = vld [vmem:[#allocation29_spill] sm:$0xff] }
 0x41a   : > { %v6488_v57 = vmax.f32 %v6081_v39, %v6384_v5  ;;  %v5377_v20 = vmax.f32 %v5375_v56, %v5376_v47  ;;  %v5387_v58 = vunpack.i.h.bf16 %v5385_v36  ;;  %v4553_v14 = vpack.c.bf16 %v4185_v49, %v4177_v43  ;;  %v15001_v30 = vld [vmem:[#allocation21_spill] sm:$0xff] }
 0x41b   : > { %6502 = vst [vmem:[#allocation2 + $0x8] sm:$0xff] %v6486_v45  ;;  %v5399_v18 = vmax.f32 %v5397_v28, %v5398_v27  ;;  %v2705_v52 = vadd.f32 %v12421_v23, %v11828_v50  ;;  %v3058_v19 = vadd.f32 %v12423_v61, %v11832_v51  ;;  %v2707_v16 = vadd.f32 %v12425_v26, %v11835_v54  ;;  %v15002_v28 = vld [vmem:[#allocation55_spill] sm:$0xff] }
 0x41c   : > { %6504 = vst [vmem:[#allocation2 + $0x18] sm:$0xff] %v6488_v57  ;;  %v5378_v41 = vrot.slane %v5377_v20, 4  ;;  %v5388_v40 = vmax.f32 %v5386_v22, %v5387_v58  ;;  %v3060_v60 = vadd.f32 %v12427_v33, %v11839_v55  ;;  %3429 = vmatmul.mubr.bf16.gmra.mrb[16].mxu0 %v15000_v24  ;;  %v5407_v43 = vmax.bf16 %v4553_v14, %v12652_v48  ;;  %v15003_v57 = vld [vmem:[#allocation56_spill] sm:$0xff] }
 0x41d   : > { %v5400_v42 = vrot.slane %v5399_v18, 4  ;;  %v4190_v49 = vmax.f32 %v2705_v52, 0.0  ;;  %v4192_v39 = vmax.f32 %v3058_v19, 0.0  ;;  %3782 = vmatmul.mubr.bf16.gmra.mrb[16].mxu1 %v15000_v24  ;;  %3438 = vmatprep.mubr.bf16.mxu0 %v14923_v11  ;;  %v4191_v53 = vmax.f32 %v2707_v16, 0.0  ;;  %v15005_v19 = vld [vmem:[#allocation57_spill] sm:$0xff] }
 0x41e   : > { %v5379_v23 = vmax.f32 %v5377_v20, %v5378_v41  ;;  %v5389_v61 = vrot.slane %v5388_v40, 4  ;;  %v4193_v36 = vmax.f32 %v3060_v60, 0.0  ;;  %3791 = vmatprep.mubr.bf16.mxu1 %v14923_v11  ;;  %v5408_v34 = vunpack.i.l.bf16 %v5407_v43  ;;  %v12734_v47 = vpop.f32.mrb[168].mxu0  ;;  %v12736_v48 = vpop.f32.mrb[168].mxu1 }
 0x41f   : > { %v5401_v26 = vmax.f32 %v5399_v18, %v5400_v42  ;;  %v5409_v33 = vunpack.i.h.bf16 %v5407_v43  ;;  %v2709_v56 = vadd.f32 %v15001_v30, %v11828_v50  ;;  %v3062_v27 = vadd.f32 %v15002_v28, %v11832_v51  ;;  %v12742_v22 = vpop.f32.mrb[169].mxu0  ;;  %v12744_v58 = vpop.f32.mrb[169].mxu1 }
 0x420   : > { %v5380_v45 = vrot.slane %v5379_v23, 2  ;;  %v5390_v5 = vmax.f32 %v5388_v40, %v5389_v61  ;;  %v2711_v20 = vadd.f32 %v15003_v57, %v11835_v54  ;;  %15004 = vst [vmem:[#allocation26_spill] sm:$0xff] %v12744_v58  ;;  %v3064_v41 = vadd.f32 %v15005_v19, %v11839_v55  ;;  %v12748_v16 = vpop.f32.mrb[170].mxu0  ;;  %v12750_v60 = vpop.f32.mrb[170].mxu1 }
 0x421   : > { %v5402_v18 = vrot.slane %v5401_v26, 2  ;;  %v5410_v14 = vmax.f32 %v5408_v34, %v5409_v33  ;;  %v4198_v52 = vmax.f32 %v2709_v56, 0.0  ;;  %15006 = vst [vmem:[#allocation29_spill] sm:$0xff] %v12748_v16  ;;  %15007 = vst [vmem:[#allocation21_spill] sm:$0xff] %v12750_v60  ;;  %v4200_v42 = vmax.f32 %v3062_v27, 0.0  ;;  %v12752_v61 = vpop.f32.mrb[171].mxu0 }
 0x422   : > { %v5381_v40 = vmax.f32 %v5379_v23, %v5380_v45  ;;  %v5391_v24 = vrot.slane %v5390_v5, 2  ;;  %v4199_v43 = vmax.f32 %v2711_v20, 0.0  ;;  %v12754_v30 = vpop.f32.mrb[171].mxu1  ;;  %v4201_v34 = vmax.f32 %v3064_v41, 0.0  ;;  %v15008_v60 = vld [vmem:[#allocation28_spill] sm:$0xff] }
 0x423   : > { %v5403_v28 = vmax.f32 %v5401_v26, %v5402_v18  ;;  %v5411_v57 = vrot.slane %v5410_v14, 4  ;;  %v12756_v58 = vpack.c.bf16 %v4198_v52, %v4190_v49  ;;  %v12758_v19 = vpack.c.bf16 %v4200_v42, %v4192_v39 }
 0x424   : > { %v5382_v33 = vrot.slane %v5381_v40, 1  ;;  %v5392_v56 = vmax.f32 %v5390_v5, %v5391_v24  ;;  %v12760_v16 = vpack.c.bf16 %v4199_v43, %v4191_v53  ;;  %3439 = vmatmul.mubr.bf16.gmra.mrb[20].mxu0 %v15008_v60  ;;  %v12763_v27 = vpack.c.bf16 %v4201_v34, %v4193_v36 }
 0x425   : > { %v5404_v23 = vrot.slane %v5403_v28, 1  ;;  %v5412_v45 = vmax.f32 %v5410_v14, %v5411_v57  ;;  %v2715_v20 = vadd.f32 %v12449_v2, %v11828_v50  ;;  %3792 = vmatmul.mubr.bf16.gmra.mrb[20].mxu1 %v15008_v60  ;;  %3448 = vmatprep.mubr.bf16.mxu0 %v14923_v11  ;;  %v3068_v39 = vadd.f32 %v12451_v46, %v11832_v51 }
 0x426   : > { %v5383_v49 = vmax.f32 %v5381_v40, %v5382_v33  ;;  %v5393_v26 = vrot.slane %v5392_v56, 1  ;;  %v2717_v53 = vadd.f32 %v12458_v31, %v11835_v54  ;;  %3801 = vmatprep.mubr.bf16.mxu1 %v14923_v11  ;;  %v3070_v2 = vadd.f32 %v12460_v15, %v11839_v55  ;;  %v12776_v14 = vpop.f32.mrb[172].mxu0  ;;  %v12778_v52 = vpop.f32.mrb[172].mxu1 }
 0x427   : > { %v5405_v5 = vmax.f32 %v5403_v28, %v5404_v23  ;;  %v5413_v36 = vrot.slane %v5412_v45, 2  ;;  %v4206_v18 = vmax.f32 %v2715_v20, 0.0  ;;  %15009 = vst [vmem:[#allocation55_spill] sm:$0xff] %v12778_v52  ;;  %v4208_v40 = vmax.f32 %v3068_v39, 0.0  ;;  %v12780_v46 = vpop.f32.mrb[173].mxu0  ;;  %v12782_v42 = vpop.f32.mrb[173].mxu1 }
 0x428   : > { %v5384_v41 = vpack.i.bf16 %v5383_v49, %v5383_v49  ;;  %v5394_v60 = vmax.f32 %v5392_v56, %v5393_v26  ;;  %v4207_v24 = vmax.f32 %v2717_v53, 0.0  ;;  %15010 = vst [vmem:[#allocation56_spill] sm:$0xff] %v12780_v46  ;;  %15011 = vst [vmem:[#allocation57_spill] sm:$0xff] %v12782_v42  ;;  %v4209_v28 = vmax.f32 %v3070_v2, 0.0  ;;  %v12786_v34 = vpop.f32.mrb[174].mxu0  ;;  %v12788_v15 = vpop.f32.mrb[174].mxu1 }
 0x429   : > { %v5406_v31 = vpack.i.bf16 %v5405_v5, %v5405_v5  ;;  %v5414_v43 = vmax.f32 %v5412_v45, %v5413_v36  ;;  %v2719_v57 = vadd.f32 %v12472_v13, %v11828_v50  ;;  %15012 = vst [vmem:[#allocation28_spill] sm:$0xff] %v12786_v34  ;;  %15013 = vst [vmem:[#allocation68_spill] sm:$0xff] %v12788_v15  ;;  %v12796_v49 = vpop.f32.mrb[175].mxu0  ;;  %v12798_v45 = vpop.f32.mrb[175].mxu1 }
 0x42a   : > { %v12790_v33 = vunpack.c.l.bf16 %v5384_v41  ;;  %v5395_v23 = vpack.i.bf16 %v5394_v60, %v5394_v60  ;;  %v3072_v56 = vadd.f32 %v12474_v63, %v11832_v51  ;;  %v2721_v20 = vadd.f32 %v12481_v17, %v11835_v54  ;;  %15014 = vst [vmem:[#allocation69_spill] sm:$0xff] %v12796_v49  ;;  %15015 = vst [vmem:[#allocation70_spill] sm:$0xff] %v12798_v45  ;;  %v15016_v17 = vld [vmem:[#allocation31_spill] sm:$0xff] }
 0x42b   : > { %v12800_v26 = vunpack.c.l.bf16 %v5406_v31  ;;  %v5415_v13 = vrot.slane %v5414_v43, 1  ;;  %v4214_v39 = vmax.f32 %v2719_v57, 0.0  ;;  %v3074_v53 = vadd.f32 %v12483_v12, %v11839_v55  ;;  %v15017_v31 = vld [vmem:[#allocation20_spill] sm:$0xff] }
 0x42c   : > { %v12804_v5 = vunpack.c.l.bf16 %v5395_v23  ;;  %v4216_v36 = vmax.f32 %v3072_v56, 0.0  ;;  %v4215_v2 = vmax.f32 %v2721_v20, 0.0  ;;  %v12808_v63 = vadd.f32 %v12497_v25, %v11828_v50  ;;  %3449 = vmatmul.mubr.bf16.gmra.mrb[24].mxu0 %v15016_v17  ;;  %v15018_v56 = vld [vmem:[#allocation23_spill] sm:$0xff] }
 0x42d   : > { %v5416_v41 = vmax.f32 %v5414_v43, %v5415_v13  ;;  %v4566_v60 = vpack.c.bf16 %v4214_v39, %v4206_v18  ;;  %v4217_v45 = vmax.f32 %v3074_v53, 0.0  ;;  %v3078_v49 = vadd.f32 %v15017_v31, %v11832_v51  ;;  %3802 = vmatmul.mubr.bf16.gmra.mrb[24].mxu1 %v15016_v17  ;;  %3458 = vmatprep.mubr.bf16.mxu0 %v14923_v11 }
 0x42e   : > { %v4568_v12 = vpack.c.bf16 %v4216_v36, %v4208_v40  ;;  %v4567_v57 = vpack.c.bf16 %v4215_v2, %v4207_v24  ;;  %v4222_v23 = vmax.f32 %v12808_v63, 0.0  ;;  %v2727_v25 = vadd.f32 %v15018_v56, %v11835_v54  ;;  %3811 = vmatprep.mubr.bf16.mxu1 %v14923_v11  ;;  %v12820_v39 = vpop.f32.mrb[176].mxu0  ;;  %v12822_v53 = vpop.f32.mrb[176].mxu1  ;;  %v15021_v36 = vld [vmem:[#allocation58_spill] sm:$0xff] }
 0x42f   : > { %v5417_v20 = vpack.i.bf16 %v5416_v41, %v5416_v41  ;;  %v5462_v18 = vmax.bf16 %v4566_v60, %v12756_v58  ;;  %v4569_v43 = vpack.c.bf16 %v4217_v45, %v4209_v28  ;;  %v4224_v13 = vmax.f32 %v3078_v49, 0.0  ;;  %15019 = vst [vmem:[#allocation31_spill] sm:$0xff] %v12820_v39  ;;  %15020 = vst [vmem:[#allocation20_spill] sm:$0xff] %v12822_v53  ;;  %v12828_v63 = vpop.f32.mrb[177].mxu0  ;;  %v12830_v31 = vpop.f32.mrb[177].mxu1  ;;  %v15030_v39 = vld [vmem:[#allocation30_spill] sm:$0xff] }
 0x430   : > { %v5484_v17 = vmax.bf16 %v4568_v12, %v12758_v19  ;;  %v5473_v40 = vmax.bf16 %v4567_v57, %v12760_v16  ;;  %v4223_v24 = vmax.f32 %v2727_v25, 0.0  ;;  %v3080_v2 = vadd.f32 %v15021_v36, %v11839_v55  ;;  %15022 = vst [vmem:[#allocation23_spill] sm:$0xff] %v12828_v63  ;;  %15023 = vst [vmem:[#allocation58_spill] sm:$0xff] %v12830_v31  ;;  %v12835_v45 = vpop.f32.mrb[178].mxu0  ;;  %v12837_v60 = vpop.f32.mrb[178].mxu1 }
 0x431   : > { %v12832_v41 = vunpack.c.l.bf16 %v5417_v20  ;;  %v5463_v58 = vunpack.i.l.bf16 %v5462_v18  ;;  %v5464_v28 = vunpack.i.h.bf16 %v5462_v18  ;;  %v5495_v49 = vmax.bf16 %v4569_v43, %v12763_v27  ;;  %15024 = vst [vmem:[#allocation71_spill] sm:$0xff] %v12835_v45  ;;  %15025 = vst [vmem:[#allocation72_spill] sm:$0xff] %v12837_v60  ;;  %v12839_v56 = vpop.f32.mrb[179].mxu0  ;;  %v12841_v25 = vpop.f32.mrb[179].mxu1  ;;  %v15028_v27 = vld [vmem:[#allocation47_spill] sm:$0xff] }
 0x432   : > { %v5485_v19 = vunpack.i.l.bf16 %v5484_v17  ;;  %v5486_v16 = vunpack.i.h.bf16 %v5484_v17  ;;  %v5474_v12 = vunpack.i.l.bf16 %v5473_v40  ;;  %v5475_v57 = vunpack.i.h.bf16 %v5473_v40  ;;  %15026 = vst [vmem:[#allocation73_spill] sm:$0xff] %v12839_v56  ;;  %15027 = vst [vmem:[#allocation74_spill] sm:$0xff] %v12841_v25  ;;  %v15029_v45 = vld [vmem:[#allocation59_spill] sm:$0xff]  ;;  %v15031_v56 = vld [vmem:[#allocation48_spill] sm:$0xff] }
 0x433   : > { %v5465_v36 = vmax.f32 %v5463_v58, %v5464_v28  ;;  %v5496_v31 = vunpack.i.l.bf16 %v5495_v49  ;;  %v5497_v20 = vunpack.i.h.bf16 %v5495_v49  ;;  %v4225_v63 = vmax.f32 %v3080_v2, 0.0  ;;  %v15032_v58 = vld [vmem:[#allocation60_spill] sm:$0xff] }
 0x434   : > { %v5487_v53 = vmax.f32 %v5485_v19, %v5486_v16  ;;  %v5476_v18 = vmax.f32 %v5474_v12, %v5475_v57  ;;  %v2729_v43 = vadd.f32 %v15028_v27, %v11828_v50  ;;  %v3082_v60 = vadd.f32 %v15029_v45, %v11832_v51  ;;  %3459 = vmatmul.mubr.bf16.gmra.mrb[28].mxu0 %v15030_v39 }
 0x435   : > { %v5466_v17 = vrot.slane %v5465_v36, 4  ;;  %v5498_v40 = vmax.f32 %v5496_v31, %v5497_v20  ;;  %v2731_v15 = vadd.f32 %v15031_v56, %v11835_v54  ;;  %v3084_v28 = vadd.f32 %v15032_v58, %v11839_v55  ;;  %3812 = vmatmul.mubr.bf16.gmra.mrb[28].mxu1 %v15030_v39  ;;  %3468 = vmatprep.mubr.bf16.mxu0 %v14923_v11 }
 0x436   : > { %v5488_v2 = vrot.slane %v5487_v53, 4  ;;  %v5477_v49 = vrot.slane %v5476_v18, 4  ;;  %v4230_v19 = vmax.f32 %v2729_v43, 0.0  ;;  %v4232_v16 = vmax.f32 %v3082_v60, 0.0  ;;  %3821 = vmatprep.mubr.bf16.mxu1 %v14923_v11  ;;  %v12855_v20 = vpop.f32.mrb[180].mxu0  ;;  %v12857_v56 = vpop.f32.mrb[180].mxu1 }
 0x437   : > { %v5467_v45 = vmax.f32 %v5465_v36, %v5466_v17  ;;  %v5499_v12 = vrot.slane %v5498_v40, 4  ;;  %v4231_v57 = vmax.f32 %v2731_v15, 0.0  ;;  %v4233_v31 = vmax.f32 %v3084_v28, 0.0  ;;  %15033 = vst [vmem:[#allocation47_spill] sm:$0xff] %v12855_v20  ;;  %15034 = vst [vmem:[#allocation59_spill] sm:$0xff] %v12857_v56  ;;  %v12863_v34 = vpop.f32.mrb[181].mxu0 }
 0x438   : > { %v5489_v27 = vmax.f32 %v5487_v53, %v5488_v2  ;;  %v5478_v58 = vmax.f32 %v5476_v18, %v5477_v49  ;;  %v12859_v25 = vpack.c.bf16 %v4230_v19, %v4222_v23  ;;  %v12861_v39 = vpack.c.bf16 %v4232_v16, %v4224_v13  ;;  %15035 = vst [vmem:[#allocation30_spill] sm:$0xff] %v12863_v34  ;;  %v12865_v43 = vpop.f32.mrb[181].mxu1  ;;  %v12871_v17 = vpop.f32.mrb[182].mxu0  ;;  %v15039_v13 = vld [vmem:[#allocation22_spill] sm:$0xff] }
 0x439   : > { %15036 = vst [vmem:[#allocation48_spill] sm:$0xff] %v12865_v43  ;;  %v5468_v60 = vrot.slane %v5467_v45, 2  ;;  %v5500_v42 = vmax.f32 %v5498_v40, %v5499_v12  ;;  %v12867_v36 = vpack.c.bf16 %v4231_v57, %v4223_v24  ;;  %v12869_v15 = vpack.c.bf16 %v4233_v31, %v4225_v63  ;;  %15037 = vst [vmem:[#allocation60_spill] sm:$0xff] %v12871_v17  ;;  %v12873_v28 = vpop.f32.mrb[182].mxu1  ;;  %v12879_v49 = vpop.f32.mrb[183].mxu0  ;;  %v15042_v63 = vld [vmem:[#allocation49_spill] sm:$0xff] }
 0x43a   : > { %15038 = vst [vmem:[#allocation75_spill] sm:$0xff] %v12873_v28  ;;  %v5490_v53 = vrot.slane %v5489_v27, 2  ;;  %v5479_v18 = vrot.slane %v5478_v58, 2  ;;  %v2735_v23 = vadd.f32 %v12539_v62, %v11828_v50  ;;  %v3088_v2 = vadd.f32 %v15039_v13, %v11832_v51  ;;  %15040 = vst [vmem:[#allocation22_spill] sm:$0xff] %v12879_v49  ;;  %v12881_v19 = vpop.f32.mrb[183].mxu1  ;;  %v15043_v12 = vld [vmem:[#allocation50_spill] sm:$0xff] }
 0x43b   : > { %15041 = vst [vmem:[#allocation76_spill] sm:$0xff] %v12881_v19  ;;  %v5469_v24 = vmax.f32 %v5467_v45, %v5468_v60  ;;  %v5501_v40 = vrot.slane %v5500_v42, 2  ;;  %v2737_v16 = vadd.f32 %v15042_v63, %v11835_v54  ;;  %v3090_v57 = vadd.f32 %v15043_v12, %v11839_v55  ;;  %v15044_v62 = vld [vmem:[#allocation33_spill] sm:$0xff] }
 0x43c   : > { %v5491_v31 = vmax.f32 %v5489_v27, %v5490_v53  ;;  %v5480_v28 = vmax.f32 %v5478_v58, %v5479_v18  ;;  %v4238_v17 = vmax.f32 %v2735_v23, 0.0  ;;  %v4240_v43 = vmax.f32 %v3088_v2, 0.0  ;;  %3469 = vmatmul.mubr.bf16.gmra.mrb[32].mxu0 %v15044_v62  ;;  %v15045_v18 = vld [vmem:[#allocation51_spill] sm:$0xff] }
 0x43d   : > { %v5470_v34 = vrot.slane %v5469_v24, 1  ;;  %v5502_v13 = vmax.f32 %v5500_v42, %v5501_v40  ;;  %v4239_v56 = vmax.f32 %v2737_v16, 0.0  ;;  %v4241_v49 = vmax.f32 %v3090_v57, 0.0  ;;  %3822 = vmatmul.mubr.bf16.gmra.mrb[32].mxu1 %v15044_v62  ;;  %3478 = vmatprep.mubr.bf16.mxu0 %v14923_v11 }
 0x43e   : > { %v5492_v45 = vrot.slane %v5491_v31, 1  ;;  %v5481_v60 = vrot.slane %v5480_v28, 1  ;;  %v2739_v63 = vadd.f32 %v12549_v10, %v11828_v50  ;;  %v3092_v27 = vadd.f32 %v12551_v29, %v11832_v51  ;;  %3831 = vmatprep.mubr.bf16.mxu1 %v14923_v11  ;;  %v12899_v2 = vpop.f32.mrb[184].mxu0 }
 0x43f   : > { %v5471_v58 = vmax.f32 %v5469_v24, %v5470_v34  ;;  %v5503_v53 = vrot.slane %v5502_v13, 1  ;;  %v2741_v42 = vadd.f32 %v12555_v21, %v11835_v54  ;;  %v3094_v23 = vadd.f32 %v15045_v18, %v11839_v55  ;;  %15046 = vst [vmem:[#allocation49_spill] sm:$0xff] %v12899_v2  ;;  %v12901_v10 = vpop.f32.mrb[184].mxu1  ;;  %v12903_v62 = vpop.f32.mrb[185].mxu0 }
 0x440   : > { %v5493_v40 = vmax.f32 %v5491_v31, %v5492_v45  ;;  %v5482_v16 = vmax.f32 %v5480_v28, %v5481_v60  ;;  %v4246_v12 = vmax.f32 %v2739_v63, 0.0  ;;  %v4248_v57 = vmax.f32 %v3092_v27, 0.0  ;;  %v12905_v20 = vpop.f32.mrb[185].mxu1  ;;  %v12907_v21 = vpop.f32.mrb[186].mxu0 }
 0x441   : > { %v5472_v29 = vpack.i.bf16 %v5471_v58, %v5471_v58  ;;  %v5504_v19 = vmax.f32 %v5502_v13, %v5503_v53  ;;  %v4247_v34 = vmax.f32 %v2741_v42, 0.0  ;;  %v4249_v24 = vmax.f32 %v3094_v23, 0.0  ;;  %v12909_v31 = vpop.f32.mrb[186].mxu1  ;;  %v12911_v28 = vpop.f32.mrb[187].mxu0 }
 0x442   : > { %v5494_v46 = vpack.i.bf16 %v5493_v40, %v5493_v40  ;;  %v5483_v18 = vpack.i.bf16 %v5482_v16, %v5482_v16  ;;  %v4582_v52 = vpack.c.bf16 %v4246_v12, %v4238_v17  ;;  %v4584_v2 = vpack.c.bf16 %v4248_v57, %v4240_v43  ;;  %v12913_v58 = vpop.f32.mrb[187].mxu1  ;;  %v15047_v40 = vld [vmem:[#allocation32_spill] sm:$0xff] }
 0x443   : > { %v6166_v45 = vunpack.c.l.bf16 %v5472_v29  ;;  %v5505_v60 = vpack.i.bf16 %v5504_v19, %v5504_v19  ;;  %v4583_v63 = vpack.c.bf16 %v4247_v34, %v4239_v56  ;;  %v4585_v27 = vpack.c.bf16 %v4249_v24, %v4241_v49 }
 0x444   : > { %v6168_v13 = vunpack.c.l.bf16 %v5494_v46  ;;  %v6167_v53 = vunpack.c.l.bf16 %v5483_v18  ;;  %v5550_v42 = vmax.bf16 %v4582_v52, %v12859_v25  ;;  %v5572_v23 = vmax.bf16 %v4584_v2, %v12861_v39  ;;  %3479 = vmatmul.mubr.bf16.gmra.mrb[36].mxu0 %v15047_v40 }
 0x445   : > { %v12920_v43 = vsel %vm6350_vm4, %v6166_v45, %v12790_v33  ;;  %v6169_v17 = vunpack.c.l.bf16 %v5505_v60  ;;  %v5561_v16 = vmax.bf16 %v4583_v63, %v12867_v36  ;;  %v5583_v56 = vmax.bf16 %v4585_v27, %v12869_v15  ;;  %3832 = vmatmul.mubr.bf16.gmra.mrb[36].mxu1 %v15047_v40  ;;  %3488 = vmatprep.mubr.bf16.mxu0 %v14923_v11 }
 0x446   : > { %v12928_v52 = vsel %vm6350_vm4, %v6168_v13, %v12800_v26  ;;  %v12932_v46 = vsel %vm6350_vm4, %v6167_v53, %v12804_v5  ;;  %v5551_v25 = vunpack.i.l.bf16 %v5550_v42  ;;  %v5552_v33 = vunpack.i.h.bf16 %v5550_v42  ;;  %3841 = vmatprep.mubr.bf16.mxu1 %v14923_v11  ;;  %v12939_v19 = vpop.f32.mrb[188].mxu0 }
 0x447   : > { %v12937_v39 = vsel %vm6350_vm4, %v6169_v17, %v12832_v41  ;;  %v5573_v36 = vunpack.i.l.bf16 %v5572_v23  ;;  %v5574_v15 = vunpack.i.h.bf16 %v5572_v23  ;;  %v5562_v49 = vunpack.i.l.bf16 %v5561_v16  ;;  %v12941_v29 = vpop.f32.mrb[188].mxu1  ;;  %v12943_v5 = vpop.f32.mrb[189].mxu0 }
 0x448   : > { %v5553_v2 = vmax.f32 %v5551_v25, %v5552_v33  ;;  %v5563_v26 = vunpack.i.h.bf16 %v5561_v16  ;;  %v5584_v12 = vunpack.i.l.bf16 %v5583_v56  ;;  %v5585_v57 = vunpack.i.h.bf16 %v5583_v56  ;;  %15048 = vst [vmem:[#allocation50_spill] sm:$0xff] %v12943_v5  ;;  %v12951_v45 = vpop.f32.mrb[189].mxu1  ;;  %v12953_v60 = vpop.f32.mrb[190].mxu0 }
 0x449   : > { %v5575_v34 = vmax.f32 %v5573_v36, %v5574_v15  ;;  %v2745_v24 = vadd.f32 %v12581_v32, %v11828_v50  ;;  %v3098_v41 = vadd.f32 %v12583_v59, %v11832_v51  ;;  %v2747_v18 = vadd.f32 %v12592_v3, %v11835_v54  ;;  %15049 = vst [vmem:[#allocation33_spill] sm:$0xff] %v12951_v45  ;;  %v12957_v42 = vpop.f32.mrb[190].mxu1  ;;  %v12959_v23 = vpop.f32.mrb[191].mxu0  ;;  %v15054_v36 = vld [vmem:[#allocation35_spill] sm:$0xff] }
 0x44a   : > { %15050 = vst [vmem:[#allocation51_spill] sm:$0xff] %v12953_v60  ;;  %v5554_v63 = vrot.slane %v5553_v2, 4  ;;  %v5564_v27 = vmax.f32 %v5562_v49, %v5563_v26  ;;  %v5586_v13 = vmax.f32 %v5584_v12, %v5585_v57  ;;  %v3100_v53 = vadd.f32 %v12594_v1, %v11839_v55  ;;  %15051 = vst [vmem:[#allocation32_spill] sm:$0xff] %v12957_v42  ;;  %v12961_v16 = vpop.f32.mrb[191].mxu1  ;;  %v15055_v49 = vld [vmem:[#allocation25_spill] sm:$0xff]  ;;  %v15056_v26 = vld [vmem:[#allocation52_spill] sm:$0xff] }
 0x44b   : > { %15052 = vst [vmem:[#allocation77_spill] sm:$0xff] %v12959_v23  ;;  %v5576_v32 = vrot.slane %v5575_v34, 4  ;;  %v4254_v40 = vmax.f32 %v2745_v24, 0.0  ;;  %v4256_v59 = vmax.f32 %v3098_v41, 0.0  ;;  %v4255_v17 = vmax.f32 %v2747_v18, 0.0  ;;  %15053 = vst [vmem:[#allocation78_spill] sm:$0xff] %v12961_v16 }
 0x44c   : > { %v5555_v3 = vmax.f32 %v5553_v2, %v5554_v63  ;;  %v5565_v56 = vrot.slane %v5564_v27, 4  ;;  %v5587_v25 = vrot.slane %v5586_v13, 4  ;;  %v4257_v33 = vmax.f32 %v3100_v53, 0.0  ;;  %3489 = vmatmul.mubr.bf16.gmra.mrb[40].mxu0 %v15054_v36  ;;  %v15057_v57 = vld [vmem:[#allocation61_spill] sm:$0xff]  ;;  %v15058_v63 = vld [vmem:[#allocation62_spill] sm:$0xff] }
 0x44d   : > { %v5577_v15 = vmax.f32 %v5575_v34, %v5576_v32  ;;  %v2749_v1 = vadd.f32 %v15055_v49, %v11828_v50  ;;  %v3102_v12 = vadd.f32 %v15056_v26, %v11832_v51  ;;  %v2751_v24 = vadd.f32 %v15057_v57, %v11835_v54  ;;  %3842 = vmatmul.mubr.bf16.gmra.mrb[40].mxu1 %v15054_v36 }
 0x44e   : > { %v5556_v41 = vrot.slane %v5555_v3, 2  ;;  %v5566_v18 = vmax.f32 %v5564_v27, %v5565_v56  ;;  %v5588_v2 = vmax.f32 %v5586_v13, %v5587_v25  ;;  %v3104_v53 = vadd.f32 %v15058_v63, %v11839_v55  ;;  %3498 = vmatprep.mubr.bf16.mxu0 %v14923_v11  ;;  %3851 = vmatprep.mubr.bf16.mxu1 %v14923_v11  ;;  %v12975_v26 = vpop.f32.mrb[192].mxu0 }
 0x44f   : > { %v5578_v34 = vrot.slane %v5577_v15, 2  ;;  %v4262_v32 = vmax.f32 %v2749_v1, 0.0  ;;  %v4264_v49 = vmax.f32 %v3102_v12, 0.0  ;;  %v4263_v16 = vmax.f32 %v2751_v24, 0.0  ;;  %15059 = vst [vmem:[#allocation35_spill] sm:$0xff] %v12975_v26  ;;  %v12977_v60 = vpop.f32.mrb[192].mxu1 }
 0x450   : > { %v5557_v23 = vmax.f32 %v5555_v3, %v5556_v41  ;;  %v5567_v57 = vrot.slane %v5566_v18, 2  ;;  %v5589_v42 = vrot.slane %v5588_v2, 2  ;;  %v4265_v36 = vmax.f32 %v3104_v53, 0.0  ;;  %15060 = vst [vmem:[#allocation25_spill] sm:$0xff] %v12977_v60  ;;  %v12985_v63 = vpop.f32.mrb[193].mxu0  ;;  %v12987_v1 = vpop.f32.mrb[193].mxu1 }
 0x451   : > { %v5579_v27 = vmax.f32 %v5577_v15, %v5578_v34  ;;  %v12979_v13 = vpack.c.bf16 %v4262_v32, %v4254_v40  ;;  %v12981_v56 = vpack.c.bf16 %v4264_v49, %v4256_v59  ;;  %v12983_v25 = vpack.c.bf16 %v4263_v16, %v4255_v17  ;;  %15061 = vst [vmem:[#allocation52_spill] sm:$0xff] %v12985_v63  ;;  %v12991_v41 = vpop.f32.mrb[194].mxu0  ;;  %v12993_v53 = vpop.f32.mrb[194].mxu1  ;;  %v15065_v40 = vld [vmem:[#allocation24_spill] sm:$0xff]  ;;  %v15066_v17 = vld [vmem:[#allocation43_spill] sm:$0xff]  ;;  %v15073_v60 = vld [vmem:[#allocation65_spill] sm:$0xff] }
 0x452   : > { %15062 = vst [vmem:[#allocation61_spill] sm:$0xff] %v12987_v1  ;;  %v5558_v12 = vrot.slane %v5557_v23, 1  ;;  %v5568_v24 = vmax.f32 %v5566_v18, %v5567_v57  ;;  %v5590_v26 = vmax.f32 %v5588_v2, %v5589_v42  ;;  %v12989_v3 = vpack.c.bf16 %v4265_v36, %v4257_v33  ;;  %15063 = vst [vmem:[#allocation62_spill] sm:$0xff] %v12991_v41  ;;  %v15067_v34 = vld [vmem:[#allocation63_spill] sm:$0xff]  ;;  %v13001_v49 = vpop.f32.mrb[195].mxu0  ;;  %v13003_v18 = vpop.f32.mrb[195].mxu1 }
 0x453   : > { %15064 = vst [vmem:[#allocation79_spill] sm:$0xff] %v12993_v53  ;;  %v5580_v15 = vrot.slane %v5579_v27, 1  ;;  %v2755_v59 = vadd.f32 %v15065_v40, %v11828_v50  ;;  %v3108_v16 = vadd.f32 %v15066_v17, %v11832_v51  ;;  %v2757_v32 = vadd.f32 %v15067_v34, %v11835_v54  ;;  %15068 = vst [vmem:[#allocation24_spill] sm:$0xff] %v13001_v49  ;;  %v15070_v57 = vld [vmem:[#allocation64_spill] sm:$0xff]  ;;  %v15071_v53 = vld [vmem:[#allocation34_spill] sm:$0xff] }
 0x454   : > { %15069 = vst [vmem:[#allocation43_spill] sm:$0xff] %v13003_v18  ;;  %v5559_v42 = vmax.f32 %v5557_v23, %v5558_v12  ;;  %v5569_v33 = vrot.slane %v5568_v24, 1  ;;  %v5591_v2 = vrot.slane %v5590_v26, 1  ;;  %v3110_v36 = vadd.f32 %v15070_v57, %v11839_v55  ;;  %3499 = vmatmul.mubr.bf16.gmra.mrb[44].mxu0 %v15071_v53  ;;  %v15072_v12 = vld [vmem:[#allocation44_spill] sm:$0xff] }
 0x455   : > { %v5581_v41 = vmax.f32 %v5579_v27, %v5580_v15  ;;  %v4270_v40 = vmax.f32 %v2755_v59, 0.0  ;;  %v4272_v1 = vmax.f32 %v3108_v16, 0.0  ;;  %v4271_v63 = vmax.f32 %v2757_v32, 0.0  ;;  %3852 = vmatmul.mubr.bf16.gmra.mrb[44].mxu1 %v15071_v53  ;;  %3508 = vmatprep.mubr.bf16.mxu0 %v14923_v11  ;;  %v15074_v15 = vld [vmem:[#allocation66_spill] sm:$0xff] }
 0x456   : > { %v5560_v17 = vpack.i.bf16 %v5559_v42, %v5559_v42  ;;  %v5570_v34 = vmax.f32 %v5568_v24, %v5569_v33  ;;  %v5592_v49 = vmax.f32 %v5590_v26, %v5591_v2  ;;  %v4273_v18 = vmax.f32 %v3110_v36, 0.0  ;;  %3861 = vmatprep.mubr.bf16.mxu1 %v14923_v11  ;;  %v13017_v16 = vpop.f32.mrb[196].mxu0  ;;  %v15075_v26 = vld [vmem:[#allocation67_spill] sm:$0xff] }
 0x457   : > { %v5582_v23 = vpack.i.bf16 %v5581_v41, %v5581_v41  ;;  %v2759_v57 = vadd.f32 %v15072_v12, %v11828_v50  ;;  %v3112_v27 = vadd.f32 %v15073_v60, %v11832_v51  ;;  %v2761_v59 = vadd.f32 %v15074_v15, %v11835_v54  ;;  %v13021_v33 = vpop.f32.mrb[196].mxu1  ;;  %v13023_v41 = vpop.f32.mrb[197].mxu0 }
 0x458   : > { %v6174_v53 = vunpack.c.l.bf16 %v5560_v17  ;;  %v5571_v32 = vpack.i.bf16 %v5570_v34, %v5570_v34  ;;  %v5593_v42 = vpack.i.bf16 %v5592_v49, %v5592_v49  ;;  %v3114_v24 = vadd.f32 %v15075_v26, %v11839_v55  ;;  %15076 = vst [vmem:[#allocation63_spill] sm:$0xff] %v13021_v33  ;;  %v13025_v60 = vpop.f32.mrb[197].mxu1  ;;  %v13027_v5 = vpop.f32.mrb[198].mxu0 }
 0x459   : > { %v6176_v2 = vunpack.c.l.bf16 %v5582_v23  ;;  %v4278_v36 = vmax.f32 %v2759_v57, 0.0  ;;  %v4280_v12 = vmax.f32 %v3112_v27, 0.0  ;;  %v4279_v45 = vmax.f32 %v2761_v59, 0.0  ;;  %15077 = vst [vmem:[#allocation64_spill] sm:$0xff] %v13025_v60  ;;  %v13033_v26 = vpop.f32.mrb[198].mxu1  ;;  %v13035_v33 = vpop.f32.mrb[199].mxu0 }
 0x45a   : > { %v13031_v17 = vsel %vm6352_vm5, %v6174_v53, %v12920_v43  ;;  %v6175_v49 = vunpack.c.l.bf16 %v5571_v32  ;;  %v6177_v34 = vunpack.c.l.bf16 %v5593_v42  ;;  %v4281_v15 = vmax.f32 %v3114_v24, 0.0  ;;  %15078 = vst [vmem:[#allocation34_spill] sm:$0xff] %v13033_v26  ;;  %15079 = vst [vmem:[#allocation44_spill] sm:$0xff] %v13035_v33  ;;  %v13041_v60 = vpop.f32.mrb[199].mxu1  ;;  %v15081_v42 = vld [vmem:[#allocation45_spill] sm:$0xff] }
 0x45b   : > { %v13039_v23 = vsel %vm6352_vm5, %v6176_v2, %v12928_v52  ;;  %v4598_v57 = vpack.c.bf16 %v4278_v36, %v4270_v40  ;;  %v4600_v27 = vpack.c.bf16 %v4280_v12, %v4272_v1  ;;  %v4599_v59 = vpack.c.bf16 %v4279_v45, %v4271_v63  ;;  %15080 = vst [vmem:[#allocation65_spill] sm:$0xff] %v13041_v60  ;;  %v15082_v33 = vld [vmem:[#allocation37_spill] sm:$0xff]  ;;  %v15083_v1 = vld [vmem:[#allocation19_spill] sm:$0xff] }
 0x45c   : > { %v13045_v43 = vsel %vm6352_vm5, %v6175_v49, %v12932_v46  ;;  %v13049_v53 = vsel %vm6352_vm5, %v6177_v34, %v12937_v39  ;;  %v4601_v32 = vpack.c.bf16 %v4281_v15, %v4273_v18  ;;  %v2765_v24 = vadd.f32 %v15081_v42, %v11828_v50  ;;  %3509 = vmatmul.mubr.bf16.gmra.mrb[48].mxu0 %v15082_v33  ;;  %v15084_v18 = vld [vmem:[#allocation27_spill] sm:$0xff]  ;;  %v15085_v36 = vld [vmem:[#allocation53_spill] sm:$0xff] }
 0x45d   : > { %v5638_v52 = vmax.bf16 %v4598_v57, %v12979_v13  ;;  %v5660_v45 = vmax.bf16 %v4600_v27, %v12981_v56  ;;  %v5649_v63 = vmax.bf16 %v4599_v59, %v12983_v25  ;;  %v3118_v46 = vadd.f32 %v15083_v1, %v11832_v51  ;;  %3862 = vmatmul.mubr.bf16.gmra.mrb[48].mxu1 %v15082_v33 }
 0x45e   : > { %v5671_v39 = vmax.bf16 %v4601_v32, %v12989_v3  ;;  %v4286_v40 = vmax.f32 %v2765_v24, 0.0  ;;  %v2767_v2 = vadd.f32 %v15084_v18, %v11835_v54  ;;  %v3120_v12 = vadd.f32 %v15085_v36, %v11839_v55  ;;  %3518 = vmatprep.mubr.bf16.mxu0 %v14923_v11  ;;  %3871 = vmatprep.mubr.bf16.mxu1 %v14923_v11  ;;  %v13067_v34 = vpop.f32.mrb[200].mxu0 }
 0x45f   : > { %v5639_v13 = vunpack.i.l.bf16 %v5638_v52  ;;  %v5640_v56 = vunpack.i.h.bf16 %v5638_v52  ;;  %v5661_v25 = vunpack.i.l.bf16 %v5660_v45  ;;  %v5662_v49 = vunpack.i.h.bf16 %v5660_v45  ;;  %15086 = vst [vmem:[#allocation66_spill] sm:$0xff] %v13067_v34  ;;  %v13069_v27 = vpop.f32.mrb[200].mxu1  ;;  %v13071_v59 = vpop.f32.mrb[201].mxu0  ;;  %v15091_v34 = vld [vmem:[#allocation54_spill] sm:$0xff] }
 0x460   : > { %v5650_v33 = vunpack.i.l.bf16 %v5649_v63  ;;  %v5651_v15 = vunpack.i.h.bf16 %v5649_v63  ;;  %v5672_v3 = vunpack.i.l.bf16 %v5671_v39  ;;  %v5673_v57 = vunpack.i.h.bf16 %v5671_v39  ;;  %15087 = vst [vmem:[#allocation67_spill] sm:$0xff] %v13069_v27  ;;  %15088 = vst [vmem:[#allocation45_spill] sm:$0xff] %v13071_v59  ;;  %v13073_v18 = vpop.f32.mrb[201].mxu1  ;;  %v13075_v36 = vpop.f32.mrb[202].mxu0 }
 0x461   : > { %v5641_v32 = vmax.f32 %v5639_v13, %v5640_v56  ;;  %v5663_v42 = vmax.f32 %v5661_v25, %v5662_v49  ;;  %v4288_v24 = vmax.f32 %v3118_v46, 0.0  ;;  %v4287_v1 = vmax.f32 %v2767_v2, 0.0  ;;  %15089 = vst [vmem:[#allocation37_spill] sm:$0xff] %v13073_v18  ;;  %15090 = vst [vmem:[#allocation19_spill] sm:$0xff] %v13075_v36  ;;  %v13079_v26 = vpop.f32.mrb[202].mxu1  ;;  %v13081_v39 = vpop.f32.mrb[203].mxu0 }
 0x462   : > { %v5652_v52 = vmax.f32 %v5650_v33, %v5651_v15  ;;  %v5674_v45 = vmax.f32 %v5672_v3, %v5673_v57  ;;  %v4289_v60 = vmax.f32 %v3120_v12, 0.0  ;;  %v2769_v63 = vadd.f32 %v15091_v34, %v11828_v50  ;;  %15092 = vst [vmem:[#allocation27_spill] sm:$0xff] %v13079_v26  ;;  %15093 = vst [vmem:[#allocation53_spill] sm:$0xff] %v13081_v39  ;;  %v15094_v13 = vld [vmem:[#allocation46_spill] sm:$0xff]  ;;  %v13087_v56 = vpop.f32.mrb[203].mxu1  ;;  %v15096_v33 = vld [vmem:[#allocation36_spill] sm:$0xff] }
 0x463   : > { %v5642_v27 = vrot.slane %v5641_v32, 4  ;;  %v5664_v59 = vrot.slane %v5663_v42, 4  ;;  %v3122_v46 = vadd.f32 %v15094_v13, %v11832_v51  ;;  %v2771_v2 = vadd.f32 %v12682_v6, %v11835_v54  ;;  %15095 = vst [vmem:[#allocation54_spill] sm:$0xff] %v13087_v56 }
 0x464   : > { %v5653_v25 = vrot.slane %v5652_v52, 4  ;;  %v5675_v49 = vrot.slane %v5674_v45, 4  ;;  %v4294_v12 = vmax.f32 %v2769_v63, 0.0  ;;  %v3124_v34 = vadd.f32 %v12684_v8, %v11839_v55  ;;  %3519 = vmatmul.mubr.bf16.gmra.mrb[52].mxu0 %v15096_v33 }
 0x465   : > { %v5643_v15 = vmax.f32 %v5641_v32, %v5642_v27  ;;  %v5665_v3 = vmax.f32 %v5663_v42, %v5664_v59  ;;  %v4296_v57 = vmax.f32 %v3122_v46, 0.0  ;;  %v4295_v39 = vmax.f32 %v2771_v2, 0.0  ;;  %3872 = vmatmul.mubr.bf16.gmra.mrb[52].mxu1 %v15096_v33  ;;  %3528 = vmatprep.mubr.bf16.mxu0 %v14923_v11 }
 0x466   : > { %v5654_v13 = vmax.f32 %v5652_v52, %v5653_v25  ;;  %v5676_v6 = vmax.f32 %v5674_v45, %v5675_v49  ;;  %v13094_v26 = vpack.c.bf16 %v4294_v12, %v4286_v40  ;;  %v4297_v56 = vmax.f32 %v3124_v34, 0.0  ;;  %3881 = vmatprep.mubr.bf16.mxu1 %v14923_v11  ;;  %v13101_v27 = vpop.f32.mrb[204].mxu0 }
 0x467   : > { %v5644_v63 = vrot.slane %v5643_v15, 2  ;;  %v5666_v36 = vrot.slane %v5665_v3, 2  ;;  %v13097_v8 = vpack.c.bf16 %v4296_v57, %v4288_v24  ;;  %v13099_v18 = vpack.c.bf16 %v4295_v39, %v4287_v1  ;;  %v13107_v40 = vpop.f32.mrb[204].mxu1  ;;  %v13109_v45 = vpop.f32.mrb[205].mxu0 }
 0x468   : > { %v5655_v59 = vrot.slane %v5654_v13, 2  ;;  %v5677_v32 = vrot.slane %v5676_v6, 2  ;;  %v13103_v42 = vpack.c.bf16 %v4297_v56, %v4289_v60  ;;  %v2775_v52 = vadd.f32 %v12699_v37, %v11828_v50  ;;  %v13115_v39 = vpop.f32.mrb[205].mxu1  ;;  %v13117_v25 = vpop.f32.mrb[206].mxu0 }
 0x469   : > { %v5645_v46 = vmax.f32 %v5643_v15, %v5644_v63  ;;  %v5667_v2 = vmax.f32 %v5665_v3, %v5666_v36  ;;  %v3128_v24 = vadd.f32 %v12701_v44, %v11832_v51  ;;  %v2777_v1 = vadd.f32 %v12705_v0, %v11835_v54  ;;  %v13121_v12 = vpop.f32.mrb[206].mxu1  ;;  %v13123_v34 = vpop.f32.mrb[207].mxu0 }
 0x46a   : > { %v5656_v60 = vmax.f32 %v5654_v13, %v5655_v59  ;;  %v5678_v56 = vmax.f32 %v5676_v6, %v5677_v32  ;;  %v4302_v49 = vmax.f32 %v2775_v52, 0.0  ;;  %v3130_v37 = vadd.f32 %v12707_v9, %v11839_v55  ;;  %15097 = vst [vmem:[#allocation46_spill] sm:$0xff] %v13121_v12  ;;  %15098 = vst [vmem:[#allocation36_spill] sm:$0xff] %v13123_v34  ;;  %v13125_v3 = vpop.f32.mrb[207].mxu1  ;;  %v15100_v6 = vld [vmem:[#allocation39_spill] sm:$0xff] }
 0x46b   : > { %v5646_v36 = vrot.slane %v5645_v46, 1  ;;  %v5668_v33 = vrot.slane %v5667_v2, 1  ;;  %v4304_v44 = vmax.f32 %v3128_v24, 0.0  ;;  %v4303_v15 = vmax.f32 %v2777_v1, 0.0  ;;  %15099 = vst [vmem:[#allocation80_spill] sm:$0xff] %v13125_v3 }
 0x46c   : > { %v5657_v0 = vrot.slane %v5656_v60, 1  ;;  %v5679_v57 = vrot.slane %v5678_v56, 1  ;;  %v4305_v63 = vmax.f32 %v3130_v37, 0.0  ;;  %v2779_v13 = vadd.f32 %v12711_v38, %v11828_v50  ;;  %3529 = vmatmul.mubr.bf16.gmra.mrb[56].mxu0 %v15100_v6 }
 0x46d   : > { %v5647_v59 = vmax.f32 %v5645_v46, %v5646_v36  ;;  %v5669_v9 = vmax.f32 %v5667_v2, %v5668_v33  ;;  %v3132_v32 = vadd.f32 %v12713_v35, %v11832_v51  ;;  %v2781_v52 = vadd.f32 %v12715_v7, %v11835_v54  ;;  %3882 = vmatmul.mubr.bf16.gmra.mrb[56].mxu1 %v15100_v6 }
 0x46e   : > { %v5658_v24 = vmax.f32 %v5656_v60, %v5657_v0  ;;  %v5680_v1 = vmax.f32 %v5678_v56, %v5679_v57  ;;  %v4310_v3 = vmax.f32 %v2779_v13, 0.0  ;;  %v3134_v37 = vadd.f32 %v12717_v4, %v11839_v55  ;;  %3538 = vmatprep.mubr.bf16.mxu0 %v14923_v11  ;;  %3891 = vmatprep.mubr.bf16.mxu1 %v14923_v11  ;;  %v13139_v35 = vpop.f32.mrb[208].mxu0 }
 0x46f   : > { %v5648_v38 = vpack.i.bf16 %v5647_v59, %v5647_v59  ;;  %v5670_v46 = vpack.i.bf16 %v5669_v9, %v5669_v9  ;;  %v4312_v2 = vmax.f32 %v3132_v32, 0.0  ;;  %v4311_v36 = vmax.f32 %v2781_v52, 0.0  ;;  %v13141_v60 = vpop.f32.mrb[208].mxu1  ;;  %v13143_v56 = vpop.f32.mrb[209].mxu0 }
 0x470   : > { %v5659_v33 = vpack.i.bf16 %v5658_v24, %v5658_v24  ;;  %v5681_v7 = vpack.i.bf16 %v5680_v1, %v5680_v1  ;;  %v4614_v34 = vpack.c.bf16 %v4310_v3, %v4302_v49  ;;  %v4313_v6 = vmax.f32 %v3134_v37, 0.0  ;;  %v13145_v12 = vpop.f32.mrb[209].mxu1  ;;  %v13147_v11 = vpop.f32.mrb[210].mxu0 }
 0x471   : > { %v6182_v0 = vunpack.c.l.bf16 %v5648_v38  ;;  %v6184_v4 = vunpack.c.l.bf16 %v5670_v46  ;;  %v4616_v57 = vpack.c.bf16 %v4312_v2, %v4304_v44  ;;  %v4615_v13 = vpack.c.bf16 %v4311_v36, %v4303_v15  ;;  %v13150_v24 = vpop.f32.mrb[210].mxu1  ;;  %v13152_v49 = vpop.f32.mrb[211].mxu0  ;;  %v15103_v38 = vld [vmem:[#allocation38_spill] sm:$0xff] }
 0x472   : > { %v6183_v59 = vunpack.c.l.bf16 %v5659_v33  ;;  %v6185_v9 = vunpack.c.l.bf16 %v5681_v7  ;;  %v5726_v32 = vmax.bf16 %v4614_v34, %v13094_v26  ;;  %v4617_v52 = vpack.c.bf16 %v4313_v6, %v4305_v63  ;;  %15101 = vst [vmem:[#allocation39_spill] sm:$0xff] %v13152_v49  ;;  %v13164_v37 = vpop.f32.mrb[211].mxu1 }
 0x473   : > { %v13156_v3 = vsel %vm6354_vm6, %v6182_v0, %v13031_v17  ;;  %v13160_v44 = vsel %vm6354_vm6, %v6184_v4, %v13039_v23  ;;  %v5748_v15 = vmax.bf16 %v4616_v57, %v13097_v8  ;;  %v5737_v1 = vmax.bf16 %v4615_v13, %v13099_v18  ;;  %15102 = vst [vmem:[#allocation81_spill] sm:$0xff] %v13164_v37  ;;  %v15104_v0 = vld [vmem:[#allocation26_spill] sm:$0xff] }
 0x474   : > { %v13168_v26 = vsel %vm6354_vm6, %v6183_v59, %v13045_v43  ;;  %v13172_v34 = vsel %vm6354_vm6, %v6185_v9, %v13049_v53  ;;  %v5727_v17 = vunpack.i.l.bf16 %v5726_v32  ;;  %v5728_v63 = vunpack.i.h.bf16 %v5726_v32  ;;  %3539 = vmatmul.mubr.bf16.gmra.mrb[60].mxu0 %v15103_v38 }
 0x475   : > { %v5749_v23 = vunpack.i.l.bf16 %v5748_v15  ;;  %v5750_v46 = vunpack.i.h.bf16 %v5748_v15  ;;  %v5738_v2 = vunpack.i.l.bf16 %v5737_v1  ;;  %v5739_v8 = vunpack.i.h.bf16 %v5737_v1  ;;  %3892 = vmatmul.mubr.bf16.gmra.mrb[60].mxu1 %v15103_v38 }
 0x476   : > { %v5729_v18 = vmax.f32 %v5727_v17, %v5728_v63  ;;  %v5759_v36 = vmax.bf16 %v4617_v52, %v13103_v42  ;;  %v2785_v43 = vadd.f32 %v12734_v47, %v11828_v50  ;;  %v3138_v53 = vadd.f32 %v12736_v48, %v11832_v51  ;;  %v13185_v57 = vpop.f32.mrb[212].mxu0 }
 0x477   : > { %v5751_v33 = vmax.f32 %v5749_v23, %v5750_v46  ;;  %v5740_v7 = vmax.f32 %v5738_v2, %v5739_v8  ;;  %v2787_v6 = vadd.f32 %v12742_v22, %v11835_v54  ;;  %v3140_v4 = vadd.f32 %v15104_v0, %v11839_v55  ;;  %15105 = vst [vmem:[#allocation38_spill] sm:$0xff] %v13185_v57  ;;  %v13187_v32 = vpop.f32.mrb[212].mxu1  ;;  %v13189_v47 = vpop.f32.mrb[213].mxu0  ;;  %v15110_v46 = vld [vmem:[#allocation29_spill] sm:$0xff] }
 0x478   : > { %v5730_v13 = vrot.slane %v5729_v18, 4  ;;  %v5760_v59 = vunpack.i.l.bf16 %v5759_v36  ;;  %v5761_v9 = vunpack.i.h.bf16 %v5759_v36  ;;  %v4318_v42 = vmax.f32 %v2785_v43, 0.0  ;;  %15106 = vst [vmem:[#allocation26_spill] sm:$0xff] %v13187_v32  ;;  %15107 = vst [vmem:[#allocation82_spill] sm:$0xff] %v13189_v47  ;;  %v13191_v17 = vpop.f32.mrb[213].mxu1  ;;  %v13193_v22 = vpop.f32.mrb[214].mxu0 }
 0x479   : > { %v5752_v52 = vrot.slane %v5751_v33, 4  ;;  %v5741_v48 = vrot.slane %v5740_v7, 4  ;;  %v4320_v15 = vmax.f32 %v3138_v53, 0.0  ;;  %v4319_v1 = vmax.f32 %v2787_v6, 0.0  ;;  %15108 = vst [vmem:[#allocation83_spill] sm:$0xff] %v13191_v17  ;;  %15109 = vst [vmem:[#allocation84_spill] sm:$0xff] %v13193_v22 }
 0x47a   : > { %v5731_v63 = vmax.f32 %v5729_v18, %v5730_v13  ;;  %v5762_v38 = vmax.f32 %v5760_v59, %v5761_v9  ;;  %v4321_v23 = vmax.f32 %v3140_v4, 0.0  ;;  %v2789_v2 = vadd.f32 %v15110_v46, %v11828_v50  ;;  %v13197_v8 = vpop.f32.mrb[214].mxu1  ;;  %v13199_v36 = vpop.f32.mrb[215].mxu0  ;;  %v15113_v47 = vld [vmem:[#allocation21_spill] sm:$0xff] }
 0x47b   : > { %15111 = vst [vmem:[#allocation29_spill] sm:$0xff] %v13197_v8  ;;  %15112 = vst [vmem:[#allocation85_spill] sm:$0xff] %v13199_v36  ;;  %v5753_v43 = vmax.f32 %v5751_v33, %v5752_v52  ;;  %v5742_v0 = vmax.f32 %v5740_v7, %v5741_v48  ;;  %v3142_v53 = vadd.f32 %v15113_v47, %v11832_v51  ;;  %v13205_v17 = vpop.f32.mrb[215].mxu1 }
 0x47c   : > { %v2791_v6 = vadd.f32 %v12752_v61, %v11835_v54  ;;  %15114 = vst [vmem:[#allocation21_spill] sm:$0xff] %v13205_v17  ;;  %v5732_v18 = vrot.slane %v5731_v63, 2  ;;  %v5763_v13 = vrot.slane %v5762_v38, 4  ;;  %v4326_v4 = vmax.f32 %v2789_v2, 0.0 }
 0x47d   : > { %v3144_v59 = vadd.f32 %v12754_v30, %v11839_v55  ;;  %v5754_v9 = vrot.slane %v5753_v43, 2  ;;  %v5743_v46 = vrot.slane %v5742_v0, 2  ;;  %v4328_v8 = vmax.f32 %v3142_v53, 0.0 }
 0x47e   : > { %v4327_v36 = vmax.f32 %v2791_v6, 0.0  ;;  %v5733_v33 = vmax.f32 %v5731_v63, %v5732_v18  ;;  %v5764_v7 = vmax.f32 %v5762_v38, %v5763_v13  ;;  %v4622_v52 = vpack.c.bf16 %v4326_v4, %v4318_v42  ;;  %v13209_v57 = vpop.f32.mrb[216].mxu0  ;;  %v15117_v63 = vld [vmem:[#allocation55_spill] sm:$0xff]  ;;  %v15118_v38 = vld [vmem:[#allocation56_spill] sm:$0xff] }
 0x47f   : > { %v4329_v48 = vmax.f32 %v3144_v59, 0.0  ;;  %v5755_v47 = vmax.f32 %v5753_v43, %v5754_v9  ;;  %v5744_v22 = vmax.f32 %v5742_v0, %v5743_v46  ;;  %v4624_v32 = vpack.c.bf16 %v4328_v8, %v4320_v15  ;;  %15115 = vst [vmem:[#allocation86_spill] sm:$0xff] %v13209_v57  ;;  %v13213_v49 = vpop.f32.mrb[216].mxu1 }
 0x480   : > { %v4623_v61 = vpack.c.bf16 %v4327_v36, %v4319_v1  ;;  %v5734_v17 = vrot.slane %v5733_v33, 1  ;;  %v5765_v37 = vrot.slane %v5764_v7, 2  ;;  %v2795_v30 = vadd.f32 %v12776_v14, %v11828_v50  ;;  %15116 = vst [vmem:[#allocation87_spill] sm:$0xff] %v13213_v49  ;;  %v15119_v36 = vld [vmem:[#allocation57_spill] sm:$0xff]  ;;  %v13223_v18 = vpop.f32.mrb[217].mxu1 }
 0x481   : > { %v4625_v2 = vpack.c.bf16 %v4329_v48, %v4321_v23  ;;  %v5756_v53 = vrot.slane %v5755_v47, 1  ;;  %v5745_v6 = vrot.slane %v5744_v22, 1  ;;  %v3148_v42 = vadd.f32 %v15117_v63, %v11832_v51  ;;  %v13221_v23 = vpop.f32.mrb[217].mxu0  ;;  %15121 = vst [vmem:[#allocation56_spill] sm:$0xff] %v13223_v18  ;;  %v15122_v63 = vld [vmem:[#allocation28_spill] sm:$0xff] }
 0x482   : > { %v2797_v43 = vadd.f32 %v15118_v38, %v11835_v54  ;;  %v5735_v15 = vmax.f32 %v5733_v33, %v5734_v17  ;;  %v5766_v1 = vmax.f32 %v5764_v7, %v5765_v37  ;;  %v4334_v8 = vmax.f32 %v2795_v30, 0.0  ;;  %15120 = vst [vmem:[#allocation55_spill] sm:$0xff] %v13221_v23  ;;  %v15123_v33 = vld [vmem:[#allocation68_spill] sm:$0xff]  ;;  %v15124_v30 = vld [vmem:[#allocation69_spill] sm:$0xff]  ;;  %v13231_v23 = vpop.f32.mrb[218].mxu0 }
 0x483   : > { %v3150_v0 = vadd.f32 %v15119_v36, %v11839_v55  ;;  %v5757_v14 = vmax.f32 %v5755_v47, %v5756_v53  ;;  %v5746_v13 = vmax.f32 %v5744_v22, %v5745_v6  ;;  %v4336_v4 = vmax.f32 %v3148_v42, 0.0  ;;  %15125 = vst [vmem:[#allocation57_spill] sm:$0xff] %v13231_v23  ;;  %v13233_v47 = vpop.f32.mrb[218].mxu1  ;;  %v15127_v42 = vld [vmem:[#allocation70_spill] sm:$0xff] }
 0x484   : > { %v4335_v59 = vmax.f32 %v2797_v43, 0.0  ;;  %v5736_v9 = vpack.i.bf16 %v5735_v15, %v5735_v15  ;;  %v5767_v46 = vrot.slane %v5766_v1, 1  ;;  %v2799_v38 = vadd.f32 %v15122_v63, %v11828_v50  ;;  %15126 = vst [vmem:[#allocation28_spill] sm:$0xff] %v13233_v47  ;;  %v13237_v15 = vpop.f32.mrb[219].mxu0 }
 0x485   : > { %v4337_v48 = vmax.f32 %v3150_v0, 0.0  ;;  %v5758_v17 = vpack.i.bf16 %v5757_v14, %v5757_v14  ;;  %v5747_v37 = vpack.i.bf16 %v5746_v13, %v5746_v13  ;;  %v3152_v7 = vadd.f32 %v15123_v33, %v11832_v51  ;;  %15128 = vst [vmem:[#allocation68_spill] sm:$0xff] %v13237_v15  ;;  %v13239_v0 = vpop.f32.mrb[219].mxu1 }
 0x486   : > { %v2801_v36 = vadd.f32 %v15124_v30, %v11835_v54  ;;  %v6190_v22 = vunpack.c.l.bf16 %v5736_v9  ;;  %v5768_v53 = vmax.f32 %v5766_v1, %v5767_v46  ;;  %v4342_v6 = vmax.f32 %v2799_v38, 0.0  ;;  %15129 = vst [vmem:[#allocation69_spill] sm:$0xff] %v13239_v0 }
 0x487   : > { %v3154_v43 = vadd.f32 %v15127_v42, %v11839_v55  ;;  %v6192_v14 = vunpack.c.l.bf16 %v5758_v17  ;;  %v6191_v13 = vunpack.c.l.bf16 %v5747_v37  ;;  %v4344_v63 = vmax.f32 %v3152_v7, 0.0  ;;  %v15130_v42 = vld [vmem:[#allocation31_spill] sm:$0xff] }
 0x488   : > { %v4343_v33 = vmax.f32 %v2801_v36, 0.0  ;;  %v13243_v30 = vsel %vm6356_vm7, %v6190_v22, %v13156_v3  ;;  %v5769_v23 = vpack.i.bf16 %v5768_v53, %v5768_v53  ;;  %v4630_v47 = vpack.c.bf16 %v4342_v6, %v4334_v8  ;;  %v15131_v8 = vld [vmem:[#allocation20_spill] sm:$0xff] }
 0x489   : > { %v4345_v9 = vmax.f32 %v3154_v43, 0.0  ;;  %v13247_v1 = vsel %vm6356_vm7, %v6192_v14, %v13160_v44  ;;  %v13251_v46 = vsel %vm6356_vm7, %v6191_v13, %v13168_v26  ;;  %v4632_v38 = vpack.c.bf16 %v4344_v63, %v4336_v4  ;;  %v15132_v44 = vld [vmem:[#allocation23_spill] sm:$0xff]  ;;  %v13263_v13 = vpop.f32.mrb[220].mxu0 }
 0x48a   : > { %v4631_v17 = vpack.c.bf16 %v4343_v33, %v4335_v59  ;;  %v6193_v37 = vunpack.c.l.bf16 %v5769_v23  ;;  %v5814_v7 = vmax.bf16 %v4630_v47, %v4622_v52  ;;  %v2805_v3 = vadd.f32 %v15130_v42, %v11828_v50  ;;  %15133 = vst [vmem:[#allocation70_spill] sm:$0xff] %v13263_v13 }
 0x48b   : > { %v4633_v36 = vpack.c.bf16 %v4345_v9, %v4337_v48  ;;  %v5836_v22 = vmax.bf16 %v4632_v38, %v4624_v32  ;;  %v3158_v6 = vadd.f32 %v15131_v8, %v11832_v51  ;;  %v2807_v43 = vadd.f32 %v15132_v44, %v11835_v54  ;;  %v13265_v32 = vpop.f32.mrb[220].mxu1  ;;  %v13267_v38 = vpop.f32.mrb[221].mxu0  ;;  %v15139_v8 = vld [vmem:[#allocation58_spill] sm:$0xff] }
 0x48c   : > { %v5825_v53 = vmax.bf16 %v4631_v17, %v4623_v61  ;;  %v13261_v26 = vsel %vm6356_vm7, %v6193_v37, %v13172_v34  ;;  %v5815_v4 = vunpack.i.l.bf16 %v5814_v7  ;;  %v5816_v59 = vunpack.i.h.bf16 %v5814_v7  ;;  %15134 = vst [vmem:[#allocation31_spill] sm:$0xff] %v13265_v32  ;;  %15135 = vst [vmem:[#allocation20_spill] sm:$0xff] %v13267_v38  ;;  %v13269_v17 = vpop.f32.mrb[221].mxu1 }
 0x48d   : > { %v5847_v23 = vmax.bf16 %v4633_v36, %v4625_v2  ;;  %v5837_v52 = vunpack.i.l.bf16 %v5836_v22  ;;  %v5838_v48 = vunpack.i.h.bf16 %v5836_v22  ;;  %v4350_v9 = vmax.f32 %v2805_v3, 0.0  ;;  %15136 = vst [vmem:[#allocation23_spill] sm:$0xff] %v13269_v17  ;;  %v13271_v36 = vpop.f32.mrb[222].mxu0  ;;  %v13273_v42 = vpop.f32.mrb[222].mxu1 }
 0x48e   : > { %v5826_v47 = vunpack.i.l.bf16 %v5825_v53  ;;  %v5827_v14 = vunpack.i.h.bf16 %v5825_v53  ;;  %v5817_v61 = vmax.f32 %v5815_v4, %v5816_v59  ;;  %v4352_v7 = vmax.f32 %v3158_v6, 0.0  ;;  %15137 = vst [vmem:[#allocation88_spill] sm:$0xff] %v13271_v36  ;;  %15138 = vst [vmem:[#allocation89_spill] sm:$0xff] %v13273_v42  ;;  %v15140_v4 = vld [vmem:[#allocation71_spill] sm:$0xff]  ;;  %v13279_v59 = vpop.f32.mrb[223].mxu0  ;;  %v15143_v6 = vld [vmem:[#allocation72_spill] sm:$0xff] }
 0x48f   : > { %v5848_v63 = vunpack.i.l.bf16 %v5847_v23  ;;  %v5849_v33 = vunpack.i.h.bf16 %v5847_v23  ;;  %v5839_v34 = vmax.f32 %v5837_v52, %v5838_v48  ;;  %v4351_v2 = vmax.f32 %v2807_v43, 0.0  ;;  %15141 = vst [vmem:[#allocation58_spill] sm:$0xff] %v13279_v59  ;;  %v13281_v23 = vpop.f32.mrb[223].mxu1 }
 0x490   : > { %v5828_v37 = vmax.f32 %v5826_v47, %v5827_v14  ;;  %v5818_v22 = vrot.slane %v5817_v61, 4  ;;  %v3160_v44 = vadd.f32 %v15139_v8, %v11839_v55  ;;  %v2809_v3 = vadd.f32 %v15140_v4, %v11828_v50  ;;  %15142 = vst [vmem:[#allocation71_spill] sm:$0xff] %v13281_v23  ;;  %v15144_v47 = vld [vmem:[#allocation73_spill] sm:$0xff]  ;;  %v15145_v23 = vld [vmem:[#allocation74_spill] sm:$0xff] }
 0x491   : > { %v5850_v53 = vmax.f32 %v5848_v63, %v5849_v33  ;;  %v5840_v52 = vrot.slane %v5839_v34, 4  ;;  %v3162_v43 = vadd.f32 %v15143_v6, %v11832_v51  ;;  %v2811_v14 = vadd.f32 %v15144_v47, %v11835_v54 }
 0x492   : > { %v5829_v48 = vrot.slane %v5828_v37, 4  ;;  %v5819_v42 = vmax.f32 %v5817_v61, %v5818_v22  ;;  %v4353_v33 = vmax.f32 %v3160_v44, 0.0  ;;  %v4358_v36 = vmax.f32 %v2809_v3, 0.0  ;;  %v15146_v22 = vld [vmem:[#allocation47_spill] sm:$0xff] }
 0x493   : > { %v5851_v63 = vrot.slane %v5850_v53, 4  ;;  %v5841_v8 = vmax.f32 %v5839_v34, %v5840_v52  ;;  %v4360_v38 = vmax.f32 %v3162_v43, 0.0  ;;  %v4359_v4 = vmax.f32 %v2811_v14, 0.0  ;;  %v15147_v3 = vld [vmem:[#allocation59_spill] sm:$0xff] }
 0x494   : > { %v5830_v17 = vmax.f32 %v5828_v37, %v5829_v48  ;;  %v5820_v32 = vrot.slane %v5819_v42, 2  ;;  %v4638_v13 = vpack.c.bf16 %v4358_v36, %v4350_v9  ;;  %v3164_v0 = vadd.f32 %v15145_v23, %v11839_v55  ;;  %v15148_v9 = vld [vmem:[#allocation30_spill] sm:$0xff] }
 0x495   : > { %v5852_v59 = vmax.f32 %v5850_v53, %v5851_v63  ;;  %v5842_v15 = vrot.slane %v5841_v8, 2  ;;  %v4640_v6 = vpack.c.bf16 %v4360_v38, %v4352_v7  ;;  %v4639_v49 = vpack.c.bf16 %v4359_v4, %v4351_v2  ;;  %v13295_v53 = vpop.f32.mrb[224].mxu0  ;;  %v15152_v63 = vld [vmem:[#allocation60_spill] sm:$0xff] }
 0x496   : > { %v5831_v18 = vrot.slane %v5830_v17, 2  ;;  %v5821_v57 = vmax.f32 %v5819_v42, %v5820_v32  ;;  %v4361_v61 = vmax.f32 %v3164_v0, 0.0  ;;  %v2815_v44 = vadd.f32 %v15146_v22, %v11828_v50  ;;  %15149 = vst [vmem:[#allocation72_spill] sm:$0xff] %v13295_v53  ;;  %v13297_v32 = vpop.f32.mrb[224].mxu1  ;;  %v13303_v4 = vpop.f32.mrb[225].mxu0 }
 0x497   : > { %v5853_v47 = vrot.slane %v5852_v59, 2  ;;  %v5843_v34 = vmax.f32 %v5841_v8, %v5842_v15  ;;  %v3168_v52 = vadd.f32 %v15147_v3, %v11832_v51  ;;  %v2817_v36 = vadd.f32 %v15148_v9, %v11835_v54  ;;  %15150 = vst [vmem:[#allocation73_spill] sm:$0xff] %v13297_v32  ;;  %15153 = vst [vmem:[#allocation74_spill] sm:$0xff] %v13303_v4  ;;  %v13305_v22 = vpop.f32.mrb[225].mxu1 }
 0x498   : > { %v5832_v37 = vmax.f32 %v5830_v17, %v5831_v18  ;;  %v5822_v23 = vrot.slane %v5821_v57, 1  ;;  %v4641_v38 = vpack.c.bf16 %v4361_v61, %v4353_v33  ;;  %v4366_v7 = vmax.f32 %v2815_v44, 0.0  ;;  %v15151_v17 = vld [vmem:[#allocation48_spill] sm:$0xff]  ;;  %15154 = vst [vmem:[#allocation47_spill] sm:$0xff] %v13305_v22  ;;  %v15156_v44 = vld [vmem:[#allocation22_spill] sm:$0xff] }
 0x499   : > { %v5854_v48 = vmax.f32 %v5852_v59, %v5853_v47  ;;  %v5844_v0 = vrot.slane %v5843_v34, 1  ;;  %v4368_v42 = vmax.f32 %v3168_v52, 0.0  ;;  %v4367_v43 = vmax.f32 %v2817_v36, 0.0  ;;  %v15155_v47 = vld [vmem:[#allocation75_spill] sm:$0xff] }
 0x49a   : > { %v5833_v2 = vrot.slane %v5832_v37, 1  ;;  %v5823_v15 = vmax.f32 %v5821_v57, %v5822_v23  ;;  %v3170_v14 = vadd.f32 %v15151_v17, %v11839_v55  ;;  %v2819_v8 = vadd.f32 %v15152_v63, %v11828_v50  ;;  %v13311_v57 = vpop.f32.mrb[226].mxu0  ;;  %v13313_v17 = vpop.f32.mrb[226].mxu1 }
 0x49b   : > { %v5855_v18 = vrot.slane %v5854_v48, 1  ;;  %v5845_v59 = vmax.f32 %v5843_v34, %v5844_v0  ;;  %v3172_v61 = vadd.f32 %v15155_v47, %v11832_v51  ;;  %v2821_v3 = vadd.f32 %v15156_v44, %v11835_v54  ;;  %v13317_v53 = vpop.f32.mrb[227].mxu0  ;;  %v13319_v44 = vpop.f32.mrb[227].mxu1 }
 0x49c   : > { %v5834_v33 = vmax.f32 %v5832_v37, %v5833_v2  ;;  %v5824_v52 = vpack.i.bf16 %v5823_v15, %v5823_v15  ;;  %v4369_v36 = vmax.f32 %v3170_v14, 0.0  ;;  %v4374_v23 = vmax.f32 %v2819_v8, 0.0  ;;  %v15157_v2 = vld [vmem:[#allocation76_spill] sm:$0xff] }
 0x49d   : > { %v5856_v9 = vmax.f32 %v5854_v48, %v5855_v18  ;;  %v5846_v63 = vpack.i.bf16 %v5845_v59, %v5845_v59  ;;  %v4376_v32 = vmax.f32 %v3172_v61, 0.0  ;;  %v4375_v22 = vmax.f32 %v2821_v3, 0.0 }
 0x49e   : > { %v5835_v4 = vpack.i.bf16 %v5834_v33, %v5834_v33  ;;  %v6198_v34 = vunpack.c.l.bf16 %v5824_v52  ;;  %v4646_v0 = vpack.c.bf16 %v4374_v23, %v4366_v7  ;;  %v3174_v47 = vadd.f32 %v15157_v2, %v11839_v55 }
 0x49f   : > { %v5857_v37 = vpack.i.bf16 %v5856_v9, %v5856_v9  ;;  %v6200_v15 = vunpack.c.l.bf16 %v5846_v63  ;;  %v4648_v18 = vpack.c.bf16 %v4376_v32, %v4368_v42  ;;  %v4647_v14 = vpack.c.bf16 %v4375_v22, %v4367_v43  ;;  %v13337_v63 = vpop.f32.mrb[228].mxu0 }
 0x4a0   : > { %v6199_v48 = vunpack.c.l.bf16 %v5835_v4  ;;  %v13323_v8 = vsel %vm6358_vm8, %v6198_v34, %v13243_v30  ;;  %v5902_v33 = vmax.bf16 %v4646_v0, %v4638_v13  ;;  %v4377_v61 = vmax.f32 %v3174_v47, 0.0 }
 0x4a1   : > { %v6201_v59 = vunpack.c.l.bf16 %v5857_v37  ;;  %v13327_v7 = vsel %vm6358_vm8, %v6200_v15, %v13247_v1  ;;  %v5924_v52 = vmax.bf16 %v4648_v18, %v4640_v6  ;;  %v5913_v9 = vmax.bf16 %v4647_v14, %v4639_v49  ;;  %v13339_v1 = vpop.f32.mrb[228].mxu1  ;;  %v15158_v6 = vld [vmem:[#allocation49_spill] sm:$0xff]  ;;  %v13345_v37 = vpop.f32.mrb[229].mxu0 }
 0x4a2   : > { %v13331_v3 = vsel %vm6358_vm8, %v6199_v48, %v13251_v46  ;;  %v5903_v42 = vunpack.i.l.bf16 %v5902_v33  ;;  %v5904_v30 = vunpack.i.h.bf16 %v5902_v33  ;;  %v4649_v43 = vpack.c.bf16 %v4377_v61, %v4369_v36  ;;  %v13347_v0 = vpop.f32.mrb[229].mxu1  ;;  %v13353_v48 = vpop.f32.mrb[230].mxu0 }
 0x4a3   : > { %v13335_v32 = vsel %vm6358_vm8, %v6201_v59, %v13261_v26  ;;  %v5925_v4 = vunpack.i.l.bf16 %v5924_v52  ;;  %v5926_v13 = vunpack.i.h.bf16 %v5924_v52  ;;  %v5914_v22 = vunpack.i.l.bf16 %v5913_v9  ;;  %15159 = vst [vmem:[#allocation59_spill] sm:$0xff] %v13353_v48  ;;  %v13355_v33 = vpop.f32.mrb[230].mxu1 }
 0x4a4   : > { %v5915_v23 = vunpack.i.h.bf16 %v5913_v9  ;;  %v5905_v34 = vmax.f32 %v5903_v42, %v5904_v30  ;;  %v5935_v46 = vmax.bf16 %v4649_v43, %v4641_v38  ;;  %v2825_v49 = vadd.f32 %v15158_v6, %v11828_v50  ;;  %15160 = vst [vmem:[#allocation30_spill] sm:$0xff] %v13355_v33 }
 0x4a5   : > { %v3178_v26 = vadd.f32 %v12901_v10, %v11832_v51  ;;  %v5927_v36 = vmax.f32 %v5925_v4, %v5926_v13  ;;  %v2827_v47 = vadd.f32 %v12903_v62, %v11835_v54  ;;  %v3180_v15 = vadd.f32 %v12905_v20, %v11839_v55  ;;  %v13359_v4 = vpop.f32.mrb[231].mxu0  ;;  %v13361_v20 = vpop.f32.mrb[231].mxu1 }
 0x4a6   : > { %v5916_v2 = vmax.f32 %v5914_v22, %v5915_v23  ;;  %v5906_v38 = vrot.slane %v5905_v34, 4  ;;  %v5936_v18 = vunpack.i.l.bf16 %v5935_v46  ;;  %v5937_v14 = vunpack.i.h.bf16 %v5935_v46  ;;  %15161 = vst [vmem:[#allocation48_spill] sm:$0xff] %v13359_v4  ;;  %15162 = vst [vmem:[#allocation60_spill] sm:$0xff] %v13361_v20  ;;  %v13369_v4 = vpop.f32.mrb[232].mxu0  ;;  %v13373_v48 = vpop.f32.mrb[232].mxu1 }
 0x4a7   : > { %v4382_v59 = vmax.f32 %v2825_v49, 0.0  ;;  %v5928_v10 = vrot.slane %v5927_v36, 4  ;;  %v4384_v52 = vmax.f32 %v3178_v26, 0.0  ;;  %v4383_v9 = vmax.f32 %v2827_v47, 0.0 }
 0x4a8   : > { %v5917_v61 = vrot.slane %v5916_v2, 4  ;;  %v5907_v42 = vmax.f32 %v5905_v34, %v5906_v38  ;;  %v5938_v30 = vmax.f32 %v5936_v18, %v5937_v14  ;;  %v4385_v43 = vmax.f32 %v3180_v15, 0.0 }
 0x4a9   : > { %v2829_v62 = vadd.f32 %v12907_v21, %v11828_v50  ;;  %v5929_v13 = vmax.f32 %v5927_v36, %v5928_v10  ;;  %v3182_v23 = vadd.f32 %v12909_v31, %v11832_v51  ;;  %v2831_v46 = vadd.f32 %v12911_v28, %v11835_v54 }
 0x4aa   : > { %v5918_v22 = vmax.f32 %v5916_v2, %v5917_v61  ;;  %v5908_v6 = vrot.slane %v5907_v42, 2  ;;  %v5939_v49 = vrot.slane %v5938_v30, 4  ;;  %v3184_v26 = vadd.f32 %v12913_v58, %v11839_v55 }
 0x4ab   : > { %v4390_v34 = vmax.f32 %v2829_v62, 0.0  ;;  %v5930_v47 = vrot.slane %v5929_v13, 2  ;;  %v4392_v15 = vmax.f32 %v3182_v23, 0.0  ;;  %v4391_v38 = vmax.f32 %v2831_v46, 0.0 }
 0x4ac   : > { %v5919_v21 = vrot.slane %v5918_v22, 2  ;;  %v5909_v18 = vmax.f32 %v5907_v42, %v5908_v6  ;;  %v5940_v14 = vmax.f32 %v5938_v30, %v5939_v49  ;;  %v4393_v2 = vmax.f32 %v3184_v26, 0.0  ;;  %v15163_v42 = vld [vmem:[#allocation50_spill] sm:$0xff]  ;;  %v13383_v49 = vpop.f32.mrb[233].mxu1 }
 0x4ad   : > { %v4654_v36 = vpack.c.bf16 %v4390_v34, %v4382_v59  ;;  %v5931_v10 = vmax.f32 %v5929_v13, %v5930_v47  ;;  %v4656_v31 = vpack.c.bf16 %v4392_v15, %v4384_v52  ;;  %v4655_v20 = vpack.c.bf16 %v4391_v38, %v4383_v9  ;;  %15165 = vst [vmem:[#allocation75_spill] sm:$0xff] %v13383_v49  ;;  %v15166_v38 = vld [vmem:[#allocation51_spill] sm:$0xff] }
 0x4ae   : > { %v5920_v61 = vmax.f32 %v5918_v22, %v5919_v21  ;;  %v5910_v28 = vrot.slane %v5909_v18, 1  ;;  %v5941_v33 = vrot.slane %v5940_v14, 2  ;;  %v4657_v62 = vpack.c.bf16 %v4393_v2, %v4385_v43  ;;  %v15164_v22 = vld [vmem:[#allocation33_spill] sm:$0xff]  ;;  %v13381_v43 = vpop.f32.mrb[233].mxu0 }
 0x4af   : > { %v2835_v58 = vadd.f32 %v12939_v19, %v11828_v50  ;;  %v5932_v23 = vrot.slane %v5931_v10, 1  ;;  %v3188_v59 = vadd.f32 %v12941_v29, %v11832_v51  ;;  %v2837_v30 = vadd.f32 %v15163_v42, %v11835_v54 }
 0x4b0   : > { %v5921_v46 = vrot.slane %v5920_v61, 1  ;;  %v5911_v52 = vmax.f32 %v5909_v18, %v5910_v28  ;;  %v5942_v9 = vmax.f32 %v5940_v14, %v5941_v33  ;;  %v3190_v6 = vadd.f32 %v15164_v22, %v11839_v55  ;;  %v15167_v14 = vld [vmem:[#allocation32_spill] sm:$0xff]  ;;  %v13391_v22 = vpop.f32.mrb[234].mxu0 }
 0x4b1   : > { %v4398_v13 = vmax.f32 %v2835_v58, 0.0  ;;  %v5933_v19 = vmax.f32 %v5931_v10, %v5932_v23  ;;  %v4400_v26 = vmax.f32 %v3188_v59, 0.0  ;;  %v4399_v47 = vmax.f32 %v2837_v30, 0.0  ;;  %v15168_v58 = vld [vmem:[#allocation77_spill] sm:$0xff]  ;;  %15169 = vst [vmem:[#allocation22_spill] sm:$0xff] %v13391_v22  ;;  %v13393_v10 = vpop.f32.mrb[234].mxu1 }
 0x4b2   : > { %v5922_v34 = vmax.f32 %v5920_v61, %v5921_v46  ;;  %v5912_v21 = vpack.i.bf16 %v5911_v52, %v5911_v52  ;;  %v5943_v15 = vrot.slane %v5942_v9, 1  ;;  %v4401_v29 = vmax.f32 %v3190_v6, 0.0  ;;  %15170 = vst [vmem:[#allocation76_spill] sm:$0xff] %v13393_v10  ;;  %v15171_v59 = vld [vmem:[#allocation78_spill] sm:$0xff]  ;;  %v13397_v52 = vpop.f32.mrb[235].mxu0  ;;  %v15190_v10 = vld [vmem:[#allocation43_spill] sm:$0xff] }
 0x4b3   : > { %v2839_v2 = vadd.f32 %v15166_v38, %v11828_v50  ;;  %v5934_v18 = vpack.i.bf16 %v5933_v19, %v5933_v19  ;;  %v3192_v28 = vadd.f32 %v15167_v14, %v11832_v51  ;;  %v2841_v42 = vadd.f32 %v15168_v58, %v11835_v54  ;;  %15172 = vst [vmem:[#allocation49_spill] sm:$0xff] %v13397_v52  ;;  %v13399_v50 = vpop.f32.mrb[235].mxu1  ;;  %v15174_v58 = vld [vmem:[#allocation40_spill] sm:$0xff] }
 0x4b4   : > { %v5923_v33 = vpack.i.bf16 %v5922_v34, %v5922_v34  ;;  %v6206_v61 = vunpack.c.l.bf16 %v5912_v21  ;;  %v5944_v23 = vmax.f32 %v5942_v9, %v5943_v15  ;;  %v3194_v30 = vadd.f32 %v15171_v59, %v11839_v55  ;;  %15173 = vst [vmem:[#allocation50_spill] sm:$0xff] %v13399_v50 }
 0x4b5   : > { %v4406_v46 = vmax.f32 %v2839_v2, 0.0  ;;  %v6208_v6 = vunpack.c.l.bf16 %v5934_v18  ;;  %v4408_v51 = vmax.f32 %v3192_v28, 0.0  ;;  %v4407_v34 = vmax.f32 %v2841_v42, 0.0 }
 0x4b6   : > { %v6207_v19 = vunpack.c.l.bf16 %v5923_v33  ;;  %v13403_v54 = vsel %vm6360_vm9, %v6206_v61, %v13323_v8  ;;  %v5945_v38 = vpack.i.bf16 %v5944_v23, %v5944_v23  ;;  %v4409_v21 = vmax.f32 %v3194_v30, 0.0 }
 0x4b7   : > { %v4662_v14 = vpack.c.bf16 %v4406_v46, %v4398_v13  ;;  %v13407_v9 = vsel %vm6360_vm9, %v6208_v6, %v13327_v7  ;;  %v4664_v15 = vpack.c.bf16 %v4408_v51, %v4400_v26  ;;  %v4663_v2 = vpack.c.bf16 %v4407_v34, %v4399_v47  ;;  %v13422_v6 = vpop.f32.mrb[236].mxu1  ;;  %v10165_v51 = vld [vmem:[%s14812_s6] sm:$0xff] }
 0x4b8   : > { %v13411_v55 = vsel %vm6360_vm9, %v6207_v19, %v13331_v3  ;;  %v6209_v18 = vunpack.c.l.bf16 %v5945_v38  ;;  %v4665_v28 = vpack.c.bf16 %v4409_v21, %v4401_v29  ;;  %v2148_v42 = vsub.s32 4, %v15174_v58  ;;  %v13420_v29 = vpop.f32.mrb[236].mxu0  ;;  %15176 = vst [vmem:[#allocation51_spill] sm:$0xff] %v13422_v6 }
 0x4b9   : > { %v5990_v33 = vmax.bf16 %v4662_v14, %v4654_v36  ;;  %v6012_v8 = vmax.bf16 %v4664_v15, %v4656_v31  ;;  %v6001_v61 = vmax.bf16 %v4663_v2, %v4655_v20  ;;  %v2156_v13 = vsub.s32 6, %v15174_v58  ;;  %15175 = vst [vmem:[#allocation33_spill] sm:$0xff] %v13420_v29  ;;  %v13429_v34 = vpop.f32.mrb[237].mxu0  ;;  %v15187_v29 = vld [vmem:[#allocation62_spill] sm:$0xff] }
 0x4ba   : > { %v2152_v23 = vsub.s32 5, %v15174_v58  ;;  %v13418_v7 = vsel %vm6360_vm9, %v6209_v18, %v13335_v32  ;;  %v6023_v59 = vmax.bf16 %v4665_v28, %v4657_v62  ;;  %v13427_v32 = vrot.slane %v10165_v51, %v2148_v42  ;;  %15177 = vst [vmem:[#allocation32_spill] sm:$0xff] %v13429_v34  ;;  %v13431_v62 = vpop.f32.mrb[237].mxu1  ;;  %v13437_v2 = vpop.f32.mrb[238].mxu0 }
 0x4bb   : > { %v5991_v46 = vunpack.i.l.bf16 %v5990_v33  ;;  %v5992_v3 = vunpack.i.h.bf16 %v5990_v33  ;;  %v6013_v26 = vunpack.i.l.bf16 %v6012_v8  ;;  %v6014_v47 = vunpack.i.h.bf16 %v6012_v8  ;;  %15178 = vst [vmem:[#allocation77_spill] sm:$0xff] %v13431_v62  ;;  %15179 = vst [vmem:[#allocation78_spill] sm:$0xff] %v13437_v2  ;;  %v13439_v18 = vpop.f32.mrb[238].mxu1  ;;  %v15181_v8 = vld [vmem:[#allocation35_spill] sm:$0xff] }
 0x4bc   : > { %v6002_v30 = vunpack.i.l.bf16 %v6001_v61  ;;  %v6003_v36 = vunpack.i.h.bf16 %v6001_v61  ;;  %v6024_v31 = vunpack.i.l.bf16 %v6023_v59  ;;  %v6025_v19 = vunpack.i.h.bf16 %v6023_v59  ;;  %15180 = vst [vmem:[#allocation90_spill] sm:$0xff] %v13439_v18 }
 0x4bd   : > { %v5993_v20 = vmax.f32 %v5991_v46, %v5992_v3  ;;  %v6015_v38 = vmax.f32 %v6013_v26, %v6014_v47  ;;  %v13433_v21 = vrot.slane %v10165_v51, %v2156_v13  ;;  %v13435_v15 = vrot.slane %v10165_v51, %v2152_v23  ;;  %v13444_v46 = vpop.f32.mrb[239].mxu0  ;;  %v13446_v3 = vpop.f32.mrb[239].mxu1  ;;  %v15184_v23 = vld [vmem:[#allocation25_spill] sm:$0xff]  ;;  %v15185_v47 = vld [vmem:[#allocation52_spill] sm:$0xff] }
 0x4be   : > { %v6004_v14 = vmax.f32 %v6002_v30, %v6003_v36  ;;  %v6026_v28 = vmax.f32 %v6024_v31, %v6025_v19  ;;  %v3231_v42 = vadd.f32 %v15181_v8, %v13427_v32  ;;  %v2160_v61 = vsub.s32 7, %v15174_v58  ;;  %15182 = vst [vmem:[#allocation35_spill] sm:$0xff] %v13444_v46  ;;  %15183 = vst [vmem:[#allocation91_spill] sm:$0xff] %v13446_v3  ;;  %v15186_v3 = vld [vmem:[#allocation61_spill] sm:$0xff] }
 0x4bf   : > { %v5994_v33 = vrot.slane %v5993_v20, 4  ;;  %v6016_v59 = vrot.slane %v6015_v38, 4  ;;  %v3584_v26 = vadd.f32 %v15184_v23, %v13433_v21  ;;  %v3233_v30 = vadd.f32 %v15185_v47, %v13435_v15 }
 0x4c0   : > { %v6005_v13 = vrot.slane %v6004_v14, 4  ;;  %v6027_v18 = vrot.slane %v6026_v28, 4  ;;  %v3906_v31 = vmax.f32 %v3231_v42, 0.0  ;;  %v13452_v19 = vrot.slane %v10165_v51, %v2160_v61  ;;  %v15189_v51 = vld [vmem:[#allocation24_spill] sm:$0xff] }
 0x4c1   : > { %v5995_v36 = vmax.f32 %v5993_v20, %v5994_v33  ;;  %v6017_v8 = vmax.f32 %v6015_v38, %v6016_v59  ;;  %v3908_v58 = vmax.f32 %v3584_v26, 0.0  ;;  %v3907_v62 = vmax.f32 %v3233_v30, 0.0  ;;  %v15188_v20 = vld [vmem:[#allocation79_spill] sm:$0xff] }
 0x4c2   : > { %v6006_v2 = vmax.f32 %v6004_v14, %v6005_v13  ;;  %v6028_v34 = vmax.f32 %v6026_v28, %v6027_v18  ;;  %v3586_v6 = vadd.f32 %v15186_v3, %v13452_v19  ;;  %v3235_v23 = vadd.f32 %v15187_v29, %v13427_v32  ;;  %v13462_v3 = vpop.f32.mrb[240].mxu0 }
 0x4c3   : > { %v5996_v46 = vrot.slane %v5995_v36, 2  ;;  %v6018_v50 = vrot.slane %v6017_v8, 2  ;;  %v3588_v33 = vadd.f32 %v15188_v20, %v13433_v21  ;;  %v3237_v42 = vadd.f32 %v15189_v51, %v13435_v15  ;;  %v13466_v20 = vpop.f32.mrb[240].mxu1 }
 0x4c4   : > { %v6007_v52 = vrot.slane %v6006_v2, 2  ;;  %v6029_v14 = vrot.slane %v6028_v34, 2  ;;  %v3909_v61 = vmax.f32 %v3586_v6, 0.0  ;;  %v3914_v59 = vmax.f32 %v3235_v23, 0.0  ;;  %v15192_v23 = vld [vmem:[#allocation63_spill] sm:$0xff] }
 0x4c5   : > { %v5997_v38 = vmax.f32 %v5995_v36, %v5996_v46  ;;  %v6019_v13 = vmax.f32 %v6017_v8, %v6018_v50  ;;  %v3916_v28 = vmax.f32 %v3588_v33, 0.0  ;;  %v3915_v26 = vmax.f32 %v3237_v42, 0.0  ;;  %v13474_v8 = vpop.f32.mrb[241].mxu0 }
 0x4c6   : > { %v6008_v18 = vmax.f32 %v6006_v2, %v6007_v52  ;;  %v6030_v29 = vmax.f32 %v6028_v34, %v6029_v14  ;;  %v4418_v30 = vpack.c.bf16 %v3914_v59, %v3906_v31  ;;  %v3590_v22 = vadd.f32 %v15190_v10, %v13452_v19  ;;  %v13476_v34 = vpop.f32.mrb[241].mxu1 }
 0x4c7   : > { %v5998_v47 = vrot.slane %v5997_v38, 1  ;;  %v6020_v49 = vrot.slane %v6019_v13, 1  ;;  %v13468_v46 = vpack.c.bf16 %v3916_v28, %v3908_v58  ;;  %v13470_v6 = vpack.c.bf16 %v3915_v26, %v3907_v62  ;;  %15191 = vst [vmem:[#allocation25_spill] sm:$0xff] %v13476_v34  ;;  %v13482_v62 = vpop.f32.mrb[242].mxu0 }
 0x4c8   : > { %v6009_v51 = vrot.slane %v6008_v18, 1  ;;  %v6031_v52 = vrot.slane %v6030_v29, 1  ;;  %v3917_v2 = vmax.f32 %v3590_v22, 0.0  ;;  %v3241_v36 = vadd.f32 %v13017_v16, %v13427_v32  ;;  %15193 = vst [vmem:[#allocation52_spill] sm:$0xff] %v13482_v62  ;;  %v13486_v16 = vpop.f32.mrb[242].mxu1 }
 0x4c9   : > { %v5999_v50 = vmax.f32 %v5997_v38, %v5998_v47  ;;  %v6021_v31 = vmax.f32 %v6019_v13, %v6020_v49  ;;  %v3594_v33 = vadd.f32 %v15192_v23, %v13433_v21  ;;  %v3243_v58 = vadd.f32 %v13023_v41, %v13435_v15  ;;  %15194 = vst [vmem:[#allocation61_spill] sm:$0xff] %v13486_v16  ;;  %v6086_v13 = vld [vmem:[#allocation2 + $0x40] sm:$0xff] }
 0x4ca   : > { %v6010_v10 = vmax.f32 %v6008_v18, %v6009_v51  ;;  %v6032_v38 = vmax.f32 %v6030_v29, %v6031_v52  ;;  %v13484_v22 = vpack.c.bf16 %v3917_v2, %v3909_v61  ;;  %v3922_v14 = vmax.f32 %v3241_v36, 0.0  ;;  %v15195_v51 = vld [vmem:[#allocation64_spill] sm:$0xff]  ;;  %v13494_v61 = vpop.f32.mrb[243].mxu1  ;;  %v6088_v29 = vld [vmem:[#allocation2 + $0x50] sm:$0xff]  ;;  %v6087_v2 = vld [vmem:[#allocation2 + $0x48] sm:$0xff] }
 0x4cb   : > { %v6000_v42 = vpack.i.bf16 %v5999_v50, %v5999_v50  ;;  %v6022_v59 = vpack.i.bf16 %v6021_v31, %v6021_v31  ;;  %v3924_v26 = vmax.f32 %v3594_v33, 0.0  ;;  %v3923_v49 = vmax.f32 %v3243_v58, 0.0  ;;  %v13492_v50 = vpop.f32.mrb[243].mxu0  ;;  %15197 = vst [vmem:[#allocation79_spill] sm:$0xff] %v13494_v61  ;;  %v15198_v31 = vld [vmem:[#allocation34_spill] sm:$0xff]  ;;  %v15199_v33 = vld [vmem:[#allocation44_spill] sm:$0xff] }
 0x4cc   : > { %v6011_v28 = vpack.i.bf16 %v6010_v10, %v6010_v10  ;;  %v6033_v47 = vpack.i.bf16 %v6032_v38, %v6032_v38  ;;  %v3596_v23 = vadd.f32 %v15195_v51, %v13452_v19  ;;  %v3245_v41 = vadd.f32 %v13027_v5, %v13427_v32  ;;  %15196 = vst [vmem:[#allocation62_spill] sm:$0xff] %v13492_v50  ;;  %v6089_v38 = vld [vmem:[#allocation2 + $0x58] sm:$0xff] }
 0x4cd   : > { %v6214_v18 = vunpack.c.l.bf16 %v6000_v42  ;;  %v6216_v52 = vunpack.c.l.bf16 %v6022_v59  ;;  %v3598_v10 = vadd.f32 %v15198_v31, %v13433_v21  ;;  %v3247_v58 = vadd.f32 %v15199_v33, %v13435_v15 }
 0x4ce   : > { %v6215_v36 = vunpack.c.l.bf16 %v6011_v28  ;;  %v6217_v51 = vunpack.c.l.bf16 %v6033_v47  ;;  %v3925_v5 = vmax.f32 %v3596_v23, 0.0  ;;  %v3930_v16 = vmax.f32 %v3245_v41, 0.0  ;;  %v15200_v23 = vld [vmem:[#allocation65_spill] sm:$0xff]  ;;  %v13510_v41 = vpop.f32.mrb[244].mxu0 }
 0x4cf   : > { %v6419_v42 = vsel %vm6362_vm10, %v6214_v18, %v13403_v54  ;;  %v6433_v61 = vsel %vm6362_vm10, %v6216_v52, %v13407_v9  ;;  %v3932_v28 = vmax.f32 %v3598_v10, 0.0  ;;  %v3931_v47 = vmax.f32 %v3247_v58, 0.0  ;;  %v13512_v9 = vpop.f32.mrb[244].mxu1 }
 0x4d0   : > { %v6493_v50 = vmax.f32 %v6086_v13, %v6419_v42  ;;  %v6426_v59 = vsel %vm6362_vm10, %v6215_v36, %v13411_v55  ;;  %v6495_v62 = vmax.f32 %v6088_v29, %v6433_v61  ;;  %v6440_v33 = vsel %vm6362_vm10, %v6217_v51, %v13418_v7  ;;  %v15201_v61 = vld [vmem:[#allocation66_spill] sm:$0xff]  ;;  %v15202_v7 = vld [vmem:[#allocation67_spill] sm:$0xff]  ;;  %v13522_v52 = vpop.f32.mrb[245].mxu1 }
 0x4d1   : > { %v6494_v31 = vmax.f32 %v6087_v2, %v6426_v59  ;;  %v4426_v34 = vpack.c.bf16 %v3930_v16, %v3922_v14  ;;  %v6496_v54 = vmax.f32 %v6089_v38, %v6440_v33  ;;  %v4428_v18 = vpack.c.bf16 %v3932_v28, %v3924_v26  ;;  %v15203_v16 = vld [vmem:[#allocation45_spill] sm:$0xff]  ;;  %v13529_v59 = vpop.f32.mrb[246].mxu1 }
 0x4d2   : > { %6509 = vst [vmem:[#allocation2 + $0x40] sm:$0xff] %v6493_v50  ;;  %v3600_v13 = vadd.f32 %v15200_v23, %v13452_v19  ;;  %6511 = vst [vmem:[#allocation2 + $0x50] sm:$0xff] %v6495_v62  ;;  %v3251_v29 = vadd.f32 %v15201_v61, %v13427_v32  ;;  %v3604_v14 = vadd.f32 %v15202_v7, %v13433_v21  ;;  %v13520_v50 = vpop.f32.mrb[245].mxu0  ;;  %v13536_v61 = vpop.f32.mrb[247].mxu1 }
 0x4d3   : > { %6510 = vst [vmem:[#allocation2 + $0x48] sm:$0xff] %v6494_v31  ;;  %v4714_v55 = vmax.bf16 %v4426_v34, %v4418_v30  ;;  %v3253_v26 = vadd.f32 %v15203_v16, %v13435_v15  ;;  %6512 = vst [vmem:[#allocation2 + $0x58] sm:$0xff] %v6496_v54  ;;  %v4736_v2 = vmax.bf16 %v4428_v18, %v13468_v46  ;;  %v15204_v30 = vld [vmem:[#allocation37_spill] sm:$0xff]  ;;  %v13527_v10 = vpop.f32.mrb[246].mxu0  ;;  %v15207_v18 = vld [vmem:[#allocation19_spill] sm:$0xff] }
 0x4d4   : > { %v4427_v36 = vpack.c.bf16 %v3931_v47, %v3923_v49  ;;  %v3933_v62 = vmax.f32 %v3600_v13, 0.0  ;;  %v3606_v34 = vadd.f32 %v15204_v30, %v13452_v19  ;;  %15205 = vst [vmem:[#allocation24_spill] sm:$0xff] %v13527_v10  ;;  %v3938_v38 = vmax.f32 %v3251_v29, 0.0  ;;  %15206 = vst [vmem:[#allocation43_spill] sm:$0xff] %v13529_v59  ;;  %v13534_v13 = vpop.f32.mrb[247].mxu0 }
 0x4d5   : > { %v4715_v58 = vunpack.i.l.bf16 %v4714_v55  ;;  %v4716_v42 = vunpack.i.h.bf16 %v4714_v55  ;;  %v3940_v51 = vmax.f32 %v3604_v14, 0.0  ;;  %v4737_v28 = vunpack.i.l.bf16 %v4736_v2  ;;  %15208 = vst [vmem:[#allocation63_spill] sm:$0xff] %v13534_v13  ;;  %15209 = vst [vmem:[#allocation64_spill] sm:$0xff] %v13536_v61 }
 0x4d6   : > { %v4738_v31 = vunpack.i.h.bf16 %v4736_v2  ;;  %v4725_v33 = vmax.bf16 %v4427_v36, %v13470_v6  ;;  %v4429_v54 = vpack.c.bf16 %v3933_v62, %v3925_v5  ;;  %v3939_v46 = vmax.f32 %v3253_v26, 0.0  ;;  %v15210_v6 = vld [vmem:[#allocation27_spill] sm:$0xff]  ;;  %v15211_v26 = vld [vmem:[#allocation53_spill] sm:$0xff] }
 0x4d7   : > { %v4717_v23 = vmax.f32 %v4715_v58, %v4716_v42  ;;  %v3941_v49 = vmax.f32 %v3606_v34, 0.0  ;;  %v3255_v47 = vadd.f32 %v15207_v18, %v13427_v32  ;;  %v3608_v5 = vadd.f32 %v15210_v6, %v13433_v21 }
 0x4d8   : > { %v4739_v55 = vmax.f32 %v4737_v28, %v4738_v31  ;;  %v4726_v29 = vunpack.i.l.bf16 %v4725_v33  ;;  %v4727_v7 = vunpack.i.h.bf16 %v4725_v33  ;;  %v4747_v14 = vmax.bf16 %v4429_v54, %v13484_v22  ;;  %v15212_v22 = vld [vmem:[#allocation54_spill] sm:$0xff] }
 0x4d9   : > { %v4718_v16 = vrot.slane %v4717_v23, 4  ;;  %v3946_v2 = vmax.f32 %v3255_v47, 0.0  ;;  %v3257_v36 = vadd.f32 %v15211_v26, %v13435_v15  ;;  %v3948_v61 = vmax.f32 %v3608_v5, 0.0  ;;  %v13545_v47 = vpop.f32.mrb[248].mxu0 }
 0x4da   : > { %v4740_v62 = vrot.slane %v4739_v55, 4  ;;  %v4728_v30 = vmax.f32 %v4726_v29, %v4727_v7  ;;  %v4748_v34 = vunpack.i.l.bf16 %v4747_v14  ;;  %v4749_v58 = vunpack.i.h.bf16 %v4747_v14  ;;  %v13549_v7 = vpop.f32.mrb[248].mxu1 }
 0x4db   : > { %v4719_v42 = vmax.f32 %v4717_v23, %v4718_v16  ;;  %v4434_v18 = vpack.c.bf16 %v3946_v2, %v3938_v38  ;;  %v3947_v28 = vmax.f32 %v3257_v36, 0.0  ;;  %v3610_v54 = vadd.f32 %v15212_v22, %v13452_v19  ;;  %15213 = vst [vmem:[#allocation34_spill] sm:$0xff] %v13549_v7  ;;  %v13555_v36 = vpop.f32.mrb[249].mxu0 }
 0x4dc   : > { %v4741_v31 = vmax.f32 %v4739_v55, %v4740_v62  ;;  %v4729_v33 = vrot.slane %v4728_v30, 4  ;;  %v4750_v13 = vmax.f32 %v4748_v34, %v4749_v58  ;;  %v4436_v59 = vpack.c.bf16 %v3948_v61, %v3940_v51  ;;  %15214 = vst [vmem:[#allocation44_spill] sm:$0xff] %v13555_v36  ;;  %v13557_v51 = vpop.f32.mrb[249].mxu1  ;;  %v13563_v22 = vpop.f32.mrb[250].mxu0 }
 0x4dd   : > { %v4720_v6 = vrot.slane %v4719_v42, 2  ;;  %v4435_v10 = vpack.c.bf16 %v3947_v28, %v3939_v46  ;;  %v3261_v29 = vadd.f32 %v13101_v27, %v13427_v32  ;;  %v3949_v16 = vmax.f32 %v3610_v54, 0.0  ;;  %15215 = vst [vmem:[#allocation65_spill] sm:$0xff] %v13557_v51  ;;  %15216 = vst [vmem:[#allocation66_spill] sm:$0xff] %v13563_v22  ;;  %v13565_v54 = vpop.f32.mrb[250].mxu1 }
 0x4de   : > { %v4742_v23 = vrot.slane %v4741_v31, 2  ;;  %v4730_v38 = vmax.f32 %v4728_v30, %v4729_v33  ;;  %v4751_v14 = vrot.slane %v4750_v13, 4  ;;  %v3614_v5 = vadd.f32 %v13107_v40, %v13433_v21  ;;  %15217 = vst [vmem:[#allocation67_spill] sm:$0xff] %v13565_v54 }
 0x4df   : > { %v4721_v55 = vmax.f32 %v4719_v42, %v4720_v6  ;;  %v3954_v2 = vmax.f32 %v3261_v29, 0.0  ;;  %v3263_v26 = vadd.f32 %v13109_v45, %v13435_v15  ;;  %v4437_v62 = vpack.c.bf16 %v3949_v16, %v3941_v49  ;;  %v15218_v49 = vld [vmem:[#allocation46_spill] sm:$0xff]  ;;  %v15219_v29 = vld [vmem:[#allocation36_spill] sm:$0xff] }
 0x4e0   : > { %v4743_v46 = vmax.f32 %v4741_v31, %v4742_v23  ;;  %v4731_v27 = vrot.slane %v4730_v38, 2  ;;  %v4752_v61 = vmax.f32 %v4750_v13, %v4751_v14  ;;  %v3956_v30 = vmax.f32 %v3614_v5, 0.0  ;;  %v13571_v14 = vpop.f32.mrb[251].mxu0 }
 0x4e1   : > { %v4722_v34 = vrot.slane %v4721_v55, 1  ;;  %v3955_v58 = vmax.f32 %v3263_v26, 0.0  ;;  %v3616_v42 = vadd.f32 %v13115_v39, %v13452_v19  ;;  %v3265_v45 = vadd.f32 %v13117_v25, %v13427_v32  ;;  %15220 = vst [vmem:[#allocation45_spill] sm:$0xff] %v13571_v14  ;;  %v13573_v39 = vpop.f32.mrb[251].mxu1 }
 0x4e2   : > { %v4744_v28 = vrot.slane %v4743_v46, 1  ;;  %v4732_v33 = vmax.f32 %v4730_v38, %v4731_v27  ;;  %v4753_v40 = vrot.slane %v4752_v61, 2  ;;  %v3618_v13 = vadd.f32 %v15218_v49, %v13433_v21  ;;  %15221 = vst [vmem:[#allocation37_spill] sm:$0xff] %v13573_v39 }
 0x4e3   : > { %v4723_v31 = vmax.f32 %v4721_v55, %v4722_v34  ;;  %v3957_v6 = vmax.f32 %v3616_v42, 0.0  ;;  %v3267_v23 = vadd.f32 %v15219_v29, %v13435_v15  ;;  %v3962_v25 = vmax.f32 %v3265_v45, 0.0  ;;  %v15222_v55 = vld [vmem:[#allocation80_spill] sm:$0xff] }
 0x4e4   : > { %v4745_v38 = vmax.f32 %v4743_v46, %v4744_v28  ;;  %v4733_v16 = vrot.slane %v4732_v33, 1  ;;  %v4754_v5 = vmax.f32 %v4752_v61, %v4753_v40  ;;  %v3964_v27 = vmax.f32 %v3618_v13, 0.0 }
 0x4e5   : > { %v4724_v26 = vpack.i.bf16 %v4723_v31, %v4723_v31  ;;  %v3963_v22 = vmax.f32 %v3267_v23, 0.0  ;;  %v3620_v34 = vadd.f32 %v15222_v55, %v13452_v19  ;;  %v4442_v51 = vpack.c.bf16 %v3962_v25, %v3954_v2 }
 0x4e6   : > { %v4746_v42 = vpack.i.bf16 %v4745_v38, %v4745_v38  ;;  %v4734_v54 = vmax.f32 %v4732_v33, %v4733_v16  ;;  %v4755_v49 = vrot.slane %v4754_v5, 1  ;;  %v4444_v29 = vpack.c.bf16 %v3964_v27, %v3956_v30  ;;  %v13585_v16 = vpop.f32.mrb[252].mxu0  ;;  %v13587_v30 = vpop.f32.mrb[252].mxu1 }
 0x4e7   : > { %v13577_v36 = vunpack.c.l.bf16 %v4724_v26  ;;  %v4443_v14 = vpack.c.bf16 %v3963_v22, %v3955_v58  ;;  %v3965_v7 = vmax.f32 %v3620_v34, 0.0  ;;  %v4802_v28 = vmax.bf16 %v4442_v51, %v4434_v18  ;;  %v13589_v18 = vpop.f32.mrb[253].mxu0 }
 0x4e8   : > { %v13579_v39 = vunpack.c.l.bf16 %v4746_v42  ;;  %v4735_v46 = vpack.i.bf16 %v4734_v54, %v4734_v54  ;;  %v4756_v61 = vmax.f32 %v4754_v5, %v4755_v49  ;;  %v4824_v40 = vmax.bf16 %v4444_v29, %v4436_v59 }
 0x4e9   : > { %v4813_v45 = vmax.bf16 %v4443_v14, %v4435_v10  ;;  %v4445_v31 = vpack.c.bf16 %v3965_v7, %v3957_v6  ;;  %v3271_v13 = vadd.f32 %v13139_v35, %v13427_v32  ;;  %v4803_v2 = vunpack.i.l.bf16 %v4802_v28  ;;  %v13591_v10 = vpop.f32.mrb[253].mxu1  ;;  %v13595_v6 = vpop.f32.mrb[254].mxu0 }
 0x4ea   : > { %v13583_v23 = vunpack.c.l.bf16 %v4735_v46  ;;  %v4757_v33 = vpack.i.bf16 %v4756_v61, %v4756_v61  ;;  %v4804_v38 = vunpack.i.h.bf16 %v4802_v28  ;;  %v4825_v58 = vunpack.i.l.bf16 %v4824_v40  ;;  %15223 = vst [vmem:[#allocation19_spill] sm:$0xff] %v13595_v6  ;;  %v13597_v14 = vpop.f32.mrb[254].mxu1  ;;  %v13603_v34 = vpop.f32.mrb[255].mxu0 }
 0x4eb   : > { %v4826_v22 = vunpack.i.h.bf16 %v4824_v40  ;;  %v4814_v54 = vunpack.i.l.bf16 %v4813_v45  ;;  %v4815_v5 = vunpack.i.h.bf16 %v4813_v45  ;;  %v4835_v7 = vmax.bf16 %v4445_v31, %v4437_v62  ;;  %15224 = vst [vmem:[#allocation27_spill] sm:$0xff] %v13597_v14  ;;  %15225 = vst [vmem:[#allocation53_spill] sm:$0xff] %v13603_v34  ;;  %v13605_v42 = vpop.f32.mrb[255].mxu1 }
 0x4ec   : > { %v13593_v59 = vunpack.c.l.bf16 %v4757_v33  ;;  %v4805_v35 = vmax.f32 %v4803_v2, %v4804_v38  ;;  %v3970_v51 = vmax.f32 %v3271_v13, 0.0  ;;  %v3624_v27 = vadd.f32 %v13141_v60, %v13433_v21  ;;  %15226 = vst [vmem:[#allocation54_spill] sm:$0xff] %v13605_v42  ;;  %v13619_v42 = vpop.f32.mrb[0].mxu1 }
 0x4ed   : > { %v4827_v25 = vmax.f32 %v4825_v58, %v4826_v22  ;;  %v4816_v26 = vmax.f32 %v4814_v54, %v4815_v5  ;;  %v3273_v55 = vadd.f32 %v13143_v56, %v13435_v15  ;;  %v4836_v29 = vunpack.i.l.bf16 %v4835_v7  ;;  %v15227_v58 = vld [vmem:[#allocation39_spill] sm:$0xff]  ;;  %15230 = vst [vmem:[#allocation36_spill] sm:$0xff] %v13619_v42 }
 0x4ee   : > { %v4806_v49 = vrot.slane %v4805_v35, 4  ;;  %v4837_v62 = vunpack.i.h.bf16 %v4835_v7  ;;  %v3626_v46 = vadd.f32 %v13145_v12, %v13452_v19  ;;  %v3972_v40 = vmax.f32 %v3624_v27, 0.0  ;;  %v15228_v7 = vld [vmem:[#allocation81_spill] sm:$0xff] }
 0x4ef   : > { %v4828_v61 = vrot.slane %v4827_v25, 4  ;;  %v4817_v28 = vrot.slane %v4816_v26, 4  ;;  %v3971_v45 = vmax.f32 %v3273_v55, 0.0  ;;  %v3275_v56 = vadd.f32 %v13147_v11, %v13427_v32 }
 0x4f0   : > { %v4807_v31 = vmax.f32 %v4805_v35, %v4806_v49  ;;  %v4838_v13 = vmax.f32 %v4836_v29, %v4837_v62  ;;  %v3973_v60 = vmax.f32 %v3626_v46, 0.0  ;;  %v3628_v38 = vadd.f32 %v13150_v24, %v13433_v21  ;;  %v13617_v46 = vpop.f32.mrb[0].mxu0 }
 0x4f1   : > { %v4829_v33 = vmax.f32 %v4827_v25, %v4828_v61  ;;  %v4818_v2 = vmax.f32 %v4816_v26, %v4817_v28  ;;  %v3277_v22 = vadd.f32 %v15227_v58, %v13435_v15  ;;  %v3978_v5 = vmax.f32 %v3275_v56, 0.0  ;;  %15229 = vst [vmem:[#allocation46_spill] sm:$0xff] %v13617_v46 }
 0x4f2   : > { %v4808_v54 = vrot.slane %v4807_v31, 2  ;;  %v4839_v12 = vrot.slane %v4838_v13, 4  ;;  %v3630_v27 = vadd.f32 %v15228_v7, %v13452_v19  ;;  %v3980_v49 = vmax.f32 %v3628_v38, 0.0  ;;  %v15231_v7 = vld [vmem:[#allocation38_spill] sm:$0xff] }
 0x4f3   : > { %v4830_v35 = vrot.slane %v4829_v33, 2  ;;  %v4819_v55 = vrot.slane %v4818_v2, 2  ;;  %v3979_v29 = vmax.f32 %v3277_v22, 0.0  ;;  %v4450_v25 = vpack.c.bf16 %v3978_v5, %v3970_v51 }
 0x4f4   : > { %v4809_v62 = vmax.f32 %v4807_v31, %v4808_v54  ;;  %v4840_v11 = vmax.f32 %v4838_v13, %v4839_v12  ;;  %v3981_v26 = vmax.f32 %v3630_v27, 0.0  ;;  %v4452_v28 = vpack.c.bf16 %v3980_v49, %v3972_v40  ;;  %v15232_v31 = vld [vmem:[#allocation26_spill] sm:$0xff]  ;;  %v13629_v40 = vpop.f32.mrb[1].mxu1 }
 0x4f5   : > { %v4831_v24 = vmax.f32 %v4829_v33, %v4830_v35  ;;  %v4820_v61 = vmax.f32 %v4818_v2, %v4819_v55  ;;  %v4451_v58 = vpack.c.bf16 %v3979_v29, %v3971_v45  ;;  %v3281_v6 = vadd.f32 %v15231_v7, %v13427_v32  ;;  %v15233_v13 = vld [vmem:[#allocation82_spill] sm:$0xff]  ;;  %v13627_v33 = vpop.f32.mrb[1].mxu0  ;;  %15235 = vst [vmem:[#allocation39_spill] sm:$0xff] %v13629_v40 }
 0x4f6   : > { %v4810_v56 = vrot.slane %v4809_v62, 1  ;;  %v4841_v34 = vrot.slane %v4840_v11, 2  ;;  %v4453_v14 = vpack.c.bf16 %v3981_v26, %v3973_v60  ;;  %v3634_v51 = vadd.f32 %v15232_v31, %v13433_v21  ;;  %15234 = vst [vmem:[#allocation80_spill] sm:$0xff] %v13627_v33  ;;  %v15236_v60 = vld [vmem:[#allocation83_spill] sm:$0xff]  ;;  %v13633_v27 = vpop.f32.mrb[2].mxu0  ;;  %v13635_v26 = vpop.f32.mrb[2].mxu1 }
 0x4f7   : > { %v4832_v38 = vrot.slane %v4831_v24, 1  ;;  %v4821_v22 = vrot.slane %v4820_v61, 1  ;;  %v3283_v54 = vadd.f32 %v15233_v13, %v13435_v15  ;;  %v3986_v12 = vmax.f32 %v3281_v6, 0.0  ;;  %15237 = vst [vmem:[#allocation81_spill] sm:$0xff] %v13633_v27  ;;  %15238 = vst [vmem:[#allocation38_spill] sm:$0xff] %v13635_v26  ;;  %v15239_v33 = vld [vmem:[#allocation84_spill] sm:$0xff] }
 0x4f8   : > { %v4811_v45 = vmax.f32 %v4809_v62, %v4810_v56  ;;  %v4842_v2 = vmax.f32 %v4840_v11, %v4841_v34  ;;  %v3636_v5 = vadd.f32 %v15236_v60, %v13452_v19  ;;  %v3988_v49 = vmax.f32 %v3634_v51, 0.0  ;;  %v15240_v6 = vld [vmem:[#allocation29_spill] sm:$0xff] }
 0x4f9   : > { %v4833_v35 = vmax.f32 %v4831_v24, %v4832_v38  ;;  %v4822_v55 = vmax.f32 %v4820_v61, %v4821_v22  ;;  %v3987_v29 = vmax.f32 %v3283_v54, 0.0  ;;  %v3285_v40 = vadd.f32 %v15239_v33, %v13427_v32  ;;  %v15241_v56 = vld [vmem:[#allocation85_spill] sm:$0xff]  ;;  %v13643_v24 = vpop.f32.mrb[3].mxu0  ;;  %v13645_v61 = vpop.f32.mrb[3].mxu1 }
 0x4fa   : > { %v4812_v7 = vpack.i.bf16 %v4811_v45, %v4811_v45  ;;  %v4843_v31 = vrot.slane %v4842_v2, 1  ;;  %v3989_v13 = vmax.f32 %v3636_v5, 0.0  ;;  %v3638_v11 = vadd.f32 %v15240_v6, %v13433_v21  ;;  %15242 = vst [vmem:[#allocation26_spill] sm:$0xff] %v13643_v24  ;;  %15243 = vst [vmem:[#allocation82_spill] sm:$0xff] %v13645_v61  ;;  %v15244_v54 = vld [vmem:[#allocation21_spill] sm:$0xff] }
 0x4fb   : > { %v4834_v62 = vpack.i.bf16 %v4833_v35, %v4833_v35  ;;  %v4823_v34 = vpack.i.bf16 %v4822_v55, %v4822_v55  ;;  %v3287_v60 = vadd.f32 %v15241_v56, %v13435_v15  ;;  %v3994_v51 = vmax.f32 %v3285_v40, 0.0 }
 0x4fc   : > { %v6106_v38 = vunpack.c.l.bf16 %v4812_v7  ;;  %v4844_v22 = vmax.f32 %v4842_v2, %v4843_v31  ;;  %v3640_v45 = vadd.f32 %v15244_v54, %v13452_v19  ;;  %v3996_v35 = vmax.f32 %v3638_v11, 0.0  ;;  %v15245_v11 = vld [vmem:[#allocation86_spill] sm:$0xff] }
 0x4fd   : > { %v6108_v5 = vunpack.c.l.bf16 %v4834_v62  ;;  %v6107_v33 = vunpack.c.l.bf16 %v4823_v34  ;;  %v3995_v55 = vmax.f32 %v3287_v60, 0.0  ;;  %v4458_v56 = vpack.c.bf16 %v3994_v51, %v3986_v12  ;;  %v13663_v60 = vpop.f32.mrb[4].mxu0  ;;  %v13665_v12 = vpop.f32.mrb[4].mxu1 }
 0x4fe   : > { %v13651_v6 = vsel %vm6350_vm4, %v6106_v38, %v13577_v36  ;;  %v4845_v26 = vpack.i.bf16 %v4844_v22, %v4844_v22  ;;  %v3997_v27 = vmax.f32 %v3640_v45, 0.0  ;;  %v4460_v2 = vpack.c.bf16 %v3996_v35, %v3988_v49  ;;  %15246 = vst [vmem:[#allocation83_spill] sm:$0xff] %v13663_v60  ;;  %15247 = vst [vmem:[#allocation84_spill] sm:$0xff] %v13665_v12  ;;  %v13671_v49 = vpop.f32.mrb[5].mxu0 }
 0x4ff   : > { %v13655_v61 = vsel %vm6350_vm4, %v6108_v5, %v13579_v39  ;;  %v13659_v40 = vsel %vm6350_vm4, %v6107_v33, %v13583_v23  ;;  %v4459_v7 = vpack.c.bf16 %v3995_v55, %v3987_v29  ;;  %v4890_v62 = vmax.bf16 %v4458_v56, %v4450_v25  ;;  %v15248_v39 = vld [vmem:[#allocation87_spill] sm:$0xff]  ;;  %15250 = vst [vmem:[#allocation29_spill] sm:$0xff] %v13671_v49  ;;  %v13673_v29 = vpop.f32.mrb[5].mxu1  ;;  %v13679_v45 = vpop.f32.mrb[6].mxu0 }
 0x500   : > { %v6109_v31 = vunpack.c.l.bf16 %v4845_v26  ;;  %v4461_v34 = vpack.c.bf16 %v3997_v27, %v3989_v13  ;;  %v3291_v36 = vadd.f32 %v15245_v11, %v13427_v32  ;;  %v4912_v38 = vmax.bf16 %v4460_v2, %v4452_v28  ;;  %v15249_v23 = vld [vmem:[#allocation55_spill] sm:$0xff]  ;;  %15251 = vst [vmem:[#allocation85_spill] sm:$0xff] %v13673_v29  ;;  %15252 = vst [vmem:[#allocation21_spill] sm:$0xff] %v13679_v45  ;;  %v13681_v35 = vpop.f32.mrb[6].mxu1 }
 0x501   : > { %v4901_v22 = vmax.bf16 %v4459_v7, %v4451_v58  ;;  %v3644_v51 = vadd.f32 %v15248_v39, %v13433_v21  ;;  %v3293_v54 = vadd.f32 %v15249_v23, %v13435_v15  ;;  %v4891_v27 = vunpack.i.l.bf16 %v4890_v62  ;;  %15253 = vst [vmem:[#allocation86_spill] sm:$0xff] %v13681_v35  ;;  %v13689_v29 = vpop.f32.mrb[7].mxu1 }
 0x502   : > { %v13677_v25 = vsel %vm6350_vm4, %v6109_v31, %v13593_v59  ;;  %v4892_v26 = vunpack.i.h.bf16 %v4890_v62  ;;  %v4923_v13 = vmax.bf16 %v4461_v34, %v4453_v14  ;;  %v4913_v28 = vunpack.i.l.bf16 %v4912_v38  ;;  %v13683_v31 = vpop.f32.mrb[7].mxu0  ;;  %v15255_v34 = vld [vmem:[#allocation56_spill] sm:$0xff]  ;;  %15257 = vst [vmem:[#allocation55_spill] sm:$0xff] %v13689_v29  ;;  %v15260_v29 = vld [vmem:[#allocation69_spill] sm:$0xff] }
 0x503   : > { %v4914_v58 = vunpack.i.h.bf16 %v4912_v38  ;;  %v4902_v5 = vunpack.i.l.bf16 %v4901_v22  ;;  %v4903_v33 = vunpack.i.h.bf16 %v4901_v22  ;;  %v4002_v7 = vmax.f32 %v3291_v36, 0.0  ;;  %15254 = vst [vmem:[#allocation87_spill] sm:$0xff] %v13683_v31  ;;  %v15256_v38 = vld [vmem:[#allocation57_spill] sm:$0xff]  ;;  %v15258_v36 = vld [vmem:[#allocation28_spill] sm:$0xff] }
 0x504   : > { %v4893_v55 = vmax.f32 %v4891_v27, %v4892_v26  ;;  %v4924_v56 = vunpack.i.l.bf16 %v4923_v13  ;;  %v4925_v2 = vunpack.i.h.bf16 %v4923_v13  ;;  %v4004_v23 = vmax.f32 %v3644_v51, 0.0  ;;  %v15259_v51 = vld [vmem:[#allocation68_spill] sm:$0xff] }
 0x505   : > { %v4915_v11 = vmax.f32 %v4913_v28, %v4914_v58  ;;  %v4904_v39 = vmax.f32 %v4902_v5, %v4903_v33  ;;  %v4003_v59 = vmax.f32 %v3293_v54, 0.0  ;;  %v3646_v45 = vadd.f32 %v15255_v34, %v13452_v19 }
 0x506   : > { %v4894_v62 = vrot.slane %v4893_v55, 4  ;;  %v4926_v14 = vmax.f32 %v4924_v56, %v4925_v2  ;;  %v3295_v22 = vadd.f32 %v15256_v38, %v13427_v32  ;;  %v3648_v13 = vadd.f32 %v15258_v36, %v13433_v21 }
 0x507   : > { %v4916_v27 = vrot.slane %v4915_v11, 4  ;;  %v4905_v26 = vrot.slane %v4904_v39, 4  ;;  %v3297_v54 = vadd.f32 %v15259_v51, %v13435_v15  ;;  %v4005_v5 = vmax.f32 %v3646_v45, 0.0  ;;  %v15261_v45 = vld [vmem:[#allocation70_spill] sm:$0xff] }
 0x508   : > { %v4895_v28 = vmax.f32 %v4893_v55, %v4894_v62  ;;  %v4927_v58 = vrot.slane %v4926_v14, 4  ;;  %v4010_v33 = vmax.f32 %v3295_v22, 0.0  ;;  %v4012_v34 = vmax.f32 %v3648_v13, 0.0 }
 0x509   : > { %v4917_v56 = vmax.f32 %v4915_v11, %v4916_v27  ;;  %v4906_v2 = vmax.f32 %v4904_v39, %v4905_v26  ;;  %v4011_v31 = vmax.f32 %v3297_v54, 0.0  ;;  %v3650_v12 = vadd.f32 %v15260_v29, %v13452_v19  ;;  %v13699_v11 = vpop.f32.mrb[8].mxu0  ;;  %v13701_v39 = vpop.f32.mrb[8].mxu1  ;;  %v15265_v29 = vld [vmem:[#allocation20_spill] sm:$0xff] }
 0x50a   : > { %v4896_v35 = vrot.slane %v4895_v28, 2  ;;  %v4928_v38 = vmax.f32 %v4926_v14, %v4927_v58  ;;  %v4466_v49 = vpack.c.bf16 %v4010_v33, %v4002_v7  ;;  %v4468_v36 = vpack.c.bf16 %v4012_v34, %v4004_v23  ;;  %15262 = vst [vmem:[#allocation56_spill] sm:$0xff] %v13699_v11  ;;  %15263 = vst [vmem:[#allocation57_spill] sm:$0xff] %v13701_v39  ;;  %v15264_v7 = vld [vmem:[#allocation31_spill] sm:$0xff]  ;;  %v13707_v23 = vpop.f32.mrb[9].mxu0  ;;  %v13709_v13 = vpop.f32.mrb[9].mxu1 }
 0x50b   : > { %v4918_v60 = vrot.slane %v4917_v56, 2  ;;  %v4907_v24 = vrot.slane %v4906_v2, 2  ;;  %v4467_v42 = vpack.c.bf16 %v4011_v31, %v4003_v59  ;;  %v4013_v55 = vmax.f32 %v3650_v12, 0.0  ;;  %15266 = vst [vmem:[#allocation28_spill] sm:$0xff] %v13707_v23  ;;  %15267 = vst [vmem:[#allocation68_spill] sm:$0xff] %v13709_v13  ;;  %v15269_v34 = vld [vmem:[#allocation88_spill] sm:$0xff] }
 0x50c   : > { %v4897_v46 = vmax.f32 %v4895_v28, %v4896_v35  ;;  %v4929_v51 = vrot.slane %v4928_v38, 2  ;;  %v3301_v62 = vadd.f32 %v15261_v45, %v13427_v32  ;;  %v3654_v27 = vadd.f32 %v15264_v7, %v13433_v21  ;;  %v13715_v7 = vpop.f32.mrb[10].mxu0 }
 0x50d   : > { %v4919_v22 = vmax.f32 %v4917_v56, %v4918_v60  ;;  %v4908_v14 = vmax.f32 %v4906_v2, %v4907_v24  ;;  %v3303_v26 = vadd.f32 %v15265_v29, %v13435_v15  ;;  %v4469_v12 = vpack.c.bf16 %v4013_v55, %v4005_v5  ;;  %v15268_v56 = vld [vmem:[#allocation23_spill] sm:$0xff]  ;;  %15270 = vst [vmem:[#allocation69_spill] sm:$0xff] %v13715_v7  ;;  %v13717_v29 = vpop.f32.mrb[10].mxu1 }
 0x50e   : > { %v4898_v35 = vrot.slane %v4897_v46, 1  ;;  %v4930_v59 = vmax.f32 %v4928_v38, %v4929_v51  ;;  %v4018_v31 = vmax.f32 %v3301_v62, 0.0  ;;  %v4020_v58 = vmax.f32 %v3654_v27, 0.0  ;;  %15271 = vst [vmem:[#allocation70_spill] sm:$0xff] %v13717_v29  ;;  %v15272_v51 = vld [vmem:[#allocation89_spill] sm:$0xff]  ;;  %v15273_v62 = vld [vmem:[#allocation58_spill] sm:$0xff] }
 0x50f   : > { %v4920_v54 = vrot.slane %v4919_v22, 1  ;;  %v4909_v28 = vrot.slane %v4908_v14, 1  ;;  %v4019_v33 = vmax.f32 %v3303_v26, 0.0  ;;  %v3656_v2 = vadd.f32 %v15268_v56, %v13452_v19  ;;  %v13723_v56 = vpop.f32.mrb[11].mxu0  ;;  %v13725_v23 = vpop.f32.mrb[11].mxu1 }
 0x510   : > { %v4899_v60 = vmax.f32 %v4897_v46, %v4898_v35  ;;  %v4931_v24 = vrot.slane %v4930_v59, 1  ;;  %v3305_v45 = vadd.f32 %v15269_v34, %v13427_v32  ;;  %v3658_v55 = vadd.f32 %v15272_v51, %v13433_v21 }
 0x511   : > { %v4921_v5 = vmax.f32 %v4919_v22, %v4920_v54  ;;  %v4910_v38 = vmax.f32 %v4908_v14, %v4909_v28  ;;  %v3307_v27 = vadd.f32 %v15273_v62, %v13435_v15  ;;  %v4021_v35 = vmax.f32 %v3656_v2, 0.0  ;;  %v15274_v28 = vld [vmem:[#allocation71_spill] sm:$0xff] }
 0x512   : > { %v4900_v46 = vpack.i.bf16 %v4899_v60, %v4899_v60  ;;  %v4932_v26 = vmax.f32 %v4930_v59, %v4931_v24  ;;  %v4026_v13 = vmax.f32 %v3305_v45, 0.0  ;;  %v4028_v39 = vmax.f32 %v3658_v55, 0.0 }
 0x513   : > { %v4922_v34 = vpack.i.bf16 %v4921_v5, %v4921_v5  ;;  %v4911_v7 = vpack.i.bf16 %v4910_v38, %v4910_v38  ;;  %v4027_v29 = vmax.f32 %v3307_v27, 0.0  ;;  %v3660_v51 = vadd.f32 %v15274_v28, %v13452_v19 }
 0x514   : > { %v6114_v22 = vunpack.c.l.bf16 %v4900_v46  ;;  %v4933_v14 = vpack.i.bf16 %v4932_v26, %v4932_v26  ;;  %v4474_v54 = vpack.c.bf16 %v4026_v13, %v4018_v31  ;;  %v4476_v60 = vpack.c.bf16 %v4028_v39, %v4020_v58 }
 0x515   : > { %v6116_v11 = vunpack.c.l.bf16 %v4922_v34  ;;  %v6115_v62 = vunpack.c.l.bf16 %v4911_v7  ;;  %v4475_v59 = vpack.c.bf16 %v4027_v29, %v4019_v33  ;;  %v4029_v5 = vmax.f32 %v3660_v51, 0.0  ;;  %v13745_v7 = vpop.f32.mrb[12].mxu0  ;;  %v15277_v34 = vld [vmem:[#allocation73_spill] sm:$0xff]  ;;  %v15280_v51 = vld [vmem:[#allocation74_spill] sm:$0xff] }
 0x516   : > { %v13731_v24 = vsel %vm6352_vm5, %v6114_v22, %v13651_v6  ;;  %v6117_v2 = vunpack.c.l.bf16 %v4933_v14  ;;  %v4978_v45 = vmax.bf16 %v4474_v54, %v4466_v49  ;;  %v5000_v13 = vmax.bf16 %v4476_v60, %v4468_v36  ;;  %v13747_v49 = vpop.f32.mrb[12].mxu1  ;;  %v13749_v46 = vpop.f32.mrb[13].mxu0  ;;  %v15281_v60 = vld [vmem:[#allocation47_spill] sm:$0xff] }
 0x517   : > { %v13735_v38 = vsel %vm6352_vm5, %v6116_v11, %v13655_v61  ;;  %v13739_v31 = vsel %vm6352_vm5, %v6115_v62, %v13659_v40  ;;  %v4989_v55 = vmax.bf16 %v4475_v59, %v4467_v42  ;;  %v4477_v33 = vpack.c.bf16 %v4029_v5, %v4021_v35  ;;  %v13751_v40 = vpop.f32.mrb[13].mxu1  ;;  %v13757_v22 = vpop.f32.mrb[14].mxu0 }
 0x518   : > { %v13743_v39 = vsel %vm6352_vm5, %v6117_v2, %v13677_v25  ;;  %v4979_v58 = vunpack.i.l.bf16 %v4978_v45  ;;  %v4980_v6 = vunpack.i.h.bf16 %v4978_v45  ;;  %v5001_v29 = vunpack.i.l.bf16 %v5000_v13  ;;  %15275 = vst [vmem:[#allocation31_spill] sm:$0xff] %v13751_v40  ;;  %v15276_v25 = vld [vmem:[#allocation72_spill] sm:$0xff]  ;;  %15278 = vst [vmem:[#allocation20_spill] sm:$0xff] %v13757_v22  ;;  %v13759_v14 = vpop.f32.mrb[14].mxu1 }
 0x519   : > { %v5002_v61 = vunpack.i.h.bf16 %v5000_v13  ;;  %v4990_v11 = vunpack.i.l.bf16 %v4989_v55  ;;  %v4991_v27 = vunpack.i.h.bf16 %v4989_v55  ;;  %v5011_v36 = vmax.bf16 %v4477_v33, %v4469_v12  ;;  %15279 = vst [vmem:[#allocation23_spill] sm:$0xff] %v13759_v14  ;;  %v13765_v13 = vpop.f32.mrb[15].mxu0  ;;  %v13767_v55 = vpop.f32.mrb[15].mxu1 }
 0x51a   : > { %v4981_v42 = vmax.f32 %v4979_v58, %v4980_v6  ;;  %v3311_v26 = vadd.f32 %v15276_v25, %v13427_v32  ;;  %v3664_v35 = vadd.f32 %v15277_v34, %v13433_v21  ;;  %v3313_v62 = vadd.f32 %v15280_v51, %v13435_v15  ;;  %15282 = vst [vmem:[#allocation88_spill] sm:$0xff] %v13765_v13 }
 0x51b   : > { %v5003_v54 = vmax.f32 %v5001_v29, %v5002_v61  ;;  %v4992_v28 = vmax.f32 %v4990_v11, %v4991_v27  ;;  %v3666_v59 = vadd.f32 %v15281_v60, %v13452_v19  ;;  %v5012_v12 = vunpack.i.l.bf16 %v5011_v36  ;;  %15283 = vst [vmem:[#allocation89_spill] sm:$0xff] %v13767_v55 }
 0x51c   : > { %v4982_v2 = vrot.slane %v4981_v42, 4  ;;  %v5013_v45 = vunpack.i.h.bf16 %v5011_v36  ;;  %v4034_v5 = vmax.f32 %v3311_v26, 0.0  ;;  %v4036_v33 = vmax.f32 %v3664_v35, 0.0 }
 0x51d   : > { %v5004_v58 = vrot.slane %v5003_v54, 4  ;;  %v4993_v6 = vrot.slane %v4992_v28, 4  ;;  %v4035_v25 = vmax.f32 %v3313_v62, 0.0  ;;  %v4037_v11 = vmax.f32 %v3666_v59, 0.0 }
 0x51e   : > { %v4983_v29 = vmax.f32 %v4981_v42, %v4982_v2  ;;  %v5014_v61 = vmax.f32 %v5012_v12, %v5013_v45  ;;  %v3315_v27 = vadd.f32 %v13311_v57, %v13427_v32  ;;  %v3668_v36 = vadd.f32 %v13313_v17, %v13433_v21  ;;  %v13777_v45 = vpop.f32.mrb[16].mxu0  ;;  %v13779_v17 = vpop.f32.mrb[16].mxu1 }
 0x51f   : > { %v5005_v34 = vmax.f32 %v5003_v54, %v5004_v58  ;;  %v4994_v51 = vmax.f32 %v4992_v28, %v4993_v6  ;;  %v3317_v26 = vadd.f32 %v13317_v53, %v13435_v15  ;;  %v3670_v35 = vadd.f32 %v13319_v44, %v13452_v19  ;;  %v13783_v22 = vpop.f32.mrb[17].mxu1 }
 0x520   : > { %v4984_v60 = vrot.slane %v4983_v29, 2  ;;  %v5015_v55 = vrot.slane %v5014_v61, 4  ;;  %v4042_v13 = vmax.f32 %v3315_v27, 0.0  ;;  %v4044_v59 = vmax.f32 %v3668_v36, 0.0  ;;  %v13781_v27 = vpop.f32.mrb[17].mxu0 }
 0x521   : > { %v5006_v42 = vrot.slane %v5005_v34, 2  ;;  %v4995_v62 = vrot.slane %v4994_v51, 2  ;;  %v4043_v2 = vmax.f32 %v3317_v26, 0.0  ;;  %v4045_v28 = vmax.f32 %v3670_v35, 0.0 }
 0x522   : > { %v4985_v12 = vmax.f32 %v4983_v29, %v4984_v60  ;;  %v5016_v57 = vmax.f32 %v5014_v61, %v5015_v55  ;;  %v4482_v54 = vpack.c.bf16 %v4042_v13, %v4034_v5  ;;  %v4484_v6 = vpack.c.bf16 %v4044_v59, %v4036_v33  ;;  %v13791_v33 = vpop.f32.mrb[18].mxu0 }
 0x523   : > { %v5007_v58 = vmax.f32 %v5005_v34, %v5006_v42  ;;  %v4996_v53 = vmax.f32 %v4994_v51, %v4995_v62  ;;  %v4483_v14 = vpack.c.bf16 %v4043_v2, %v4035_v25  ;;  %v4485_v36 = vpack.c.bf16 %v4045_v28, %v4037_v11  ;;  %v13795_v11 = vpop.f32.mrb[18].mxu1  ;;  %v15284_v2 = vld [vmem:[#allocation59_spill] sm:$0xff]  ;;  %v13799_v28 = vpop.f32.mrb[19].mxu0 }
 0x524   : > { %v4986_v44 = vrot.slane %v4985_v12, 1  ;;  %v5017_v40 = vrot.slane %v5016_v57, 2  ;;  %v3321_v55 = vadd.f32 %v13337_v63, %v13427_v32  ;;  %v3674_v29 = vadd.f32 %v13339_v1, %v13433_v21  ;;  %15285 = vst [vmem:[#allocation58_spill] sm:$0xff] %v13799_v28 }
 0x525   : > { %v5008_v5 = vrot.slane %v5007_v58, 1  ;;  %v4997_v13 = vrot.slane %v4996_v53, 1  ;;  %v3323_v61 = vadd.f32 %v13345_v37, %v13435_v15  ;;  %v3676_v26 = vadd.f32 %v13347_v0, %v13452_v19  ;;  %v15287_v0 = vld [vmem:[#allocation30_spill] sm:$0xff] }
 0x526   : > { %v4987_v25 = vmax.f32 %v4985_v12, %v4986_v44  ;;  %v5018_v34 = vmax.f32 %v5016_v57, %v5017_v40  ;;  %v4050_v51 = vmax.f32 %v3321_v55, 0.0  ;;  %v4052_v35 = vmax.f32 %v3674_v29, 0.0  ;;  %v13801_v12 = vpop.f32.mrb[19].mxu1  ;;  %v15289_v29 = vld [vmem:[#allocation60_spill] sm:$0xff] }
 0x527   : > { %v5009_v60 = vmax.f32 %v5007_v58, %v5008_v5  ;;  %v4998_v63 = vmax.f32 %v4996_v53, %v4997_v13  ;;  %v4051_v42 = vmax.f32 %v3323_v61, 0.0  ;;  %v4053_v1 = vmax.f32 %v3676_v26, 0.0  ;;  %15286 = vst [vmem:[#allocation71_spill] sm:$0xff] %v13801_v12  ;;  %v15288_v58 = vld [vmem:[#allocation48_spill] sm:$0xff] }
 0x528   : > { %v4988_v62 = vpack.i.bf16 %v4987_v25, %v4987_v25  ;;  %v5019_v59 = vrot.slane %v5018_v34, 1  ;;  %v3325_v37 = vadd.f32 %v15284_v2, %v13427_v32  ;;  %v3678_v44 = vadd.f32 %v15287_v0, %v13433_v21 }
 0x529   : > { %v5010_v40 = vpack.i.bf16 %v5009_v60, %v5009_v60  ;;  %v4999_v57 = vpack.i.bf16 %v4998_v63, %v4998_v63  ;;  %v3327_v53 = vadd.f32 %v15288_v58, %v13435_v15  ;;  %v3680_v61 = vadd.f32 %v15289_v29, %v13452_v19 }
 0x52a   : > { %v6122_v55 = vunpack.c.l.bf16 %v4988_v62  ;;  %v5020_v5 = vmax.f32 %v5018_v34, %v5019_v59  ;;  %v4058_v13 = vmax.f32 %v3325_v37, 0.0  ;;  %v4060_v2 = vmax.f32 %v3678_v44, 0.0  ;;  %v13821_v37 = vpop.f32.mrb[20].mxu0 }
 0x52b   : > { %v6124_v25 = vunpack.c.l.bf16 %v5010_v40  ;;  %v6123_v26 = vunpack.c.l.bf16 %v4999_v57  ;;  %v4059_v28 = vmax.f32 %v3327_v53, 0.0  ;;  %v4061_v0 = vmax.f32 %v3680_v61, 0.0  ;;  %15290 = vst [vmem:[#allocation72_spill] sm:$0xff] %v13821_v37  ;;  %v13823_v40 = vpop.f32.mrb[20].mxu1  ;;  %v13827_v53 = vpop.f32.mrb[21].mxu0 }
 0x52c   : > { %v13811_v60 = vsel %vm6354_vm6, %v6122_v55, %v13731_v24  ;;  %v5021_v63 = vpack.i.bf16 %v5020_v5, %v5020_v5  ;;  %v4490_v12 = vpack.c.bf16 %v4058_v13, %v4050_v51  ;;  %v4492_v62 = vpack.c.bf16 %v4060_v2, %v4052_v35  ;;  %15291 = vst [vmem:[#allocation73_spill] sm:$0xff] %v13823_v40 }
 0x52d   : > { %v13815_v58 = vsel %vm6354_vm6, %v6124_v25, %v13735_v38  ;;  %v13819_v34 = vsel %vm6354_vm6, %v6123_v26, %v13739_v31  ;;  %v4491_v59 = vpack.c.bf16 %v4059_v28, %v4051_v42  ;;  %v4493_v44 = vpack.c.bf16 %v4061_v0, %v4053_v1  ;;  %15292 = vst [vmem:[#allocation74_spill] sm:$0xff] %v13827_v53  ;;  %v13829_v38 = vpop.f32.mrb[21].mxu1  ;;  %v13835_v42 = vpop.f32.mrb[22].mxu0 }
 0x52e   : > { %v6125_v57 = vunpack.c.l.bf16 %v5021_v63  ;;  %v5066_v24 = vmax.bf16 %v4490_v12, %v4482_v54  ;;  %v3331_v51 = vadd.f32 %v13369_v4, %v13427_v32  ;;  %15293 = vst [vmem:[#allocation47_spill] sm:$0xff] %v13829_v38  ;;  %v5088_v55 = vmax.bf16 %v4492_v62, %v4484_v6  ;;  %15294 = vst [vmem:[#allocation59_spill] sm:$0xff] %v13835_v42  ;;  %v13841_v12 = vpop.f32.mrb[22].mxu1  ;;  %v15303_v42 = vld [vmem:[#allocation50_spill] sm:$0xff] }
 0x52f   : > { %v5077_v5 = vmax.bf16 %v4491_v59, %v4483_v14  ;;  %v3684_v31 = vadd.f32 %v13373_v48, %v13433_v21  ;;  %v3333_v35 = vadd.f32 %v13381_v43, %v13435_v15  ;;  %v5099_v28 = vmax.bf16 %v4493_v44, %v4485_v36  ;;  %15295 = vst [vmem:[#allocation30_spill] sm:$0xff] %v13841_v12  ;;  %v13843_v43 = vpop.f32.mrb[23].mxu0  ;;  %v13845_v2 = vpop.f32.mrb[23].mxu1  ;;  %v15299_v44 = vld [vmem:[#allocation22_spill] sm:$0xff] }
 0x530   : > { %v13839_v54 = vsel %vm6354_vm6, %v6125_v57, %v13743_v39  ;;  %v5067_v1 = vunpack.i.l.bf16 %v5066_v24  ;;  %v5068_v4 = vunpack.i.h.bf16 %v5066_v24  ;;  %v5089_v13 = vunpack.i.l.bf16 %v5088_v55  ;;  %15296 = vst [vmem:[#allocation48_spill] sm:$0xff] %v13843_v43  ;;  %15297 = vst [vmem:[#allocation60_spill] sm:$0xff] %v13845_v2  ;;  %v15298_v57 = vld [vmem:[#allocation75_spill] sm:$0xff] }
 0x531   : > { %v5090_v6 = vunpack.i.h.bf16 %v5088_v55  ;;  %v5078_v14 = vunpack.i.l.bf16 %v5077_v5  ;;  %v5079_v29 = vunpack.i.h.bf16 %v5077_v5  ;;  %v5100_v48 = vunpack.i.l.bf16 %v5099_v28 }
 0x532   : > { %v5069_v61 = vmax.f32 %v5067_v1, %v5068_v4  ;;  %v5101_v25 = vunpack.i.h.bf16 %v5099_v28  ;;  %v4066_v26 = vmax.f32 %v3331_v51, 0.0  ;;  %v4068_v0 = vmax.f32 %v3684_v31, 0.0  ;;  %v15300_v51 = vld [vmem:[#allocation76_spill] sm:$0xff]  ;;  %v15301_v28 = vld [vmem:[#allocation49_spill] sm:$0xff] }
 0x533   : > { %v5091_v63 = vmax.f32 %v5089_v13, %v5090_v6  ;;  %v5080_v39 = vmax.f32 %v5078_v14, %v5079_v29  ;;  %v4067_v62 = vmax.f32 %v3333_v35, 0.0  ;;  %v3686_v24 = vadd.f32 %v15298_v57, %v13452_v19  ;;  %v13855_v57 = vpop.f32.mrb[24].mxu0 }
 0x534   : > { %v5070_v59 = vrot.slane %v5069_v61, 4  ;;  %v5102_v36 = vmax.f32 %v5100_v48, %v5101_v25  ;;  %v3335_v55 = vadd.f32 %v15299_v44, %v13427_v32  ;;  %v3688_v4 = vadd.f32 %v15300_v51, %v13433_v21  ;;  %15302 = vst [vmem:[#allocation75_spill] sm:$0xff] %v13855_v57  ;;  %v15316_v57 = vld [vmem:[#allocation91_spill] sm:$0xff] }
 0x535   : > { %v5092_v5 = vrot.slane %v5091_v63, 4  ;;  %v5081_v1 = vrot.slane %v5080_v39, 4  ;;  %v3337_v2 = vadd.f32 %v15301_v28, %v13435_v15  ;;  %v4069_v31 = vmax.f32 %v3686_v24, 0.0 }
 0x536   : > { %v5071_v13 = vmax.f32 %v5069_v61, %v5070_v59  ;;  %v5103_v6 = vrot.slane %v5102_v36, 4  ;;  %v4074_v35 = vmax.f32 %v3335_v55, 0.0  ;;  %v4076_v48 = vmax.f32 %v3688_v4, 0.0  ;;  %v13865_v4 = vpop.f32.mrb[24].mxu1 }
 0x537   : > { %v5093_v14 = vmax.f32 %v5091_v63, %v5092_v5  ;;  %v5082_v29 = vmax.f32 %v5080_v39, %v5081_v1  ;;  %v4075_v25 = vmax.f32 %v3337_v2, 0.0  ;;  %v3690_v38 = vadd.f32 %v15303_v42, %v13452_v19  ;;  %v15304_v63 = vld [vmem:[#allocation33_spill] sm:$0xff]  ;;  %v15305_v5 = vld [vmem:[#allocation51_spill] sm:$0xff]  ;;  %15307 = vst [vmem:[#allocation22_spill] sm:$0xff] %v13865_v4 }
 0x538   : > { %v5072_v43 = vrot.slane %v5071_v13, 2  ;;  %v5104_v44 = vmax.f32 %v5102_v36, %v5103_v6  ;;  %v4498_v12 = vpack.c.bf16 %v4074_v35, %v4066_v26  ;;  %v4500_v40 = vpack.c.bf16 %v4076_v48, %v4068_v0  ;;  %v15306_v26 = vld [vmem:[#allocation32_spill] sm:$0xff] }
 0x539   : > { %v5094_v51 = vrot.slane %v5093_v14, 2  ;;  %v5083_v53 = vrot.slane %v5082_v29, 2  ;;  %v4499_v28 = vpack.c.bf16 %v4075_v25, %v4067_v62  ;;  %v4077_v24 = vmax.f32 %v3690_v38, 0.0  ;;  %v13869_v38 = vpop.f32.mrb[25].mxu1 }
 0x53a   : > { %v5073_v61 = vmax.f32 %v5071_v13, %v5072_v43  ;;  %v5105_v59 = vrot.slane %v5104_v44, 2  ;;  %v3341_v39 = vadd.f32 %v15304_v63, %v13427_v32  ;;  %v3694_v1 = vadd.f32 %v15305_v5, %v13433_v21  ;;  %v13867_v43 = vpop.f32.mrb[25].mxu0  ;;  %15309 = vst [vmem:[#allocation49_spill] sm:$0xff] %v13869_v38  ;;  %v15312_v5 = vld [vmem:[#allocation78_spill] sm:$0xff] }
 0x53b   : > { %v5095_v55 = vmax.f32 %v5093_v14, %v5094_v51  ;;  %v5084_v2 = vmax.f32 %v5082_v29, %v5083_v53  ;;  %v3343_v36 = vadd.f32 %v15306_v26, %v13435_v15  ;;  %v4501_v0 = vpack.c.bf16 %v4077_v24, %v4069_v31  ;;  %15308 = vst [vmem:[#allocation76_spill] sm:$0xff] %v13867_v43  ;;  %v13871_v29 = vpop.f32.mrb[26].mxu0  ;;  %v15311_v51 = vld [vmem:[#allocation77_spill] sm:$0xff]  ;;  %v15313_v24 = vld [vmem:[#allocation90_spill] sm:$0xff]  ;;  %v15314_v26 = vld [vmem:[#allocation35_spill] sm:$0xff] }
 0x53c   : > { %v5074_v42 = vrot.slane %v5073_v61, 1  ;;  %v5106_v6 = vmax.f32 %v5104_v44, %v5105_v59  ;;  %v4082_v62 = vmax.f32 %v3341_v39, 0.0  ;;  %v4084_v14 = vmax.f32 %v3694_v1, 0.0  ;;  %15310 = vst [vmem:[#allocation50_spill] sm:$0xff] %v13871_v29  ;;  %v13881_v1 = vpop.f32.mrb[26].mxu1  ;;  %v13883_v43 = vpop.f32.mrb[27].mxu0 }
 0x53d   : > { %v5096_v13 = vrot.slane %v5095_v55, 1  ;;  %v5085_v35 = vrot.slane %v5084_v2, 1  ;;  %v4083_v53 = vmax.f32 %v3343_v36, 0.0  ;;  %v3696_v63 = vadd.f32 %v15311_v51, %v13452_v19  ;;  %15315 = vst [vmem:[#allocation33_spill] sm:$0xff] %v13881_v1  ;;  %v13885_v51 = vpop.f32.mrb[27].mxu1 }
 0x53e   : > { %v5075_v48 = vmax.f32 %v5073_v61, %v5074_v42  ;;  %v5107_v25 = vrot.slane %v5106_v6, 1  ;;  %v3345_v44 = vadd.f32 %v15312_v5, %v13427_v32  ;;  %v3698_v39 = vadd.f32 %v15313_v24, %v13433_v21 }
 0x53f   : > { %v5097_v31 = vmax.f32 %v5095_v55, %v5096_v13  ;;  %v5086_v59 = vmax.f32 %v5084_v2, %v5085_v35  ;;  %v3347_v38 = vadd.f32 %v15314_v26, %v13435_v15  ;;  %v4085_v61 = vmax.f32 %v3696_v63, 0.0 }
 0x540   : > { %v5076_v36 = vpack.i.bf16 %v5075_v48, %v5075_v48  ;;  %v5108_v29 = vmax.f32 %v5106_v6, %v5107_v25  ;;  %v4090_v42 = vmax.f32 %v3345_v44, 0.0  ;;  %v4092_v55 = vmax.f32 %v3698_v39, 0.0 }
 0x541   : > { %v5098_v4 = vpack.i.bf16 %v5097_v31, %v5097_v31  ;;  %v5087_v5 = vpack.i.bf16 %v5086_v59, %v5086_v59  ;;  %v4091_v2 = vmax.f32 %v3347_v38, 0.0  ;;  %v3700_v26 = vadd.f32 %v15316_v57, %v13452_v19 }
 0x542   : > { %v6130_v13 = vunpack.c.l.bf16 %v5076_v36  ;;  %v5109_v35 = vpack.i.bf16 %v5108_v29, %v5108_v29  ;;  %v4506_v24 = vpack.c.bf16 %v4090_v42, %v4082_v62  ;;  %v4508_v48 = vpack.c.bf16 %v4092_v55, %v4084_v14  ;;  %v13901_v29 = vpop.f32.mrb[28].mxu0  ;;  %v13903_v14 = vpop.f32.mrb[28].mxu1 }
 0x543   : > { %v6132_v37 = vunpack.c.l.bf16 %v5098_v4  ;;  %v6131_v1 = vunpack.c.l.bf16 %v5087_v5  ;;  %v4507_v6 = vpack.c.bf16 %v4091_v2, %v4083_v53  ;;  %v4093_v31 = vmax.f32 %v3700_v26, 0.0  ;;  %v13909_v39 = vpop.f32.mrb[29].mxu0 }
 0x544   : > { %v13891_v25 = vsel %vm6356_vm7, %v6130_v13, %v13811_v60  ;;  %v6133_v63 = vunpack.c.l.bf16 %v5109_v35  ;;  %v5154_v44 = vmax.bf16 %v4506_v24, %v4498_v12  ;;  %v5176_v57 = vmax.bf16 %v4508_v48, %v4500_v40  ;;  %15317 = vst [vmem:[#allocation51_spill] sm:$0xff] %v13909_v39  ;;  %v15320_v13 = vld [vmem:[#allocation25_spill] sm:$0xff] }
 0x545   : > { %v13895_v38 = vsel %vm6356_vm7, %v6132_v37, %v13815_v58  ;;  %v13899_v62 = vsel %vm6356_vm7, %v6131_v1, %v13819_v34  ;;  %v5165_v4 = vmax.bf16 %v4507_v6, %v4499_v28  ;;  %v4509_v59 = vpack.c.bf16 %v4093_v31, %v4085_v61  ;;  %v13911_v58 = vpop.f32.mrb[29].mxu1  ;;  %v13913_v28 = vpop.f32.mrb[30].mxu0 }
 0x546   : > { %v13907_v60 = vsel %vm6356_vm7, %v6133_v63, %v13839_v54  ;;  %v5155_v12 = vunpack.i.l.bf16 %v5154_v44  ;;  %v5156_v53 = vunpack.i.h.bf16 %v5154_v44  ;;  %15318 = vst [vmem:[#allocation32_spill] sm:$0xff] %v13911_v58  ;;  %v5177_v37 = vunpack.i.l.bf16 %v5176_v57  ;;  %15319 = vst [vmem:[#allocation77_spill] sm:$0xff] %v13913_v28  ;;  %v13923_v24 = vpop.f32.mrb[30].mxu1  ;;  %v13925_v63 = vpop.f32.mrb[31].mxu0 }
 0x547   : > { %v5178_v34 = vunpack.i.h.bf16 %v5176_v57  ;;  %v5166_v1 = vunpack.i.l.bf16 %v5165_v4  ;;  %v5167_v40 = vunpack.i.h.bf16 %v5165_v4  ;;  %v5187_v42 = vmax.bf16 %v4509_v59, %v4501_v0  ;;  %15321 = vst [vmem:[#allocation78_spill] sm:$0xff] %v13923_v24  ;;  %15322 = vst [vmem:[#allocation90_spill] sm:$0xff] %v13925_v63 }
 0x548   : > { %v5157_v36 = vmax.f32 %v5155_v12, %v5156_v53  ;;  %v3351_v5 = vadd.f32 %v13462_v3, %v13427_v32  ;;  %v3704_v54 = vadd.f32 %v13466_v20, %v13433_v21  ;;  %v3353_v2 = vadd.f32 %v13474_v8, %v13435_v15  ;;  %v13927_v3 = vpop.f32.mrb[31].mxu1  ;;  %v15324_v53 = vld [vmem:[#allocation52_spill] sm:$0xff] }
 0x549   : > { %v5179_v55 = vmax.f32 %v5177_v37, %v5178_v34  ;;  %v5168_v61 = vmax.f32 %v5166_v1, %v5167_v40  ;;  %v3706_v35 = vadd.f32 %v15320_v13, %v13452_v19  ;;  %v5188_v48 = vunpack.i.l.bf16 %v5187_v42  ;;  %15323 = vst [vmem:[#allocation35_spill] sm:$0xff] %v13927_v3  ;;  %v15325_v1 = vld [vmem:[#allocation61_spill] sm:$0xff] }
 0x54a   : > { %v5158_v26 = vrot.slane %v5157_v36, 4  ;;  %v5189_v6 = vunpack.i.h.bf16 %v5187_v42  ;;  %v4098_v0 = vmax.f32 %v3351_v5, 0.0  ;;  %v4100_v31 = vmax.f32 %v3704_v54, 0.0  ;;  %v15326_v42 = vld [vmem:[#allocation62_spill] sm:$0xff]  ;;  %v15327_v54 = vld [vmem:[#allocation79_spill] sm:$0xff] }
 0x54b   : > { %v5180_v44 = vrot.slane %v5179_v55, 4  ;;  %v5169_v20 = vrot.slane %v5168_v61, 4  ;;  %v4099_v57 = vmax.f32 %v3353_v2, 0.0  ;;  %v4101_v8 = vmax.f32 %v3706_v35, 0.0 }
 0x54c   : > { %v5159_v4 = vmax.f32 %v5157_v36, %v5158_v26  ;;  %v5190_v12 = vmax.f32 %v5188_v48, %v5189_v6  ;;  %v3355_v59 = vadd.f32 %v15324_v53, %v13427_v32  ;;  %v3708_v40 = vadd.f32 %v15325_v1, %v13433_v21  ;;  %v13937_v6 = vpop.f32.mrb[32].mxu0 }
 0x54d   : > { %v5181_v37 = vmax.f32 %v5179_v55, %v5180_v44  ;;  %v5170_v34 = vmax.f32 %v5168_v61, %v5169_v20  ;;  %v3357_v5 = vadd.f32 %v15326_v42, %v13435_v15  ;;  %v3710_v2 = vadd.f32 %v15327_v54, %v13452_v19  ;;  %15328 = vst [vmem:[#allocation91_spill] sm:$0xff] %v13937_v6  ;;  %v13939_v55 = vpop.f32.mrb[32].mxu1 }
 0x54e   : > { %v5160_v13 = vrot.slane %v5159_v4, 2  ;;  %v5191_v3 = vrot.slane %v5190_v12, 4  ;;  %v4106_v63 = vmax.f32 %v3355_v59, 0.0  ;;  %v4108_v35 = vmax.f32 %v3708_v40, 0.0  ;;  %15329 = vst [vmem:[#allocation25_spill] sm:$0xff] %v13939_v55  ;;  %v13943_v40 = vpop.f32.mrb[33].mxu0 }
 0x54f   : > { %v5182_v36 = vrot.slane %v5181_v37, 2  ;;  %v5171_v26 = vrot.slane %v5170_v34, 2  ;;  %v4107_v48 = vmax.f32 %v3357_v5, 0.0  ;;  %v4109_v53 = vmax.f32 %v3710_v2, 0.0  ;;  %v13945_v5 = vpop.f32.mrb[33].mxu1 }
 0x550   : > { %v5161_v61 = vmax.f32 %v5159_v4, %v5160_v13  ;;  %v5192_v44 = vmax.f32 %v5190_v12, %v5191_v3  ;;  %v4514_v20 = vpack.c.bf16 %v4106_v63, %v4098_v0  ;;  %v4516_v24 = vpack.c.bf16 %v4108_v35, %v4100_v31  ;;  %v13951_v3 = vpop.f32.mrb[34].mxu0  ;;  %v13955_v12 = vpop.f32.mrb[34].mxu1 }
 0x551   : > { %v5183_v1 = vmax.f32 %v5181_v37, %v5182_v36  ;;  %v5172_v42 = vmax.f32 %v5170_v34, %v5171_v26  ;;  %v4515_v28 = vpack.c.bf16 %v4107_v48, %v4099_v57  ;;  %v4517_v39 = vpack.c.bf16 %v4109_v53, %v4101_v8  ;;  %v15330_v26 = vld [vmem:[#allocation24_spill] sm:$0xff]  ;;  %v13959_v35 = vpop.f32.mrb[35].mxu0  ;;  %v13961_v48 = vpop.f32.mrb[35].mxu1 }
 0x552   : > { %v5162_v59 = vrot.slane %v5161_v61, 1  ;;  %v5193_v58 = vrot.slane %v5192_v44, 2  ;;  %v3361_v54 = vadd.f32 %v13510_v41, %v13427_v32  ;;  %v3714_v0 = vadd.f32 %v13512_v9, %v13433_v21  ;;  %15331 = vst [vmem:[#allocation52_spill] sm:$0xff] %v13959_v35  ;;  %15332 = vst [vmem:[#allocation61_spill] sm:$0xff] %v13961_v48 }
 0x553   : > { %v5184_v6 = vrot.slane %v5183_v1, 1  ;;  %v5173_v55 = vrot.slane %v5172_v42, 1  ;;  %v3363_v63 = vadd.f32 %v13520_v50, %v13435_v15  ;;  %v3716_v41 = vadd.f32 %v13522_v52, %v13452_v19  ;;  %v15333_v52 = vld [vmem:[#allocation43_spill] sm:$0xff] }
 0x554   : > { %v5163_v31 = vmax.f32 %v5161_v61, %v5162_v59  ;;  %v5194_v57 = vmax.f32 %v5192_v44, %v5193_v58  ;;  %v4114_v4 = vmax.f32 %v3361_v54, 0.0  ;;  %v4116_v34 = vmax.f32 %v3714_v0, 0.0  ;;  %v15335_v59 = vld [vmem:[#allocation64_spill] sm:$0xff] }
 0x555   : > { %v5185_v8 = vmax.f32 %v5183_v1, %v5184_v6  ;;  %v5174_v37 = vmax.f32 %v5172_v42, %v5173_v55  ;;  %v4115_v13 = vmax.f32 %v3363_v63, 0.0  ;;  %v4117_v9 = vmax.f32 %v3716_v41, 0.0  ;;  %v15334_v6 = vld [vmem:[#allocation63_spill] sm:$0xff] }
 0x556   : > { %v5164_v2 = vpack.i.bf16 %v5163_v31, %v5163_v31  ;;  %v5195_v36 = vrot.slane %v5194_v57, 1  ;;  %v3365_v50 = vadd.f32 %v15330_v26, %v13427_v32  ;;  %v3718_v44 = vadd.f32 %v15333_v52, %v13433_v21 }
 0x557   : > { %v5186_v58 = vpack.i.bf16 %v5185_v8, %v5185_v8  ;;  %v5175_v61 = vpack.i.bf16 %v5174_v37, %v5174_v37  ;;  %v3367_v55 = vadd.f32 %v15334_v6, %v13435_v15  ;;  %v3720_v54 = vadd.f32 %v15335_v59, %v13452_v19 }
 0x558   : > { %v6138_v53 = vunpack.c.l.bf16 %v5164_v2  ;;  %v5196_v1 = vmax.f32 %v5194_v57, %v5195_v36  ;;  %v4122_v42 = vmax.f32 %v3365_v50, 0.0  ;;  %v4124_v31 = vmax.f32 %v3718_v44, 0.0  ;;  %v13981_v50 = vpop.f32.mrb[36].mxu0 }
 0x559   : > { %v6140_v0 = vunpack.c.l.bf16 %v5186_v58  ;;  %v6139_v63 = vunpack.c.l.bf16 %v5175_v61  ;;  %v4123_v41 = vmax.f32 %v3367_v55, 0.0  ;;  %v4125_v52 = vmax.f32 %v3720_v54, 0.0  ;;  %15336 = vst [vmem:[#allocation62_spill] sm:$0xff] %v13981_v50  ;;  %v13983_v58 = vpop.f32.mrb[36].mxu1  ;;  %v13987_v55 = vpop.f32.mrb[37].mxu0 }
 0x55a   : > { %v13971_v8 = vsel %vm6358_vm8, %v6138_v53, %v13891_v25  ;;  %v5197_v37 = vpack.i.bf16 %v5196_v1, %v5196_v1  ;;  %v4522_v26 = vpack.c.bf16 %v4122_v42, %v4114_v4  ;;  %v4524_v2 = vpack.c.bf16 %v4124_v31, %v4116_v34  ;;  %15337 = vst [vmem:[#allocation79_spill] sm:$0xff] %v13983_v58  ;;  %v13995_v59 = vpop.f32.mrb[38].mxu0 }
 0x55b   : > { %v13975_v6 = vsel %vm6358_vm8, %v6140_v0, %v13895_v38  ;;  %v13979_v57 = vsel %vm6358_vm8, %v6139_v63, %v13899_v62  ;;  %v4523_v36 = vpack.c.bf16 %v4123_v41, %v4115_v13  ;;  %v4525_v44 = vpack.c.bf16 %v4125_v52, %v4117_v9  ;;  %15338 = vst [vmem:[#allocation24_spill] sm:$0xff] %v13987_v55  ;;  %v13989_v38 = vpop.f32.mrb[37].mxu1  ;;  %v15340_v62 = vld [vmem:[#allocation34_spill] sm:$0xff]  ;;  %v15341_v13 = vld [vmem:[#allocation44_spill] sm:$0xff] }
 0x55c   : > { %v6141_v61 = vunpack.c.l.bf16 %v5197_v37  ;;  %v5242_v25 = vmax.bf16 %v4522_v26, %v4514_v20  ;;  %v3371_v4 = vadd.f32 %v13545_v47, %v13427_v32  ;;  %15339 = vst [vmem:[#allocation43_spill] sm:$0xff] %v13989_v38  ;;  %v5264_v53 = vmax.bf16 %v4524_v2, %v4516_v24  ;;  %15342 = vst [vmem:[#allocation63_spill] sm:$0xff] %v13995_v59  ;;  %v14001_v0 = vpop.f32.mrb[38].mxu1  ;;  %v14003_v2 = vpop.f32.mrb[39].mxu0 }
 0x55d   : > { %v5253_v1 = vmax.bf16 %v4523_v36, %v4515_v28  ;;  %v3724_v34 = vadd.f32 %v15340_v62, %v13433_v21  ;;  %v3373_v42 = vadd.f32 %v15341_v13, %v13435_v15  ;;  %v5275_v54 = vmax.bf16 %v4525_v44, %v4517_v39  ;;  %15343 = vst [vmem:[#allocation64_spill] sm:$0xff] %v14001_v0  ;;  %v14005_v36 = vpop.f32.mrb[39].mxu1  ;;  %v15346_v44 = vld [vmem:[#allocation65_spill] sm:$0xff]  ;;  %v14017_v35 = vpop.f32.mrb[40].mxu0 }
 0x55e   : > { %v13999_v20 = vsel %vm6358_vm8, %v6141_v61, %v13907_v60  ;;  %v5243_v9 = vunpack.i.l.bf16 %v5242_v25  ;;  %v5244_v47 = vunpack.i.h.bf16 %v5242_v25  ;;  %v5265_v63 = vunpack.i.l.bf16 %v5264_v53  ;;  %15344 = vst [vmem:[#allocation34_spill] sm:$0xff] %v14003_v2  ;;  %15345 = vst [vmem:[#allocation44_spill] sm:$0xff] %v14005_v36  ;;  %v15349_v2 = vld [vmem:[#allocation45_spill] sm:$0xff] }
 0x55f   : > { %v5266_v24 = vunpack.i.h.bf16 %v5264_v53  ;;  %v5254_v28 = vunpack.i.l.bf16 %v5253_v1  ;;  %v5255_v31 = vunpack.i.h.bf16 %v5253_v1  ;;  %v5276_v37 = vunpack.i.l.bf16 %v5275_v54  ;;  %v15347_v53 = vld [vmem:[#allocation66_spill] sm:$0xff] }
 0x560   : > { %v5245_v41 = vmax.f32 %v5243_v9, %v5244_v47  ;;  %v5277_v26 = vunpack.i.h.bf16 %v5275_v54  ;;  %v4130_v52 = vmax.f32 %v3371_v4, 0.0  ;;  %v4132_v61 = vmax.f32 %v3724_v34, 0.0  ;;  %v15348_v4 = vld [vmem:[#allocation67_spill] sm:$0xff] }
 0x561   : > { %v5267_v62 = vmax.f32 %v5265_v63, %v5266_v24  ;;  %v5256_v60 = vmax.f32 %v5254_v28, %v5255_v31  ;;  %v4131_v13 = vmax.f32 %v3373_v42, 0.0  ;;  %v3726_v0 = vadd.f32 %v15346_v44, %v13452_v19 }
 0x562   : > { %v5246_v25 = vrot.slane %v5245_v41, 4  ;;  %v5278_v39 = vmax.f32 %v5276_v37, %v5277_v26  ;;  %v3375_v1 = vadd.f32 %v15347_v53, %v13427_v32  ;;  %v3728_v54 = vadd.f32 %v15348_v4, %v13433_v21  ;;  %v15350_v53 = vld [vmem:[#allocation37_spill] sm:$0xff] }
 0x563   : > { %v5268_v9 = vrot.slane %v5267_v62, 4  ;;  %v5257_v47 = vrot.slane %v5256_v60, 4  ;;  %v3377_v36 = vadd.f32 %v15349_v2, %v13435_v15  ;;  %v4133_v34 = vmax.f32 %v3726_v0, 0.0 }
 0x564   : > { %v5247_v63 = vmax.f32 %v5245_v41, %v5246_v25  ;;  %v5279_v24 = vrot.slane %v5278_v39, 4  ;;  %v4138_v42 = vmax.f32 %v3375_v1, 0.0  ;;  %v4140_v37 = vmax.f32 %v3728_v54, 0.0 }
 0x565   : > { %v5269_v28 = vmax.f32 %v5267_v62, %v5268_v9  ;;  %v5258_v31 = vmax.f32 %v5256_v60, %v5257_v47  ;;  %v4139_v26 = vmax.f32 %v3377_v36, 0.0  ;;  %v3730_v55 = vadd.f32 %v15350_v53, %v13452_v19  ;;  %v14021_v60 = vpop.f32.mrb[40].mxu1  ;;  %v14027_v47 = vpop.f32.mrb[41].mxu0 }
 0x566   : > { %v5248_v44 = vrot.slane %v5247_v63, 2  ;;  %v5280_v59 = vmax.f32 %v5278_v39, %v5279_v24  ;;  %v4530_v38 = vpack.c.bf16 %v4138_v42, %v4130_v52  ;;  %v4532_v4 = vpack.c.bf16 %v4140_v37, %v4132_v61  ;;  %v15355_v37 = vld [vmem:[#allocation27_spill] sm:$0xff] }
 0x567   : > { %v5270_v58 = vrot.slane %v5269_v28, 2  ;;  %v5259_v50 = vrot.slane %v5258_v31, 2  ;;  %v4531_v48 = vpack.c.bf16 %v4139_v26, %v4131_v13  ;;  %v4141_v0 = vmax.f32 %v3730_v55, 0.0  ;;  %v14029_v55 = vpop.f32.mrb[41].mxu1 }
 0x568   : > { %v5249_v41 = vmax.f32 %v5247_v63, %v5248_v44  ;;  %v5281_v2 = vrot.slane %v5280_v59, 2  ;;  %v3381_v62 = vadd.f32 %v13585_v16, %v13427_v32  ;;  %v3734_v52 = vadd.f32 %v13587_v30, %v13433_v21  ;;  %15351 = vst [vmem:[#allocation65_spill] sm:$0xff] %v14029_v55  ;;  %v15356_v44 = vld [vmem:[#allocation53_spill] sm:$0xff] }
 0x569   : > { %v5271_v36 = vmax.f32 %v5269_v28, %v5270_v58  ;;  %v5260_v25 = vmax.f32 %v5258_v31, %v5259_v50  ;;  %v3383_v39 = vadd.f32 %v13589_v18, %v13435_v15  ;;  %v4533_v1 = vpack.c.bf16 %v4141_v0, %v4133_v34  ;;  %v14031_v58 = vpop.f32.mrb[42].mxu0  ;;  %v15353_v18 = vld [vmem:[#allocation19_spill] sm:$0xff]  ;;  %v14037_v34 = vpop.f32.mrb[42].mxu1 }
 0x56a   : > { %v5250_v61 = vrot.slane %v5249_v41, 1  ;;  %v5282_v13 = vmax.f32 %v5280_v59, %v5281_v2  ;;  %v4146_v9 = vmax.f32 %v3381_v62, 0.0  ;;  %v4148_v63 = vmax.f32 %v3734_v52, 0.0  ;;  %15352 = vst [vmem:[#allocation66_spill] sm:$0xff] %v14031_v58  ;;  %15354 = vst [vmem:[#allocation67_spill] sm:$0xff] %v14037_v34  ;;  %v14043_v52 = vpop.f32.mrb[43].mxu0 }
 0x56b   : > { %v5272_v54 = vrot.slane %v5271_v36, 1  ;;  %v5261_v16 = vrot.slane %v5260_v25, 1  ;;  %v4147_v24 = vmax.f32 %v3383_v39, 0.0  ;;  %v3736_v30 = vadd.f32 %v13591_v10, %v13452_v19  ;;  %15357 = vst [vmem:[#allocation45_spill] sm:$0xff] %v14043_v52  ;;  %v14045_v10 = vpop.f32.mrb[43].mxu1 }
 0x56c   : > { %v5251_v50 = vmax.f32 %v5249_v41, %v5250_v61  ;;  %v5283_v42 = vrot.slane %v5282_v13, 1  ;;  %v3385_v59 = vadd.f32 %v15353_v18, %v13427_v32  ;;  %v3738_v26 = vadd.f32 %v15355_v37, %v13433_v21  ;;  %15358 = vst [vmem:[#allocation37_spill] sm:$0xff] %v14045_v10 }
 0x56d   : > { %v5273_v28 = vmax.f32 %v5271_v36, %v5272_v54  ;;  %v5262_v31 = vmax.f32 %v5260_v25, %v5261_v16  ;;  %v3387_v53 = vadd.f32 %v15356_v44, %v13435_v15  ;;  %v4149_v41 = vmax.f32 %v3736_v30, 0.0  ;;  %v15359_v16 = vld [vmem:[#allocation54_spill] sm:$0xff] }
 0x56e   : > { %v5252_v2 = vpack.i.bf16 %v5251_v50, %v5251_v50  ;;  %v5284_v0 = vmax.f32 %v5282_v13, %v5283_v42  ;;  %v4154_v62 = vmax.f32 %v3385_v59, 0.0  ;;  %v4156_v18 = vmax.f32 %v3738_v26, 0.0 }
 0x56f   : > { %v5274_v39 = vpack.i.bf16 %v5273_v28, %v5273_v28  ;;  %v5263_v61 = vpack.i.bf16 %v5262_v31, %v5262_v31  ;;  %v4155_v34 = vmax.f32 %v3387_v53, 0.0  ;;  %v3740_v37 = vadd.f32 %v15359_v16, %v13452_v19 }
 0x570   : > { %v6146_v36 = vunpack.c.l.bf16 %v5252_v2  ;;  %v5285_v25 = vpack.i.bf16 %v5284_v0, %v5284_v0  ;;  %v4538_v54 = vpack.c.bf16 %v4154_v62, %v4146_v9  ;;  %v4540_v50 = vpack.c.bf16 %v4156_v18, %v4148_v63  ;;  %v14061_v2 = vpop.f32.mrb[44].mxu0  ;;  %v14063_v63 = vpop.f32.mrb[44].mxu1  ;;  %v15365_v18 = vld [vmem:[#allocation46_spill] sm:$0xff] }
 0x571   : > { %v6148_v58 = vunpack.c.l.bf16 %v5274_v39  ;;  %v6147_v44 = vunpack.c.l.bf16 %v5263_v61  ;;  %v4539_v13 = vpack.c.bf16 %v4155_v34, %v4147_v24  ;;  %v4157_v28 = vmax.f32 %v3740_v37, 0.0  ;;  %15360 = vst [vmem:[#allocation19_spill] sm:$0xff] %v14061_v2  ;;  %15361 = vst [vmem:[#allocation27_spill] sm:$0xff] %v14063_v63  ;;  %v14069_v0 = vpop.f32.mrb[45].mxu0  ;;  %v15368_v37 = vld [vmem:[#allocation80_spill] sm:$0xff] }
 0x572   : > { %v14051_v42 = vsel %vm6360_vm9, %v6146_v36, %v13971_v8  ;;  %v6149_v30 = vunpack.c.l.bf16 %v5285_v25  ;;  %v5330_v59 = vmax.bf16 %v4538_v54, %v4530_v38  ;;  %v5352_v26 = vmax.bf16 %v4540_v50, %v4532_v4  ;;  %15362 = vst [vmem:[#allocation53_spill] sm:$0xff] %v14069_v0  ;;  %v15369_v50 = vld [vmem:[#allocation39_spill] sm:$0xff] }
 0x573   : > { %v14055_v31 = vsel %vm6360_vm9, %v6148_v58, %v13975_v6  ;;  %v14059_v9 = vsel %vm6360_vm9, %v6147_v44, %v13979_v57  ;;  %v5341_v53 = vmax.bf16 %v4539_v13, %v4531_v48  ;;  %v4541_v34 = vpack.c.bf16 %v4157_v28, %v4149_v41  ;;  %v14071_v6 = vpop.f32.mrb[45].mxu1  ;;  %v14073_v48 = vpop.f32.mrb[46].mxu0 }
 0x574   : > { %v14067_v8 = vsel %vm6360_vm9, %v6149_v30, %v13999_v20  ;;  %v5331_v38 = vunpack.i.l.bf16 %v5330_v59  ;;  %v5332_v24 = vunpack.i.h.bf16 %v5330_v59  ;;  %15363 = vst [vmem:[#allocation54_spill] sm:$0xff] %v14071_v6  ;;  %v5353_v58 = vunpack.i.l.bf16 %v5352_v26  ;;  %15364 = vst [vmem:[#allocation92_spill] sm:$0xff] %v14073_v48  ;;  %v15366_v20 = vld [vmem:[#allocation36_spill] sm:$0xff]  ;;  %v14079_v54 = vpop.f32.mrb[46].mxu1 }
 0x575   : > { %v5354_v57 = vunpack.i.h.bf16 %v5352_v26  ;;  %v5342_v62 = vunpack.i.l.bf16 %v5341_v53  ;;  %v5343_v4 = vunpack.i.h.bf16 %v5341_v53  ;;  %v5363_v61 = vmax.bf16 %v4541_v34, %v4533_v1  ;;  %15367 = vst [vmem:[#allocation46_spill] sm:$0xff] %v14079_v54  ;;  %v14085_v26 = vpop.f32.mrb[47].mxu0  ;;  %v14087_v53 = vpop.f32.mrb[47].mxu1  ;;  %v15373_v54 = vld [vmem:[#allocation38_spill] sm:$0xff] }
 0x576   : > { %v5333_v39 = vmax.f32 %v5331_v38, %v5332_v24  ;;  %v3391_v36 = vadd.f32 %v15365_v18, %v13427_v32  ;;  %v3744_v25 = vadd.f32 %v15366_v20, %v13433_v21  ;;  %v3393_v44 = vadd.f32 %v15368_v37, %v13435_v15  ;;  %15370 = vst [vmem:[#allocation36_spill] sm:$0xff] %v14085_v26 }
 0x577   : > { %v5355_v41 = vmax.f32 %v5353_v58, %v5354_v57  ;;  %v5344_v16 = vmax.f32 %v5342_v62, %v5343_v4  ;;  %v3746_v13 = vadd.f32 %v15369_v50, %v13452_v19  ;;  %v5364_v59 = vunpack.i.l.bf16 %v5363_v61  ;;  %15371 = vst [vmem:[#allocation80_spill] sm:$0xff] %v14087_v53  ;;  %v15372_v4 = vld [vmem:[#allocation81_spill] sm:$0xff] }
 0x578   : > { %v5334_v30 = vrot.slane %v5333_v39, 4  ;;  %v5365_v28 = vunpack.i.h.bf16 %v5363_v61  ;;  %v4162_v1 = vmax.f32 %v3391_v36, 0.0  ;;  %v4164_v34 = vmax.f32 %v3744_v25, 0.0  ;;  %v15374_v36 = vld [vmem:[#allocation26_spill] sm:$0xff] }
 0x579   : > { %v5356_v38 = vrot.slane %v5355_v41, 4  ;;  %v5345_v24 = vrot.slane %v5344_v16, 4  ;;  %v4163_v18 = vmax.f32 %v3393_v44, 0.0  ;;  %v4165_v62 = vmax.f32 %v3746_v13, 0.0  ;;  %v15375_v25 = vld [vmem:[#allocation82_spill] sm:$0xff] }
 0x57a   : > { %v5335_v58 = vmax.f32 %v5333_v39, %v5334_v30  ;;  %v5366_v57 = vmax.f32 %v5364_v59, %v5365_v28  ;;  %v3395_v20 = vadd.f32 %v15372_v4, %v13427_v32  ;;  %v3748_v61 = vadd.f32 %v15373_v54, %v13433_v21  ;;  %v14097_v28 = vpop.f32.mrb[48].mxu0  ;;  %v14099_v54 = vpop.f32.mrb[48].mxu1 }
 0x57b   : > { %v5357_v37 = vmax.f32 %v5355_v41, %v5356_v38  ;;  %v5346_v50 = vmax.f32 %v5344_v16, %v5345_v24  ;;  %v3397_v26 = vadd.f32 %v15374_v36, %v13435_v15  ;;  %v3750_v44 = vadd.f32 %v15375_v25, %v13452_v19  ;;  %15376 = vst [vmem:[#allocation39_spill] sm:$0xff] %v14097_v28  ;;  %v14107_v10 = vpop.f32.mrb[49].mxu0 }
 0x57c   : > { %v5336_v48 = vrot.slane %v5335_v58, 2  ;;  %v5367_v53 = vrot.slane %v5366_v57, 4  ;;  %v4170_v6 = vmax.f32 %v3395_v20, 0.0  ;;  %v4172_v13 = vmax.f32 %v3748_v61, 0.0  ;;  %15377 = vst [vmem:[#allocation81_spill] sm:$0xff] %v14099_v54  ;;  %v15378_v61 = vld [vmem:[#allocation83_spill] sm:$0xff] }
 0x57d   : > { %v5358_v39 = vrot.slane %v5357_v37, 2  ;;  %v5347_v30 = vrot.slane %v5346_v50, 2  ;;  %v4171_v59 = vmax.f32 %v3397_v26, 0.0  ;;  %v4173_v24 = vmax.f32 %v3750_v44, 0.0  ;;  %15379 = vst [vmem:[#allocation38_spill] sm:$0xff] %v14107_v10  ;;  %v15386_v54 = vld [vmem:[#allocation21_spill] sm:$0xff] }
 0x57e   : > { %v5337_v41 = vmax.f32 %v5335_v58, %v5336_v48  ;;  %v5368_v16 = vmax.f32 %v5366_v57, %v5367_v53  ;;  %v4546_v38 = vpack.c.bf16 %v4170_v6, %v4162_v1  ;;  %v4548_v0 = vpack.c.bf16 %v4172_v13, %v4164_v34  ;;  %v14109_v48 = vpop.f32.mrb[49].mxu1  ;;  %v15381_v53 = vld [vmem:[#allocation84_spill] sm:$0xff]  ;;  %v15382_v34 = vld [vmem:[#allocation29_spill] sm:$0xff] }
 0x57f   : > { %v5359_v4 = vmax.f32 %v5357_v37, %v5358_v39  ;;  %v5348_v36 = vmax.f32 %v5346_v50, %v5347_v30  ;;  %v14101_v63 = vpack.c.bf16 %v4171_v59, %v4163_v18  ;;  %v14103_v25 = vpack.c.bf16 %v4173_v24, %v4165_v62  ;;  %15380 = vst [vmem:[#allocation26_spill] sm:$0xff] %v14109_v48  ;;  %v15383_v62 = vld [vmem:[#allocation85_spill] sm:$0xff]  ;;  %v14117_v24 = vpop.f32.mrb[50].mxu0 }
 0x580   : > { %v5338_v20 = vrot.slane %v5337_v41, 1  ;;  %v5369_v2 = vrot.slane %v5368_v16, 2  ;;  %v3401_v26 = vadd.f32 %v15378_v61, %v13427_v32  ;;  %v3754_v58 = vadd.f32 %v15381_v53, %v13433_v21  ;;  %15384 = vst [vmem:[#allocation82_spill] sm:$0xff] %v14117_v24  ;;  %v14119_v61 = vpop.f32.mrb[50].mxu1 }
 0x581   : > { %v5360_v6 = vrot.slane %v5359_v4, 1  ;;  %v5349_v1 = vrot.slane %v5348_v36, 1  ;;  %v3403_v18 = vadd.f32 %v15382_v34, %v13435_v15  ;;  %v3756_v44 = vadd.f32 %v15383_v62, %v13452_v19  ;;  %15385 = vst [vmem:[#allocation83_spill] sm:$0xff] %v14119_v61  ;;  %v15391_v62 = vld [vmem:[#allocation55_spill] sm:$0xff] }
 0x582   : > { %v5339_v57 = vmax.f32 %v5337_v41, %v5338_v20  ;;  %v5370_v37 = vmax.f32 %v5368_v16, %v5369_v2  ;;  %v4178_v50 = vmax.f32 %v3401_v26, 0.0  ;;  %v4180_v13 = vmax.f32 %v3754_v58, 0.0  ;;  %v14123_v41 = vpop.f32.mrb[51].mxu0  ;;  %v14125_v2 = vpop.f32.mrb[51].mxu1  ;;  %v15390_v26 = vld [vmem:[#allocation87_spill] sm:$0xff] }
 0x583   : > { %v5361_v39 = vmax.f32 %v5359_v4, %v5360_v6  ;;  %v5350_v30 = vmax.f32 %v5348_v36, %v5349_v1  ;;  %v4179_v59 = vmax.f32 %v3403_v18, 0.0  ;;  %v4181_v53 = vmax.f32 %v3756_v44, 0.0  ;;  %15387 = vst [vmem:[#allocation84_spill] sm:$0xff] %v14123_v41  ;;  %15388 = vst [vmem:[#allocation29_spill] sm:$0xff] %v14125_v2  ;;  %v15389_v4 = vld [vmem:[#allocation86_spill] sm:$0xff]  ;;  %v6082_v1 = vld [vmem:[#allocation2 + $0x20] sm:$0xff] }
 0x584   : > { %v5340_v48 = vpack.i.bf16 %v5339_v57, %v5339_v57  ;;  %v5371_v10 = vrot.slane %v5370_v37, 1  ;;  %v3405_v34 = vadd.f32 %v15386_v54, %v13427_v32  ;;  %v3758_v36 = vadd.f32 %v15389_v4, %v13433_v21  ;;  %v6084_v54 = vld [vmem:[#allocation2 + $0x30] sm:$0xff]  ;;  %v6083_v41 = vld [vmem:[#allocation2 + $0x28] sm:$0xff] }
 0x585   : > { %v5362_v16 = vpack.i.bf16 %v5361_v39, %v5361_v39  ;;  %v5351_v20 = vpack.i.bf16 %v5350_v30, %v5350_v30  ;;  %v3407_v6 = vadd.f32 %v15390_v26, %v13435_v15  ;;  %v3760_v44 = vadd.f32 %v15391_v62, %v13452_v19  ;;  %v6085_v62 = vld [vmem:[#allocation2 + $0x38] sm:$0xff] }
 0x586   : > { %v6154_v58 = vunpack.c.l.bf16 %v5340_v48  ;;  %v5372_v18 = vmax.f32 %v5370_v37, %v5371_v10  ;;  %v4186_v57 = vmax.f32 %v3405_v34, 0.0  ;;  %v4188_v2 = vmax.f32 %v3758_v36, 0.0 }
 0x587   : > { %v6156_v61 = vunpack.c.l.bf16 %v5362_v16  ;;  %v6155_v24 = vunpack.c.l.bf16 %v5351_v20  ;;  %v4187_v39 = vmax.f32 %v3407_v6, 0.0  ;;  %v4189_v52 = vmax.f32 %v3760_v44, 0.0 }
 0x588   : > { %v6391_v30 = vsel %vm6362_vm10, %v6154_v58, %v14051_v42  ;;  %v5373_v4 = vpack.i.bf16 %v5372_v18, %v5372_v18  ;;  %v4554_v28 = vpack.c.bf16 %v4186_v57, %v4178_v50  ;;  %v4556_v37 = vpack.c.bf16 %v4188_v2, %v4180_v13  ;;  %v15392_v50 = vld [vmem:[#allocation56_spill] sm:$0xff]  ;;  %v14143_v18 = vpop.f32.mrb[52].mxu1 }
 0x589   : > { %v6489_v26 = vmax.f32 %v6082_v1, %v6391_v30  ;;  %v6405_v10 = vsel %vm6362_vm10, %v6156_v61, %v14055_v31  ;;  %v6398_v48 = vsel %vm6362_vm10, %v6155_v24, %v14059_v9  ;;  %v4555_v55 = vpack.c.bf16 %v4187_v39, %v4179_v59  ;;  %v14141_v1 = vpop.f32.mrb[52].mxu0 }
 0x58a   : > { %v6491_v34 = vmax.f32 %v6084_v54, %v6405_v10  ;;  %v6490_v16 = vmax.f32 %v6083_v41, %v6398_v48  ;;  %v6157_v20 = vunpack.c.l.bf16 %v5373_v4  ;;  %v5418_v36 = vmax.bf16 %v4554_v28, %v4546_v38  ;;  %v15393_v28 = vld [vmem:[#allocation57_spill] sm:$0xff]  ;;  %v15394_v48 = vld [vmem:[#allocation28_spill] sm:$0xff] }
 0x58b   : > { %6505 = vst [vmem:[#allocation2 + $0x20] sm:$0xff] %v6489_v26  ;;  %v5440_v6 = vmax.bf16 %v4556_v37, %v4548_v0  ;;  %v4557_v42 = vpack.c.bf16 %v4189_v52, %v4181_v53  ;;  %v3411_v58 = vadd.f32 %v15392_v50, %v13427_v32  ;;  %v3764_v38 = vadd.f32 %v15393_v28, %v13433_v21  ;;  %v14149_v0 = vpop.f32.mrb[53].mxu0  ;;  %v14151_v52 = vpop.f32.mrb[53].mxu1 }
 0x58c   : > { %6507 = vst [vmem:[#allocation2 + $0x30] sm:$0xff] %v6491_v34  ;;  %6506 = vst [vmem:[#allocation2 + $0x28] sm:$0xff] %v6490_v16  ;;  %v6412_v31 = vsel %vm6362_vm10, %v6157_v20, %v14067_v8  ;;  %v5419_v9 = vunpack.i.l.bf16 %v5418_v36  ;;  %v5420_v13 = vunpack.i.h.bf16 %v5418_v36  ;;  %v5429_v53 = vmax.bf16 %v4555_v55, %v14101_v63  ;;  %v14154_v41 = vpop.f32.mrb[54].mxu0  ;;  %v14156_v2 = vpop.f32.mrb[54].mxu1  ;;  %v15395_v16 = vld [vmem:[#allocation68_spill] sm:$0xff] }
 0x58d   : > { %v6492_v59 = vmax.f32 %v6085_v62, %v6412_v31  ;;  %v5441_v24 = vunpack.i.l.bf16 %v5440_v6  ;;  %v5442_v61 = vunpack.i.h.bf16 %v5440_v6  ;;  %v5451_v8 = vmax.bf16 %v4557_v42, %v14103_v25  ;;  %v14159_v39 = vpop.f32.mrb[55].mxu0  ;;  %v14161_v30 = vpop.f32.mrb[55].mxu1  ;;  %v15396_v6 = vld [vmem:[#allocation69_spill] sm:$0xff] }
 0x58e   : > { %v5421_v57 = vmax.f32 %v5419_v9, %v5420_v13  ;;  %v4194_v44 = vmax.f32 %v3411_v58, 0.0  ;;  %v4196_v54 = vmax.f32 %v3764_v38, 0.0  ;;  %v5430_v26 = vunpack.i.l.bf16 %v5429_v53  ;;  %v15397_v9 = vld [vmem:[#allocation70_spill] sm:$0xff] }
 0x58f   : > { %6508 = vst [vmem:[#allocation2 + $0x38] sm:$0xff] %v6492_v59  ;;  %v5443_v4 = vmax.f32 %v5441_v24, %v5442_v61  ;;  %v5431_v10 = vunpack.i.h.bf16 %v5429_v53  ;;  %v3413_v55 = vadd.f32 %v15394_v48, %v13435_v15  ;;  %v5452_v37 = vunpack.i.l.bf16 %v5451_v8 }
 0x590   : > { %v5422_v63 = vrot.slane %v5421_v57, 4  ;;  %v5453_v34 = vunpack.i.h.bf16 %v5451_v8  ;;  %v3766_v62 = vadd.f32 %v15395_v16, %v13452_v19  ;;  %v3415_v42 = vadd.f32 %v15396_v6, %v13427_v32 }
 0x591   : > { %v5444_v25 = vrot.slane %v5443_v4, 4  ;;  %v5432_v20 = vmax.f32 %v5430_v26, %v5431_v10  ;;  %v4195_v36 = vmax.f32 %v3413_v55, 0.0  ;;  %v3768_v13 = vadd.f32 %v15397_v9, %v13433_v21 }
 0x592   : > { %v5423_v50 = vmax.f32 %v5421_v57, %v5422_v63  ;;  %v5454_v58 = vmax.f32 %v5452_v37, %v5453_v34  ;;  %v4197_v31 = vmax.f32 %v3766_v62, 0.0  ;;  %v4202_v59 = vmax.f32 %v3415_v42, 0.0  ;;  %v14175_v63 = vpop.f32.mrb[56].mxu0  ;;  %v14177_v62 = vpop.f32.mrb[56].mxu1 }
 0x593   : > { %v5445_v28 = vmax.f32 %v5443_v4, %v5444_v25  ;;  %v5433_v38 = vrot.slane %v5432_v20, 4  ;;  %v3417_v24 = vadd.f32 %v13723_v56, %v13435_v15  ;;  %v4204_v8 = vmax.f32 %v3768_v13, 0.0 }
 0x594   : > { %v5424_v61 = vrot.slane %v5423_v50, 2  ;;  %v5455_v53 = vrot.slane %v5454_v58, 4  ;;  %v3770_v26 = vadd.f32 %v13725_v23, %v13452_v19  ;;  %v4562_v57 = vpack.c.bf16 %v4202_v59, %v4194_v44 }
 0x595   : > { %v5446_v10 = vrot.slane %v5445_v28, 2  ;;  %v5434_v48 = vmax.f32 %v5432_v20, %v5433_v38  ;;  %v4203_v55 = vmax.f32 %v3417_v24, 0.0  ;;  %v4564_v4 = vpack.c.bf16 %v4204_v8, %v4196_v54  ;;  %v14183_v20 = vpop.f32.mrb[57].mxu0 }
 0x596   : > { %v5425_v37 = vmax.f32 %v5423_v50, %v5424_v61  ;;  %v5456_v34 = vmax.f32 %v5454_v58, %v5455_v53  ;;  %v4205_v16 = vmax.f32 %v3770_v26, 0.0  ;;  %v3421_v42 = vadd.f32 %v13745_v7, %v13427_v32  ;;  %15398 = vst [vmem:[#allocation85_spill] sm:$0xff] %v14183_v20  ;;  %v14185_v50 = vpop.f32.mrb[57].mxu1 }
 0x597   : > { %v5447_v25 = vmax.f32 %v5445_v28, %v5446_v10  ;;  %v5435_v56 = vrot.slane %v5434_v48, 2  ;;  %v4563_v6 = vpack.c.bf16 %v4203_v55, %v4195_v36  ;;  %v3774_v44 = vadd.f32 %v13747_v49, %v13433_v21  ;;  %15399 = vst [vmem:[#allocation21_spill] sm:$0xff] %v14185_v50  ;;  %v14189_v36 = vpop.f32.mrb[58].mxu0  ;;  %v14193_v53 = vpop.f32.mrb[58].mxu1  ;;  %v15403_v10 = vld [vmem:[#allocation20_spill] sm:$0xff] }
 0x598   : > { %v5426_v9 = vrot.slane %v5425_v37, 1  ;;  %v5457_v23 = vrot.slane %v5456_v34, 2  ;;  %v4565_v13 = vpack.c.bf16 %v4205_v16, %v4197_v31  ;;  %v4210_v38 = vmax.f32 %v3421_v42, 0.0  ;;  %15400 = vst [vmem:[#allocation86_spill] sm:$0xff] %v14189_v36  ;;  %v15401_v31 = vld [vmem:[#allocation31_spill] sm:$0xff]  ;;  %15402 = vst [vmem:[#allocation87_spill] sm:$0xff] %v14193_v53 }
 0x599   : > { %v5448_v54 = vrot.slane %v5447_v25, 1  ;;  %v5436_v58 = vmax.f32 %v5434_v48, %v5435_v56  ;;  %v3423_v28 = vadd.f32 %v13749_v46, %v13435_v15  ;;  %v4212_v24 = vmax.f32 %v3774_v44, 0.0  ;;  %v15404_v46 = vld [vmem:[#allocation23_spill] sm:$0xff] }
 0x59a   : > { %v5427_v59 = vmax.f32 %v5425_v37, %v5426_v9  ;;  %v5458_v7 = vmax.f32 %v5456_v34, %v5457_v23  ;;  %v3776_v61 = vadd.f32 %v15401_v31, %v13452_v19  ;;  %v3425_v48 = vadd.f32 %v15403_v10, %v13427_v32  ;;  %v14199_v37 = vpop.f32.mrb[59].mxu0  ;;  %v14201_v34 = vpop.f32.mrb[59].mxu1 }
 0x59b   : > { %v5449_v49 = vmax.f32 %v5447_v25, %v5448_v54  ;;  %v5437_v8 = vrot.slane %v5436_v58, 1  ;;  %v4211_v26 = vmax.f32 %v3423_v28, 0.0  ;;  %v3778_v42 = vadd.f32 %v15404_v46, %v13433_v21  ;;  %15405 = vst [vmem:[#allocation55_spill] sm:$0xff] %v14199_v37  ;;  %15406 = vst [vmem:[#allocation56_spill] sm:$0xff] %v14201_v34  ;;  %v15407_v25 = vld [vmem:[#allocation88_spill] sm:$0xff] }
 0x59c   : > { %v5428_v55 = vpack.i.bf16 %v5427_v59, %v5427_v59  ;;  %v5459_v16 = vrot.slane %v5458_v7, 1  ;;  %v4213_v56 = vmax.f32 %v3776_v61, 0.0  ;;  %v4218_v44 = vmax.f32 %v3425_v48, 0.0  ;;  %v15408_v59 = vld [vmem:[#allocation89_spill] sm:$0xff] }
 0x59d   : > { %v5450_v9 = vpack.i.bf16 %v5449_v49, %v5449_v49  ;;  %v5438_v23 = vmax.f32 %v5436_v58, %v5437_v8  ;;  %v3427_v54 = vadd.f32 %v15407_v25, %v13435_v15  ;;  %v4220_v10 = vmax.f32 %v3778_v42, 0.0  ;;  %v14219_v42 = vpop.f32.mrb[60].mxu1 }
 0x59e   : > { %v14205_v28 = vunpack.c.l.bf16 %v5428_v55  ;;  %v5460_v31 = vmax.f32 %v5458_v7, %v5459_v16  ;;  %v3780_v61 = vadd.f32 %v15408_v59, %v13452_v19  ;;  %v4570_v36 = vpack.c.bf16 %v4218_v44, %v4210_v38  ;;  %v14217_v16 = vpop.f32.mrb[60].mxu0  ;;  %15410 = vst [vmem:[#allocation28_spill] sm:$0xff] %v14219_v42  ;;  %v14225_v25 = vpop.f32.mrb[61].mxu1 }
 0x59f   : > { %v14209_v53 = vunpack.c.l.bf16 %v5450_v9  ;;  %v5439_v46 = vpack.i.bf16 %v5438_v23, %v5438_v23  ;;  %v4219_v37 = vmax.f32 %v3427_v54, 0.0  ;;  %v4572_v34 = vpack.c.bf16 %v4220_v10, %v4212_v24  ;;  %15409 = vst [vmem:[#allocation57_spill] sm:$0xff] %v14217_v16  ;;  %v14223_v44 = vpop.f32.mrb[61].mxu0  ;;  %15412 = vst [vmem:[#allocation69_spill] sm:$0xff] %v14225_v25  ;;  %v14231_v10 = vpop.f32.mrb[62].mxu1 }
 0x5a0   : > { %v5461_v50 = vpack.i.bf16 %v5460_v31, %v5460_v31  ;;  %v4221_v49 = vmax.f32 %v3780_v61, 0.0  ;;  %v3431_v58 = vadd.f32 %v13777_v45, %v13427_v32  ;;  %v5506_v48 = vmax.bf16 %v4570_v36, %v4562_v57  ;;  %15411 = vst [vmem:[#allocation68_spill] sm:$0xff] %v14223_v44  ;;  %15414 = vst [vmem:[#allocation31_spill] sm:$0xff] %v14231_v10 }
 0x5a1   : > { %v14213_v8 = vunpack.c.l.bf16 %v5439_v46  ;;  %v4571_v55 = vpack.c.bf16 %v4219_v37, %v4211_v26  ;;  %v3784_v7 = vadd.f32 %v13779_v17, %v13433_v21  ;;  %v5528_v38 = vmax.bf16 %v4572_v34, %v4564_v4  ;;  %v14227_v26 = vpop.f32.mrb[62].mxu0 }
 0x5a2   : > { %v14221_v9 = vunpack.c.l.bf16 %v5461_v50  ;;  %v4573_v23 = vpack.c.bf16 %v4221_v49, %v4213_v56  ;;  %v4226_v24 = vmax.f32 %v3431_v58, 0.0  ;;  %v5507_v45 = vunpack.i.l.bf16 %v5506_v48  ;;  %15413 = vst [vmem:[#allocation70_spill] sm:$0xff] %v14227_v26  ;;  %v14235_v58 = vpop.f32.mrb[63].mxu0 }
 0x5a3   : > { %v5508_v54 = vunpack.i.h.bf16 %v5506_v48  ;;  %v5517_v57 = vmax.bf16 %v4571_v55, %v4563_v6  ;;  %v4228_v36 = vmax.f32 %v3784_v7, 0.0  ;;  %v5529_v17 = vunpack.i.l.bf16 %v5528_v38  ;;  %15415 = vst [vmem:[#allocation20_spill] sm:$0xff] %v14235_v58  ;;  %v14237_v48 = vpop.f32.mrb[63].mxu1 }
 0x5a4   : > { %v5530_v37 = vunpack.i.h.bf16 %v5528_v38  ;;  %v5539_v31 = vmax.bf16 %v4573_v23, %v4565_v13  ;;  %v3433_v50 = vadd.f32 %v13781_v27, %v13435_v15  ;;  %v3786_v59 = vadd.f32 %v13783_v22, %v13452_v19  ;;  %15416 = vst [vmem:[#allocation23_spill] sm:$0xff] %v14237_v48  ;;  %v15417_v22 = vld [vmem:[#allocation58_spill] sm:$0xff] }
 0x5a5   : > { %v5509_v4 = vmax.f32 %v5507_v45, %v5508_v54  ;;  %v5518_v56 = vunpack.i.l.bf16 %v5517_v57  ;;  %v5519_v34 = vunpack.i.h.bf16 %v5517_v57  ;;  %v3435_v27 = vadd.f32 %v13791_v33, %v13427_v32 }
 0x5a6   : > { %v5531_v61 = vmax.f32 %v5529_v17, %v5530_v37  ;;  %v5540_v46 = vunpack.i.l.bf16 %v5539_v31  ;;  %v5541_v6 = vunpack.i.h.bf16 %v5539_v31  ;;  %v4227_v49 = vmax.f32 %v3433_v50, 0.0  ;;  %v15418_v31 = vld [vmem:[#allocation71_spill] sm:$0xff] }
 0x5a7   : > { %v5510_v13 = vrot.slane %v5509_v4, 4  ;;  %v5520_v55 = vmax.f32 %v5518_v56, %v5519_v34  ;;  %v4229_v7 = vmax.f32 %v3786_v59, 0.0  ;;  %v3788_v45 = vadd.f32 %v13795_v11, %v13433_v21 }
 0x5a8   : > { %v5532_v38 = vrot.slane %v5531_v61, 4  ;;  %v5542_v23 = vmax.f32 %v5540_v46, %v5541_v6  ;;  %v3437_v54 = vadd.f32 %v15417_v22, %v13435_v15  ;;  %v4234_v37 = vmax.f32 %v3435_v27, 0.0 }
 0x5a9   : > { %v5511_v57 = vmax.f32 %v5509_v4, %v5510_v13  ;;  %v5521_v17 = vrot.slane %v5520_v55, 4  ;;  %v3790_v50 = vadd.f32 %v15418_v31, %v13452_v19  ;;  %v4236_v34 = vmax.f32 %v3788_v45, 0.0  ;;  %v15419_v13 = vld [vmem:[#allocation72_spill] sm:$0xff]  ;;  %v15421_v45 = vld [vmem:[#allocation74_spill] sm:$0xff] }
 0x5aa   : > { %v5533_v48 = vmax.f32 %v5531_v61, %v5532_v38  ;;  %v5543_v56 = vrot.slane %v5542_v23, 4  ;;  %v4235_v59 = vmax.f32 %v3437_v54, 0.0  ;;  %v4578_v10 = vpack.c.bf16 %v4234_v37, %v4226_v24  ;;  %v15420_v61 = vld [vmem:[#allocation73_spill] sm:$0xff] }
 0x5ab   : > { %v5512_v58 = vrot.slane %v5511_v57, 2  ;;  %v5522_v33 = vmax.f32 %v5520_v55, %v5521_v17  ;;  %v4237_v46 = vmax.f32 %v3790_v50, 0.0  ;;  %v4580_v11 = vpack.c.bf16 %v4236_v34, %v4228_v36  ;;  %v15422_v36 = vld [vmem:[#allocation47_spill] sm:$0xff] }
 0x5ac   : > { %v5534_v6 = vrot.slane %v5533_v48, 2  ;;  %v5544_v26 = vmax.f32 %v5542_v23, %v5543_v56  ;;  %v4579_v25 = vpack.c.bf16 %v4235_v59, %v4227_v49  ;;  %v3441_v27 = vadd.f32 %v15419_v13, %v13427_v32  ;;  %v15423_v56 = vld [vmem:[#allocation59_spill] sm:$0xff] }
 0x5ad   : > { %v5513_v44 = vmax.f32 %v5511_v57, %v5512_v58  ;;  %v5523_v22 = vrot.slane %v5522_v33, 2  ;;  %v4581_v4 = vpack.c.bf16 %v4237_v46, %v4229_v7  ;;  %v3794_v38 = vadd.f32 %v15420_v61, %v13433_v21 }
 0x5ae   : > { %v5535_v42 = vmax.f32 %v5533_v48, %v5534_v6  ;;  %v5545_v31 = vrot.slane %v5544_v26, 2  ;;  %v3443_v55 = vadd.f32 %v15421_v45, %v13435_v15  ;;  %v4242_v17 = vmax.f32 %v3441_v27, 0.0  ;;  %v15424_v6 = vld [vmem:[#allocation30_spill] sm:$0xff] }
 0x5af   : > { %v5514_v24 = vrot.slane %v5513_v44, 1  ;;  %v5524_v54 = vmax.f32 %v5522_v33, %v5523_v22  ;;  %v3796_v49 = vadd.f32 %v15422_v36, %v13452_v19  ;;  %v4244_v7 = vmax.f32 %v3794_v38, 0.0  ;;  %v15425_v33 = vld [vmem:[#allocation48_spill] sm:$0xff] }
 0x5b0   : > { %v5536_v58 = vrot.slane %v5535_v42, 1  ;;  %v5546_v23 = vmax.f32 %v5544_v26, %v5545_v31  ;;  %v4243_v57 = vmax.f32 %v3443_v55, 0.0  ;;  %v3445_v34 = vadd.f32 %v15423_v56, %v13427_v32  ;;  %v15426_v26 = vld [vmem:[#allocation60_spill] sm:$0xff] }
 0x5b1   : > { %v5515_v37 = vmax.f32 %v5513_v44, %v5514_v24  ;;  %v5525_v50 = vrot.slane %v5524_v54, 1  ;;  %v4245_v48 = vmax.f32 %v3796_v49, 0.0  ;;  %v3798_v13 = vadd.f32 %v15424_v6, %v13433_v21 }
 0x5b2   : > { %v5537_v59 = vmax.f32 %v5535_v42, %v5536_v58  ;;  %v5547_v46 = vrot.slane %v5546_v23, 1  ;;  %v3447_v22 = vadd.f32 %v15425_v33, %v13435_v15  ;;  %v4250_v45 = vmax.f32 %v3445_v34, 0.0 }
 0x5b3   : > { %v5516_v27 = vpack.i.bf16 %v5515_v37, %v5515_v37  ;;  %v5526_v61 = vmax.f32 %v5524_v54, %v5525_v50  ;;  %v3800_v31 = vadd.f32 %v15426_v26, %v13452_v19  ;;  %v4252_v55 = vmax.f32 %v3798_v13, 0.0 }
 0x5b4   : > { %v5538_v44 = vpack.i.bf16 %v5537_v59, %v5537_v59  ;;  %v5548_v38 = vmax.f32 %v5546_v23, %v5547_v46  ;;  %v4251_v24 = vmax.f32 %v3447_v22, 0.0  ;;  %v4586_v42 = vpack.c.bf16 %v4250_v45, %v4242_v17 }
 0x5b5   : > { %v6170_v36 = vunpack.c.l.bf16 %v5516_v27  ;;  %v5527_v49 = vpack.i.bf16 %v5526_v61, %v5526_v61  ;;  %v4253_v58 = vmax.f32 %v3800_v31, 0.0  ;;  %v4588_v6 = vpack.c.bf16 %v4252_v55, %v4244_v7 }
 0x5b6   : > { %v6172_v56 = vunpack.c.l.bf16 %v5538_v44  ;;  %v5549_v16 = vpack.i.bf16 %v5548_v38, %v5548_v38  ;;  %v4587_v20 = vpack.c.bf16 %v4251_v24, %v4243_v57  ;;  %v5594_v50 = vmax.bf16 %v4586_v42, %v4578_v10  ;;  %v15430_v38 = vld [vmem:[#allocation49_spill] sm:$0xff] }
 0x5b7   : > { %v14265_v37 = vsel %vm6350_vm4, %v6170_v36, %v14205_v28  ;;  %v6171_v54 = vunpack.c.l.bf16 %v5527_v49  ;;  %v4589_v34 = vpack.c.bf16 %v4253_v58, %v4245_v48  ;;  %v5616_v46 = vmax.bf16 %v4588_v6, %v4580_v11 }
 0x5b8   : > { %v14269_v23 = vsel %vm6350_vm4, %v6172_v56, %v14209_v53  ;;  %v6173_v59 = vunpack.c.l.bf16 %v5549_v16  ;;  %v5605_v13 = vmax.bf16 %v4587_v20, %v4579_v25  ;;  %v5595_v7 = vunpack.i.l.bf16 %v5594_v50  ;;  %v15427_v20 = vld [vmem:[#allocation75_spill] sm:$0xff] }
 0x5b9   : > { %v14273_v17 = vsel %vm6350_vm4, %v6171_v54, %v14213_v8  ;;  %v5596_v57 = vunpack.i.h.bf16 %v5594_v50  ;;  %v5627_v33 = vmax.bf16 %v4589_v34, %v4581_v4  ;;  %v5617_v10 = vunpack.i.l.bf16 %v5616_v46  ;;  %v15428_v8 = vld [vmem:[#allocation22_spill] sm:$0xff]  ;;  %v15429_v4 = vld [vmem:[#allocation76_spill] sm:$0xff] }
 0x5ba   : > { %v14277_v28 = vsel %vm6350_vm4, %v6173_v59, %v14221_v9  ;;  %v5618_v48 = vunpack.i.h.bf16 %v5616_v46  ;;  %v5606_v22 = vunpack.i.l.bf16 %v5605_v13  ;;  %v5607_v53 = vunpack.i.h.bf16 %v5605_v13  ;;  %v15431_v34 = vld [vmem:[#allocation50_spill] sm:$0xff]  ;;  %v15432_v46 = vld [vmem:[#allocation33_spill] sm:$0xff] }
 0x5bb   : > { %v5597_v27 = vmax.f32 %v5595_v7, %v5596_v57  ;;  %v5628_v61 = vunpack.i.l.bf16 %v5627_v33  ;;  %v5629_v16 = vunpack.i.h.bf16 %v5627_v33  ;;  %v3451_v25 = vadd.f32 %v15427_v20, %v13427_v32 }
 0x5bc   : > { %v5619_v11 = vmax.f32 %v5617_v10, %v5618_v48  ;;  %v3804_v45 = vadd.f32 %v15428_v8, %v13433_v21  ;;  %v3453_v26 = vadd.f32 %v15429_v4, %v13435_v15  ;;  %v5608_v9 = vmax.f32 %v5606_v22, %v5607_v53 }
 0x5bd   : > { %v5598_v31 = vrot.slane %v5597_v27, 4  ;;  %v5630_v44 = vmax.f32 %v5628_v61, %v5629_v16  ;;  %v3806_v55 = vadd.f32 %v15430_v38, %v13452_v19  ;;  %v4258_v36 = vmax.f32 %v3451_v25, 0.0 }
 0x5be   : > { %v5620_v24 = vrot.slane %v5619_v11, 4  ;;  %v4260_v49 = vmax.f32 %v3804_v45, 0.0  ;;  %v4259_v42 = vmax.f32 %v3453_v26, 0.0  ;;  %v5609_v56 = vrot.slane %v5608_v9, 4 }
 0x5bf   : > { %v5599_v58 = vmax.f32 %v5597_v27, %v5598_v31  ;;  %v5631_v6 = vrot.slane %v5630_v44, 4  ;;  %v4261_v54 = vmax.f32 %v3806_v55, 0.0  ;;  %v3455_v59 = vadd.f32 %v15431_v34, %v13427_v32 }
 0x5c0   : > { %v5621_v50 = vmax.f32 %v5619_v11, %v5620_v24  ;;  %v3808_v13 = vadd.f32 %v15432_v46, %v13433_v21  ;;  %v3457_v7 = vadd.f32 %v13883_v43, %v13435_v15  ;;  %v5610_v33 = vmax.f32 %v5608_v9, %v5609_v56  ;;  %v15433_v24 = vld [vmem:[#allocation51_spill] sm:$0xff] }
 0x5c1   : > { %v5600_v57 = vrot.slane %v5599_v58, 2  ;;  %v5632_v10 = vmax.f32 %v5630_v44, %v5631_v6  ;;  %v3810_v48 = vadd.f32 %v13885_v51, %v13452_v19  ;;  %v4266_v27 = vmax.f32 %v3455_v59, 0.0 }
 0x5c2   : > { %v5622_v22 = vrot.slane %v5621_v50, 2  ;;  %v4268_v53 = vmax.f32 %v3808_v13, 0.0  ;;  %v4267_v61 = vmax.f32 %v3457_v7, 0.0  ;;  %v5611_v11 = vrot.slane %v5610_v33, 2 }
 0x5c3   : > { %v5601_v16 = vmax.f32 %v5599_v58, %v5600_v57  ;;  %v5633_v20 = vrot.slane %v5632_v10, 2  ;;  %v4269_v25 = vmax.f32 %v3810_v48, 0.0  ;;  %v4594_v45 = vpack.c.bf16 %v4266_v27, %v4258_v36  ;;  %v15434_v36 = vld [vmem:[#allocation32_spill] sm:$0xff] }
 0x5c4   : > { %v5623_v8 = vmax.f32 %v5621_v50, %v5622_v22  ;;  %v4596_v4 = vpack.c.bf16 %v4268_v53, %v4260_v49  ;;  %v4595_v26 = vpack.c.bf16 %v4267_v61, %v4259_v42  ;;  %v5612_v43 = vmax.f32 %v5610_v33, %v5611_v11  ;;  %v15437_v22 = vld [vmem:[#allocation90_spill] sm:$0xff]  ;;  %v15438_v11 = vld [vmem:[#allocation35_spill] sm:$0xff] }
 0x5c5   : > { %v5602_v31 = vrot.slane %v5601_v16, 1  ;;  %v5634_v38 = vmax.f32 %v5632_v10, %v5633_v20  ;;  %v4597_v9 = vpack.c.bf16 %v4269_v25, %v4261_v54  ;;  %v3461_v51 = vadd.f32 %v13901_v29, %v13427_v32  ;;  %v15436_v10 = vld [vmem:[#allocation78_spill] sm:$0xff] }
 0x5c6   : > { %v5624_v44 = vrot.slane %v5623_v8, 1  ;;  %v3814_v55 = vadd.f32 %v13903_v14, %v13433_v21  ;;  %v3463_v58 = vadd.f32 %v15433_v24, %v13435_v15  ;;  %v5613_v6 = vrot.slane %v5612_v43, 1  ;;  %v15435_v14 = vld [vmem:[#allocation77_spill] sm:$0xff] }
 0x5c7   : > { %v5603_v56 = vmax.f32 %v5601_v16, %v5602_v31  ;;  %v5635_v50 = vrot.slane %v5634_v38, 1  ;;  %v3816_v49 = vadd.f32 %v15434_v36, %v13452_v19  ;;  %v4274_v34 = vmax.f32 %v3461_v51, 0.0 }
 0x5c8   : > { %v5625_v42 = vmax.f32 %v5623_v8, %v5624_v44  ;;  %v4276_v59 = vmax.f32 %v3814_v55, 0.0  ;;  %v4275_v54 = vmax.f32 %v3463_v58, 0.0  ;;  %v5614_v13 = vmax.f32 %v5612_v43, %v5613_v6 }
 0x5c9   : > { %v5604_v46 = vpack.i.bf16 %v5603_v56, %v5603_v56  ;;  %v5636_v7 = vmax.f32 %v5634_v38, %v5635_v50  ;;  %v4277_v29 = vmax.f32 %v3816_v49, 0.0  ;;  %v3465_v33 = vadd.f32 %v15435_v14, %v13427_v32  ;;  %v15439_v49 = vld [vmem:[#allocation91_spill] sm:$0xff] }
 0x5ca   : > { %v5626_v57 = vpack.i.bf16 %v5625_v42, %v5625_v42  ;;  %v3818_v48 = vadd.f32 %v15436_v10, %v13433_v21  ;;  %v3467_v27 = vadd.f32 %v15437_v22, %v13435_v15  ;;  %v5615_v61 = vpack.i.bf16 %v5614_v13, %v5614_v13 }
 0x5cb   : > { %v6178_v53 = vunpack.c.l.bf16 %v5604_v46  ;;  %v5637_v16 = vpack.i.bf16 %v5636_v7, %v5636_v7  ;;  %v3820_v20 = vadd.f32 %v15438_v11, %v13452_v19  ;;  %v4282_v8 = vmax.f32 %v3465_v33, 0.0 }
 0x5cc   : > { %v6180_v25 = vunpack.c.l.bf16 %v5626_v57  ;;  %v4284_v31 = vmax.f32 %v3818_v48, 0.0  ;;  %v4283_v43 = vmax.f32 %v3467_v27, 0.0  ;;  %v6179_v44 = vunpack.c.l.bf16 %v5615_v61 }
 0x5cd   : > { %v14313_v38 = vsel %vm6352_vm5, %v6178_v53, %v14265_v37  ;;  %v6181_v51 = vunpack.c.l.bf16 %v5637_v16  ;;  %v4285_v55 = vmax.f32 %v3820_v20, 0.0  ;;  %v4602_v58 = vpack.c.bf16 %v4282_v8, %v4274_v34 }
 0x5ce   : > { %v14317_v24 = vsel %vm6352_vm5, %v6180_v25, %v14269_v23  ;;  %v4604_v56 = vpack.c.bf16 %v4284_v31, %v4276_v59  ;;  %v4603_v6 = vpack.c.bf16 %v4283_v43, %v4275_v54  ;;  %v14321_v50 = vsel %vm6352_vm5, %v6179_v44, %v14273_v17  ;;  %v15440_v23 = vld [vmem:[#allocation25_spill] sm:$0xff]  ;;  %v15441_v25 = vld [vmem:[#allocation52_spill] sm:$0xff] }
 0x5cf   : > { %v14325_v36 = vsel %vm6352_vm5, %v6181_v51, %v14277_v28  ;;  %v4605_v37 = vpack.c.bf16 %v4285_v55, %v4277_v29  ;;  %v3471_v42 = vadd.f32 %v15439_v49, %v13427_v32  ;;  %v5682_v46 = vmax.bf16 %v4602_v58, %v4594_v45  ;;  %v15442_v51 = vld [vmem:[#allocation61_spill] sm:$0xff] }
 0x5d0   : > { %v5704_v13 = vmax.bf16 %v4604_v56, %v4596_v4  ;;  %v5693_v7 = vmax.bf16 %v4603_v6, %v4595_v26  ;;  %v3824_v34 = vadd.f32 %v15440_v23, %v13433_v21  ;;  %v3473_v17 = vadd.f32 %v13943_v40, %v13435_v15 }
 0x5d1   : > { %v5715_v59 = vmax.bf16 %v4605_v37, %v4597_v9  ;;  %v4290_v54 = vmax.f32 %v3471_v42, 0.0  ;;  %v3826_v57 = vadd.f32 %v13945_v5, %v13452_v19  ;;  %v5683_v28 = vunpack.i.l.bf16 %v5682_v46 }
 0x5d2   : > { %v5684_v14 = vunpack.i.h.bf16 %v5682_v46  ;;  %v5705_v29 = vunpack.i.l.bf16 %v5704_v13  ;;  %v5706_v33 = vunpack.i.h.bf16 %v5704_v13  ;;  %v5694_v10 = vunpack.i.l.bf16 %v5693_v7 }
 0x5d3   : > { %v5695_v48 = vunpack.i.h.bf16 %v5693_v7  ;;  %v5716_v45 = vunpack.i.l.bf16 %v5715_v59  ;;  %v5717_v4 = vunpack.i.h.bf16 %v5715_v59  ;;  %v4292_v27 = vmax.f32 %v3824_v34, 0.0 }
 0x5d4   : > { %v5685_v26 = vmax.f32 %v5683_v28, %v5684_v14  ;;  %v5707_v22 = vmax.f32 %v5705_v29, %v5706_v33  ;;  %v4291_v53 = vmax.f32 %v3473_v17, 0.0  ;;  %v4293_v16 = vmax.f32 %v3826_v57, 0.0  ;;  %v15443_v57 = vld [vmem:[#allocation62_spill] sm:$0xff]  ;;  %v15444_v33 = vld [vmem:[#allocation79_spill] sm:$0xff] }
 0x5d5   : > { %v5696_v9 = vmax.f32 %v5694_v10, %v5695_v48  ;;  %v5718_v61 = vmax.f32 %v5716_v45, %v5717_v4  ;;  %v3475_v40 = vadd.f32 %v13951_v3, %v13427_v32  ;;  %v3828_v20 = vadd.f32 %v13955_v12, %v13433_v21  ;;  %v15445_v48 = vld [vmem:[#allocation24_spill] sm:$0xff] }
 0x5d6   : > { %v5686_v11 = vrot.slane %v5685_v26, 4  ;;  %v5708_v5 = vrot.slane %v5707_v22, 4  ;;  %v3477_v8 = vadd.f32 %v15441_v25, %v13435_v15  ;;  %v3830_v55 = vadd.f32 %v15442_v51, %v13452_v19  ;;  %v15449_v51 = vld [vmem:[#allocation34_spill] sm:$0xff] }
 0x5d7   : > { %v5697_v31 = vrot.slane %v5696_v9, 4  ;;  %v5719_v43 = vrot.slane %v5718_v61, 4  ;;  %v4298_v44 = vmax.f32 %v3475_v40, 0.0  ;;  %v4300_v6 = vmax.f32 %v3828_v20, 0.0  ;;  %v15447_v20 = vld [vmem:[#allocation63_spill] sm:$0xff] }
 0x5d8   : > { %v5687_v58 = vmax.f32 %v5685_v26, %v5686_v11  ;;  %v5709_v56 = vmax.f32 %v5707_v22, %v5708_v5  ;;  %v4299_v37 = vmax.f32 %v3477_v8, 0.0  ;;  %v4301_v46 = vmax.f32 %v3830_v55, 0.0  ;;  %v15446_v22 = vld [vmem:[#allocation43_spill] sm:$0xff] }
 0x5d9   : > { %v5698_v49 = vmax.f32 %v5696_v9, %v5697_v31  ;;  %v5720_v3 = vmax.f32 %v5718_v61, %v5719_v43  ;;  %v4610_v42 = vpack.c.bf16 %v4298_v44, %v4290_v54  ;;  %v4612_v12 = vpack.c.bf16 %v4300_v6, %v4292_v27  ;;  %v15448_v43 = vld [vmem:[#allocation64_spill] sm:$0xff] }
 0x5da   : > { %v5688_v13 = vrot.slane %v5687_v58, 2  ;;  %v5710_v7 = vrot.slane %v5709_v56, 2  ;;  %v4611_v23 = vpack.c.bf16 %v4299_v37, %v4291_v53  ;;  %v4613_v17 = vpack.c.bf16 %v4301_v46, %v4293_v16  ;;  %v15450_v37 = vld [vmem:[#allocation44_spill] sm:$0xff] }
 0x5db   : > { %v5699_v34 = vrot.slane %v5698_v49, 2  ;;  %v5721_v59 = vrot.slane %v5720_v3, 2  ;;  %v3481_v28 = vadd.f32 %v15443_v57, %v13427_v32  ;;  %v3834_v10 = vadd.f32 %v15444_v33, %v13433_v21 }
 0x5dc   : > { %v5689_v14 = vmax.f32 %v5687_v58, %v5688_v13  ;;  %v5711_v29 = vmax.f32 %v5709_v56, %v5710_v7  ;;  %v3483_v45 = vadd.f32 %v15445_v48, %v13435_v15  ;;  %v3836_v27 = vadd.f32 %v15446_v22, %v13452_v19 }
 0x5dd   : > { %v5700_v54 = vmax.f32 %v5698_v49, %v5699_v34  ;;  %v5722_v4 = vmax.f32 %v5720_v3, %v5721_v59  ;;  %v4306_v26 = vmax.f32 %v3481_v28, 0.0  ;;  %v4308_v61 = vmax.f32 %v3834_v10, 0.0 }
 0x5de   : > { %v5690_v53 = vrot.slane %v5689_v14, 1  ;;  %v5712_v9 = vrot.slane %v5711_v29, 1  ;;  %v4307_v16 = vmax.f32 %v3483_v45, 0.0  ;;  %v4309_v5 = vmax.f32 %v3836_v27, 0.0 }
 0x5df   : > { %v5701_v40 = vrot.slane %v5700_v54, 1  ;;  %v5723_v11 = vrot.slane %v5722_v4, 1  ;;  %v3485_v25 = vadd.f32 %v15447_v20, %v13427_v32  ;;  %v3838_v44 = vadd.f32 %v15448_v43, %v13433_v21 }
 0x5e0   : > { %v5691_v8 = vmax.f32 %v5689_v14, %v5690_v53  ;;  %v5713_v31 = vmax.f32 %v5711_v29, %v5712_v9  ;;  %v3487_v55 = vadd.f32 %v15449_v51, %v13435_v15  ;;  %v3840_v49 = vadd.f32 %v15450_v37, %v13452_v19 }
 0x5e1   : > { %v5702_v58 = vmax.f32 %v5700_v54, %v5701_v40  ;;  %v5724_v56 = vmax.f32 %v5722_v4, %v5723_v11  ;;  %v4314_v6 = vmax.f32 %v3485_v25, 0.0  ;;  %v4316_v13 = vmax.f32 %v3838_v44, 0.0 }
 0x5e2   : > { %v5692_v3 = vpack.i.bf16 %v5691_v8, %v5691_v8  ;;  %v5714_v46 = vpack.i.bf16 %v5713_v31, %v5713_v31  ;;  %v4315_v7 = vmax.f32 %v3487_v55, 0.0  ;;  %v4317_v28 = vmax.f32 %v3840_v49, 0.0  ;;  %v15451_v8 = vld [vmem:[#allocation65_spill] sm:$0xff] }
 0x5e3   : > { %v5703_v34 = vpack.i.bf16 %v5702_v58, %v5702_v58  ;;  %v5725_v59 = vpack.i.bf16 %v5724_v56, %v5724_v56  ;;  %v4618_v57 = vpack.c.bf16 %v4314_v6, %v4306_v26  ;;  %v4620_v33 = vpack.c.bf16 %v4316_v13, %v4308_v61 }
 0x5e4   : > { %v6186_v14 = vunpack.c.l.bf16 %v5692_v3  ;;  %v6188_v29 = vunpack.c.l.bf16 %v5714_v46  ;;  %v4619_v10 = vpack.c.bf16 %v4315_v7, %v4307_v16  ;;  %v4621_v4 = vpack.c.bf16 %v4317_v28, %v4309_v5 }
 0x5e5   : > { %v6187_v48 = vunpack.c.l.bf16 %v5703_v34  ;;  %v6189_v45 = vunpack.c.l.bf16 %v5725_v59  ;;  %v5770_v54 = vmax.bf16 %v4618_v57, %v4610_v42  ;;  %v5792_v53 = vmax.bf16 %v4620_v33, %v4612_v12  ;;  %v15454_v34 = vld [vmem:[#allocation45_spill] sm:$0xff] }
 0x5e6   : > { %v14361_v22 = vsel %vm6354_vm6, %v6186_v14, %v14313_v38  ;;  %v14365_v27 = vsel %vm6354_vm6, %v6188_v29, %v14317_v24  ;;  %v5781_v9 = vmax.bf16 %v4619_v10, %v4611_v23  ;;  %v5803_v25 = vmax.bf16 %v4621_v4, %v4613_v17  ;;  %v15455_v29 = vld [vmem:[#allocation37_spill] sm:$0xff] }
 0x5e7   : > { %v14369_v26 = vsel %vm6354_vm6, %v6187_v48, %v14321_v50  ;;  %v14373_v61 = vsel %vm6354_vm6, %v6189_v45, %v14325_v36  ;;  %v5771_v42 = vunpack.i.l.bf16 %v5770_v54  ;;  %v5772_v16 = vunpack.i.h.bf16 %v5770_v54 }
 0x5e8   : > { %v5793_v40 = vunpack.i.l.bf16 %v5792_v53  ;;  %v5794_v11 = vunpack.i.h.bf16 %v5792_v53  ;;  %v5782_v38 = vunpack.i.l.bf16 %v5781_v9  ;;  %v5783_v5 = vunpack.i.h.bf16 %v5781_v9 }
 0x5e9   : > { %v5773_v20 = vmax.f32 %v5771_v42, %v5772_v16  ;;  %v3491_v24 = vadd.f32 %v14017_v35, %v13427_v32  ;;  %v3844_v12 = vadd.f32 %v14021_v60, %v13433_v21  ;;  %v3493_v36 = vadd.f32 %v14027_v47, %v13435_v15  ;;  %v15452_v60 = vld [vmem:[#allocation66_spill] sm:$0xff]  ;;  %v15453_v47 = vld [vmem:[#allocation67_spill] sm:$0xff] }
 0x5ea   : > { %v5795_v50 = vmax.f32 %v5793_v40, %v5794_v11  ;;  %v5784_v23 = vmax.f32 %v5782_v38, %v5783_v5  ;;  %v3846_v31 = vadd.f32 %v15451_v8, %v13452_v19  ;;  %v5804_v44 = vunpack.i.l.bf16 %v5803_v25 }
 0x5eb   : > { %v5774_v43 = vrot.slane %v5773_v20, 4  ;;  %v5805_v51 = vunpack.i.h.bf16 %v5803_v25  ;;  %v4322_v55 = vmax.f32 %v3491_v24, 0.0  ;;  %v4324_v56 = vmax.f32 %v3844_v12, 0.0  ;;  %v15456_v24 = vld [vmem:[#allocation19_spill] sm:$0xff] }
 0x5ec   : > { %v5796_v58 = vrot.slane %v5795_v50, 4  ;;  %v5785_v17 = vrot.slane %v5784_v23, 4  ;;  %v4323_v6 = vmax.f32 %v3493_v36, 0.0  ;;  %v4325_v49 = vmax.f32 %v3846_v31, 0.0  ;;  %v15457_v36 = vld [vmem:[#allocation27_spill] sm:$0xff]  ;;  %v15458_v31 = vld [vmem:[#allocation53_spill] sm:$0xff] }
 0x5ed   : > { %v5775_v35 = vmax.f32 %v5773_v20, %v5774_v43  ;;  %v5806_v37 = vmax.f32 %v5804_v44, %v5805_v51  ;;  %v3495_v3 = vadd.f32 %v15452_v60, %v13427_v32  ;;  %v3848_v7 = vadd.f32 %v15453_v47, %v13433_v21 }
 0x5ee   : > { %v5797_v46 = vmax.f32 %v5795_v50, %v5796_v58  ;;  %v5786_v13 = vmax.f32 %v5784_v23, %v5785_v17  ;;  %v3497_v59 = vadd.f32 %v15454_v34, %v13435_v15  ;;  %v3850_v33 = vadd.f32 %v15455_v29, %v13452_v19  ;;  %v15459_v58 = vld [vmem:[#allocation54_spill] sm:$0xff] }
 0x5ef   : > { %v5776_v57 = vrot.slane %v5775_v35, 2  ;;  %v5807_v28 = vrot.slane %v5806_v37, 4  ;;  %v4330_v14 = vmax.f32 %v3495_v3, 0.0  ;;  %v4332_v45 = vmax.f32 %v3848_v7, 0.0  ;;  %v15461_v34 = vld [vmem:[#allocation46_spill] sm:$0xff] }
 0x5f0   : > { %v5798_v10 = vrot.slane %v5797_v46, 2  ;;  %v5787_v48 = vrot.slane %v5786_v13, 2  ;;  %v4331_v54 = vmax.f32 %v3497_v59, 0.0  ;;  %v4333_v42 = vmax.f32 %v3850_v33, 0.0 }
 0x5f1   : > { %v5777_v4 = vmax.f32 %v5775_v35, %v5776_v57  ;;  %v5808_v53 = vmax.f32 %v5806_v37, %v5807_v28  ;;  %v4626_v9 = vpack.c.bf16 %v4330_v14, %v4322_v55  ;;  %v4628_v11 = vpack.c.bf16 %v4332_v45, %v4324_v56  ;;  %v15462_v57 = vld [vmem:[#allocation36_spill] sm:$0xff] }
 0x5f2   : > { %v5799_v16 = vmax.f32 %v5797_v46, %v5798_v10  ;;  %v5788_v40 = vmax.f32 %v5786_v13, %v5787_v48  ;;  %v4627_v38 = vpack.c.bf16 %v4331_v54, %v4323_v6  ;;  %v4629_v25 = vpack.c.bf16 %v4333_v42, %v4325_v49  ;;  %v15460_v46 = vld [vmem:[#allocation92_spill] sm:$0xff] }
 0x5f3   : > { %v5778_v5 = vrot.slane %v5777_v4, 1  ;;  %v5809_v20 = vrot.slane %v5808_v53, 2  ;;  %v3501_v12 = vadd.f32 %v15456_v24, %v13427_v32  ;;  %v3854_v8 = vadd.f32 %v15457_v36, %v13433_v21  ;;  %v15463_v10 = vld [vmem:[#allocation80_spill] sm:$0xff] }
 0x5f4   : > { %v5800_v50 = vrot.slane %v5799_v16, 1  ;;  %v5789_v23 = vrot.slane %v5788_v40, 1  ;;  %v3503_v43 = vadd.f32 %v15458_v31, %v13435_v15  ;;  %v3856_v17 = vadd.f32 %v15459_v58, %v13452_v19  ;;  %v15464_v31 = vld [vmem:[#allocation39_spill] sm:$0xff] }
 0x5f5   : > { %v5779_v44 = vmax.f32 %v5777_v4, %v5778_v5  ;;  %v5810_v51 = vmax.f32 %v5808_v53, %v5809_v20  ;;  %v4338_v55 = vmax.f32 %v3501_v12, 0.0  ;;  %v4340_v35 = vmax.f32 %v3854_v8, 0.0 }
 0x5f6   : > { %v5801_v56 = vmax.f32 %v5799_v16, %v5800_v50  ;;  %v5790_v6 = vmax.f32 %v5788_v40, %v5789_v23  ;;  %v4339_v37 = vmax.f32 %v3503_v43, 0.0  ;;  %v4341_v3 = vmax.f32 %v3856_v17, 0.0 }
 0x5f7   : > { %v5780_v49 = vpack.i.bf16 %v5779_v44, %v5779_v44  ;;  %v5811_v60 = vrot.slane %v5810_v51, 1  ;;  %v3505_v13 = vadd.f32 %v15460_v46, %v13427_v32  ;;  %v3858_v59 = vadd.f32 %v15461_v34, %v13433_v21 }
 0x5f8   : > { %v5802_v47 = vpack.i.bf16 %v5801_v56, %v5801_v56  ;;  %v5791_v7 = vpack.i.bf16 %v5790_v6, %v5790_v6  ;;  %v3507_v28 = vadd.f32 %v15462_v57, %v13435_v15  ;;  %v3860_v48 = vadd.f32 %v15463_v10, %v13452_v19 }
 0x5f9   : > { %v6194_v14 = vunpack.c.l.bf16 %v5780_v49  ;;  %v5812_v29 = vmax.f32 %v5810_v51, %v5811_v60  ;;  %v4346_v33 = vmax.f32 %v3505_v13, 0.0  ;;  %v4348_v4 = vmax.f32 %v3858_v59, 0.0  ;;  %v15465_v51 = vld [vmem:[#allocation81_spill] sm:$0xff] }
 0x5fa   : > { %v6196_v45 = vunpack.c.l.bf16 %v5802_v47  ;;  %v6195_v54 = vunpack.c.l.bf16 %v5791_v7  ;;  %v4347_v53 = vmax.f32 %v3507_v28, 0.0  ;;  %v4349_v5 = vmax.f32 %v3860_v48, 0.0  ;;  %v15468_v28 = vld [vmem:[#allocation82_spill] sm:$0xff]  ;;  %v15470_v48 = vld [vmem:[#allocation84_spill] sm:$0xff] }
 0x5fb   : > { %v14409_v42 = vsel %vm6356_vm7, %v6194_v14, %v14361_v22  ;;  %v5813_v16 = vpack.i.bf16 %v5812_v29, %v5812_v29  ;;  %v4634_v40 = vpack.c.bf16 %v4346_v33, %v4338_v55  ;;  %v4636_v12 = vpack.c.bf16 %v4348_v4, %v4340_v35  ;;  %v15469_v33 = vld [vmem:[#allocation83_spill] sm:$0xff] }
 0x5fc   : > { %v14413_v20 = vsel %vm6356_vm7, %v6196_v45, %v14365_v27  ;;  %v14417_v24 = vsel %vm6356_vm7, %v6195_v54, %v14369_v26  ;;  %v4635_v50 = vpack.c.bf16 %v4347_v53, %v4339_v37  ;;  %v4637_v8 = vpack.c.bf16 %v4349_v5, %v4341_v3  ;;  %v15466_v27 = vld [vmem:[#allocation38_spill] sm:$0xff] }
 0x5fd   : > { %v6197_v23 = vunpack.c.l.bf16 %v5813_v16  ;;  %v5858_v36 = vmax.bf16 %v4634_v40, %v4626_v9  ;;  %v3511_v22 = vadd.f32 %v15464_v31, %v13427_v32  ;;  %v5880_v43 = vmax.bf16 %v4636_v12, %v4628_v11  ;;  %v15471_v31 = vld [vmem:[#allocation29_spill] sm:$0xff] }
 0x5fe   : > { %v5869_v44 = vmax.bf16 %v4635_v50, %v4627_v38  ;;  %v3864_v55 = vadd.f32 %v15465_v51, %v13433_v21  ;;  %v3513_v58 = vadd.f32 %v15466_v27, %v13435_v15  ;;  %v5891_v6 = vmax.bf16 %v4637_v8, %v4629_v25 }
 0x5ff   : > { %v14427_v26 = vsel %vm6356_vm7, %v6197_v23, %v14373_v61  ;;  %v5859_v17 = vunpack.i.l.bf16 %v5858_v36  ;;  %v5860_v56 = vunpack.i.h.bf16 %v5858_v36  ;;  %v5881_v9 = vunpack.i.l.bf16 %v5880_v43  ;;  %v15467_v61 = vld [vmem:[#allocation26_spill] sm:$0xff] }
 0x600   : > { %v5882_v35 = vunpack.i.h.bf16 %v5880_v43  ;;  %v5870_v37 = vunpack.i.l.bf16 %v5869_v44  ;;  %v5871_v49 = vunpack.i.h.bf16 %v5869_v44  ;;  %v5892_v11 = vunpack.i.l.bf16 %v5891_v6 }
 0x601   : > { %v5861_v60 = vmax.f32 %v5859_v17, %v5860_v56  ;;  %v5893_v38 = vunpack.i.h.bf16 %v5891_v6  ;;  %v4354_v3 = vmax.f32 %v3511_v22, 0.0  ;;  %v4356_v47 = vmax.f32 %v3864_v55, 0.0 }
 0x602   : > { %v5883_v46 = vmax.f32 %v5881_v9, %v5882_v35  ;;  %v5872_v13 = vmax.f32 %v5870_v37, %v5871_v49  ;;  %v4355_v7 = vmax.f32 %v3513_v58, 0.0  ;;  %v3866_v57 = vadd.f32 %v15467_v61, %v13452_v19 }
 0x603   : > { %v5862_v34 = vrot.slane %v5861_v60, 4  ;;  %v5894_v59 = vmax.f32 %v5892_v11, %v5893_v38  ;;  %v3515_v25 = vadd.f32 %v15468_v28, %v13427_v32  ;;  %v3868_v10 = vadd.f32 %v15469_v33, %v13433_v21 }
 0x604   : > { %v5884_v14 = vrot.slane %v5883_v46, 4  ;;  %v5873_v29 = vrot.slane %v5872_v13, 4  ;;  %v3517_v45 = vadd.f32 %v15470_v48, %v13435_v15  ;;  %v4357_v53 = vmax.f32 %v3866_v57, 0.0 }
 0x605   : > { %v5863_v54 = vmax.f32 %v5861_v60, %v5862_v34  ;;  %v5895_v4 = vrot.slane %v5894_v59, 4  ;;  %v4362_v16 = vmax.f32 %v3515_v25, 0.0  ;;  %v4364_v12 = vmax.f32 %v3868_v10, 0.0 }
 0x606   : > { %v5885_v40 = vmax.f32 %v5883_v46, %v5884_v14  ;;  %v5874_v5 = vmax.f32 %v5872_v13, %v5873_v29  ;;  %v4363_v50 = vmax.f32 %v3517_v45, 0.0  ;;  %v3870_v22 = vadd.f32 %v15471_v31, %v13452_v19 }
 0x607   : > { %v5864_v23 = vrot.slane %v5863_v54, 2  ;;  %v5896_v36 = vmax.f32 %v5894_v59, %v5895_v4  ;;  %v4642_v8 = vpack.c.bf16 %v4362_v16, %v4354_v3  ;;  %v4644_v51 = vpack.c.bf16 %v4364_v12, %v4356_v47 }
 0x608   : > { %v5886_v43 = vrot.slane %v5885_v40, 2  ;;  %v5875_v44 = vrot.slane %v5874_v5, 2  ;;  %v4643_v55 = vpack.c.bf16 %v4363_v50, %v4355_v7  ;;  %v4365_v17 = vmax.f32 %v3870_v22, 0.0 }
 0x609   : > { %v5865_v27 = vmax.f32 %v5863_v54, %v5864_v23  ;;  %v5897_v58 = vrot.slane %v5896_v36, 2  ;;  %v3521_v56 = vadd.f32 %v14141_v1, %v13427_v32  ;;  %v3874_v35 = vadd.f32 %v14143_v18, %v13433_v21 }
 0x60a   : > { %v5887_v6 = vmax.f32 %v5885_v40, %v5886_v43  ;;  %v5876_v9 = vmax.f32 %v5874_v5, %v5875_v44  ;;  %v3523_v37 = vadd.f32 %v14149_v0, %v13435_v15  ;;  %v4645_v11 = vpack.c.bf16 %v4365_v17, %v4357_v53 }
 0x60b   : > { %v5866_v49 = vrot.slane %v5865_v27, 1  ;;  %v5898_v60 = vmax.f32 %v5896_v36, %v5897_v58  ;;  %v4370_v38 = vmax.f32 %v3521_v56, 0.0  ;;  %v4372_v13 = vmax.f32 %v3874_v35, 0.0  ;;  %v15473_v35 = vld [vmem:[#allocation21_spill] sm:$0xff] }
 0x60c   : > { %v5888_v3 = vrot.slane %v5887_v6, 1  ;;  %v5877_v46 = vrot.slane %v5876_v9, 1  ;;  %v4371_v47 = vmax.f32 %v3523_v37, 0.0  ;;  %v3876_v1 = vadd.f32 %v14151_v52, %v13452_v19 }
 0x60d   : > { %v5867_v7 = vmax.f32 %v5865_v27, %v5866_v49  ;;  %v5899_v34 = vrot.slane %v5898_v60, 1  ;;  %v3525_v59 = vadd.f32 %v14154_v41, %v13427_v32  ;;  %v3878_v0 = vadd.f32 %v14156_v2, %v13433_v21 }
 0x60e   : > { %v5889_v18 = vmax.f32 %v5887_v6, %v5888_v3  ;;  %v5878_v61 = vmax.f32 %v5876_v9, %v5877_v46  ;;  %v3527_v57 = vadd.f32 %v14159_v39, %v13435_v15  ;;  %v4373_v14 = vmax.f32 %v3876_v1, 0.0 }
 0x60f   : > { %v5868_v28 = vpack.i.bf16 %v5867_v7, %v5867_v7  ;;  %v5900_v25 = vmax.f32 %v5898_v60, %v5899_v34  ;;  %v4378_v29 = vmax.f32 %v3525_v59, 0.0  ;;  %v4380_v48 = vmax.f32 %v3878_v0, 0.0 }
 0x610   : > { %v5890_v33 = vpack.i.bf16 %v5889_v18, %v5889_v18  ;;  %v5879_v10 = vpack.i.bf16 %v5878_v61, %v5878_v61  ;;  %v4379_v45 = vmax.f32 %v3527_v57, 0.0  ;;  %v3880_v41 = vadd.f32 %v14161_v30, %v13452_v19  ;;  %v15475_v61 = vld [vmem:[#allocation87_spill] sm:$0xff] }
 0x611   : > { %v6202_v52 = vunpack.c.l.bf16 %v5868_v28  ;;  %v5901_v54 = vpack.i.bf16 %v5900_v25, %v5900_v25  ;;  %v4650_v4 = vpack.c.bf16 %v4378_v29, %v4370_v38  ;;  %v4652_v2 = vpack.c.bf16 %v4380_v48, %v4372_v13  ;;  %v15476_v57 = vld [vmem:[#allocation55_spill] sm:$0xff] }
 0x612   : > { %v6204_v53 = vunpack.c.l.bf16 %v5890_v33  ;;  %v6203_v16 = vunpack.c.l.bf16 %v5879_v10  ;;  %v4651_v40 = vpack.c.bf16 %v4379_v45, %v4371_v47  ;;  %v4381_v50 = vmax.f32 %v3880_v41, 0.0  ;;  %v15477_v33 = vld [vmem:[#allocation56_spill] sm:$0xff] }
 0x613   : > { %v14457_v39 = vsel %vm6358_vm8, %v6202_v52, %v14409_v42  ;;  %v6205_v5 = vunpack.c.l.bf16 %v5901_v54  ;;  %v5946_v12 = vmax.bf16 %v4650_v4, %v4642_v8  ;;  %v5968_v30 = vmax.bf16 %v4652_v2, %v4644_v51 }
 0x614   : > { %v14461_v23 = vsel %vm6358_vm8, %v6204_v53, %v14413_v20  ;;  %v14465_v36 = vsel %vm6358_vm8, %v6203_v16, %v14417_v24  ;;  %v5957_v31 = vmax.bf16 %v4651_v40, %v4643_v55  ;;  %v4653_v44 = vpack.c.bf16 %v4381_v50, %v4373_v14 }
 0x615   : > { %v14469_v22 = vsel %vm6358_vm8, %v6205_v5, %v14427_v26  ;;  %v5947_v43 = vunpack.i.l.bf16 %v5946_v12  ;;  %v5948_v42 = vunpack.i.h.bf16 %v5946_v12  ;;  %v5969_v27 = vunpack.i.l.bf16 %v5968_v30  ;;  %v15472_v26 = vld [vmem:[#allocation85_spill] sm:$0xff] }
 0x616   : > { %v5970_v8 = vunpack.i.h.bf16 %v5968_v30  ;;  %v5958_v58 = vunpack.i.l.bf16 %v5957_v31  ;;  %v5959_v17 = vunpack.i.h.bf16 %v5957_v31  ;;  %v5979_v20 = vmax.bf16 %v4653_v44, %v4645_v11 }
 0x617   : > { %v5949_v56 = vmax.f32 %v5947_v43, %v5948_v42  ;;  %v3531_v6 = vadd.f32 %v14175_v63, %v13427_v32  ;;  %v3884_v24 = vadd.f32 %v14177_v62, %v13433_v21  ;;  %v3533_v9 = vadd.f32 %v15472_v26, %v13435_v15  ;;  %v15474_v62 = vld [vmem:[#allocation86_spill] sm:$0xff]  ;;  %v15478_v43 = vld [vmem:[#allocation57_spill] sm:$0xff] }
 0x618   : > { %v5971_v51 = vmax.f32 %v5969_v27, %v5970_v8  ;;  %v5960_v55 = vmax.f32 %v5958_v58, %v5959_v17  ;;  %v3886_v37 = vadd.f32 %v15473_v35, %v13452_v19  ;;  %v5980_v60 = vunpack.i.l.bf16 %v5979_v20  ;;  %v15479_v8 = vld [vmem:[#allocation28_spill] sm:$0xff] }
 0x619   : > { %v5950_v49 = vrot.slane %v5949_v56, 4  ;;  %v5981_v38 = vunpack.i.h.bf16 %v5979_v20  ;;  %v4386_v3 = vmax.f32 %v3531_v6, 0.0  ;;  %v4388_v13 = vmax.f32 %v3884_v24, 0.0  ;;  %v15480_v17 = vld [vmem:[#allocation68_spill] sm:$0xff] }
 0x61a   : > { %v5972_v46 = vrot.slane %v5971_v51, 4  ;;  %v5961_v11 = vrot.slane %v5960_v55, 4  ;;  %v4387_v47 = vmax.f32 %v3533_v9, 0.0  ;;  %v4389_v34 = vmax.f32 %v3886_v37, 0.0 }
 0x61b   : > { %v5951_v63 = vmax.f32 %v5949_v56, %v5950_v49  ;;  %v5982_v7 = vmax.f32 %v5980_v60, %v5981_v38  ;;  %v3535_v1 = vadd.f32 %v15474_v62, %v13427_v32  ;;  %v3888_v0 = vadd.f32 %v15475_v61, %v13433_v21 }
 0x61c   : > { %v5973_v59 = vmax.f32 %v5971_v51, %v5972_v46  ;;  %v5962_v18 = vmax.f32 %v5960_v55, %v5961_v11  ;;  %v3537_v28 = vadd.f32 %v15476_v57, %v13435_v15  ;;  %v3890_v10 = vadd.f32 %v15477_v33, %v13452_v19  ;;  %v15481_v51 = vld [vmem:[#allocation69_spill] sm:$0xff] }
 0x61d   : > { %v5952_v25 = vrot.slane %v5951_v63, 2  ;;  %v5983_v14 = vrot.slane %v5982_v7, 4  ;;  %v4394_v29 = vmax.f32 %v3535_v1, 0.0  ;;  %v4396_v52 = vmax.f32 %v3888_v0, 0.0 }
 0x61e   : > { %v5974_v48 = vrot.slane %v5973_v59, 2  ;;  %v5963_v45 = vrot.slane %v5962_v18, 2  ;;  %v4395_v54 = vmax.f32 %v3537_v28, 0.0  ;;  %v4397_v16 = vmax.f32 %v3890_v10, 0.0 }
 0x61f   : > { %v5953_v4 = vmax.f32 %v5951_v63, %v5952_v25  ;;  %v5984_v41 = vmax.f32 %v5982_v7, %v5983_v14  ;;  %v4658_v53 = vpack.c.bf16 %v4394_v29, %v4386_v3  ;;  %v4660_v5 = vpack.c.bf16 %v4396_v52, %v4388_v13  ;;  %v15482_v3 = vld [vmem:[#allocation70_spill] sm:$0xff]  ;;  %v15484_v7 = vld [vmem:[#allocation20_spill] sm:$0xff] }
 0x620   : > { %v5975_v2 = vmax.f32 %v5973_v59, %v5974_v48  ;;  %v5964_v40 = vmax.f32 %v5962_v18, %v5963_v45  ;;  %v4659_v12 = vpack.c.bf16 %v4395_v54, %v4387_v47  ;;  %v4661_v31 = vpack.c.bf16 %v4397_v16, %v4389_v34  ;;  %v15483_v47 = vld [vmem:[#allocation31_spill] sm:$0xff] }
 0x621   : > { %v5954_v50 = vrot.slane %v5953_v4, 1  ;;  %v5985_v30 = vrot.slane %v5984_v41, 2  ;;  %v3541_v42 = vadd.f32 %v15478_v43, %v13427_v32  ;;  %v3894_v58 = vadd.f32 %v15479_v8, %v13433_v21  ;;  %v15485_v18 = vld [vmem:[#allocation23_spill] sm:$0xff] }
 0x622   : > { %v5976_v44 = vrot.slane %v5975_v2, 1  ;;  %v5965_v27 = vrot.slane %v5964_v40, 1  ;;  %v3543_v56 = vadd.f32 %v15480_v17, %v13435_v15  ;;  %v3896_v55 = vadd.f32 %v15481_v51, %v13452_v19 }
 0x623   : > { %v5955_v20 = vmax.f32 %v5953_v4, %v5954_v50  ;;  %v5986_v6 = vmax.f32 %v5984_v41, %v5985_v30  ;;  %v4402_v24 = vmax.f32 %v3541_v42, 0.0  ;;  %v4404_v35 = vmax.f32 %v3894_v58, 0.0 }
 0x624   : > { %v5977_v26 = vmax.f32 %v5975_v2, %v5976_v44  ;;  %v5966_v9 = vmax.f32 %v5964_v40, %v5965_v27  ;;  %v4403_v37 = vmax.f32 %v3543_v56, 0.0  ;;  %v4405_v38 = vmax.f32 %v3896_v55, 0.0 }
 0x625   : > { %v5956_v49 = vpack.i.bf16 %v5955_v20, %v5955_v20  ;;  %v5987_v60 = vrot.slane %v5986_v6, 1  ;;  %v3545_v46 = vadd.f32 %v15482_v3, %v13427_v32  ;;  %v3898_v63 = vadd.f32 %v15483_v47, %v13433_v21 }
 0x626   : > { %v5978_v11 = vpack.i.bf16 %v5977_v26, %v5977_v26  ;;  %v5967_v13 = vpack.i.bf16 %v5966_v9, %v5966_v9  ;;  %v3547_v34 = vadd.f32 %v15484_v7, %v13435_v15  ;;  %v3900_v61 = vadd.f32 %v15485_v18, %v13452_v19 }
 0x627   : > { %v6210_v62 = vunpack.c.l.bf16 %v5956_v49  ;;  %v5988_v1 = vmax.f32 %v5986_v6, %v5987_v60  ;;  %v4410_v59 = vmax.f32 %v3545_v46, 0.0  ;;  %v4412_v28 = vmax.f32 %v3898_v63, 0.0 }
 0x628   : > { %v6212_v0 = vunpack.c.l.bf16 %v5978_v11  ;;  %v6211_v57 = vunpack.c.l.bf16 %v5967_v13  ;;  %v4411_v25 = vmax.f32 %v3547_v34, 0.0  ;;  %v4413_v33 = vmax.f32 %v3900_v61, 0.0  ;;  %v6090_v34 = vld [vmem:[#allocation2 + $0x60] sm:$0xff]  ;;  %v6091_v61 = vld [vmem:[#allocation2 + $0x68] sm:$0xff] }
 0x629   : > { %v6446_v32 = vsel %vm6360_vm9, %v6210_v62, %v14457_v39  ;;  %v5989_v14 = vpack.i.bf16 %v5988_v1, %v5988_v1  ;;  %v4666_v29 = vpack.c.bf16 %v4410_v59, %v4402_v24  ;;  %v4668_v10 = vpack.c.bf16 %v4412_v28, %v4404_v35  ;;  %v6092_v59 = vld [vmem:[#allocation2 + $0x70] sm:$0xff]  ;;  %v6093_v28 = vld [vmem:[#allocation2 + $0x78] sm:$0xff] }
 0x62a   : > { %v6460_v21 = vsel %vm6360_vm9, %v6212_v0, %v14461_v23  ;;  %v6453_v15 = vsel %vm6360_vm9, %v6211_v57, %v14465_v36  ;;  %v4667_v48 = vpack.c.bf16 %v4411_v25, %v4403_v37  ;;  %v4669_v52 = vpack.c.bf16 %v4413_v33, %v4405_v38 }
 0x62b   : > { %v6213_v45 = vunpack.c.l.bf16 %v5989_v14  ;;  %v6034_v19 = vmax.bf16 %v4666_v29, %v4658_v53  ;;  %v6056_v54 = vmax.bf16 %v4668_v10, %v4660_v5 }
 0x62c   : > { %v6045_v4 = vmax.bf16 %v4667_v48, %v4659_v12  ;;  %v6067_v2 = vmax.bf16 %v4669_v52, %v4661_v31  ;;  %v10168_v52 = vld [vmem:[#allocation9 + $0x204] ss:$16 sps:$4 sm:$0xff] (!%p9420_p3)  }
 0x62d   : > { %v6467_v41 = vsel %vm6360_vm9, %v6213_v45, %v14469_v22  ;;  %v6035_v39 = vunpack.i.l.bf16 %v6034_v19  ;;  %v6036_v16 = vunpack.i.h.bf16 %v6034_v19  ;;  %v6057_v40 = vunpack.i.l.bf16 %v6056_v54  ;;  %8146 = vmatprep.subr.bf16.mxu0 (!%p9420_p3), %v10168_v52  ;;  %v10255_v52 = vld [vmem:[#allocation9 + $0x3c0] ss:$16 sps:$4 sm:$0xff] (!%p9420_p3)  }
 0x62e   : > { %v6058_v50 = vunpack.i.h.bf16 %v6056_v54  ;;  %v6046_v30 = vunpack.i.l.bf16 %v6045_v4  ;;  %v6047_v23 = vunpack.i.h.bf16 %v6045_v4  ;;  %v6068_v42 = vunpack.i.l.bf16 %v6067_v2  ;;  %v10170_v54 = vld [vmem:[#allocation9] ss:$16 sps:$4 sm:$0xff] (!%p9420_p3)  }
 0x62f   : > { %v6037_v43 = vmax.f32 %v6035_v39, %v6036_v16  ;;  %v6069_v36 = vunpack.i.h.bf16 %v6067_v2  ;;  %v10171_v4 = vld [vmem:[#allocation9 + $0x200] ss:$16 sps:$4 sm:$0xff] (!%p9420_p3)   ;;  %v10178_v16 = vld [vmem:[#allocation9 + $0x44] ss:$16 sps:$4 sm:$0xff] (!%p9420_p3)  }
 0x630   : > { %v6059_v44 = vmax.f32 %v6057_v40, %v6058_v50  ;;  %v6048_v27 = vmax.f32 %v6046_v30, %v6047_v23  ;;  %8147 = vmatpush1.bf16.msra.mxu0 (!%p9420_p3), %v10171_v4  ;;  %v10176_v39 = vld [vmem:[#allocation9 + $0x20] ss:$16 sps:$4 sm:$0xff] (!%p9420_p3)   ;;  %v10180_v2 = vld [vmem:[#allocation9 + $0x244] ss:$16 sps:$4 sm:$0xff] (!%p9420_p3)  }
 0x631   : > { %v6038_v8 = vrot.slane %v6037_v43, 4  ;;  %v6070_v53 = vmax.f32 %v6068_v42, %v6069_v36  ;;  %v10182_v40 = vld [vmem:[#allocation9 + $0x40] ss:$16 sps:$4 sm:$0xff] (!%p9420_p3)   ;;  %v10184_v30 = vld [vmem:[#allocation9 + $0x64] ss:$16 sps:$4 sm:$0xff] (!%p9420_p3)  }
 0x632   : > { %v6060_v58 = vrot.slane %v6059_v44, 4  ;;  %v6049_v5 = vrot.slane %v6048_v27, 4  ;;  %v10183_v50 = vld [vmem:[#allocation9 + $0x240] ss:$16 sps:$4 sm:$0xff] (!%p9420_p3)   ;;  %v10186_v23 = vld [vmem:[#allocation9 + $0x264] ss:$16 sps:$4 sm:$0xff] (!%p9420_p3)  }
 0x633   : > { %v6039_v12 = vmax.f32 %v6037_v43, %v6038_v8  ;;  %v6071_v17 = vrot.slane %v6070_v53, 4  ;;  %v10188_v43 = vld [vmem:[#allocation9 + $0x60] ss:$16 sps:$4 sm:$0xff] (!%p9420_p3)   ;;  %v10190_v36 = vld [vmem:[#allocation9 + $0x84] ss:$16 sps:$4 sm:$0xff] (!%p9420_p3)  }
 0x634   : > { %v6061_v56 = vmax.f32 %v6059_v44, %v6060_v58  ;;  %v6050_v22 = vmax.f32 %v6048_v27, %v6049_v5  ;;  %v10189_v42 = vld [vmem:[#allocation9 + $0x260] ss:$16 sps:$4 sm:$0xff] (!%p9420_p3)   ;;  %v10192_v44 = vld [vmem:[#allocation9 + $0x284] ss:$16 sps:$4 sm:$0xff] (!%p9420_p3)  }
 0x635   : > { %v6040_v20 = vrot.slane %v6039_v12, 2  ;;  %v6072_v6 = vmax.f32 %v6070_v53, %v6071_v17  ;;  %v10194_v27 = vld [vmem:[#allocation9 + $0x80] ss:$16 sps:$4 sm:$0xff] (!%p9420_p3)   ;;  %v10196_v53 = vld [vmem:[#allocation9 + $0xa4] ss:$16 sps:$4 sm:$0xff] (!%p9420_p3)  }
 0x636   : > { %v6062_v31 = vrot.slane %v6061_v56, 2  ;;  %v6051_v24 = vrot.slane %v6050_v22, 2  ;;  %v10195_v8 = vld [vmem:[#allocation9 + $0x280] ss:$16 sps:$4 sm:$0xff] (!%p9420_p3)   ;;  %v10198_v58 = vld [vmem:[#allocation9 + $0x2a4] ss:$16 sps:$4 sm:$0xff] (!%p9420_p3)  }
 0x637   : > { %v6041_v51 = vmax.f32 %v6039_v12, %v6040_v20  ;;  %v6073_v55 = vrot.slane %v6072_v6, 2  ;;  %v10200_v5 = vld [vmem:[#allocation9 + $0xa0] ss:$16 sps:$4 sm:$0xff] (!%p9420_p3)   ;;  %v10202_v17 = vld [vmem:[#allocation9 + $0xc4] ss:$16 sps:$4 sm:$0xff] (!%p9420_p3)  }
 0x638   : > { %v6063_v26 = vmax.f32 %v6061_v56, %v6062_v31  ;;  %v6052_v9 = vmax.f32 %v6050_v22, %v6051_v24  ;;  %v10201_v12 = vld [vmem:[#allocation9 + $0x2a0] ss:$16 sps:$4 sm:$0xff] (!%p9420_p3)   ;;  %v10204_v56 = vld [vmem:[#allocation9 + $0x2c4] ss:$16 sps:$4 sm:$0xff] (!%p9420_p3)  }
 0x639   : > { %v6042_v35 = vrot.slane %v6041_v51, 1  ;;  %v6074_v37 = vmax.f32 %v6072_v6, %v6073_v55  ;;  %v10206_v22 = vld [vmem:[#allocation9 + $0xc0] ss:$16 sps:$4 sm:$0xff] (!%p9420_p3)   ;;  %v10208_v6 = vld [vmem:[#allocation9 + $0xe4] ss:$16 sps:$4 sm:$0xff] (!%p9420_p3)  }
 0x63a   : > { %v6064_v49 = vrot.slane %v6063_v26, 1  ;;  %v6053_v60 = vrot.slane %v6052_v9, 1  ;;  %v10207_v20 = vld [vmem:[#allocation9 + $0x2c0] ss:$16 sps:$4 sm:$0xff] (!%p9420_p3)   ;;  %v10210_v31 = vld [vmem:[#allocation9 + $0x2e4] ss:$16 sps:$4 sm:$0xff] (!%p9420_p3)  }
 0x63b   : > { %v6043_v38 = vmax.f32 %v6041_v51, %v6042_v35  ;;  %v6075_v3 = vrot.slane %v6074_v37, 1  ;;  %v10212_v24 = vld [vmem:[#allocation9 + $0xe0] ss:$16 sps:$4 sm:$0xff] (!%p9420_p3)   ;;  %v10214_v55 = vld [vmem:[#allocation9 + $0x104] ss:$16 sps:$4 sm:$0xff] (!%p9420_p3)  }
 0x63c   : > { %v6065_v46 = vmax.f32 %v6063_v26, %v6064_v49  ;;  %v6054_v11 = vmax.f32 %v6052_v9, %v6053_v60  ;;  %v10213_v51 = vld [vmem:[#allocation9 + $0x2e0] ss:$16 sps:$4 sm:$0xff] (!%p9420_p3)   ;;  %v10216_v26 = vld [vmem:[#allocation9 + $0x304] ss:$16 sps:$4 sm:$0xff] (!%p9420_p3)  }
 0x63d   : > { %v6044_v13 = vpack.i.bf16 %v6043_v38, %v6043_v38  ;;  %v6076_v47 = vmax.f32 %v6074_v37, %v6075_v3  ;;  %v10218_v9 = vld [vmem:[#allocation9 + $0x100] ss:$16 sps:$4 sm:$0xff] (!%p9420_p3)   ;;  %v10220_v37 = vld [vmem:[#allocation9 + $0x124] ss:$16 sps:$4 sm:$0xff] (!%p9420_p3)  }
 0x63e   : > { %v6066_v63 = vpack.i.bf16 %v6065_v46, %v6065_v46  ;;  %v6055_v7 = vpack.i.bf16 %v6054_v11, %v6054_v11  ;;  %v10219_v35 = vld [vmem:[#allocation9 + $0x300] ss:$16 sps:$4 sm:$0xff] (!%p9420_p3)   ;;  %v10222_v49 = vld [vmem:[#allocation9 + $0x324] ss:$16 sps:$4 sm:$0xff] (!%p9420_p3)  }
 0x63f   : > { %v6218_v62 = vunpack.c.l.bf16 %v6044_v13  ;;  %v6077_v1 = vpack.i.bf16 %v6076_v47, %v6076_v47  ;;  %v10224_v60 = vld [vmem:[#allocation9 + $0x120] ss:$16 sps:$4 sm:$0xff] (!%p9420_p3)   ;;  %v10226_v3 = vld [vmem:[#allocation9 + $0x144] ss:$16 sps:$4 sm:$0xff] (!%p9420_p3)  }
 0x640   : > { %v6220_v18 = vunpack.c.l.bf16 %v6066_v63  ;;  %v6219_v0 = vunpack.c.l.bf16 %v6055_v7  ;;  %6520 = sbr.rel (%p9420_p3) target bundleno = 2586 (0xa1a), region = 137  ;;  %v10225_v38 = vld [vmem:[#allocation9 + $0x320] ss:$16 sps:$4 sm:$0xff] (!%p9420_p3)   ;;  %v10228_v46 = vld [vmem:[#allocation9 + $0x344] ss:$16 sps:$4 sm:$0xff] (!%p9420_p3)  }
 0x641   : > { %v6447_v57 = vsel %vm6362_vm10, %v6218_v62, %v6446_v32  ;;  %v6221_v25 = vunpack.c.l.bf16 %v6077_v1  ;;  %v10166_v32 = vld [vmem:[#allocation9 + $0x4] ss:$16 sps:$4 sm:$0xff] (!%p9420_p3)   ;;  %v10230_v11 = vld [vmem:[#allocation9 + $0x140] ss:$16 sps:$4 sm:$0xff] (!%p9420_p3)  }
 0x642   : > { %v6497_v14 = vmax.f32 %v6090_v34, %v6447_v57  ;;  %v6461_v29 = vsel %vm6362_vm10, %v6220_v18, %v6460_v21  ;;  %v6454_v33 = vsel %vm6362_vm10, %v6219_v0, %v6453_v15  ;;  %8103 = vmatprep.subr.bf16.mxu1 (!%p9420_p3), %v10166_v32  ;;  %v10172_v21 = vld [vmem:[#allocation9 + $0x24] ss:$16 sps:$4 sm:$0xff] (!%p9420_p3)   ;;  %v10231_v13 = vld [vmem:[#allocation9 + $0x340] ss:$16 sps:$4 sm:$0xff] (!%p9420_p3)  }
 0x643   : > { %v6499_v10 = vmax.f32 %v6092_v59, %v6461_v29  ;;  %v6498_v48 = vmax.f32 %v6091_v61, %v6454_v33  ;;  %v6468_v45 = vsel %vm6362_vm10, %v6221_v25, %v6467_v41  ;;  %8104 = vmatpush1.bf16.msra.mxu1 (!%p9420_p3), %v10170_v54  ;;  %v10174_v15 = vld [vmem:[#allocation9 + $0x224] ss:$16 sps:$4 sm:$0xff] (!%p9420_p3)   ;;  %v10177_v41 = vld [vmem:[#allocation9 + $0x220] ss:$16 sps:$4 sm:$0xff] (!%p9420_p3)  }
 0x644   : > { %6513 = vst [vmem:[#allocation2 + $0x60] sm:$0xff] %v6497_v14  ;;  %v6500_v19 = vmax.f32 %v6093_v28, %v6468_v45  ;;  %8105 = vmatprep.subr.bf16.mxu1 (!%p9420_p3), %v10172_v21  ;;  %8148 = vmatprep.subr.bf16.mxu0 (!%p9420_p3), %v10174_v15  ;;  %v10232_v47 = vld [vmem:[#allocation9 + $0x164] ss:$16 sps:$4 sm:$0xff] (!%p9420_p3)   ;;  %v10236_v34 = vld [vmem:[#allocation9 + $0x160] ss:$16 sps:$4 sm:$0xff] (!%p9420_p3)  }
 0x645   : > { %6515 = vst [vmem:[#allocation2 + $0x70] sm:$0xff] %v6499_v10  ;;  %6514 = vst [vmem:[#allocation2 + $0x68] sm:$0xff] %v6498_v48  ;;  %8149 = vmatpush1.bf16.msra.mxu0 (!%p9420_p3), %v10177_v41  ;;  %v10234_v63 = vld [vmem:[#allocation9 + $0x364] ss:$16 sps:$4 sm:$0xff] (!%p9420_p3)   ;;  %v10237_v62 = vld [vmem:[#allocation9 + $0x360] ss:$16 sps:$4 sm:$0xff] (!%p9420_p3)  }
 0x646   : > { %6516 = vst [vmem:[#allocation2 + $0x78] sm:$0xff] %v6500_v19  ;;  %8150 = vmatprep.subr.bf16.mxu0 (!%p9420_p3), %v10180_v2  ;;  %v6522_v7 = vld [vmem:[#allocation2 + $0x8] sm:$0xff] (!%p9420_p3)  ;;  %v6524_v18 = vld [vmem:[#allocation2 + $0x18] sm:$0xff] (!%p9420_p3)  ;;  %v10242_v25 = vld [vmem:[#allocation9 + $0x180] ss:$16 sps:$4 sm:$0xff] (!%p9420_p3)  }
 0x647   : > { %8106 = vmatpush1.bf16.msra.mxu1 %v10176_v39  ;;  %v6530_v1 = vld [vmem:[#allocation2 + $0x48] sm:$0xff]  ;;  %v6532_v61 = vld [vmem:[#allocation2 + $0x58] sm:$0xff]  ;;  %v10243_v14 = vld [vmem:[#allocation9 + $0x380] ss:$16 sps:$4 sm:$0xff]  }
 0x648   : > { %8107 = vmatprep.subr.bf16.mxu1 %v10178_v16  ;;  %v14516_v59 = vpack.c.bf16 %v6530_v1, %v6522_v7  ;;  %v10238_v0 = vld [vmem:[#allocation9 + $0x184] ss:$16 sps:$4 sm:$0xff]   ;;  %v14518_v28 = vpack.c.bf16 %v6532_v61, %v6524_v18  ;;  %v10248_v10 = vld [vmem:[#allocation9 + $0x1a0] ss:$16 sps:$4 sm:$0xff]   ;;  %v10307_v7 = vld [vmem:[#allocation9 + $0xe8] ss:$16 sps:$4 sm:$0xff]  }
 0x649   : > { %8151 = vmatpush1.bf16.msra.mxu0 %v10183_v50  ;;  %v10240_v57 = vld [vmem:[#allocation9 + $0x384] ss:$16 sps:$4 sm:$0xff]   ;;  %v10249_v48 = vld [vmem:[#allocation9 + $0x3a0] ss:$16 sps:$4 sm:$0xff]   ;;  %v10267_v50 = vld [vmem:[#allocation9 + $0xc] ss:$16 sps:$4 sm:$0xff]  }
 0x64a   : > { %8152 = vmatprep.subr.bf16.mxu0 %v10186_v23  ;;  %8135 = vmatprep.mubr.bf16.mxu1 %v14516_v59  ;;  %v10244_v29 = vld [vmem:[#allocation9 + $0x1a4] ss:$16 sps:$4 sm:$0xff]   ;;  %v10254_v32 = vld [vmem:[#allocation9 + $0x1c0] ss:$16 sps:$4 sm:$0xff]   ;;  %v10321_v61 = vld [vmem:[#allocation9 + $0x12c] ss:$16 sps:$4 sm:$0xff]  }
 0x64b   : > { %8108 = vmatpush1.bf16.msra.mxu1 %v10182_v40  ;;  %8178 = vmatprep.mubr.bf16.mxu0 %v14518_v28  ;;  %v10246_v33 = vld [vmem:[#allocation9 + $0x3a4] ss:$16 sps:$4 sm:$0xff]   ;;  %v10260_v21 = vld [vmem:[#allocation9 + $0x1e0] ss:$16 sps:$4 sm:$0xff]  }
 0x64c   : > { %8109 = vmatprep.subr.bf16.mxu1 %v10184_v30  ;;  %v10250_v45 = vld [vmem:[#allocation9 + $0x1c4] ss:$16 sps:$4 sm:$0xff]   ;;  %v10261_v15 = vld [vmem:[#allocation9 + $0x3e0] ss:$16 sps:$4 sm:$0xff]  }
 0x64d   : > { %8153 = vmatpush1.bf16.msra.mxu0 %v10189_v42  ;;  %v10252_v19 = vld [vmem:[#allocation9 + $0x3c4] ss:$16 sps:$4 sm:$0xff]   ;;  %v6521_v39 = vld [vmem:[#allocation2] sm:$0xff]  ;;  %v6523_v2 = vld [vmem:[#allocation2 + $0x10] sm:$0xff] }
 0x64e   : > { %8154 = vmatprep.subr.bf16.mxu0 %v10192_v44  ;;  %v10256_v54 = vld [vmem:[#allocation9 + $0x1e4] ss:$16 sps:$4 sm:$0xff]   ;;  %v6529_v41 = vld [vmem:[#allocation2 + $0x40] sm:$0xff]  ;;  %v6531_v40 = vld [vmem:[#allocation2 + $0x50] sm:$0xff] }
 0x64f   : > { %8110 = vmatpush1.bf16.msra.mxu1 %v10188_v43  ;;  %v10258_v4 = vld [vmem:[#allocation9 + $0x3e4] ss:$16 sps:$4 sm:$0xff]   ;;  %v14522_v30 = vpack.c.bf16 %v6529_v41, %v6521_v39  ;;  %v10262_v23 = vld [vmem:[#allocation9 + $0x400] ss:$16 sps:$4 sm:$0xff]   ;;  %v10265_v43 = vld [vmem:[#allocation9 + $0x8] ss:$16 sps:$4 sm:$0xff]   ;;  %v14524_v42 = vpack.c.bf16 %v6531_v40, %v6523_v2 }
 0x650   : > { %8111 = vmatprep.subr.bf16.mxu1 %v10190_v36  ;;  %v10264_v16 = vld [vmem:[#allocation9 + $0x404] ss:$16 sps:$4 sm:$0xff]   ;;  %v10273_v44 = vld [vmem:[#allocation9 + $0x2c] ss:$16 sps:$4 sm:$0xff]   ;;  %v10310_v1 = vld [vmem:[#allocation9 + $0x500] ss:$16 sps:$4 sm:$0xff]  }
 0x651   : > { %8155 = vmatpush1.bf16.msra.mxu0 %v10195_v8  ;;  %v10270_v36 = vld [vmem:[#allocation9 + $0x424] ss:$16 sps:$4 sm:$0xff]   ;;  %v10271_v8 = vld [vmem:[#allocation9 + $0x28] ss:$16 sps:$4 sm:$0xff]   ;;  %v10340_v39 = vld [vmem:[#allocation9 + $0x5a0] ss:$16 sps:$4 sm:$0xff]  }
 0x652   : > { %8156 = vmatprep.subr.bf16.mxu0 %v10198_v58  ;;  %v10279_v58 = vld [vmem:[#allocation9 + $0x4c] ss:$16 sps:$4 sm:$0xff]   ;;  %v10318_v18 = vld [vmem:[#allocation9 + $0x524] ss:$16 sps:$4 sm:$0xff]   ;;  %v10343_v41 = vld [vmem:[#allocation9 + $0x1a8] ss:$16 sps:$4 sm:$0xff]  }
 0x653   : > { %8112 = vmatpush1.bf16.msra.mxu1 %v10194_v27  ;;  %v10268_v27 = vld [vmem:[#allocation9 + $0x420] ss:$16 sps:$4 sm:$0xff]   ;;  %v10351_v2 = vld [vmem:[#allocation9 + $0x1cc] ss:$16 sps:$4 sm:$0xff]  }
 0x654   : > { %8113 = vmatprep.subr.bf16.mxu1 %v10196_v53  ;;  %v10276_v53 = vld [vmem:[#allocation9 + $0x444] ss:$16 sps:$4 sm:$0xff]   ;;  %v10346_v40 = vld [vmem:[#allocation9 + $0x5c0] ss:$16 sps:$4 sm:$0xff]  }
 0x655   : > { %8157 = vmatpush1.bf16.msra.mxu0 %v10201_v12  ;;  %v10277_v12 = vld [vmem:[#allocation9 + $0x48] ss:$16 sps:$4 sm:$0xff]  }
 0x656   : > { %8158 = vmatprep.subr.bf16.mxu0 %v10204_v56  ;;  %v10285_v56 = vld [vmem:[#allocation9 + $0x6c] ss:$16 sps:$4 sm:$0xff]  }
 0x657   : > { %8114 = vmatpush1.bf16.msra.mxu1 %v10200_v5  ;;  %v10274_v5 = vld [vmem:[#allocation9 + $0x440] ss:$16 sps:$4 sm:$0xff]  }
 0x658   : > { %8115 = vmatprep.subr.bf16.mxu1 %v10202_v17  ;;  %v10282_v17 = vld [vmem:[#allocation9 + $0x464] ss:$16 sps:$4 sm:$0xff]  }
 0x659   : > { %8159 = vmatpush1.bf16.msra.mxu0 %v10207_v20  ;;  %v10283_v20 = vld [vmem:[#allocation9 + $0x68] ss:$16 sps:$4 sm:$0xff]  }
 0x65a   : > { %8160 = vmatprep.subr.bf16.mxu0 %v10210_v31  ;;  %v10291_v31 = vld [vmem:[#allocation9 + $0x8c] ss:$16 sps:$4 sm:$0xff]  }
 0x65b   : > { %8116 = vmatpush1.bf16.msra.mxu1 %v10206_v22  ;;  %v10280_v22 = vld [vmem:[#allocation9 + $0x460] ss:$16 sps:$4 sm:$0xff]  }
 0x65c   : > { %8117 = vmatprep.subr.bf16.mxu1 %v10208_v6  ;;  %v10288_v6 = vld [vmem:[#allocation9 + $0x484] ss:$16 sps:$4 sm:$0xff]  }
 0x65d   : > { %8161 = vmatpush1.bf16.msra.mxu0 %v10213_v51  ;;  %v10289_v51 = vld [vmem:[#allocation9 + $0x88] ss:$16 sps:$4 sm:$0xff]  }
 0x65e   : > { %8162 = vmatprep.subr.bf16.mxu0 %v10216_v26  ;;  %v10297_v26 = vld [vmem:[#allocation9 + $0xac] ss:$16 sps:$4 sm:$0xff]  }
 0x65f   : > { %8118 = vmatpush1.bf16.msra.mxu1 %v10212_v24  ;;  %v10286_v24 = vld [vmem:[#allocation9 + $0x480] ss:$16 sps:$4 sm:$0xff]  }
 0x660   : > { %8119 = vmatprep.subr.bf16.mxu1 %v10214_v55  ;;  %v10294_v55 = vld [vmem:[#allocation9 + $0x4a4] ss:$16 sps:$4 sm:$0xff]  }
 0x661   : > { %8163 = vmatpush1.bf16.msra.mxu0 %v10219_v35  ;;  %v10295_v35 = vld [vmem:[#allocation9 + $0xa8] ss:$16 sps:$4 sm:$0xff]  }
 0x662   : > { %8164 = vmatprep.subr.bf16.mxu0 %v10222_v49  ;;  %v10303_v49 = vld [vmem:[#allocation9 + $0xcc] ss:$16 sps:$4 sm:$0xff]  }
 0x663   : > { %8120 = vmatpush1.bf16.msra.mxu1 %v10218_v9  ;;  %v10292_v9 = vld [vmem:[#allocation9 + $0x4a0] ss:$16 sps:$4 sm:$0xff]  }
 0x664   : > { %8121 = vmatprep.subr.bf16.mxu1 %v10220_v37  ;;  %v10300_v37 = vld [vmem:[#allocation9 + $0x4c4] ss:$16 sps:$4 sm:$0xff]  }
 0x665   : > { %8165 = vmatpush1.bf16.msra.mxu0 %v10225_v38  ;;  %v10301_v38 = vld [vmem:[#allocation9 + $0xc8] ss:$16 sps:$4 sm:$0xff]  }
 0x666   : > { %8166 = vmatprep.subr.bf16.mxu0 %v10228_v46  ;;  %v6534_v46 = vld [vmem:[#allocation2 + $0x68] sm:$0xff] }
 0x667   : > { %8122 = vmatpush1.bf16.msra.mxu1 %v10224_v60  ;;  %v10298_v60 = vld [vmem:[#allocation9 + $0x4c0] ss:$16 sps:$4 sm:$0xff]  }
 0x668   : > { %8123 = vmatprep.subr.bf16.mxu1 %v10226_v3  ;;  %v6526_v3 = vld [vmem:[#allocation2 + $0x28] sm:$0xff] }
 0x669   : > { %8167 = vmatpush1.bf16.msra.mxu0 %v10231_v13  ;;  %v10309_v13 = vld [vmem:[#allocation9 + $0xec] ss:$16 sps:$4 sm:$0xff]  }
 0x66a   : > { %8168 = vmatprep.subr.bf16.mxu0 %v10234_v63  ;;  %v10304_v63 = vld [vmem:[#allocation9 + $0x4e0] ss:$16 sps:$4 sm:$0xff]  }
 0x66b   : > { %8124 = vmatpush1.bf16.msra.mxu1 %v10230_v11  ;;  %v10306_v11 = vld [vmem:[#allocation9 + $0x4e4] ss:$16 sps:$4 sm:$0xff]  }
 0x66c   : > { %8125 = vmatprep.subr.bf16.mxu1 %v10232_v47  ;;  %v14529_v47 = vpack.c.bf16 %v6534_v46, %v6526_v3  ;;  %v10387_v3 = vld [vmem:[#allocation9 + $0x28c] ss:$16 sps:$4 sm:$0xff]   ;;  %v10382_v46 = vld [vmem:[#allocation9 + $0x680] ss:$16 sps:$4 sm:$0xff]  }
 0x66d   : > { %8169 = vmatpush1.bf16.msra.mxu0 %v10237_v62  ;;  %v10315_v62 = vld [vmem:[#allocation9 + $0x10c] ss:$16 sps:$4 sm:$0xff]  }
 0x66e   : > { %8170 = vmatprep.subr.bf16.mxu0 %v10240_v57  ;;  %v10319_v57 = vld [vmem:[#allocation9 + $0x128] ss:$16 sps:$4 sm:$0xff]  }
 0x66f   : > { %8126 = vmatpush1.bf16.msra.mxu1 %v10236_v34  ;;  %v10312_v34 = vld [vmem:[#allocation9 + $0x504] ss:$16 sps:$4 sm:$0xff]  }
 0x670   : > { %8127 = vmatprep.subr.bf16.mxu1 %v10238_v0  ;;  %v10316_v0 = vld [vmem:[#allocation9 + $0x520] ss:$16 sps:$4 sm:$0xff]  }
 0x671   : > { %8171 = vmatpush1.bf16.msra.mxu0 %v10243_v14  ;;  %v10327_v14 = vld [vmem:[#allocation9 + $0x14c] ss:$16 sps:$4 sm:$0xff]  }
 0x672   : > { %8172 = vmatprep.subr.bf16.mxu0 %v10246_v33  ;;  %v10325_v33 = vld [vmem:[#allocation9 + $0x148] ss:$16 sps:$4 sm:$0xff]  }
 0x673   : > { %8128 = vmatpush1.bf16.msra.mxu1 %v10242_v25  ;;  %v10324_v25 = vld [vmem:[#allocation9 + $0x544] ss:$16 sps:$4 sm:$0xff]  }
 0x674   : > { %8129 = vmatprep.subr.bf16.mxu1 %v10244_v29  ;;  %v10322_v29 = vld [vmem:[#allocation9 + $0x540] ss:$16 sps:$4 sm:$0xff]  }
 0x675   : > { %8173 = vmatpush1.bf16.msra.mxu0 %v10249_v48  ;;  %v10333_v48 = vld [vmem:[#allocation9 + $0x16c] ss:$16 sps:$4 sm:$0xff]  }
 0x676   : > { %8174 = vmatprep.subr.bf16.mxu0 %v10252_v19  ;;  %v10331_v19 = vld [vmem:[#allocation9 + $0x168] ss:$16 sps:$4 sm:$0xff]  }
 0x677   : > { %8130 = vmatpush1.bf16.msra.mxu1 %v10248_v10  ;;  %v10330_v10 = vld [vmem:[#allocation9 + $0x564] ss:$16 sps:$4 sm:$0xff]  }
 0x678   : > { %8131 = vmatprep.subr.bf16.mxu1 %v10250_v45  ;;  %v10328_v45 = vld [vmem:[#allocation9 + $0x560] ss:$16 sps:$4 sm:$0xff]  }
 0x679   : > { %8175 = vmatpush1.bf16.msra.mxu0 %v10255_v52  ;;  %v10339_v52 = vld [vmem:[#allocation9 + $0x18c] ss:$16 sps:$4 sm:$0xff]  }
 0x67a   : > { %8176 = vmatprep.subr.bf16.mxu0 %v10258_v4  ;;  %v10337_v4 = vld [vmem:[#allocation9 + $0x188] ss:$16 sps:$4 sm:$0xff]  }
 0x67b   : > { %8132 = vmatpush1.bf16.msra.mxu1 %v10254_v32  ;;  %v10336_v32 = vld [vmem:[#allocation9 + $0x584] ss:$16 sps:$4 sm:$0xff]  }
 0x67c   : > { %8133 = vmatprep.subr.bf16.mxu1 %v10256_v54  ;;  %v10334_v54 = vld [vmem:[#allocation9 + $0x580] ss:$16 sps:$4 sm:$0xff]  }
 0x67d   : > { %8177 = vmatpush1.bf16.msra.mxu0 %v10261_v15  ;;  %v10345_v15 = vld [vmem:[#allocation9 + $0x1ac] ss:$16 sps:$4 sm:$0xff]  }
 0x67e   : > { %8189 = vmatprep.subr.bf16.mxu0 %v10264_v16  ;;  %v10348_v16 = vld [vmem:[#allocation9 + $0x5c4] ss:$16 sps:$4 sm:$0xff]  }
 0x67f   : > { %8134 = vmatpush1.bf16.msra.mxu1 %v10260_v21  ;;  %v10342_v21 = vld [vmem:[#allocation9 + $0x5a4] ss:$16 sps:$4 sm:$0xff]  }
 0x680   : > { %8275 = vmatprep.subr.bf16.mxu1 %v10267_v50  ;;  %8179 = vmatmul.mubr.bf16.vlgmr.msra.gmra.mrb[0].mxu0 %v14524_v42  ;;  %v10349_v50 = vld [vmem:[#allocation9 + $0x1c8] ss:$16 sps:$4 sm:$0xff]  }
 0x681   : > { %8190 = vmatpush1.bf16.msra.mxu0 %v10262_v23  ;;  %8221 = vmatprep.mubr.bf16.mxu0 %v14529_v47  ;;  %v10354_v23 = vld [vmem:[#allocation9 + $0x5e4] ss:$16 sps:$4 sm:$0xff]  }
 0x682   : > { %8136 = vmatmul.mubr.bf16.vlgmr.msra.gmra.mrb[0].mxu1 %v14522_v30  ;;  %8191 = vmatprep.subr.bf16.mxu0 %v10270_v36  ;;  %v10352_v36 = vld [vmem:[#allocation9 + $0x5e0] ss:$16 sps:$4 sm:$0xff]  }
 0x683   : > { %8276 = vmatpush1.bf16.msra.mxu1 %v10265_v43  ;;  %8307 = vmatprep.mubr.bf16.mxu1 %v14516_v59  ;;  %v10313_v59 = vld [vmem:[#allocation9 + $0x108] ss:$16 sps:$4 sm:$0xff]   ;;  %v10357_v43 = vld [vmem:[#allocation9 + $0x1ec] ss:$16 sps:$4 sm:$0xff]  }
 0x684   : > { %8277 = vmatprep.subr.bf16.mxu1 %v10273_v44  ;;  %v10355_v44 = vld [vmem:[#allocation9 + $0x1e8] ss:$16 sps:$4 sm:$0xff]  }
 0x685   : > { %8192 = vmatpush1.bf16.msra.mxu0 %v10268_v27  ;;  %v10360_v27 = vld [vmem:[#allocation9 + $0x604] ss:$16 sps:$4 sm:$0xff]  }
 0x686   : > { %8193 = vmatprep.subr.bf16.mxu0 %v10276_v53  ;;  %v6533_v53 = vld [vmem:[#allocation2 + $0x60] sm:$0xff] }
 0x687   : > { %8278 = vmatpush1.bf16.msra.mxu1 %v10271_v8  ;;  %v6525_v8 = vld [vmem:[#allocation2 + $0x20] sm:$0xff] }
 0x688   : > { %8279 = vmatprep.subr.bf16.mxu1 %v10279_v58  ;;  %v10363_v58 = vld [vmem:[#allocation9 + $0x20c] ss:$16 sps:$4 sm:$0xff]  }
 0x689   : > { %8194 = vmatpush1.bf16.msra.mxu0 %v10274_v5  ;;  %v10358_v5 = vld [vmem:[#allocation9 + $0x600] ss:$16 sps:$4 sm:$0xff]  }
 0x68a   : > { %8195 = vmatprep.subr.bf16.mxu0 %v10282_v17  ;;  %v14532_v17 = vpack.c.bf16 %v6533_v53, %v6525_v8  ;;  %v10447_v8 = vld [vmem:[#allocation9 + $0x3cc] ss:$16 sps:$4 sm:$0xff]   ;;  %v10442_v53 = vld [vmem:[#allocation9 + $0x7c0] ss:$16 sps:$4 sm:$0xff]  }
 0x68b   : > { %8280 = vmatpush1.bf16.msra.mxu1 %v10277_v12  ;;  %v10361_v12 = vld [vmem:[#allocation9 + $0x208] ss:$16 sps:$4 sm:$0xff]  }
 0x68c   : > { %8281 = vmatprep.subr.bf16.mxu1 %v10285_v56  ;;  %v10366_v56 = vld [vmem:[#allocation9 + $0x624] ss:$16 sps:$4 sm:$0xff]  }
 0x68d   : > { %8196 = vmatpush1.bf16.msra.mxu0 %v10280_v22  ;;  %v10369_v22 = vld [vmem:[#allocation9 + $0x22c] ss:$16 sps:$4 sm:$0xff]  }
 0x68e   : > { %8197 = vmatprep.subr.bf16.mxu0 %v10288_v6  ;;  %v10367_v6 = vld [vmem:[#allocation9 + $0x228] ss:$16 sps:$4 sm:$0xff]  }
 0x68f   : > { %8282 = vmatpush1.bf16.msra.mxu1 %v10283_v20  ;;  %v10364_v20 = vld [vmem:[#allocation9 + $0x620] ss:$16 sps:$4 sm:$0xff]  }
 0x690   : > { %8283 = vmatprep.subr.bf16.mxu1 %v10291_v31  ;;  %v10372_v31 = vld [vmem:[#allocation9 + $0x644] ss:$16 sps:$4 sm:$0xff]  }
 0x691   : > { %8198 = vmatpush1.bf16.msra.mxu0 %v10286_v24  ;;  %v6528_v24 = vld [vmem:[#allocation2 + $0x38] sm:$0xff] }
 0x692   : > { %8199 = vmatprep.subr.bf16.mxu0 %v10294_v55  ;;  %v10375_v55 = vld [vmem:[#allocation9 + $0x24c] ss:$16 sps:$4 sm:$0xff]  }
 0x693   : > { %8284 = vmatpush1.bf16.msra.mxu1 %v10289_v51  ;;  %v6536_v51 = vld [vmem:[#allocation2 + $0x78] sm:$0xff] }
 0x694   : > { %8285 = vmatprep.subr.bf16.mxu1 %v10297_v26  ;;  %v14536_v26 = vpack.c.bf16 %v6536_v51, %v6528_v24  ;;  %v10454_v24 = vld [vmem:[#allocation9 + $0x408] ss:$16 sps:$4 sm:$0xff]  }
 0x695   : > { %8200 = vmatpush1.bf16.msra.mxu0 %v10292_v9  ;;  %v10370_v9 = vld [vmem:[#allocation9 + $0x640] ss:$16 sps:$4 sm:$0xff]  }
 0x696   : > { %8201 = vmatprep.subr.bf16.mxu0 %v10300_v37  ;;  %v10381_v37 = vld [vmem:[#allocation9 + $0x26c] ss:$16 sps:$4 sm:$0xff]  }
 0x697   : > { %8286 = vmatpush1.bf16.msra.mxu1 %v10295_v35  ;;  %v10373_v35 = vld [vmem:[#allocation9 + $0x248] ss:$16 sps:$4 sm:$0xff]  }
 0x698   : > { %8287 = vmatprep.subr.bf16.mxu1 %v10303_v49  ;;  %v10376_v49 = vld [vmem:[#allocation9 + $0x660] ss:$16 sps:$4 sm:$0xff]  }
 0x699   : > { %8202 = vmatpush1.bf16.msra.mxu0 %v10298_v60  ;;  %v10379_v60 = vld [vmem:[#allocation9 + $0x268] ss:$16 sps:$4 sm:$0xff]  }
 0x69a   : > { %8203 = vmatprep.subr.bf16.mxu0 %v10306_v11  ;;  %v10390_v11 = vld [vmem:[#allocation9 + $0x6a4] ss:$16 sps:$4 sm:$0xff]  }
 0x69b   : > { %8288 = vmatpush1.bf16.msra.mxu1 %v10301_v38  ;;  %v10384_v38 = vld [vmem:[#allocation9 + $0x684] ss:$16 sps:$4 sm:$0xff]  }
 0x69c   : > { %8289 = vmatprep.subr.bf16.mxu1 %v10309_v13  ;;  %v10393_v13 = vld [vmem:[#allocation9 + $0x2ac] ss:$16 sps:$4 sm:$0xff]  }
 0x69d   : > { %8204 = vmatpush1.bf16.msra.mxu0 %v10304_v63  ;;  %v10388_v63 = vld [vmem:[#allocation9 + $0x6a0] ss:$16 sps:$4 sm:$0xff]  }
 0x69e   : > { %8205 = vmatprep.subr.bf16.mxu0 %v10312_v34  ;;  %v10396_v34 = vld [vmem:[#allocation9 + $0x6c4] ss:$16 sps:$4 sm:$0xff]  }
 0x69f   : > { %8290 = vmatpush1.bf16.msra.mxu1 %v10307_v7  ;;  %v10391_v7 = vld [vmem:[#allocation9 + $0x2a8] ss:$16 sps:$4 sm:$0xff]  }
 0x6a0   : > { %8291 = vmatprep.subr.bf16.mxu1 %v10315_v62  ;;  %v10399_v62 = vld [vmem:[#allocation9 + $0x2cc] ss:$16 sps:$4 sm:$0xff]  }
 0x6a1   : > { %8206 = vmatpush1.bf16.msra.mxu0 %v10310_v1  ;;  %v10394_v1 = vld [vmem:[#allocation9 + $0x6c0] ss:$16 sps:$4 sm:$0xff]  }
 0x6a2   : > { %8207 = vmatprep.subr.bf16.mxu0 %v10318_v18  ;;  %v10402_v18 = vld [vmem:[#allocation9 + $0x6e4] ss:$16 sps:$4 sm:$0xff]  }
 0x6a3   : > { %8292 = vmatpush1.bf16.msra.mxu1 %v10313_v59  ;;  %v10397_v59 = vld [vmem:[#allocation9 + $0x2c8] ss:$16 sps:$4 sm:$0xff]  }
 0x6a4   : > { %8293 = vmatprep.subr.bf16.mxu1 %v10321_v61  ;;  %v10405_v61 = vld [vmem:[#allocation9 + $0x2ec] ss:$16 sps:$4 sm:$0xff]  }
 0x6a5   : > { %8208 = vmatpush1.bf16.msra.mxu0 %v10316_v0  ;;  %v10400_v0 = vld [vmem:[#allocation9 + $0x6e0] ss:$16 sps:$4 sm:$0xff]  }
 0x6a6   : > { %8209 = vmatprep.subr.bf16.mxu0 %v10324_v25  ;;  %v10408_v25 = vld [vmem:[#allocation9 + $0x704] ss:$16 sps:$4 sm:$0xff]  }
 0x6a7   : > { %8294 = vmatpush1.bf16.msra.mxu1 %v10319_v57  ;;  %v10403_v57 = vld [vmem:[#allocation9 + $0x2e8] ss:$16 sps:$4 sm:$0xff]  }
 0x6a8   : > { %8295 = vmatprep.subr.bf16.mxu1 %v10327_v14  ;;  %v10411_v14 = vld [vmem:[#allocation9 + $0x30c] ss:$16 sps:$4 sm:$0xff]  }
 0x6a9   : > { %8210 = vmatpush1.bf16.msra.mxu0 %v10322_v29  ;;  %v10406_v29 = vld [vmem:[#allocation9 + $0x700] ss:$16 sps:$4 sm:$0xff]  }
 0x6aa   : > { %8211 = vmatprep.subr.bf16.mxu0 %v10330_v10  ;;  %v10414_v10 = vld [vmem:[#allocation9 + $0x724] ss:$16 sps:$4 sm:$0xff]  }
 0x6ab   : > { %8296 = vmatpush1.bf16.msra.mxu1 %v10325_v33  ;;  %v10409_v33 = vld [vmem:[#allocation9 + $0x308] ss:$16 sps:$4 sm:$0xff]  }
 0x6ac   : > { %8297 = vmatprep.subr.bf16.mxu1 %v10333_v48  ;;  %v10417_v48 = vld [vmem:[#allocation9 + $0x32c] ss:$16 sps:$4 sm:$0xff]  }
 0x6ad   : > { %8212 = vmatpush1.bf16.msra.mxu0 %v10328_v45  ;;  %v10412_v45 = vld [vmem:[#allocation9 + $0x720] ss:$16 sps:$4 sm:$0xff]  }
 0x6ae   : > { %8213 = vmatprep.subr.bf16.mxu0 %v10336_v32  ;;  %v10420_v32 = vld [vmem:[#allocation9 + $0x744] ss:$16 sps:$4 sm:$0xff]  }
 0x6af   : > { %8298 = vmatpush1.bf16.msra.mxu1 %v10331_v19  ;;  %v10415_v19 = vld [vmem:[#allocation9 + $0x328] ss:$16 sps:$4 sm:$0xff]  }
 0x6b0   : > { %8299 = vmatprep.subr.bf16.mxu1 %v10339_v52  ;;  %v10423_v52 = vld [vmem:[#allocation9 + $0x34c] ss:$16 sps:$4 sm:$0xff]  }
 0x6b1   : > { %8214 = vmatpush1.bf16.msra.mxu0 %v10334_v54  ;;  %v10418_v54 = vld [vmem:[#allocation9 + $0x740] ss:$16 sps:$4 sm:$0xff]  }
 0x6b2   : > { %8215 = vmatprep.subr.bf16.mxu0 %v10342_v21  ;;  %v10426_v21 = vld [vmem:[#allocation9 + $0x764] ss:$16 sps:$4 sm:$0xff]  }
 0x6b3   : > { %8300 = vmatpush1.bf16.msra.mxu1 %v10337_v4  ;;  %v10421_v4 = vld [vmem:[#allocation9 + $0x348] ss:$16 sps:$4 sm:$0xff]  }
 0x6b4   : > { %8301 = vmatprep.subr.bf16.mxu1 %v10345_v15  ;;  %v10429_v15 = vld [vmem:[#allocation9 + $0x36c] ss:$16 sps:$4 sm:$0xff]  }
 0x6b5   : > { %8216 = vmatpush1.bf16.msra.mxu0 %v10340_v39  ;;  %v10424_v39 = vld [vmem:[#allocation9 + $0x760] ss:$16 sps:$4 sm:$0xff]  }
 0x6b6   : > { %8217 = vmatprep.subr.bf16.mxu0 %v10348_v16  ;;  %v10432_v16 = vld [vmem:[#allocation9 + $0x784] ss:$16 sps:$4 sm:$0xff]  }
 0x6b7   : > { %8302 = vmatpush1.bf16.msra.mxu1 %v10343_v41  ;;  %v10427_v41 = vld [vmem:[#allocation9 + $0x368] ss:$16 sps:$4 sm:$0xff]  }
 0x6b8   : > { %8303 = vmatprep.subr.bf16.mxu1 %v10351_v2  ;;  %v10435_v2 = vld [vmem:[#allocation9 + $0x38c] ss:$16 sps:$4 sm:$0xff]  }
 0x6b9   : > { %8218 = vmatpush1.bf16.msra.mxu0 %v10346_v40  ;;  %v10430_v40 = vld [vmem:[#allocation9 + $0x780] ss:$16 sps:$4 sm:$0xff]  }
 0x6ba   : > { %8219 = vmatprep.subr.bf16.mxu0 %v10354_v23  ;;  %v10438_v23 = vld [vmem:[#allocation9 + $0x7a4] ss:$16 sps:$4 sm:$0xff]  }
 0x6bb   : > { %8304 = vmatpush1.bf16.msra.mxu1 %v10349_v50  ;;  %v10433_v50 = vld [vmem:[#allocation9 + $0x388] ss:$16 sps:$4 sm:$0xff]  }
 0x6bc   : > { %8305 = vmatprep.subr.bf16.mxu1 %v10357_v43  ;;  %v10441_v43 = vld [vmem:[#allocation9 + $0x3ac] ss:$16 sps:$4 sm:$0xff]  }
 0x6bd   : > { %8220 = vmatpush1.bf16.msra.mxu0 %v10352_v36  ;;  %v10436_v36 = vld [vmem:[#allocation9 + $0x7a0] ss:$16 sps:$4 sm:$0xff]  }
 0x6be   : > { %8232 = vmatprep.subr.bf16.mxu0 %v10360_v27  ;;  %v10444_v27 = vld [vmem:[#allocation9 + $0x7c4] ss:$16 sps:$4 sm:$0xff]  }
 0x6bf   : > { %8306 = vmatpush1.bf16.msra.mxu1 %v10355_v44  ;;  %v10439_v44 = vld [vmem:[#allocation9 + $0x3a8] ss:$16 sps:$4 sm:$0xff]  }
 0x6c0   : > { %8318 = vmatprep.subr.bf16.mxu1 %v10363_v58  ;;  %8222 = vmatmul.mubr.bf16.vlgmr.msra.gmra.mrb[0].mxu0 %v14532_v17  ;;  %v10445_v58 = vld [vmem:[#allocation9 + $0x3c8] ss:$16 sps:$4 sm:$0xff]  }
 0x6c1   : > { %8233 = vmatpush1.bf16.msra.mxu0 %v10358_v5  ;;  %8264 = vmatprep.mubr.bf16.mxu0 %v14536_v26  ;;  %v10450_v5 = vld [vmem:[#allocation9 + $0x7e4] ss:$16 sps:$4 sm:$0xff]  }
 0x6c2   : > { %8308 = vmatmul.mubr.bf16.vlgmr.msra.gmra.mrb[4].mxu1 %v14522_v30  ;;  %8234 = vmatprep.subr.bf16.mxu0 %v10366_v56  ;;  %v10378_v30 = vld [vmem:[#allocation9 + $0x664] ss:$16 sps:$4 sm:$0xff]   ;;  %v10448_v56 = vld [vmem:[#allocation9 + $0x7e0] ss:$16 sps:$4 sm:$0xff]  }
 0x6c3   : > { %8319 = vmatpush1.bf16.msra.mxu1 %v10361_v12  ;;  %8350 = vmatprep.mubr.bf16.mxu1 %v14518_v28  ;;  %v10385_v28 = vld [vmem:[#allocation9 + $0x288] ss:$16 sps:$4 sm:$0xff]   ;;  %v10453_v12 = vld [vmem:[#allocation9 + $0x3ec] ss:$16 sps:$4 sm:$0xff]  }
 0x6c4   : > { %8320 = vmatprep.subr.bf16.mxu1 %v10369_v22  ;;  %v10451_v22 = vld [vmem:[#allocation9 + $0x3e8] ss:$16 sps:$4 sm:$0xff]  }
 0x6c5   : > { %8235 = vmatpush1.bf16.msra.mxu0 %v10364_v20  ;;  %v6527_v20 = vld [vmem:[#allocation2 + $0x30] sm:$0xff] }
 0x6c6   : > { %8236 = vmatprep.subr.bf16.mxu0 %v10372_v31  ;;  %v10456_v31 = vld [vmem:[#allocation9 + $0x40c] ss:$16 sps:$4 sm:$0xff]  }
 0x6c7   : > { %8321 = vmatpush1.bf16.msra.mxu1 %v10367_v6  ;;  %v6535_v6 = vld [vmem:[#allocation2 + $0x70] sm:$0xff] }
 0x6c8   : > { %8322 = vmatprep.subr.bf16.mxu1 %v10375_v55  ;;  %v14540_v51 = vpack.c.bf16 %v6535_v6, %v6527_v20  ;;  %v10459_v55 = vld [vmem:[#allocation9 + $0x42c] ss:$16 sps:$4 sm:$0xff]   ;;  %v10499_v20 = vld [vmem:[#allocation9 + $0x5e8] ss:$16 sps:$4 sm:$0xff]  }
 0x6c9   : > { %8237 = vmatpush1.bf16.msra.mxu0 %v10370_v9  ;;  %v10550_v9 = vld [vmem:[%s15486_s22] ss:$8 sps:$4 sm:$0xff]  }
 0x6ca   : > { %8238 = vmatprep.subr.bf16.mxu0 %v10378_v30  ;;  %v10457_v30 = vld [vmem:[#allocation9 + $0x428] ss:$16 sps:$4 sm:$0xff]   ;;  %v10504_v6 = vld [vmem:[#allocation9 + $0x60c] ss:$16 sps:$4 sm:$0xff]  }
 0x6cb   : > { %8323 = vmatpush1.bf16.msra.mxu1 %v10373_v35  ;;  %v10552_v35 = vld [vmem:[%s15486_s22 + $0x4] ss:$8 sps:$4 sm:$0xff]  }
 0x6cc   : > { %8324 = vmatprep.subr.bf16.mxu1 %v10381_v37  ;;  %v10555_v37 = vld [vmem:[%s15486_s22 + $0x14] ss:$8 sps:$4 sm:$0xff]  }
 0x6cd   : > { %8239 = vmatpush1.bf16.msra.mxu0 %v10376_v49  ;;  %v10462_v49 = vld [vmem:[#allocation9 + $0x44c] ss:$16 sps:$4 sm:$0xff]  }
 0x6ce   : > { %8240 = vmatprep.subr.bf16.mxu0 %v10384_v38  ;;  %v10460_v38 = vld [vmem:[#allocation9 + $0x448] ss:$16 sps:$4 sm:$0xff]  }
 0x6cf   : > { %8325 = vmatpush1.bf16.msra.mxu1 %v10379_v60  ;;  %v10558_v60 = vld [vmem:[%s15486_s22 + $0x24] ss:$8 sps:$4 sm:$0xff]  }
 0x6d0   : > { %8326 = vmatprep.subr.bf16.mxu1 %v10387_v3  ;;  %v10556_v3 = vld [vmem:[%s15486_s22 + $0x20] ss:$8 sps:$4 sm:$0xff]  }
 0x6d1   : > { %8241 = vmatpush1.bf16.msra.mxu0 %v10382_v46  ;;  %v10463_v46 = vld [vmem:[#allocation9 + $0x468] ss:$16 sps:$4 sm:$0xff]  }
 0x6d2   : > { %8242 = vmatprep.subr.bf16.mxu0 %v10390_v11  ;;  %v10561_v11 = vld [vmem:[%s15486_s22 + $0x34] ss:$8 sps:$4 sm:$0xff]  }
 0x6d3   : > { %8327 = vmatpush1.bf16.msra.mxu1 %v10385_v28  ;;  %v10468_v28 = vld [vmem:[#allocation9 + $0x48c] ss:$16 sps:$4 sm:$0xff]  }
 0x6d4   : > { %8328 = vmatprep.subr.bf16.mxu1 %v10393_v13  ;;  %v10559_v13 = vld [vmem:[%s15486_s22 + $0x30] ss:$8 sps:$4 sm:$0xff]  }
 0x6d5   : > { %8243 = vmatpush1.bf16.msra.mxu0 %v10388_v63  ;;  %v10564_v63 = vld [vmem:[%s15486_s22 + $0x44] ss:$8 sps:$4 sm:$0xff]  }
 0x6d6   : > { %8244 = vmatprep.subr.bf16.mxu0 %v10396_v34  ;;  %v10471_v34 = vld [vmem:[#allocation9 + $0x4ac] ss:$16 sps:$4 sm:$0xff]  }
 0x6d7   : > { %8329 = vmatpush1.bf16.msra.mxu1 %v10391_v7  ;;  %v10466_v7 = vld [vmem:[#allocation9 + $0x488] ss:$16 sps:$4 sm:$0xff]  }
 0x6d8   : > { %8330 = vmatprep.subr.bf16.mxu1 %v10399_v62  ;;  %v10562_v62 = vld [vmem:[%s15486_s22 + $0x40] ss:$8 sps:$4 sm:$0xff]  }
 0x6d9   : > { %8245 = vmatpush1.bf16.msra.mxu0 %v10394_v1  ;;  %v10567_v1 = vld [vmem:[%s15486_s22 + $0x54] ss:$8 sps:$4 sm:$0xff]  }
 0x6da   : > { %8246 = vmatprep.subr.bf16.mxu0 %v10402_v18  ;;  %v10474_v18 = vld [vmem:[#allocation9 + $0x4cc] ss:$16 sps:$4 sm:$0xff]  }
 0x6db   : > { %8331 = vmatpush1.bf16.msra.mxu1 %v10397_v59  ;;  %v10469_v59 = vld [vmem:[#allocation9 + $0x4a8] ss:$16 sps:$4 sm:$0xff]  }
 0x6dc   : > { %8332 = vmatprep.subr.bf16.mxu1 %v10405_v61  ;;  %v10565_v61 = vld [vmem:[%s15486_s22 + $0x50] ss:$8 sps:$4 sm:$0xff]  }
 0x6dd   : > { %8247 = vmatpush1.bf16.msra.mxu0 %v10400_v0  ;;  %v10570_v0 = vld [vmem:[%s15486_s22 + $0x64] ss:$8 sps:$4 sm:$0xff]  }
 0x6de   : > { %8248 = vmatprep.subr.bf16.mxu0 %v10408_v25  ;;  %v10477_v25 = vld [vmem:[#allocation9 + $0x4ec] ss:$16 sps:$4 sm:$0xff]  }
 0x6df   : > { %8333 = vmatpush1.bf16.msra.mxu1 %v10403_v57  ;;  %v10472_v57 = vld [vmem:[#allocation9 + $0x4c8] ss:$16 sps:$4 sm:$0xff]  }
 0x6e0   : > { %8334 = vmatprep.subr.bf16.mxu1 %v10411_v14  ;;  %v10568_v14 = vld [vmem:[%s15486_s22 + $0x60] ss:$8 sps:$4 sm:$0xff]  }
 0x6e1   : > { %8249 = vmatpush1.bf16.msra.mxu0 %v10406_v29  ;;  %v10573_v29 = vld [vmem:[%s15486_s22 + $0x74] ss:$8 sps:$4 sm:$0xff]  }
 0x6e2   : > { %8250 = vmatprep.subr.bf16.mxu0 %v10414_v10  ;;  %v10480_v10 = vld [vmem:[#allocation9 + $0x50c] ss:$16 sps:$4 sm:$0xff]  }
 0x6e3   : > { %8335 = vmatpush1.bf16.msra.mxu1 %v10409_v33  ;;  %v10475_v33 = vld [vmem:[#allocation9 + $0x4e8] ss:$16 sps:$4 sm:$0xff]  }
 0x6e4   : > { %8336 = vmatprep.subr.bf16.mxu1 %v10417_v48  ;;  %v10571_v48 = vld [vmem:[%s15486_s22 + $0x70] ss:$8 sps:$4 sm:$0xff]  }
 0x6e5   : > { %8251 = vmatpush1.bf16.msra.mxu0 %v10412_v45  ;;  %v10576_v45 = vld [vmem:[%s15486_s22 + $0x84] ss:$8 sps:$4 sm:$0xff]  }
 0x6e6   : > { %8252 = vmatprep.subr.bf16.mxu0 %v10420_v32  ;;  %v10483_v32 = vld [vmem:[#allocation9 + $0x52c] ss:$16 sps:$4 sm:$0xff]  }
 0x6e7   : > { %8337 = vmatpush1.bf16.msra.mxu1 %v10415_v19  ;;  %v10478_v19 = vld [vmem:[#allocation9 + $0x508] ss:$16 sps:$4 sm:$0xff]  }
 0x6e8   : > { %8338 = vmatprep.subr.bf16.mxu1 %v10423_v52  ;;  %v10574_v52 = vld [vmem:[%s15486_s22 + $0x80] ss:$8 sps:$4 sm:$0xff]  }
 0x6e9   : > { %8253 = vmatpush1.bf16.msra.mxu0 %v10418_v54  ;;  %v10579_v54 = vld [vmem:[%s15486_s22 + $0x94] ss:$8 sps:$4 sm:$0xff]  }
 0x6ea   : > { %8254 = vmatprep.subr.bf16.mxu0 %v10426_v21  ;;  %v10486_v21 = vld [vmem:[#allocation9 + $0x54c] ss:$16 sps:$4 sm:$0xff]  }
 0x6eb   : > { %8339 = vmatpush1.bf16.msra.mxu1 %v10421_v4  ;;  %v10481_v4 = vld [vmem:[#allocation9 + $0x528] ss:$16 sps:$4 sm:$0xff]  }
 0x6ec   : > { %8340 = vmatprep.subr.bf16.mxu1 %v10429_v15  ;;  %v10577_v15 = vld [vmem:[%s15486_s22 + $0x90] ss:$8 sps:$4 sm:$0xff]  }
 0x6ed   : > { %8255 = vmatpush1.bf16.msra.mxu0 %v10424_v39  ;;  %v10582_v39 = vld [vmem:[%s15486_s22 + $0xa4] ss:$8 sps:$4 sm:$0xff]  }
 0x6ee   : > { %8256 = vmatprep.subr.bf16.mxu0 %v10432_v16  ;;  %v10489_v16 = vld [vmem:[#allocation9 + $0x56c] ss:$16 sps:$4 sm:$0xff]  }
 0x6ef   : > { %8341 = vmatpush1.bf16.msra.mxu1 %v10427_v41  ;;  %v10484_v41 = vld [vmem:[#allocation9 + $0x548] ss:$16 sps:$4 sm:$0xff]  }
 0x6f0   : > { %8342 = vmatprep.subr.bf16.mxu1 %v10435_v2  ;;  %v10580_v2 = vld [vmem:[%s15486_s22 + $0xa0] ss:$8 sps:$4 sm:$0xff]  }
 0x6f1   : > { %8257 = vmatpush1.bf16.msra.mxu0 %v10430_v40  ;;  %v10585_v40 = vld [vmem:[%s15486_s22 + $0xb4] ss:$8 sps:$4 sm:$0xff]  }
 0x6f2   : > { %8258 = vmatprep.subr.bf16.mxu0 %v10438_v23  ;;  %v10492_v23 = vld [vmem:[#allocation9 + $0x58c] ss:$16 sps:$4 sm:$0xff]  }
 0x6f3   : > { %8343 = vmatpush1.bf16.msra.mxu1 %v10433_v50  ;;  %v10487_v50 = vld [vmem:[#allocation9 + $0x568] ss:$16 sps:$4 sm:$0xff]  }
 0x6f4   : > { %8344 = vmatprep.subr.bf16.mxu1 %v10441_v43  ;;  %v10583_v43 = vld [vmem:[%s15486_s22 + $0xb0] ss:$8 sps:$4 sm:$0xff]  }
 0x6f5   : > { %8259 = vmatpush1.bf16.msra.mxu0 %v10436_v36  ;;  %v10588_v36 = vld [vmem:[%s15486_s22 + $0xc4] ss:$8 sps:$4 sm:$0xff]  }
 0x6f6   : > { %8260 = vmatprep.subr.bf16.mxu0 %v10444_v27  ;;  %v10495_v27 = vld [vmem:[#allocation9 + $0x5ac] ss:$16 sps:$4 sm:$0xff]  }
 0x6f7   : > { %8345 = vmatpush1.bf16.msra.mxu1 %v10439_v44  ;;  %v10490_v44 = vld [vmem:[#allocation9 + $0x588] ss:$16 sps:$4 sm:$0xff]  }
 0x6f8   : > { %8346 = vmatprep.subr.bf16.mxu1 %v10447_v8  ;;  %v10586_v8 = vld [vmem:[%s15486_s22 + $0xc0] ss:$8 sps:$4 sm:$0xff]  }
 0x6f9   : > { %8261 = vmatpush1.bf16.msra.mxu0 %v10442_v53  ;;  %v10591_v53 = vld [vmem:[%s15486_s22 + $0xd4] ss:$8 sps:$4 sm:$0xff]  }
 0x6fa   : > { %8262 = vmatprep.subr.bf16.mxu0 %v10450_v5  ;;  %v10498_v5 = vld [vmem:[#allocation9 + $0x5cc] ss:$16 sps:$4 sm:$0xff]  }
 0x6fb   : > { %8347 = vmatpush1.bf16.msra.mxu1 %v10445_v58  ;;  %v10493_v58 = vld [vmem:[#allocation9 + $0x5a8] ss:$16 sps:$4 sm:$0xff]  }
 0x6fc   : > { %8348 = vmatprep.subr.bf16.mxu1 %v10453_v12  ;;  %v10589_v12 = vld [vmem:[%s15486_s22 + $0xd0] ss:$8 sps:$4 sm:$0xff]  }
 0x6fd   : > { %8263 = vmatpush1.bf16.msra.mxu0 %v10448_v56  ;;  %v10496_v56 = vld [vmem:[#allocation9 + $0x5c8] ss:$16 sps:$4 sm:$0xff]  }
 0x6fe   : > { %8855 = vmatprep.subr.bf16.mxu0 %v10552_v35  ;;  %v10508_v35 = vld [vmem:[#allocation9 + $0x648] ss:$16 sps:$4 sm:$0xff]  }
 0x6ff   : > { %8349 = vmatpush1.bf16.msra.mxu1 %v10451_v22  ;;  %v10501_v22 = vld [vmem:[#allocation9 + $0x5ec] ss:$16 sps:$4 sm:$0xff]  }
 0x700   : > { %8361 = vmatprep.subr.bf16.mxu1 %v10456_v31  ;;  %8265 = vmatmul.mubr.bf16.vlgmr.msra.gmra.mrb[0].mxu0 %v14540_v51  ;;  %v10502_v31 = vld [vmem:[#allocation9 + $0x608] ss:$16 sps:$4 sm:$0xff]  }
 0x701   : > { %8856 = vmatpush1.bf16.msra.mxu0 %v10550_v9  ;;  %v10510_v9 = vld [vmem:[#allocation9 + $0x64c] ss:$16 sps:$4 sm:$0xff]  }
 0x702   : > { %8351 = vmatmul.mubr.bf16.vlgmr.msra.gmra.mrb[4].mxu1 %v14524_v42  ;;  %v10553_v42 = vld [vmem:[%s15486_s22 + $0x10] ss:$8 sps:$4 sm:$0xff]   ;;  %8857 = vmatprep.subr.bf16.mxu0 %v10555_v37  ;;  %v10511_v37 = vld [vmem:[#allocation9 + $0x668] ss:$16 sps:$4 sm:$0xff]  }
 0x703   : > { %8362 = vmatpush1.bf16.msra.mxu1 %v10454_v24  ;;  %8393 = vmatprep.mubr.bf16.mxu1 %v14529_v47  ;;  %v10465_v47 = vld [vmem:[#allocation9 + $0x46c] ss:$16 sps:$4 sm:$0xff]  }
 0x704   : > { %8363 = vmatprep.subr.bf16.mxu1 %v10459_v55  ;;  %v10507_v24 = vld [vmem:[#allocation9 + $0x62c] ss:$16 sps:$4 sm:$0xff]   ;;  %v10505_v55 = vld [vmem:[#allocation9 + $0x628] ss:$16 sps:$4 sm:$0xff]  }
 0x705   : > { %8858 = vmatpush1.bf16.msra.mxu0 %v10553_v42  ;;  %v10514_v42 = vld [vmem:[#allocation9 + $0x688] ss:$16 sps:$4 sm:$0xff]  }
 0x706   : > { %8859 = vmatprep.subr.bf16.mxu0 %v10558_v60  ;;  %v10519_v60 = vld [vmem:[#allocation9 + $0x6ac] ss:$16 sps:$4 sm:$0xff]  }
 0x707   : > { %8364 = vmatpush1.bf16.msra.mxu1 %v10457_v30  ;;  %v10513_v30 = vld [vmem:[#allocation9 + $0x66c] ss:$16 sps:$4 sm:$0xff]  }
 0x708   : > { %8365 = vmatprep.subr.bf16.mxu1 %v10462_v49  ;;  %v10516_v49 = vld [vmem:[#allocation9 + $0x68c] ss:$16 sps:$4 sm:$0xff]  }
 0x709   : > { %8860 = vmatpush1.bf16.msra.mxu0 %v10556_v3  ;;  %v10594_v3 = vld [vmem:[%s15486_s22 + $0xe4] ss:$8 sps:$4 sm:$0xff]  }
 0x70a   : > { %8861 = vmatprep.subr.bf16.mxu0 %v10561_v11  ;;  %v10592_v11 = vld [vmem:[%s15486_s22 + $0xe0] ss:$8 sps:$4 sm:$0xff]  }
 0x70b   : > { %8366 = vmatpush1.bf16.msra.mxu1 %v10460_v38  ;;  %v10522_v38 = vld [vmem:[#allocation9 + $0x6cc] ss:$16 sps:$4 sm:$0xff]  }
 0x70c   : > { %8367 = vmatprep.subr.bf16.mxu1 %v10465_v47 }
 0x70d   : > { %8862 = vmatpush1.bf16.msra.mxu0 %v10559_v13 }
 0x70e   : > { %8863 = vmatprep.subr.bf16.mxu0 %v10564_v63  ;;  %v10525_v63 = vld [vmem:[#allocation9 + $0x6ec] ss:$16 sps:$4 sm:$0xff]  }
 0x70f   : > { %8368 = vmatpush1.bf16.msra.mxu1 %v10463_v46 }
 0x710   : > { %8369 = vmatprep.subr.bf16.mxu1 %v10468_v28  ;;  %v10520_v28 = vld [vmem:[#allocation9 + $0x6c8] ss:$16 sps:$4 sm:$0xff]  }
 0x711   : > { %8864 = vmatpush1.bf16.msra.mxu0 %v10562_v62  ;;  %v10595_v62 = vld [vmem:[%s15486_s22 + $0xf0] ss:$8 sps:$4 sm:$0xff]  }
 0x712   : > { %8865 = vmatprep.subr.bf16.mxu0 %v10567_v1  ;;  %v10528_v1 = vld [vmem:[#allocation9 + $0x70c] ss:$16 sps:$4 sm:$0xff]  }
 0x713   : > { %8370 = vmatpush1.bf16.msra.mxu1 %v10466_v7  ;;  %v10597_v7 = vld [vmem:[%s15486_s22 + $0xf4] ss:$8 sps:$4 sm:$0xff]  }
 0x714   : > { %8371 = vmatprep.subr.bf16.mxu1 %v10471_v34  ;;  %v10523_v34 = vld [vmem:[#allocation9 + $0x6e8] ss:$16 sps:$4 sm:$0xff]  }
 0x715   : > { %8866 = vmatpush1.bf16.msra.mxu0 %v10565_v61  ;;  %v10600_v61 = vld [vmem:[%s15486_s22 + $0x104] ss:$8 sps:$4 sm:$0xff]  }
 0x716   : > { %8867 = vmatprep.subr.bf16.mxu0 %v10570_v0  ;;  %v10529_v0 = vld [vmem:[#allocation9 + $0x728] ss:$16 sps:$4 sm:$0xff]  }
 0x717   : > { %8372 = vmatpush1.bf16.msra.mxu1 %v10469_v59  ;;  %v10526_v59 = vld [vmem:[#allocation9 + $0x708] ss:$16 sps:$4 sm:$0xff]  }
 0x718   : > { %8373 = vmatprep.subr.bf16.mxu1 %v10474_v18  ;;  %v10531_v18 = vld [vmem:[#allocation9 + $0x72c] ss:$16 sps:$4 sm:$0xff]  }
 0x719   : > { %8868 = vmatpush1.bf16.msra.mxu0 %v10568_v14  ;;  %v10537_v14 = vld [vmem:[#allocation9 + $0x76c] ss:$16 sps:$4 sm:$0xff]  }
 0x71a   : > { %8869 = vmatprep.subr.bf16.mxu0 %v10573_v29  ;;  %v10535_v29 = vld [vmem:[#allocation9 + $0x768] ss:$16 sps:$4 sm:$0xff]  }
 0x71b   : > { %8374 = vmatpush1.bf16.msra.mxu1 %v10472_v57  ;;  %v10534_v57 = vld [vmem:[#allocation9 + $0x74c] ss:$16 sps:$4 sm:$0xff]  }
 0x71c   : > { %8375 = vmatprep.subr.bf16.mxu1 %v10477_v25  ;;  %v10532_v25 = vld [vmem:[#allocation9 + $0x748] ss:$16 sps:$4 sm:$0xff]  }
 0x71d   : > { %8870 = vmatpush1.bf16.msra.mxu0 %v10571_v48  ;;  %v10543_v48 = vld [vmem:[#allocation9 + $0x7ac] ss:$16 sps:$4 sm:$0xff]  }
 0x71e   : > { %8871 = vmatprep.subr.bf16.mxu0 %v10576_v45  ;;  %v10541_v45 = vld [vmem:[#allocation9 + $0x7a8] ss:$16 sps:$4 sm:$0xff]  }
 0x71f   : > { %8376 = vmatpush1.bf16.msra.mxu1 %v10475_v33  ;;  %v10540_v33 = vld [vmem:[#allocation9 + $0x78c] ss:$16 sps:$4 sm:$0xff]  }
 0x720   : > { %8377 = vmatprep.subr.bf16.mxu1 %v10480_v10  ;;  %v10538_v10 = vld [vmem:[#allocation9 + $0x788] ss:$16 sps:$4 sm:$0xff]  }
 0x721   : > { %8872 = vmatpush1.bf16.msra.mxu0 %v10574_v52  ;;  %v10549_v52 = vld [vmem:[#allocation9 + $0x7ec] ss:$16 sps:$4 sm:$0xff]  }
 0x722   : > { %8873 = vmatprep.subr.bf16.mxu0 %v10579_v54  ;;  %v10547_v54 = vld [vmem:[#allocation9 + $0x7e8] ss:$16 sps:$4 sm:$0xff]  }
 0x723   : > { %8378 = vmatpush1.bf16.msra.mxu1 %v10478_v19  ;;  %v10546_v19 = vld [vmem:[#allocation9 + $0x7cc] ss:$16 sps:$4 sm:$0xff]  }
 0x724   : > { %8379 = vmatprep.subr.bf16.mxu1 %v10483_v32  ;;  %v10544_v32 = vld [vmem:[#allocation9 + $0x7c8] ss:$16 sps:$4 sm:$0xff]  }
 0x725   : > { %8874 = vmatpush1.bf16.msra.mxu0 %v10577_v15 }
 0x726   : > { %8875 = vmatprep.subr.bf16.mxu0 %v10582_v39  ;;  %v15489_v39 = vld [vmem:[#allocation42_spill] sm:$0xff] }
 0x727   : > { %8380 = vmatpush1.bf16.msra.mxu1 %v10481_v4  ;;  %v14650_v4 = vld [vmem:[%s15487_s9] sm:$0xf] }
 0x728   : > { %8381 = vmatprep.subr.bf16.mxu1 %v10486_v21  ;;  %v15488_v21 = vld [vmem:[#allocation41_spill] sm:$0xff] }
 0x729   : > { %8876 = vmatpush1.bf16.msra.mxu0 %v10580_v2  ;;  %v6806_v15 = vrot.slane %v14650_v4, %v15488_v21 }
 0x72a   : > { %8877 = vmatprep.subr.bf16.mxu0 %v10585_v40 }
 0x72b   : > { %8382 = vmatpush1.bf16.msra.mxu1 %v10484_v41  ;;  %v6810_v41 = vrot.slane %v14650_v4, %v15489_v39 }
 0x72c   : > { %8383 = vmatprep.subr.bf16.mxu1 %v10489_v16 }
 0x72d   : > { %8878 = vmatpush1.bf16.msra.mxu0 %v10583_v43 }
 0x72e   : > { %8879 = vmatprep.subr.bf16.mxu0 %v10588_v36 }
 0x72f   : > { %8384 = vmatpush1.bf16.msra.mxu1 %v10487_v50 }
 0x730   : > { %8385 = vmatprep.subr.bf16.mxu1 %v10492_v23 }
 0x731   : > { %8880 = vmatpush1.bf16.msra.mxu0 %v10586_v8 }
 0x732   : > { %8881 = vmatprep.subr.bf16.mxu0 %v10591_v53 }
 0x733   : > { %8386 = vmatpush1.bf16.msra.mxu1 %v10490_v44 }
 0x734   : > { %8387 = vmatprep.subr.bf16.mxu1 %v10495_v27 }
 0x735   : > { %8882 = vmatpush1.bf16.msra.mxu0 %v10589_v12 }
 0x736   : > { %8883 = vmatprep.subr.bf16.mxu0 %v10594_v3  ;;  %v10653_v3 = vld [vmem:[#allocation10 + $0x18] sm:$0xff]  }
 0x737   : > { %8388 = vmatpush1.bf16.msra.mxu1 %v10493_v58 }
 0x738   : > { %8389 = vmatprep.subr.bf16.mxu1 %v10498_v5 }
 0x739   : > { %8884 = vmatpush1.bf16.msra.mxu0 %v10592_v11  ;;  %v10615_v11 = vld [vmem:[%s15486_s22 + $0x154] ss:$8 sps:$4 sm:$0xff]  }
 0x73a   : > { %8885 = vmatprep.subr.bf16.mxu0 %v10597_v7  ;;  %v10613_v7 = vld [vmem:[%s15486_s22 + $0x150] ss:$8 sps:$4 sm:$0xff]  }
 0x73b   : > { %8390 = vmatpush1.bf16.msra.mxu1 %v10496_v56 }
 0x73c   : > { %8391 = vmatprep.subr.bf16.mxu1 %v10501_v22 }
 0x73d   : > { %8886 = vmatpush1.bf16.msra.mxu0 %v10595_v62  ;;  %v10616_v62 = vld [vmem:[%s15486_s22 + $0x160] ss:$8 sps:$4 sm:$0xff]  }
 0x73e   : > { %8898 = vmatprep.subr.bf16.mxu0 %v10600_v61  ;;  %v10622_v61 = vld [vmem:[%s15486_s22 + $0x180] ss:$8 sps:$4 sm:$0xff]  }
 0x73f   : > { %8392 = vmatpush1.bf16.msra.mxu1 %v10499_v20 }
 0x740   : > { %8404 = vmatprep.subr.bf16.mxu1 %v10504_v6  ;;  %v10598_v6 = vld [vmem:[%s15486_s22 + $0x100] ss:$8 sps:$4 sm:$0xff]  }
 0x742   : > { %8394 = vmatmul.mubr.bf16.vlgmr.msra.gmra.mrb[4].mxu1 %v14532_v17  ;;  %v10517_v17 = vld [vmem:[#allocation9 + $0x6a8] ss:$16 sps:$4 sm:$0xff]  }
 0x743   : > { %8405 = vmatpush1.bf16.msra.mxu1 %v10502_v31  ;;  %8436 = vmatprep.mubr.bf16.mxu1 %v14536_v26  ;;  %v10603_v31 = vld [vmem:[%s15486_s22 + $0x114] ss:$8 sps:$4 sm:$0xff]  }
 0x744   : > { %8406 = vmatprep.subr.bf16.mxu1 %v10507_v24  ;;  %v10646_v24 = vld [vmem:[#allocation10 + $0x40] sm:$0xff]  }
 0x747   : > { %8407 = vmatpush1.bf16.msra.mxu1 %v10505_v55  ;;  %v10647_v55 = vld [vmem:[#allocation10] sm:$0xff]  }
 0x748   : > { %8408 = vmatprep.subr.bf16.mxu1 %v10510_v9  ;;  %v10648_v9 = vld [vmem:[#allocation10 + $0x48] sm:$0xff]  }
 0x74b   : > { %8409 = vmatpush1.bf16.msra.mxu1 %v10508_v35  ;;  %v10601_v35 = vld [vmem:[%s15486_s22 + $0x110] ss:$8 sps:$4 sm:$0xff]  }
 0x74c   : > { %8410 = vmatprep.subr.bf16.mxu1 %v10513_v30  ;;  %v10606_v30 = vld [vmem:[%s15486_s22 + $0x124] ss:$8 sps:$4 sm:$0xff]  }
 0x74f   : > { %8411 = vmatpush1.bf16.msra.mxu1 %v10511_v37  ;;  %v10649_v37 = vld [vmem:[#allocation10 + $0x8] sm:$0xff]  }
 0x750   : > { %8412 = vmatprep.subr.bf16.mxu1 %v10516_v49  ;;  %v10650_v49 = vld [vmem:[#allocation10 + $0x50] sm:$0xff]  }
 0x753   : > { %8413 = vmatpush1.bf16.msra.mxu1 %v10514_v42  ;;  %v10604_v42 = vld [vmem:[%s15486_s22 + $0x120] ss:$8 sps:$4 sm:$0xff]  }
 0x754   : > { %8414 = vmatprep.subr.bf16.mxu1 %v10519_v60  ;;  %v10609_v60 = vld [vmem:[%s15486_s22 + $0x134] ss:$8 sps:$4 sm:$0xff]  }
 0x755   : > { %v8137_v47 = vpop.f32.mrb[0].mxu1 }
 0x756   : > { %v8139_v26 = vpop.f32.mrb[1].mxu1  ;;  %v8138_v16 = vadd.f32 %v8137_v47, %v6806_v15  ;;  %v10607_v47 = vld [vmem:[%s15486_s22 + $0x130] ss:$8 sps:$4 sm:$0xff]  }
 0x757   : > { %v8141_v46 = vpop.f32.mrb[2].mxu1  ;;  %8415 = vmatpush1.bf16.msra.mxu1 %v10517_v17  ;;  %v8140_v2 = vadd.f32 %v8139_v26, %v6810_v41  ;;  %v10651_v17 = vld [vmem:[#allocation10 + $0x10] sm:$0xff]   ;;  %v10612_v26 = vld [vmem:[%s15486_s22 + $0x144] ss:$8 sps:$4 sm:$0xff]  }
 0x758   : > { %v8143_v13 = vpop.f32.mrb[3].mxu1  ;;  %8416 = vmatprep.subr.bf16.mxu1 %v10522_v38  ;;  %v8142_v50 = vadd.f32 %v8141_v46, %v6806_v15  ;;  %v10652_v38 = vld [vmem:[#allocation10 + $0x58] sm:$0xff]   ;;  %v10654_v46 = vld [vmem:[#allocation10 + $0x60] sm:$0xff]   ;;  %v10643_v15 = vld [vmem:[%s15486_s22 + $0x1f0] ss:$8 sps:$4 sm:$0xff]  }
 0x759   : > { %v8144_v36 = vadd.f32 %v8143_v13, %v6810_v41  ;;  %v10655_v13 = vld [vmem:[#allocation10 + $0x20] sm:$0xff]   ;;  %v15490_v41 = vld [vmem:[#allocation40_spill] sm:$0xff] }
 0x75b   : > { %8417 = vmatpush1.bf16.msra.mxu1 %v10520_v28  ;;  %v10610_v28 = vld [vmem:[%s15486_s22 + $0x140] ss:$8 sps:$4 sm:$0xff]  }
 0x75c   : > { %8418 = vmatprep.subr.bf16.mxu1 %v10525_v63  ;;  %v10656_v63 = vld [vmem:[#allocation10 + $0x68] sm:$0xff]  }
 0x75f   : > { %8419 = vmatpush1.bf16.msra.mxu1 %v10523_v34  ;;  %v10618_v34 = vld [vmem:[%s15486_s22 + $0x164] ss:$8 sps:$4 sm:$0xff]  }
 0x760   : > { %8420 = vmatprep.subr.bf16.mxu1 %v10528_v1  ;;  %v10621_v1 = vld [vmem:[%s15486_s22 + $0x174] ss:$8 sps:$4 sm:$0xff]  }
 0x763   : > { %8421 = vmatpush1.bf16.msra.mxu1 %v10526_v59  ;;  %v10619_v59 = vld [vmem:[%s15486_s22 + $0x170] ss:$8 sps:$4 sm:$0xff]  }
 0x764   : > { %8422 = vmatprep.subr.bf16.mxu1 %v10531_v18  ;;  %v10624_v18 = vld [vmem:[%s15486_s22 + $0x184] ss:$8 sps:$4 sm:$0xff]  }
 0x767   : > { %8423 = vmatpush1.bf16.msra.mxu1 %v10529_v0  ;;  %v10627_v0 = vld [vmem:[%s15486_s22 + $0x194] ss:$8 sps:$4 sm:$0xff]  }
 0x768   : > { %8424 = vmatprep.subr.bf16.mxu1 %v10534_v57  ;;  %v10625_v57 = vld [vmem:[%s15486_s22 + $0x190] ss:$8 sps:$4 sm:$0xff]  }
 0x76b   : > { %8425 = vmatpush1.bf16.msra.mxu1 %v10532_v25  ;;  %v10630_v25 = vld [vmem:[%s15486_s22 + $0x1a4] ss:$8 sps:$4 sm:$0xff]  }
 0x76c   : > { %8426 = vmatprep.subr.bf16.mxu1 %v10537_v14  ;;  %v10628_v14 = vld [vmem:[%s15486_s22 + $0x1a0] ss:$8 sps:$4 sm:$0xff]  }
 0x76f   : > { %8427 = vmatpush1.bf16.msra.mxu1 %v10535_v29  ;;  %v10633_v29 = vld [vmem:[%s15486_s22 + $0x1b4] ss:$8 sps:$4 sm:$0xff]  }
 0x770   : > { %8428 = vmatprep.subr.bf16.mxu1 %v10540_v33  ;;  %v10631_v33 = vld [vmem:[%s15486_s22 + $0x1b0] ss:$8 sps:$4 sm:$0xff]  }
 0x773   : > { %8429 = vmatpush1.bf16.msra.mxu1 %v10538_v10  ;;  %v10636_v10 = vld [vmem:[%s15486_s22 + $0x1c4] ss:$8 sps:$4 sm:$0xff]  }
 0x774   : > { %8430 = vmatprep.subr.bf16.mxu1 %v10543_v48  ;;  %v10634_v48 = vld [vmem:[%s15486_s22 + $0x1c0] ss:$8 sps:$4 sm:$0xff]  }
 0x777   : > { %8431 = vmatpush1.bf16.msra.mxu1 %v10541_v45  ;;  %v10639_v45 = vld [vmem:[%s15486_s22 + $0x1d4] ss:$8 sps:$4 sm:$0xff]  }
 0x778   : > { %8432 = vmatprep.subr.bf16.mxu1 %v10546_v19  ;;  %v10637_v19 = vld [vmem:[%s15486_s22 + $0x1d0] ss:$8 sps:$4 sm:$0xff]  }
 0x77b   : > { %8433 = vmatpush1.bf16.msra.mxu1 %v10544_v32  ;;  %v10642_v32 = vld [vmem:[%s15486_s22 + $0x1e4] ss:$8 sps:$4 sm:$0xff]  }
 0x77c   : > { %8434 = vmatprep.subr.bf16.mxu1 %v10549_v52  ;;  %v10640_v52 = vld [vmem:[%s15486_s22 + $0x1e0] ss:$8 sps:$4 sm:$0xff]  }
 0x77f   : > { %8435 = vmatpush1.bf16.msra.mxu1 %v10547_v54  ;;  %v10645_v54 = vld [vmem:[%s15486_s22 + $0x1f4] ss:$8 sps:$4 sm:$0xff]  }
 0x780   : > { %9832 = vmatprep.subr.bf16.mxu1 %v10646_v24  ;;  %v10660_v24 = vld [vmem:[#allocation10 + $0x78] sm:$0xff]  }
 0x782   : > { %8437 = vmatmul.mubr.bf16.vlgmr.msra.gmra.mrb[4].mxu1 %v14540_v51 }
 0x783   : > { %9833 = vmatpush3.bf16.msra.mxu1 %v10647_v55  ;;  %v10661_v55 = vld [vmem:[#allocation10 + $0x38] sm:$0xff]  }
 0x784   : > { %9834 = vmatprep.subr.bf16.mxu1 %v10648_v9  ;;  %v8523_v9 = vld [vmem:[%s15493_s12] sm:$0x3] }
 0x787   : > { %9835 = vmatpush3.bf16.msra.mxu1 %v10649_v37 }
 0x788   : > { %9836 = vmatprep.subr.bf16.mxu1 %v10650_v49 }
 0x78b   : > { %9837 = vmatpush3.bf16.msra.mxu1 %v10651_v17 }
 0x78c   : > { %9838 = vmatprep.subr.bf16.mxu1 %v10652_v38 }
 0x78f   : > { %9839 = vmatpush3.bf16.msra.mxu1 %v10653_v3 }
 0x790   : > { %9840 = vmatprep.subr.bf16.mxu1 %v10654_v46 }
 0x793   : > { %9841 = vmatpush3.bf16.msra.mxu1 %v10655_v13 }
 0x794   : > { %9842 = vmatprep.subr.bf16.mxu1 %v10656_v63 }
 0x7d3   : > { %v8266_v40 = vpop.f32.mrb[0].mxu0 }
 0x7d4   : > { %v9993_v23 = vadd.f32 %v8266_v40, %v8138_v16  ;;  %v8268_v43 = vpop.f32.mrb[1].mxu0  ;;  %v15491_v16 = vsub.s32 2, %v15490_v41  ;;  %v15492_v40 = vsub.s32 3, %v15490_v41 }
 0x7d5   : > { %v9995_v44 = vadd.f32 %v8268_v43, %v8140_v2  ;;  %v8270_v51 = vpop.f32.mrb[2].mxu0 }
 0x7d6   : > { %v9997_v27 = vadd.f32 %v8270_v51, %v8142_v50  ;;  %v8272_v8 = vpop.f32.mrb[3].mxu0  ;;  %v8447_v58 = vmax.f32 %v9993_v23, 0.0  ;;  %v6814_v2 = vrot.slane %v14650_v4, %v15491_v16  ;;  %v6818_v50 = vrot.slane %v14650_v4, %v15492_v40  ;;  %v10659_v4 = vld [vmem:[#allocation10 + $0x30] sm:$0xff]  }
 0x7d7   : > { %v9999_v53 = vadd.f32 %v8272_v8, %v8144_v36  ;;  %v8448_v12 = vmax.f32 %v9995_v44, 0.0 }
 0x7d8   : > { %v8451_v5 = vmax.f32 %v9997_v27, 0.0 }
 0x7d9   : > { %v8452_v56 = vmax.f32 %v9999_v53, 0.0 }
 0x7da   : > { %v8455_v22 = vpack.c.bf16 %v8451_v5, %v8447_v58 }
 0x7db   : > { %v8456_v20 = vpack.c.bf16 %v8452_v56, %v8448_v12 }
 0x7dd   : > { %8887 = vmatprep.mubr.bf16.mxu0 %v8456_v20 }
 0x7de   : > { %8888 = vmatmul.mubr.bf16.vlgmr.msra.gmra.mrb[4].mxu0 %v8455_v22 }
 0x7df   : > { %8899 = vmatpush1.bf16.msra.mxu0 %v10598_v6  ;;  %v10657_v6 = vld [vmem:[#allocation10 + $0x28] sm:$0xff]  }
 0x7e0   : > { %8900 = vmatprep.subr.bf16.mxu0 %v10603_v31  ;;  %9843 = vmatpush3.bf16.msra.mxu1 %v10657_v6  ;;  %v10658_v31 = vld [vmem:[#allocation10 + $0x70] sm:$0xff]  }
 0x7e1   : > { %9844 = vmatprep.subr.bf16.mxu1 %v10658_v31 }
 0x7e3   : > { %8901 = vmatpush1.bf16.msra.mxu0 %v10601_v35  ;;  %v8528_v35 = vrot.slane %v8523_v9, %v15488_v21  ;;  %v9741_v21 = vld [vmem:[%s15494_s15] ss:$0 sm:$0xff] }
 0x7e4   : > { %8902 = vmatprep.subr.bf16.mxu0 %v10606_v30  ;;  %9845 = vmatpush3.bf16.msra.mxu1 %v10659_v4  ;;  %v8532_v30 = vrot.slane %v8523_v9, %v15489_v39 }
 0x7e5   : > { %9846 = vmatprep.subr.bf16.mxu1 %v10660_v24 }
 0x7e7   : > { %8903 = vmatpush1.bf16.msra.mxu0 %v10604_v42 }
 0x7e8   : > { %8904 = vmatprep.subr.bf16.mxu0 %v10609_v60  ;;  %9847 = vmatpush3.bf16.msra.mxu1 %v10661_v55 }
 0x7eb   : > { %8905 = vmatpush1.bf16.msra.mxu0 %v10607_v47 }
 0x7ec   : > { %8906 = vmatprep.subr.bf16.mxu0 %v10612_v26 }
 0x7ef   : > { %8907 = vmatpush1.bf16.msra.mxu0 %v10610_v28 }
 0x7f0   : > { %8908 = vmatprep.subr.bf16.mxu0 %v10615_v11 }
 0x7f3   : > { %8909 = vmatpush1.bf16.msra.mxu0 %v10613_v7 }
 0x7f4   : > { %8910 = vmatprep.subr.bf16.mxu0 %v10618_v34 }
 0x7f7   : > { %8911 = vmatpush1.bf16.msra.mxu0 %v10616_v62 }
 0x7f8   : > { %8912 = vmatprep.subr.bf16.mxu0 %v10621_v1 }
 0x7fb   : > { %8913 = vmatpush1.bf16.msra.mxu0 %v10619_v59 }
 0x7fc   : > { %8914 = vmatprep.subr.bf16.mxu0 %v10624_v18 }
 0x7ff   : > { %8915 = vmatpush1.bf16.msra.mxu0 %v10622_v61 }
 0x800   : > { %8916 = vmatprep.subr.bf16.mxu0 %v10627_v0 }
 0x803   : > { %8917 = vmatpush1.bf16.msra.mxu0 %v10625_v57 }
 0x804   : > { %8918 = vmatprep.subr.bf16.mxu0 %v10630_v25 }
 0x807   : > { %8919 = vmatpush1.bf16.msra.mxu0 %v10628_v14 }
 0x808   : > { %8920 = vmatprep.subr.bf16.mxu0 %v10633_v29 }
 0x80b   : > { %8921 = vmatpush1.bf16.msra.mxu0 %v10631_v33 }
 0x80c   : > { %8922 = vmatprep.subr.bf16.mxu0 %v10636_v10 }
 0x80f   : > { %8923 = vmatpush1.bf16.msra.mxu0 %v10634_v48 }
 0x810   : > { %8924 = vmatprep.subr.bf16.mxu0 %v10639_v45 }
 0x813   : > { %8925 = vmatpush1.bf16.msra.mxu0 %v10637_v19 }
 0x814   : > { %8926 = vmatprep.subr.bf16.mxu0 %v10642_v32 }
 0x817   : > { %8927 = vmatpush1.bf16.msra.mxu0 %v10640_v52 }
 0x818   : > { %8928 = vmatprep.subr.bf16.mxu0 %v10645_v54 }
 0x81b   : > { %8929 = vmatpush1.bf16.msra.mxu0 %v10643_v15 }
 0x855   : > { %v8438_v23 = vpop.f32.mrb[4].mxu1 }
 0x856   : > { %v10000_v43 = vadd.f32 %v8438_v23, %v6814_v2  ;;  %v8440_v36 = vpop.f32.mrb[5].mxu1 }
 0x857   : > { %v10001_v44 = vadd.f32 %v8440_v36, %v6818_v50  ;;  %v8442_v51 = vpop.f32.mrb[6].mxu1 }
 0x858   : > { %v10002_v27 = vadd.f32 %v8442_v51, %v6814_v2  ;;  %v8444_v8 = vpop.f32.mrb[7].mxu1  ;;  %v8449_v58 = vmax.f32 %v10000_v43, 0.0 }
 0x859   : > { %v10003_v53 = vadd.f32 %v8444_v8, %v6818_v50  ;;  %v8450_v12 = vmax.f32 %v10001_v44, 0.0 }
 0x85a   : > { %v8453_v5 = vmax.f32 %v10002_v27, 0.0 }
 0x85b   : > { %v8454_v56 = vmax.f32 %v10003_v53, 0.0 }
 0x85c   : > { %v8457_v22 = vpack.c.bf16 %v8453_v5, %v8449_v58 }
 0x85d   : > { %v8458_v20 = vpack.c.bf16 %v8454_v56, %v8450_v12 }
 0x85f   : > { %8930 = vmatprep.mubr.bf16.mxu0 %v8458_v20 }
 0x860   : > { %8931 = vmatmul.mubr.bf16.vlgmr.msra.gmra.mrb[4].mxu0 %v8457_v22 }
 0x933   : > { %v8932_v37 = vpop.f32.mrb[4].mxu0 }
 0x934   : > { %v10004_v49 = vadd.f32 %v8932_v37, %v8528_v35  ;;  %v8934_v42 = vpop.f32.mrb[5].mxu0 }
 0x935   : > { %v10005_v60 = vadd.f32 %v8934_v42, %v8532_v30  ;;  %v8936_v17 = vpop.f32.mrb[6].mxu0 }
 0x936   : > { %v10006_v38 = vadd.f32 %v8936_v17, %v8528_v35  ;;  %v8938_v47 = vpop.f32.mrb[7].mxu0  ;;  %v8941_v3 = vmax.f32 %v10004_v49, 0.0 }
 0x937   : > { %v10007_v26 = vadd.f32 %v8938_v47, %v8532_v30  ;;  %v8942_v28 = vmax.f32 %v10005_v60, 0.0 }
 0x938   : > { %v8943_v46 = vmax.f32 %v10006_v38, 0.0 }
 0x939   : > { %v8944_v11 = vmax.f32 %v10007_v26, 0.0 }
 0x93a   : > { %v8945_v13 = vpack.c.bf16 %v8943_v46, %v8941_v3 }
 0x93b   : > { %v8946_v63 = vpack.c.bf16 %v8944_v11, %v8942_v28 }
 0x93d   : > { %9114 = vmatprep.mubr.bf16.mxu1 %v8946_v63 }
 0x93e   : > { %9115 = vmatmul.mubr.bf16.vlgmr.msra.gmra.mrb[8].mxu1 %v8945_v13 }
 0xa11   : > { %v9848_v7 = vpop.f32.mrb[8].mxu1 }
 0xa12   : > { %v9849_v39 = vpop.f32.mrb[9].mxu1 }
 0xa13   : > { %v9850_v34 = vadd.f32 %v9849_v39, %v9848_v7  ;;  %v9851_v62 = vpop.f32.mrb[10].mxu1 }
 0xa14   : > { %v9852_v1 = vpop.f32.mrb[11].mxu1 }
 0xa15   : > { %v9117_v59 = vadd.f32 %v9850_v34, %v9741_v21  ;;  %v9853_v18 = vadd.f32 %v9852_v1, %v9851_v62 }
 0xa17   : > { %9123 = vst [vmem:[#allocation12] sm:$0xff] %v9117_v59  ;;  %v9120_v61 = vadd.f32 %v9853_v18, %v9741_v21 }
 0xa19   : > { %9124 = vst [vmem:[#allocation12 + $0x8] sm:$0xff] %v9120_v61 }
 0xa1a PF: > { %s15495_s14 = sadd.s32 4294967295, %s10854_s29   ;;  %s10867_s18 = smov [#allocation12]  }
 0xa1b   : > { %p14765_p13 = scmp.eq.s32.totalorder %s15495_s14, 3  ;;  %s9134_s27 = sshll.u32 %s10867_s18, 4  ;;  %s9135_s27 = int_to_ptr.vmem [resolvable:$true] %s9134_s27 }
 0xa1c   : > { %s10774_s19 = scalar_lea.vmem %s9135_s27, 256  ;;  %p10781_p4 = scmp.lt.s32.totalorder %s9135_s27, %s9135_s27 }
 0xa1d   : > { %p10775_p0 = scmp.ne.s32.totalorder %s9135_s27, %s10774_s19  ;;  %p10782_p5 = scmp.lt.s32.totalorder %s10774_s19, %s10774_s19 }
 0xa1f   : > { %p10776_p1 = pnand %p10775_p0, %p14765_p13  ;;  %p10783_p6 = por %p10782_p5, %p10781_p4 }
 0xa21   : > { %p10777_p2 = pneg %p10776_p1 }
 0xa23   : > { %p10784_p9 = pnand %p10783_p6, %p10777_p2 }
 0xa25   : > { %10787 = shalt.err (!%p10784_p9)
}
 0xa26   : > { %s15497_s4 = sld [smem:[#allocation99_spill]] }
 0xa2c   : > { %s10788_s8 = scalar_lea.hbm %s15497_s4, 256 }
 0xa2d   : > { %p10789_p11 = scmp.ne.s32.totalorder %s15497_s4, %s10788_s8  ;;  %p10794_p12 = scmp.lt.u32.totalorder %s10788_s8, %s15497_s4 }
 0xa2f   : > { %p10790_p8 = pnand %p10789_p11, %p14765_p13 }
 0xa31   : > { %p10791_p10 = pneg %p10790_p8 }
 0xa33   : > { %p10796_p7 = pnand %p10794_p12, %p10791_p10 }
 0xa35   : > { %10799 = shalt.err (!%p10796_p7)
}
 0xa36   : > { %s10868_s10 = smov 128   ;;  %s10869_s20 = smov 8  }
 0xa37   : > { %10049 = dma.vmem_to_hbm [thread:$0]  (%p14765_p13), %s9135_s27, 256, %s15497_s4, [#allocation6], %s10868_s10, %s10868_s10, %s10869_s20  }
 0xa38   : > { %10833 = dma.done.wait (%p14765_p13), [#allocation6], 256  }
 0xa39   : > { %10835 = vsyncadd (%p14765_p13), [#allocation6], 4294967040 }
 0xa3a PF: > { %s27_s29 = sadd.s32 1, %s10854_s29   ;;  %s15498_s16 = sld [smem:[#allocation18_spill]] }
 0xa3b   : > { %p24_p3 = scmp.ge.s32.totalorder %s27_s29, 6   ;;  %s15499_s23 = sld [smem:[#allocation17_spill]] }
 0xa3c   : > { %s15500_s25 = smov %s10842_s26  ;;  %s15502_s27 = smov %s10850_s28 }
 0xa3d   :  { %26 = sbr.rel (!%p24_p3) target bundleno = 14 (0xe), region = 171 }
 0xa40   : > { %s15501_s26 = smov %s15498_s16 }
 0xa41   : > { %s15503_s28 = smov %s15499_s23 }
 0xa44   :  { %9150 = vsyncpa [#allocation5], 1 }
 0xa45   :  { %9152 = vsyncpa [#allocation5 + $0x1], 1 }
 0xa46   :  { %9153 = vsyncpa [#allocation8], 1 }
 0xa47   :  { %9154 = vsyncpa [#allocation11], 1 }
 0xa48   :  { %9155 = vsyncpa [#allocation6], 1 }
 0xa49   :  { %9157 = vsyncpa [#allocation6 + $0x1], 1 }

</bundles_post_ra>
